<compile_context>
chip_gen: v5e
topology: v5e:2x2
jax: 0.10.0
libtpu: 0.0.40
codegen_flags: <defaults>
</compile_context>

<pallas_src>
import functools

import jax
import jax.numpy as jnp
from jax import lax
from jax.experimental import pallas as pl
from jax.experimental.pallas import tpu as pltpu


def _fused_textcnn_kernel(x_ref, w_ref, b_ref, o_ref, *, kernel_sizes, c_out,
                          l_outs, shifts, offsets, c_total, c_total_pad):
    """Fused TextCNN: wide matmul + shifted-add conv + max pool + bias + ReLU.

    x_ref: (TN, L_pad, C_in_pad)          padded input block, channels-last
    w_ref: (C_in_pad, sum(k) * C_out)     all taps of all branches, tap-major per branch
    b_ref: (1, C_total_pad)               concatenated biases (lane-padded)
    o_ref: (TN, C_total_pad)              pooled output block (lane-padded)
    """
    tn, l_pad, c_in_pad = x_ref.shape

    # One lane-dense MXU matmul covering every tap of every branch.
    x2 = x_ref[...].reshape(tn * l_pad, c_in_pad)          # leading-dim flatten, layout-free
    z = jnp.dot(x2, w_ref[...],
                preferred_element_type=jnp.float32,
                precision=lax.Precision.HIGHEST)
    z = z.reshape(tn, l_pad, w_ref.shape[1])               # (TN, L_pad, sum(k)*C_out)

    pooled = []
    for bi, k in enumerate(kernel_sizes):
        l_out = l_outs[bi]
        s = shifts[bi]
        off = offsets[bi]
        # conv_k[n, t, c] = sum_j Z[n, t + s + j, off + j*C_out + c]   (all slices static)
        acc = z[:, s:s + l_out, off:off + c_out]
        for j in range(1, k):
            acc = acc + z[:, s + j:s + j + l_out,
                          off + j * c_out:off + (j + 1) * c_out]
        pooled.append(jnp.max(acc, axis=1))                # global max pool over time (XLU)
    if c_total_pad > c_total:                               # lane-pad to unmasked store width
        pooled.append(jnp.zeros((tn, c_total_pad - c_total), jnp.float32))
    pooled = jnp.concatenate(pooled, axis=1)                # (TN, C_total_pad), one store

    # Bias + ReLU after the pool: max_t(relu(a_t + b)) == relu(max_t(a_t) + b).
    o_ref[...] = jnp.maximum(pooled + b_ref[...], 0.0)


def text_cnn_encoder(text_emb, weights, biases, kernel_sizes, *, block_n=None):
    """text_emb: (N, L, 300) f32; weights[i]: (C_out, 300, k_i) (PyTorch Conv1d layout);
    biases[i]: (C_out,).  Returns (N, len(kernel_sizes) * C_out)."""
    n, l, c_in = text_emb.shape
    c_out = weights[0].shape[0]
    n_branch = len(kernel_sizes)
    t_total = sum(kernel_sizes)
    c_total = n_branch * c_out
    pad_max = max(k // 2 for k in kernel_sizes)

    c_in_pad = int(pl.cdiv(c_in, 128) * 128)                # 300 -> 384 (clean MXU K)
    l_pad = int(pl.cdiv(l + 2 * pad_max, 8) * 8)            # sublane-aligned time axis
    c_total_pad = int(pl.cdiv(c_total, 128) * 128)          # lane-dense output slab

    # Static per-branch geometry (matches PyTorch Conv1d(300, C, k, padding=k//2)).
    l_outs = tuple(l + 2 * (k // 2) - k + 1 for k in kernel_sizes)
    shifts = tuple(pad_max - k // 2 for k in kernel_sizes)
    offsets = tuple(sum(kernel_sizes[:i]) * c_out for i in range(n_branch))

    # Batch tiling: a few MiB per input block, multiple of 8 rows.
    if block_n is None:
        target_bytes = 2 << 20
        block_n = max(8, (target_bytes // (l_pad * c_in_pad * 4)) // 8 * 8)
    block_n = int(min(block_n, pl.cdiv(n, 8) * 8))
    block_n = max(8, block_n - block_n % 8)
    n_pad = int(pl.cdiv(n, block_n) * block_n)

    # Pad the input ONCE: batch -> n_pad, time -> pad_max each side (+alignment), C_in -> 384.
    x_pad = jnp.pad(
        text_emb,
        ((0, n_pad - n),
         (pad_max, l_pad - l - pad_max),
         (0, c_in_pad - c_in)))

    # Pack all conv weights into one (C_in_pad, sum(k)*C_out) matrix, tap-major per branch.
    w_cols = []
    for k, w in zip(kernel_sizes, weights):
        wt = jnp.transpose(w, (1, 2, 0))                    # (C_in, k, C_out)
        wt = jnp.pad(wt, ((0, c_in_pad - c_in), (0, 0), (0, 0)))
        w_cols.append(wt.reshape(c_in_pad, k * c_out))
    w_all = jnp.concatenate(w_cols, axis=1)                 # (C_in_pad, sum(k)*C_out)
    b_all = jnp.concatenate(biases).reshape(1, c_total)
    b_all = jnp.pad(b_all, ((0, 0), (0, c_total_pad - c_total)))

    # VMEM budget: double-buffered x/out blocks + resident weights + matmul result slab.
    x_blk = block_n * l_pad * c_in_pad * 4
    o_blk = block_n * c_total_pad * 4
    z_blk = block_n * l_pad * t_total * c_out * 4
    w_bytes = c_in_pad * t_total * c_out * 4 + c_total_pad * 4
    vmem_limit = int(min(max(2 * (x_blk + o_blk) + w_bytes + 4 * z_blk + (4 << 20),
                             16 << 20),
                         48 << 20))                         # headroom, safe on v7x (64 MiB)

    out = pl.pallas_call(
        functools.partial(
            _fused_textcnn_kernel,
            kernel_sizes=tuple(kernel_sizes), c_out=c_out,
            l_outs=l_outs, shifts=shifts, offsets=offsets,
            c_total=c_total, c_total_pad=c_total_pad),
        out_shape=jax.ShapeDtypeStruct((n_pad, c_total_pad), jnp.float32),
        grid=(n_pad // block_n,),
        in_specs=[
            pl.BlockSpec((block_n, l_pad, c_in_pad), lambda i: (i, 0, 0)),
            pl.BlockSpec((c_in_pad, t_total * c_out), lambda i: (0, 0)),
            pl.BlockSpec((1, c_total_pad), lambda i: (0, 0)),
        ],
        out_specs=pl.BlockSpec((block_n, c_total_pad), lambda i: (i, 0)),
        compiler_params=pltpu.CompilerParams(
            dimension_semantics=("parallel",),   # shard batch tiles across TCs (megacore/v7x)
            vmem_limit_bytes=vmem_limit,
        ),
    )(x_pad, w_all, b_all)
    return out[:n, :c_total]


def _reference(text_emb, weights, biases, kernel_sizes):
    """Pure-JAX reference matching PyTorch semantics (NCL conv, relu, max, cat)."""
    x_ncl = jnp.transpose(text_emb, (0, 2, 1))              # (N, 300, L)
    outs = []
    for k, w, b in zip(kernel_sizes, weights, biases):
        y = lax.conv_general_dilated(
            x_ncl, w, window_strides=(1,), padding=[(k // 2, k // 2)],
            dimension_numbers=("NCH", "OIH", "NCH"),
            precision=lax.Precision.HIGHEST,
        ) + b[None, :, None]
        y = jnp.maximum(y, 0.0)
        outs.append(jnp.max(y, axis=2))
    return jnp.concatenate(outs, axis=1)


if __name__ == "__main__":
    # Small shapes consistent with the module: N utterances, L tokens, embedding dim 300,
    # kernel sizes [3, 4, 5], num_channel=16.  block_n=8 -> grid of 3 batch tiles.
    kernel_sizes = [3, 4, 5]
    num_channel = 16
    N, L, EMB = 18, 12, 300

    key = jax.random.PRNGKey(0)
    k_x, *k_params = jax.random.split(key, 1 + 2 * len(kernel_sizes))
    text_emb = jax.random.normal(k_x, (N, L, EMB), dtype=jnp.float32)

    weights, biases = [], []
    for i, k in enumerate(kernel_sizes):
        kw, kb = k_params[2 * i], k_params[2 * i + 1]
        # PyTorch Conv1d weight shape: (C_out, C_in, k).
        weights.append(0.05 * jax.random.normal(kw, (num_channel, EMB, k), dtype=jnp.float32))
        biases.append(0.05 * jax.random.normal(kb, (num_channel,), dtype=jnp.float32))

    out = text_cnn_encoder(text_emb, weights, biases, kernel_sizes, block_n=8)
    out = jax.block_until_ready(out)

    ref = _reference(text_emb, weights, biases, kernel_sizes)
    assert out.shape == (N, len(kernel_sizes) * num_channel), out.shape
    if not jnp.allclose(out, ref, atol=1e-3, rtol=1e-3):
        err = float(jnp.max(jnp.abs(out - ref)))
        raise AssertionError(f"Pallas kernel output does not match reference (max err {err})")

    print("KERNEL_OK")
</pallas_src>

<mosaic_0001>
module attributes {stable_mosaic.version = 11 : i64} {
  func.func @_fused_textcnn_kernel(%arg0: i32, %arg1: memref<8x16x384xf32, #tpu.memory_space<vmem>>, %arg2: memref<384x192xf32, #tpu.memory_space<vmem>>, %arg3: memref<1x128xf32, #tpu.memory_space<vmem>>, %arg4: memref<8x128xf32, #tpu.memory_space<vmem>>) attributes {dimension_semantics = [#tpu.dimension_semantics<parallel>], iteration_bounds = array<i64: 3>, scalar_prefetch = 0 : i64, scratch_operands = 0 : i64, tpu.core_type = #tpu.core_type<tc>, window_params = [{transform_indices = @transform_0, window_bounds = array<i64: 8, 16, 384>}, {pipeline_mode = #tpu.pipeline_mode<synchronous>, transform_indices = @transform_1, window_bounds = array<i64: 384, 192>}, {pipeline_mode = #tpu.pipeline_mode<synchronous>, transform_indices = @transform_2, window_bounds = array<i64: 1, 128>}, {transform_indices = @transform_3, window_bounds = array<i64: 8, 128>}]} {
    %c0 = arith.constant 0 : index
    %c0_0 = arith.constant 0 : index
    %c0_1 = arith.constant 0 : index
    %0 = vector.load %arg1[%c0, %c0_0, %c0_1] : memref<8x16x384xf32, #tpu.memory_space<vmem>>, vector<8x16x384xf32>
    %1 = vector.shape_cast %0 : vector<8x16x384xf32> to vector<128x384xf32>
    %c0_2 = arith.constant 0 : index
    %c0_3 = arith.constant 0 : index
    %2 = vector.load %arg2[%c0_2, %c0_3] : memref<384x192xf32, #tpu.memory_space<vmem>>, vector<384x192xf32>
    %cst = arith.constant dense<0.000000e+00> : vector<128x192xf32>
    %3 = tpu.matmul %1, %2, %cst {dimension_numbers = #tpu.dot_dimension_numbers<[1], [0], [0], [1], [0, 0, 1, 1], [], []>, precision = #tpu.contract_precision<fp32>} : vector<128x384xf32>, vector<384x192xf32>, vector<128x192xf32> -> vector<128x192xf32>
    %4 = vector.shape_cast %3 : vector<128x192xf32> to vector<8x16x192xf32>
    %5 = vector.extract_strided_slice %4 {offsets = [0, 1, 0], sizes = [8, 12, 16], strides = [1, 1, 1]} : vector<8x16x192xf32> to vector<8x12x16xf32>
    %6 = vector.extract_strided_slice %4 {offsets = [0, 2, 16], sizes = [8, 12, 16], strides = [1, 1, 1]} : vector<8x16x192xf32> to vector<8x12x16xf32>
    %7 = arith.addf %5, %6 : vector<8x12x16xf32>
    %8 = vector.extract_strided_slice %4 {offsets = [0, 3, 32], sizes = [8, 12, 16], strides = [1, 1, 1]} : vector<8x16x192xf32> to vector<8x12x16xf32>
    %9 = arith.addf %7, %8 : vector<8x12x16xf32>
    %cst_4 = arith.constant dense<0xFF800000> : vector<8x16xf32>
    %10 = vector.multi_reduction <maximumf>, %9, %cst_4 [1] : vector<8x12x16xf32> to vector<8x16xf32>
    %11 = vector.extract_strided_slice %4 {offsets = [0, 0, 48], sizes = [8, 13, 16], strides = [1, 1, 1]} : vector<8x16x192xf32> to vector<8x13x16xf32>
    %12 = vector.extract_strided_slice %4 {offsets = [0, 1, 64], sizes = [8, 13, 16], strides = [1, 1, 1]} : vector<8x16x192xf32> to vector<8x13x16xf32>
    %13 = arith.addf %11, %12 : vector<8x13x16xf32>
    %14 = vector.extract_strided_slice %4 {offsets = [0, 2, 80], sizes = [8, 13, 16], strides = [1, 1, 1]} : vector<8x16x192xf32> to vector<8x13x16xf32>
    %15 = arith.addf %13, %14 : vector<8x13x16xf32>
    %16 = vector.extract_strided_slice %4 {offsets = [0, 3, 96], sizes = [8, 13, 16], strides = [1, 1, 1]} : vector<8x16x192xf32> to vector<8x13x16xf32>
    %17 = arith.addf %15, %16 : vector<8x13x16xf32>
    %cst_5 = arith.constant dense<0xFF800000> : vector<8x16xf32>
    %18 = vector.multi_reduction <maximumf>, %17, %cst_5 [1] : vector<8x13x16xf32> to vector<8x16xf32>
    %19 = vector.extract_strided_slice %4 {offsets = [0, 0, 112], sizes = [8, 12, 16], strides = [1, 1, 1]} : vector<8x16x192xf32> to vector<8x12x16xf32>
    %20 = vector.extract_strided_slice %4 {offsets = [0, 1, 128], sizes = [8, 12, 16], strides = [1, 1, 1]} : vector<8x16x192xf32> to vector<8x12x16xf32>
    %21 = arith.addf %19, %20 : vector<8x12x16xf32>
    %22 = vector.extract_strided_slice %4 {offsets = [0, 2, 144], sizes = [8, 12, 16], strides = [1, 1, 1]} : vector<8x16x192xf32> to vector<8x12x16xf32>
    %23 = arith.addf %21, %22 : vector<8x12x16xf32>
    %24 = vector.extract_strided_slice %4 {offsets = [0, 3, 160], sizes = [8, 12, 16], strides = [1, 1, 1]} : vector<8x16x192xf32> to vector<8x12x16xf32>
    %25 = arith.addf %23, %24 : vector<8x12x16xf32>
    %26 = vector.extract_strided_slice %4 {offsets = [0, 4, 176], sizes = [8, 12, 16], strides = [1, 1, 1]} : vector<8x16x192xf32> to vector<8x12x16xf32>
    %27 = arith.addf %25, %26 : vector<8x12x16xf32>
    %cst_6 = arith.constant dense<0xFF800000> : vector<8x16xf32>
    %28 = vector.multi_reduction <maximumf>, %27, %cst_6 [1] : vector<8x12x16xf32> to vector<8x16xf32>
    %cst_7 = arith.constant 0.000000e+00 : f32
    %29 = vector.broadcast %cst_7 : f32 to vector<8x80xf32>
    %30 = tpu.concatenate %10, %18, %28, %29 in 1 : vector<8x16xf32>, vector<8x16xf32>, vector<8x16xf32>, vector<8x80xf32> -> vector<8x128xf32>
    %c0_8 = arith.constant 0 : index
    %c0_9 = arith.constant 0 : index
    %31 = vector.load %arg3[%c0_8, %c0_9] : memref<1x128xf32, #tpu.memory_space<vmem>>, vector<1x128xf32>
    %32 = vector.broadcast %31 : vector<1x128xf32> to vector<8x128xf32>
    %33 = arith.addf %30, %32 : vector<8x128xf32>
    %cst_10 = arith.constant 0.000000e+00 : f32
    %34 = vector.broadcast %cst_10 : f32 to vector<8x128xf32>
    %35 = arith.maximumf %33, %34 : vector<8x128xf32>
    %c0_11 = arith.constant 0 : index
    %c0_12 = arith.constant 0 : index
    %36 = vector.load %arg4[%c0_11, %c0_12] : memref<8x128xf32, #tpu.memory_space<vmem>>, vector<8x128xf32>
    tpu.vector_store %arg4[%c0_11, %c0_12], %35 {strides = array<i32>} : memref<8x128xf32, #tpu.memory_space<vmem>>, vector<8x128xf32>,
    return
  }
  func.func @transform_0(%arg0: i32) -> (i32, i32, i32) {
    %c0_i32 = arith.constant 0 : i32
    %c0_i32_0 = arith.constant 0 : i32
    %c0_i32_1 = arith.constant 0 : i32
    return %arg0, %c0_i32, %c0_i32_0 : i32, i32, i32
  }
  func.func @transform_1(%arg0: i32) -> (i32, i32) {
    %c0_i32 = arith.constant 0 : i32
    %c0_i32_0 = arith.constant 0 : i32
    %c0_i32_1 = arith.constant 0 : i32
    return %c0_i32, %c0_i32_0 : i32, i32
  }
  func.func @transform_2(%arg0: i32) -> (i32, i32) {
    %c0_i32 = arith.constant 0 : i32
    %c0_i32_0 = arith.constant 0 : i32
    %c0_i32_1 = arith.constant 0 : i32
    return %c0_i32, %c0_i32_0 : i32, i32
  }
  func.func @transform_3(%arg0: i32) -> (i32, i32) {
    %c0_i32 = arith.constant 0 : i32
    %c0_i32_0 = arith.constant 0 : i32
    return %arg0, %c0_i32 : i32, i32
  }
}

</mosaic_0001>

<bundles_post_ra>
// kernel: tpu_custom_call.1
= control target key start
LH: loop header
LB: loop body
LE: loop exit
PB: predicated region body
PF: predicated region fallthrough
CT: control target
= control target key end

     0   :  { %8 = vsyncpa [#allocation3], 0  ;;  %s10327_s0 = inlined_call_operand.vmem [shape: f32[24,16,384], index: 0, kind: input, shape index: {}]   ;;  %s10328_s1 = inlined_call_operand.vmem [shape: f32[384,192], index: 1, kind: input, shape index: {}]   ;;  %s10329_s2 = inlined_call_operand.vmem [shape: f32[1,128], index: 2, kind: input, shape index: {}]   ;;  %s10330_s3 = inlined_call_operand.hbm [shape: f32[24,128], index: 3, kind: output, shape index: {}]  }
   0x1   :  { %10 = vsyncpa [#allocation3 + $0x1], 0  ;;  %s6321_s12 = smov 0   ;;  %s6323_s13 = smov 0  }
   0x2   :  { %s6325_s14 = smov 0   ;;  %s6327_s15 = smov 0  }
   0x3 LB: > { %s6174_s16 = sadd.s32 4294967295, %s6294_s15   ;;  %s6175_s17 = sadd.s32 4294967294, %s6294_s15   ;;  %s6294_s15 = sphi %s6327_s15, %s11329_s15   ;;  %s6290_s14 = sphi %s6325_s14, %s11328_s14   ;;  %s6286_s13 = sphi %s6323_s13, %s11327_s13   ;;  %s6282_s12 = sphi %s6321_s12, %s11326_s12  }
   0x4   : > { %s6344_s18 = sadd.s32 1, %s6294_s15   ;;  %s91_s19 = sadd.s32 1, %s6290_s14 }
   0x5   : > { %s88_s20 = ssub.s32 %s6294_s15, %s6344_s18  ;;  %p101_p0 = scmp.ne.s32.totalorder %s6290_s14, %s6286_s13 }
   0x6   : > { %p89_p1 = scmp.eq.s32.totalorder %s88_s20, 0  ;;  %p102_p2 = scmp.eq.s32.totalorder %s6174_s16, 2 }
   0x7   : > { %p107_p3 = scmp.ne.s32.totalorder %s6286_s13, %s6282_s12  ;;  %p108_p4 = scmp.eq.s32.totalorder %s6175_s17, 2 }
   0x8   : > { %s6354_s21 = scalar_select %p89_p1, %s6290_s14, %s91_s19  }
   0x9   : > { %p6356_p5 = por %p102_p2, %p101_p0  ;;  %p6360_p6 = por %p108_p4, %p107_p3 }
   0xa   : > { %p6178_p7 = scmp.ge.s32.totalorder %s6294_s15, 1  ;;  %p142_p8 = scmp.lt.s32.totalorder %s6294_s15, 4 }
   0xc   : > { %p143_p9 = pnand %p6178_p7, %p142_p8 }
   0xe   : > { %146 = sbr.rel (%p143_p9) target bundleno = 1630 (0x65e), region = 32 }
  0x13   : > { %v252_v0 = vld [vmem:[%s10328_s1 + $0xf0] sm:$0xff]  ;;  %v250_v1 = vld [vmem:[%s10328_s1 + $0xe0] sm:$0xff]  ;;  %s6375_s30 = sshll.u32 %s6174_s16, 3  ;;  %vm5259_vm0 = vcmask 1045504   ;;  %s6296_s4 = smov 96   ;;  %vm5422_vm1 = vcmask 1044480  }
  0x14   : > { %v248_v2 = vld [vmem:[%s10328_s1 + $0xd0] sm:$0xff]  ;;  %v6377_v3 = vand.u32 4294901760, %v252_v0  ;;  %v6379_v4 = vand.u32 4294901760, %v250_v1  ;;  %v246_v6 = vld [vmem:[%s10328_s1 + $0xc0] sm:$0xff]  ;;  %p168_p10 = scmp.lt.s32.totalorder %s6375_s30, 23  ;;  %s6297_s5 = smov 112  }
  0x15   : > { %v6381_v5 = vand.u32 4294901760, %v248_v2  ;;  %v244_v7 = vld [vmem:[%s10328_s1 + $0xb0] sm:$0xff]  ;;  %v242_v8 = vld [vmem:[%s10328_s1 + $0xa0] sm:$0xff]  ;;  %v6392_v9 = vand.u32 4294901760, %v246_v6  ;;  %s6298_s9 = smov 80   ;;  %vm5170_vm2 = vcmask 1046528  }
  0x16   : > { %v6394_v10 = vand.u32 4294901760, %v244_v7  ;;  %v6396_v11 = vand.u32 4294901760, %v242_v8  ;;  %v240_v12 = vld [vmem:[%s10328_s1 + $0x90] sm:$0xff]  ;;  %v238_v13 = vld [vmem:[%s10328_s1 + $0x80] sm:$0xff]  ;;  %319 = vmatpush.msra.mxu0 %v6377_v3  ;;  %v6406_v14 = vsub.f32 %v252_v0, %v6377_v3  ;;  %770 = vmatpush.msra.mxu3 %v6377_v3  ;;  %v6410_v15 = vsub.f32 %v250_v1, %v6379_v4  ;;  %s6441_s26 = scalar_select %p168_p10, %s6375_s30, 23 }
  0x17   : > { %v6413_v16 = vsub.f32 %v248_v2, %v6381_v5  ;;  %v6415_v17 = vand.u32 4294901760, %v240_v12  ;;  %v236_v18 = vld [vmem:[%s10328_s1 + $0x70] sm:$0xff]  ;;  %v6422_v19 = vsub.f32 %v246_v6, %v6392_v9  ;;  %v6435_v25 = vand.u32 4294901760, %v238_v13  ;;  %v234_v26 = vld [vmem:[%s10328_s1 + $0x60] sm:$0xff]  ;;  %s6299_s19 = smov 64   ;;  %s6252_s16 = scalar_lea.hbm %s10330_s3, 24 }
  0x18   : > { %v6425_v20 = vsub.f32 %v244_v7, %v6394_v10  ;;  %v6428_v21 = vsub.f32 %v242_v8, %v6396_v11  ;;  %321 = vmatpush.msra.mxu0 %v6379_v4  ;;  %642 = vmatpush.msra.mxu2 %v6406_v14  ;;  %v10348_v22 = vand.u32 4294901760, %v6406_v14  ;;  %v10347_v23 = vand.u32 4294901760, %v6410_v15  ;;  %s6186_s27 = smul.u32 48, %s6441_s26  ;;  %v232_v36 = vld [vmem:[%s10328_s1 + $0x50] sm:$0xff]  ;;  %v230_v41 = vld [vmem:[%s10328_s1 + $0x40] sm:$0xff] }
  0x19   : > { %v10345_v24 = vand.u32 4294901760, %v6413_v16  ;;  %772 = vmatpush.msra.mxu3 %v6379_v4  ;;  %v10341_v27 = vand.u32 4294901760, %v6422_v19  ;;  %v6445_v28 = vand.u32 4294901760, %v236_v18  ;;  %v6448_v29 = vsub.f32 %v240_v12, %v6415_v17  ;;  %v228_v49 = vld [vmem:[%s10328_s1 + $0x30] sm:$0xff]  ;;  %v226_v55 = vld [vmem:[%s10328_s1 + $0x20] sm:$0xff] }
  0x1a   : > { %323 = vmatpush.msra.mxu0 %v6381_v5  ;;  %645 = vmatpush.msra.mxu2 %v6410_v15  ;;  %v482_v30 = vsub.f32 %v6406_v14, %v10348_v22  ;;  %v488_v31 = vsub.f32 %v6410_v15, %v10347_v23  ;;  %v10340_v33 = vand.u32 4294901760, %v6425_v20  ;;  %v6464_v34 = vand.u32 4294901760, %v234_v26  ;;  %s6495_s8 = scalar_lea.vmem %s10327_s0, %s6186_s27  ;;  %v224_v60 = vld [vmem:[%s10328_s1 + $0x10] sm:$0xff]  ;;  %s6111_s27 = scalar_lea.hbm %s10330_s3, %s6375_s30 }
  0x1b   : > { %v494_v32 = vsub.f32 %v6413_v16, %v10345_v24  ;;  %774 = vmatpush.msra.mxu3 %v6381_v5  ;;  %v10339_v35 = vand.u32 4294901760, %v6428_v21  ;;  %v500_v39 = vsub.f32 %v6422_v19, %v10341_v27  ;;  %v6476_v40 = vsub.f32 %v238_v13, %v6435_v25  ;;  %v174_v56 = vld [vmem:[%s6495_s8] sm:$0xff]  ;;  %v284_v63 = vld [vmem:[%s10328_s1 + $0x1f0] sm:$0xff]  ;;  %s6115_s6 = sshll.u32 %s6111_s27, 4  ;;  %s6116_s6 = int_to_ptr.hbm [resolvable:$true] %s6115_s6 }
  0x1c   : > { %325 = vmatpush.msra.mxu0 %v6392_v9  ;;  %v483_v37 = vand.u32 4294901760, %v482_v30  ;;  %648 = vmatpush.msra.mxu2 %v6413_v16  ;;  %v489_v38 = vand.u32 4294901760, %v488_v31  ;;  %v10337_v42 = vand.u32 4294901760, %v6448_v29  ;;  %v6484_v43 = vsub.f32 %v236_v18, %v6445_v28  ;;  %v222_v13 = vld [vmem:[%s10328_s1] sm:$0xff]  ;;  %s6246_s10 = sshra.s32 %s6116_s6, 4  ;;  %s6247_s10 = int_to_ptr.hbm [resolvable:$true] %s6246_s10 }
  0x1d   : > { %776 = vmatpush.msra.mxu3 %v6392_v9  ;;  %v495_v44 = vand.u32 4294901760, %v494_v32  ;;  %v506_v45 = vsub.f32 %v6425_v20, %v10340_v33  ;;  %v6490_v46 = vand.u32 4294901760, %v232_v36  ;;  %v512_v47 = vsub.f32 %v6428_v21, %v10339_v35  ;;  %v177_v32 = vld [vmem:[%s6495_s8 + $0x18] sm:$0xff]  ;;  %p6253_p0 = scmp.lt.s32.totalorder %s6247_s10, %s10330_s3 }
  0x1e   : > { %327 = vmatpush.msra.mxu0 %v6394_v10  ;;  %484 = vmatpush.msra.mxu1 %v483_v37  ;;  %v6502_v48 = vand.u32 4294901760, %v230_v41  ;;  %v501_v50 = vand.u32 4294901760, %v500_v39  ;;  %v10336_v51 = vand.u32 4294901760, %v6476_v40  ;;  %v6510_v52 = vsub.f32 %v234_v26, %v6464_v34 }
  0x1f   : > { %651 = vmatpush.msra.mxu2 %v6422_v19  ;;  %778 = vmatpush.msra.mxu3 %v6394_v10  ;;  %v518_v53 = vsub.f32 %v6448_v29, %v10337_v42  ;;  %v10334_v54 = vand.u32 4294901760, %v6484_v43  ;;  %v507_v57 = vand.u32 4294901760, %v506_v45  ;;  %v6523_v58 = vand.u32 4294901760, %v228_v49  ;;  %v278_v42 = vld [vmem:[%s10328_s1 + $0x1c0] sm:$0xff] }
  0x20   : > { %329 = vmatpush.msra.mxu0 %v6396_v11  ;;  %490 = vmatpush.msra.mxu1 %v489_v38  ;;  %v6526_v59 = vsub.f32 %v232_v36, %v6490_v46  ;;  %v513_v61 = vand.u32 4294901760, %v512_v47  ;;  %v6534_v62 = vsub.f32 %v230_v41, %v6502_v48  ;;  %v524_v0 = vsub.f32 %v6476_v40, %v10336_v51  ;;  %v282_v36 = vld [vmem:[%s10328_s1 + $0x1e0] sm:$0xff] }
  0x21   : > { %654 = vmatpush.msra.mxu2 %v6425_v20  ;;  %780 = vmatpush.msra.mxu3 %v6396_v11  ;;  %v6543_v1 = vand.u32 4294901760, %v226_v55  ;;  %v10333_v2 = vand.u32 4294901760, %v6510_v52  ;;  %v6546_v6 = vand.u32 4294901760, %v174_v56  ;;  %v519_v7 = vand.u32 4294901760, %v518_v53 }
  0x22   : > { %331 = vmatpush.msra.mxu0 %v6415_v17  ;;  %496 = vmatpush.msra.mxu1 %v495_v44  ;;  %v530_v8 = vsub.f32 %v6484_v43, %v10334_v54  ;;  %v6553_v12 = vand.u32 4294901760, %v224_v60  ;;  %v10331_v18 = vand.u32 4294901760, %v6526_v59  ;;  %v6561_v26 = vsub.f32 %v228_v49, %v6523_v58 }
  0x23   : > { %657 = vmatpush.msra.mxu2 %v6428_v21  ;;  %782 = vmatpush.msra.mxu3 %v6415_v17  ;;  %10712 = vst [vmem:[#allocation5_spill] sm:$0xff] %v6546_v6  ;;  %v6564_v30 = vsub.f32 %v174_v56, %v6546_v6  ;;  %v6566_v31 = vand.u32 4294901760, %v284_v63  ;;  %v10332_v37 = vand.u32 4294901760, %v6534_v62  ;;  %v525_v38 = vand.u32 4294901760, %v524_v0 }
  0x24   : > { %333 = vmatpush.msra.mxu0 %v6435_v25  ;;  %502 = vmatpush.msra.mxu1 %v501_v50  ;;  %v536_v39 = vsub.f32 %v6510_v52, %v10333_v2  ;;  %v6579_v41 = vand.u32 4294901760, %v222_v13  ;;  %v6582_v44 = vsub.f32 %v226_v55, %v6543_v1  ;;  %v531_v45 = vand.u32 4294901760, %v530_v8 }
  0x25   : > { %660 = vmatpush.msra.mxu2 %v6448_v29  ;;  %784 = vmatpush.msra.mxu3 %v6435_v25  ;;  %10713 = vst [vmem:[#allocation6_spill] sm:$0xff] %v6564_v30  ;;  %v6587_v47 = vand.u32 4294901760, %v6564_v30  ;;  %v6589_v49 = vand.u32 4294901760, %v177_v32  ;;  %v6591_v50 = vand.u32 4294901760, %v282_v36  ;;  %v542_v53 = vsub.f32 %v6526_v59, %v10331_v18 }
  0x26   : > { %335 = vmatpush.msra.mxu0 %v6445_v28  ;;  %508 = vmatpush.msra.mxu1 %v507_v57  ;;  %v10335_v55 = vand.u32 4294901760, %v6561_v26  ;;  %v6599_v56 = vsub.f32 %v224_v60, %v6553_v12  ;;  %v6602_v57 = vsub.f32 %v284_v63, %v6566_v31  ;;  %v548_v0 = vsub.f32 %v6534_v62, %v10332_v37 }
  0x27   : > { %663 = vmatpush.msra.mxu2 %v6476_v40  ;;  %786 = vmatpush.msra.mxu3 %v6445_v28  ;;  %10714 = vst [vmem:[#allocation7_spill] sm:$0xff] %v6587_v47  ;;  %v537_v60 = vand.u32 4294901760, %v536_v39  ;;  %v6615_v63 = vsub.f32 %v222_v13, %v6579_v41  ;;  %v6618_v8 = vsub.f32 %v282_v36, %v6591_v50  ;;  %v543_v13 = vand.u32 4294901760, %v542_v53 }
  0x28   : > { %337 = vmatpush.msra.mxu0 %v6464_v34  ;;  %514 = vmatpush.msra.mxu1 %v513_v61  ;;  %10715 = vst [vmem:[#allocation8_spill] sm:$0xff] %v6589_v49  ;;  %v280_v61 = vld [vmem:[%s10328_s1 + $0x1d0] sm:$0xff]  ;;  %v353_v18 = vsub.f32 %v6564_v30, %v6587_v47  ;;  %v6625_v37 = vsub.f32 %v177_v32, %v6589_v49  ;;  %v10342_v2 = vand.u32 4294901760, %v6599_v56  ;;  %v10343_v54 = vand.u32 4294901760, %v6602_v57 }
  0x29   : > { %666 = vmatpush.msra.mxu2 %v6484_v43  ;;  %788 = vmatpush.msra.mxu3 %v6464_v34  ;;  %v6628_v39 = vand.u32 4294901760, %v280_v61  ;;  %v554_v36 = vsub.f32 %v6561_v26, %v10335_v55  ;;  %v549_v32 = vand.u32 4294901760, %v548_v0  ;;  %v10344_v53 = vand.u32 4294901760, %v6615_v63 }
  0x2a   : > { %339 = vmatpush.msra.mxu0 %v6490_v46  ;;  %520 = vmatpush.msra.mxu1 %v519_v7  ;;  %v10338_v7 = vand.u32 4294901760, %v6582_v44  ;;  %10716 = vst [vmem:[#allocation9_spill] sm:$0xff] %v6625_v37  ;;  %v10346_v55 = vand.u32 4294901760, %v6618_v8  ;;  %v6651_v0 = vand.u32 4294901760, %v353_v18  ;;  %v6659_v35 = vand.u32 4294901760, %v278_v42 }
  0x2b   : > { %669 = vmatpush.msra.mxu2 %v6510_v52  ;;  %790 = vmatpush.msra.mxu3 %v6490_v46  ;;  %v555_v33 = vand.u32 4294901760, %v554_v36  ;;  %v566_v27 = vsub.f32 %v6599_v56, %v10342_v2  ;;  %v1288_v18 = vsub.f32 %v6602_v57, %v10343_v54  ;;  %v572_v36 = vsub.f32 %v6615_v63, %v10344_v53 }
  0x2c   : > { %341 = vmatpush.msra.mxu0 %v6502_v48  ;;  %526 = vmatpush.msra.mxu1 %v525_v38  ;;  %v180_v38 = vld [vmem:[%s6495_s8 + $0x30] sm:$0xff]  ;;  %10718 = vst [vmem:[#allocation11_spill] sm:$0xff] %v6651_v0  ;;  %v1294_v2 = vsub.f32 %v6618_v8, %v10346_v55  ;;  %vm5350_vm3 = vcmask 126976   ;;  %vm5348_vm4 = vcmask 130049   ;;  %vm5513_vm5 = vcmask 520576  }
  0x2d   : > { %672 = vmatpush.msra.mxu2 %v6526_v59  ;;  %792 = vmatpush.msra.mxu3 %v6502_v48  ;;  %v6644_v51 = vand.u32 4294901760, %v180_v38  ;;  %v567_v53 = vand.u32 4294901760, %v566_v27  ;;  %v1289_v24 = vand.u32 4294901760, %v1288_v18  ;;  %v573_v23 = vand.u32 4294901760, %v572_v36 }
  0x2e   : > { %343 = vmatpush.msra.mxu0 %v6523_v58  ;;  %532 = vmatpush.msra.mxu1 %v531_v45  ;;  %v560_v45 = vsub.f32 %v6582_v44, %v10338_v7  ;;  %v6657_v7 = vsub.f32 %v280_v61, %v6628_v39  ;;  %v6671_v61 = vsub.f32 %v278_v42, %v6659_v35  ;;  %v10722_v27 = vand.u32 4294901760, %v6406_v14 }
  0x2f   : > { %675 = vmatpush.msra.mxu2 %v6534_v62  ;;  %794 = vmatpush.msra.mxu3 %v6523_v58  ;;  %10717 = vst [vmem:[#allocation10_spill] sm:$0xff] %v6644_v51  ;;  %v6685_v54 = vsub.f32 %v180_v38, %v6644_v51  ;;  %v1295_v38 = vand.u32 4294901760, %v1294_v2  ;;  %v10725_v36 = vand.u32 4294901760, %v6410_v15  ;;  %vm5511_vm6 = vcmask 523648  }
  0x30   : > { %345 = vmatpush.msra.mxu0 %v6543_v1  ;;  %538 = vmatpush.msra.mxu1 %v537_v60  ;;  %v6654_v60 = vand.u32 4294901760, %v6625_v37  ;;  %v10726_v14 = vand.u32 4294901760, %v6671_v61  ;;  %vm6036_vm7 = vcmask 1041409   ;;  %vm6038_vm8 = vcmask 1042434  }
  0x31   : > { %678 = vmatpush.msra.mxu2 %v6561_v26  ;;  %796 = vmatpush.msra.mxu3 %v6543_v1  ;;  %10720 = vst [vmem:[#allocation13_spill] sm:$0xff] %v6685_v54  ;;  %v6705_v55 = vand.u32 4294901760, %v6685_v54  ;;  %vm6040_vm9 = vcmask 1043459   ;;  %vm6042_vm10 = vcmask 1044484   ;;  %vm6044_vm11 = vcmask 1045509  }
  0x32   : > { %10719 = vst [vmem:[#allocation12_spill] sm:$0xff] %v6654_v60  ;;  %347 = vmatpush.msra.mxu0 %v6553_v12  ;;  %544 = vmatpush.msra.mxu1 %v543_v13  ;;  %v561_v13 = vand.u32 4294901760, %v560_v45  ;;  %v361_v42 = vsub.f32 %v6625_v37, %v6654_v60  ;;  %v183_v45 = vld [vmem:[%s6495_s8 + $0x48] sm:$0xff]  ;;  %vm6046_vm12 = vcmask 1046534   ;;  %vm6048_vm13 = vcmask 1047559  }
  0x33   : > { %681 = vmatpush.msra.mxu2 %v6582_v44  ;;  %798 = vmatpush.msra.mxu3 %v6553_v12  ;;  %v6694_v22 = vand.u32 4294901760, %v183_v45  ;;  %10724 = vst [vmem:[#allocation16_spill] sm:$0xff] %v6705_v55  ;;  %vm5865_vm14 = vcmask 1043456   ;;  %vm5954_vm15 = vcmask 1048448  }
  0x34   : > { %349 = vmatpush.msra.mxu0 %v6579_v41  ;;  %550 = vmatpush.msra.mxu1 %v549_v32  ;;  %v10355_v32 = vand.u32 4294901760, %v6657_v7  ;;  %v6702_v18 = vand.u32 4294901760, %v361_v42  ;;  %v1306_v42 = vsub.f32 %v6671_v61, %v10726_v14 }
  0x35   : > { %355 = vmatmul.f32.vlgmr.msra.gmra.mxu0 %v6651_v0  ;;  %684 = vmatpush.msra.mxu2 %v6599_v56  ;;  %10721 = vst [vmem:[#allocation14_spill] sm:$0xff] %v6694_v22  ;;  %v6726_v15 = vsub.f32 %v183_v45, %v6694_v22 }
  0x36   : > { %556 = vmatpush.msra.mxu1 %v555_v33  ;;  %800 = vmatpush.msra.mxu3 %v6579_v41  ;;  %v276_v33 = vld [vmem:[%s10328_s1 + $0x1b0] sm:$0xff]  ;;  %10723 = vst [vmem:[#allocation15_spill] sm:$0xff] %v6702_v18  ;;  %v1300_v2 = vsub.f32 %v6657_v7, %v10355_v32 }
  0x37   : > { %687 = vmatpush.msra.mxu2 %v6615_v63  ;;  %804 = vmatmul.f32.vlgmr.msra.gmra.mxu3 %v6587_v47  ;;  %10727 = vst [vmem:[#allocation17_spill] sm:$0xff] %v6726_v15  ;;  %v6746_v14 = vand.u32 4294901760, %v6726_v15  ;;  %v204_v32 = vld [vmem:[%s6495_s8 + $0xf0] sm:$0xff] }
  0x38   : > { %562 = vmatpush.msra.mxu1 %v561_v13  ;;  %690 = vmatmul.f32.vlgmr.msra.gmra.mxu2 %v6564_v30  ;;  %v6710_v13 = vand.u32 4294901760, %v276_v33 }
  0x39   : > { %1125 = vmatpush.msrb.mxu2 %v6566_v31  ;;  %901 = vmatpush.msrb.mxu0 %v10722_v27  ;;  %10730 = vst [vmem:[#allocation19_spill] sm:$0xff] %v6746_v14 }
  0x3a   : > { %568 = vmatpush.msra.mxu1 %v567_v53  ;;  %1290 = vmatpush.msrb.mxu3 %v1289_v24  ;;  %v6719_v27 = vsub.f32 %v276_v33, %v6710_v13  ;;  %v369_v24 = vsub.f32 %v6685_v54, %v6705_v55  ;;  %v1301_v53 = vand.u32 4294901760, %v1300_v2  ;;  %v186_v33 = vld [vmem:[%s6495_s8 + $0x60] sm:$0xff] }
  0x3b   : > { %1127 = vmatpush.msrb.mxu2 %v6591_v50  ;;  %905 = vmatpush.msrb.mxu0 %v10725_v36 }
  0x3c   : > { %574 = vmatpush.msra.mxu1 %v573_v23  ;;  %1296 = vmatpush.msrb.mxu3 %v1295_v38  ;;  %v10353_v36 = vand.u32 4294901760, %v6719_v27  ;;  %v10728_v23 = vand.u32 4294901760, %v6413_v16  ;;  %v1307_v38 = vand.u32 4294901760, %v1306_v42  ;;  %v6743_v45 = vand.u32 4294901760, %v369_v24 }
  0x3d   : > { %363 = vmatmul.f32.gmra.mxu0 %v6702_v18  ;;  %576 = vmatmul.f32.vlgmr.msra.gmra.mxu1 %v6546_v6  ;;  %v6749_v16 = vand.u32 4294901760, %v186_v33 }
  0x3e   : > { %1028 = vmatpush.msrb.mxu1 %v6377_v3  ;;  %1129 = vmatpush.msrb.mxu2 %v6628_v39  ;;  %v1312_v2 = vsub.f32 %v6719_v27, %v10353_v36  ;;  %v274_v3 = vld [vmem:[%s10328_s1 + $0x1a0] sm:$0xff]  ;;  %10729 = vst [vmem:[#allocation18_spill] sm:$0xff] %v6743_v45 }
  0x3f   : > { %810 = vmatmul.f32.gmra.mxu3 %v6654_v60  ;;  %909 = vmatpush.msrb.mxu0 %v10728_v23  ;;  %10731 = vst [vmem:[#allocation20_spill] sm:$0xff] %v6749_v16  ;;  %v6751_v42 = vand.u32 4294901760, %v274_v3 }
  0x40   : > { %695 = vmatmul.f32.gmra.mxu2 %v6625_v37  ;;  %1030 = vmatpush.msrb.mxu1 %v6379_v4  ;;  %v10732_v4 = vand.u32 4294901760, %v6422_v19  ;;  %v1313_v23 = vand.u32 4294901760, %v1312_v2  ;;  %v6768_v19 = vsub.f32 %v186_v33, %v6749_v16  ;;  %v10736_v33 = vand.u32 4294901760, %v6428_v21 }
  0x41   : > { %1302 = vmatpush.msrb.mxu3 %v1301_v53  ;;  %1131 = vmatpush.msrb.mxu2 %v6659_v35  ;;  %v6758_v24 = vsub.f32 %v274_v3, %v6751_v42  ;;  %v10733_v53 = vand.u32 4294901760, %v6425_v20  ;;  %v272_v3 = vld [vmem:[%s10328_s1 + $0x190] sm:$0xff] }
  0x42   : > { %1032 = vmatpush.msrb.mxu1 %v6381_v5  ;;  %913 = vmatpush.msrb.mxu0 %v10732_v4  ;;  %v377_v5 = vsub.f32 %v6726_v15, %v6746_v14  ;;  %10734 = vst [vmem:[#allocation21_spill] sm:$0xff] %v6768_v19  ;;  %v6789_v4 = vand.u32 4294901760, %v6768_v19 }
  0x43   : > { %1308 = vmatpush.msrb.mxu3 %v1307_v38  ;;  %1133 = vmatpush.msrb.mxu2 %v6710_v13  ;;  %v189_v38 = vld [vmem:[%s6495_s8 + $0x78] sm:$0xff]  ;;  %v10349_v2 = vand.u32 4294901760, %v6758_v24 }
  0x44   : > { %1034 = vmatpush.msrb.mxu1 %v6392_v9  ;;  %917 = vmatpush.msrb.mxu0 %v10733_v53  ;;  %v6779_v20 = vand.u32 4294901760, %v189_v38  ;;  %10738 = vst [vmem:[#allocation24_spill] sm:$0xff] %v6789_v4  ;;  %v6792_v53 = vand.u32 4294901760, %v272_v3 }
  0x45   : > { %371 = vmatmul.f32.gmra.mxu0 %v6743_v45  ;;  %580 = vmatmul.f32.gmra.mxu1 %v6589_v49  ;;  %v1318_v9 = vsub.f32 %v6758_v24, %v10349_v2  ;;  %v10739_v2 = vand.u32 4294901760, %v6448_v29 }
  0x46   : > { %1314 = vmatpush.msrb.mxu3 %v1313_v23  ;;  %1036 = vmatpush.msrb.mxu1 %v6394_v10  ;;  %10735 = vst [vmem:[#allocation22_spill] sm:$0xff] %v6779_v20  ;;  %v6786_v10 = vand.u32 4294901760, %v377_v5  ;;  %v6798_v21 = vsub.f32 %v272_v3, %v6792_v53  ;;  %v6801_v5 = vsub.f32 %v189_v38, %v6779_v20  ;;  %v10742_v38 = vand.u32 4294901760, %v6484_v43 }
  0x47   : > { %816 = vmatmul.f32.gmra.mxu3 %v6705_v55  ;;  %1135 = vmatpush.msrb.mxu2 %v6751_v42  ;;  %v1319_v23 = vand.u32 4294901760, %v1318_v9  ;;  %v10741_v9 = vand.u32 4294901760, %v6476_v40 }
  0x48   : > { %700 = vmatmul.f32.gmra.mxu2 %v6685_v54  ;;  %921 = vmatpush.msrb.mxu0 %v10736_v33  ;;  %10737 = vst [vmem:[#allocation23_spill] sm:$0xff] %v6786_v10  ;;  %v10352_v29 = vand.u32 4294901760, %v6798_v21  ;;  %v6821_v40 = vand.u32 4294901760, %v6801_v5  ;;  %v270_v33 = vld [vmem:[%s10328_s1 + $0x180] sm:$0xff] }
  0x49   : > { %1038 = vmatpush.msrb.mxu1 %v6396_v11  ;;  %1320 = vmatpush.msrb.mxu3 %v1319_v23  ;;  %10740 = vst [vmem:[#allocation25_spill] sm:$0xff] %v6801_v5  ;;  %v385_v11 = vsub.f32 %v6768_v19, %v6789_v4  ;;  %v6831_v23 = vand.u32 4294901760, %v270_v33 }
  0x4a   : > { %925 = vmatpush.msrb.mxu0 %v10739_v2  ;;  %1137 = vmatpush.msrb.mxu2 %v6792_v53  ;;  %v192_v2 = vld [vmem:[%s6495_s8 + $0x90] sm:$0xff]  ;;  %10743 = vst [vmem:[#allocation26_spill] sm:$0xff] %v6821_v40 }
  0x4b   : > { %1040 = vmatpush.msrb.mxu1 %v6415_v17  ;;  %v1324_v17 = vsub.f32 %v6798_v21, %v10352_v29  ;;  %v6829_v43 = vand.u32 4294901760, %v192_v2 }
  0x4c   : > { %929 = vmatpush.msrb.mxu0 %v10741_v9  ;;  %v10746_v9 = vand.u32 4294901760, %v6510_v52  ;;  %1139 = vmatpush.msrb.mxu2 %v6831_v23 }
  0x4d   : > { %379 = vmatmul.f32.gmra.mxu0 %v6786_v10  ;;  %584 = vmatmul.f32.gmra.mxu1 %v6644_v51  ;;  %10745 = vst [vmem:[#allocation28_spill] sm:$0xff] %v6829_v43  ;;  %v1325_v3 = vand.u32 4294901760, %v1324_v17  ;;  %v195_v17 = vld [vmem:[%s6495_s8 + $0xa8] sm:$0xff] }
  0x4e   : > { %1042 = vmatpush.msrb.mxu1 %v6435_v25  ;;  %933 = vmatpush.msrb.mxu0 %v10742_v38  ;;  %v6827_v25 = vand.u32 4294901760, %v385_v11  ;;  %v6838_v38 = vsub.f32 %v270_v33, %v6831_v23  ;;  %v10747_v11 = vand.u32 4294901760, %v6526_v59  ;;  %v10749_v33 = vand.u32 4294901760, %v6534_v62 }
  0x4f   : > { %822 = vmatmul.f32.gmra.mxu3 %v6746_v14  ;;  %v6870_v62 = vand.u32 4294901760, %v195_v17 }
  0x50   : > { %705 = vmatmul.f32.gmra.mxu2 %v6726_v15  ;;  %1044 = vmatpush.msrb.mxu1 %v6445_v28  ;;  %10744 = vst [vmem:[#allocation27_spill] sm:$0xff] %v6827_v25  ;;  %v393_v28 = vsub.f32 %v6801_v5, %v6821_v40  ;;  %v10351_v52 = vand.u32 4294901760, %v6838_v38  ;;  %v258_v15 = vld [vmem:[%s10328_s1 + $0x120] sm:$0xff] }
  0x51   : > { %937 = vmatpush.msrb.mxu0 %v10746_v9  ;;  %1326 = vmatpush.msrb.mxu3 %v1325_v3  ;;  %v10751_v3 = vand.u32 4294901760, %v6561_v26  ;;  %10753 = vst [vmem:[#allocation32_spill] sm:$0xff] %v6870_v62 }
  0x52   : > { %1046 = vmatpush.msrb.mxu1 %v6464_v34  ;;  %v6848_v34 = vsub.f32 %v192_v2, %v6829_v43  ;;  %v6860_v59 = vand.u32 4294901760, %v393_v28  ;;  %v268_v2 = vld [vmem:[%s10328_s1 + $0x170] sm:$0xff]  ;;  %v10754_v28 = vand.u32 4294901760, %v6582_v44  ;;  %v6889_v44 = vsub.f32 %v195_v17, %v6870_v62 }
  0x53   : > { %941 = vmatpush.msrb.mxu0 %v10747_v11  ;;  %v6872_v11 = vand.u32 4294901760, %v268_v2 }
  0x54   : > { %1048 = vmatpush.msrb.mxu1 %v6490_v46  ;;  %10748 = vst [vmem:[#allocation29_spill] sm:$0xff] %v6848_v34  ;;  %v1330_v46 = vsub.f32 %v6838_v38, %v10351_v52 }
  0x55   : > { %387 = vmatmul.f32.gmra.mxu0 %v6827_v25  ;;  %588 = vmatmul.f32.gmra.mxu1 %v6694_v22  ;;  %10750 = vst [vmem:[#allocation30_spill] sm:$0xff] %v6860_v59  ;;  %v6879_v26 = vsub.f32 %v268_v2, %v6872_v11  ;;  %v266_v2 = vld [vmem:[%s10328_s1 + $0x160] sm:$0xff] }
  0x56   : > { %945 = vmatpush.msrb.mxu0 %v10749_v33  ;;  %1050 = vmatpush.msrb.mxu1 %v6502_v48  ;;  %v6868_v48 = vand.u32 4294901760, %v6848_v34  ;;  %v1331_v9 = vand.u32 4294901760, %v1330_v46  ;;  %v10755_v33 = vand.u32 4294901760, %v6599_v56  ;;  %10756 = vst [vmem:[#allocation33_spill] sm:$0xff] %v6889_v44  ;;  %v198_v46 = vld [vmem:[%s6495_s8 + $0xc0] sm:$0xff] }
  0x57   : > { %828 = vmatmul.f32.gmra.mxu3 %v6789_v4  ;;  %1141 = vmatpush.msrb.mxu2 %v6872_v11  ;;  %v6902_v17 = vand.u32 4294901760, %v198_v46 }
  0x58   : > { %710 = vmatmul.f32.gmra.mxu2 %v6768_v19  ;;  %949 = vmatpush.msrb.mxu0 %v10751_v3  ;;  %10752 = vst [vmem:[#allocation31_spill] sm:$0xff] %v6868_v48  ;;  %v10350_v3 = vand.u32 4294901760, %v6879_v26 }
  0x59   : > { %1052 = vmatpush.msrb.mxu1 %v6523_v58  ;;  %1332 = vmatpush.msrb.mxu3 %v1331_v9  ;;  %v401_v58 = vsub.f32 %v6848_v34, %v6868_v48  ;;  %10758 = vst [vmem:[#allocation34_spill] sm:$0xff] %v6902_v17 }
  0x5a   : > { %953 = vmatpush.msrb.mxu0 %v10754_v28  ;;  %v1336_v56 = vsub.f32 %v6879_v26, %v10350_v3  ;;  %v6913_v28 = vand.u32 4294901760, %v266_v2 }
  0x5b   : > { %1054 = vmatpush.msrb.mxu1 %v6543_v1  ;;  %v10757_v1 = vand.u32 4294901760, %v6615_v63  ;;  %v6911_v63 = vand.u32 4294901760, %v6889_v44 }
  0x5c   : > { %957 = vmatpush.msrb.mxu0 %v10755_v33  ;;  %v1337_v9 = vand.u32 4294901760, %v1336_v56  ;;  %1143 = vmatpush.msrb.mxu2 %v6913_v28  ;;  %v6919_v33 = vsub.f32 %v266_v2, %v6913_v28  ;;  %v201_v56 = vld [vmem:[%s6495_s8 + $0xd8] sm:$0xff] }
  0x5d   : > { %395 = vmatmul.f32.gmra.mxu0 %v6860_v59  ;;  %592 = vmatmul.f32.gmra.mxu1 %v6749_v16  ;;  %10760 = vst [vmem:[#allocation36_spill] sm:$0xff] %v6911_v63  ;;  %v6948_v52 = vand.u32 4294901760, %v201_v56 }
  0x5e   : > { %1056 = vmatpush.msrb.mxu1 %v6553_v12  ;;  %961 = vmatpush.msrb.mxu0 %v10757_v1  ;;  %v6908_v12 = vand.u32 4294901760, %v401_v58  ;;  %v409_v58 = vsub.f32 %v6889_v44, %v6911_v63  ;;  %v10354_v1 = vand.u32 4294901760, %v6919_v33 }
  0x5f   : > { %834 = vmatmul.f32.gmra.mxu3 %v6821_v40  ;;  %10764 = vst [vmem:[#allocation40_spill] sm:$0xff] %v6948_v52 }
  0x60   : > { %1448 = vmatpush.msra.mxu0 %v6602_v57  ;;  %715 = vmatmul.f32.gmra.mxu2 %v6801_v5  ;;  %10759 = vst [vmem:[#allocation35_spill] sm:$0xff] %v6908_v12  ;;  %v6946_v3 = vand.u32 4294901760, %v409_v58 }
  0x61   : > { %1058 = vmatpush.msrb.mxu1 %v6579_v41  ;;  %1338 = vmatpush.msrb.mxu3 %v1337_v9  ;;  %v6922_v41 = vsub.f32 %v198_v46, %v6902_v17  ;;  %v1342_v46 = vsub.f32 %v6919_v33, %v10354_v1  ;;  %v264_v9 = vld [vmem:[%s10328_s1 + $0x150] sm:$0xff] }
  0x62   : > { %1451 = vmatpush.msra.mxu0 %v6618_v8  ;;  %10763 = vst [vmem:[#allocation39_spill] sm:$0xff] %v6946_v3  ;;  %v6950_v36 = vand.u32 4294901760, %v264_v9 }
  0x63   : > { %1576 = vmatpush.msra.mxu1 %v6566_v31  ;;  %10761 = vst [vmem:[#allocation37_spill] sm:$0xff] %v6922_v41  ;;  %v6940_v2 = vand.u32 4294901760, %v6922_v41  ;;  %v1343_v29 = vand.u32 4294901760, %v1342_v46  ;;  %v6965_v46 = vsub.f32 %v201_v56, %v6948_v52  ;;  %v262_v56 = vld [vmem:[%s10328_s1 + $0x140] sm:$0xff] }
  0x64   : > { %1454 = vmatpush.msra.mxu0 %v6657_v7  ;;  %1145 = vmatpush.msrb.mxu2 %v6950_v36  ;;  %v6956_v1 = vsub.f32 %v264_v9, %v6950_v36  ;;  %v6987_v4 = vand.u32 4294901760, %v262_v56 }
  0x65   : > { %1578 = vmatpush.msra.mxu1 %v6591_v50  ;;  %403 = vmatmul.f32.gmra.mxu0 %v6908_v12  ;;  %10762 = vst [vmem:[#allocation38_spill] sm:$0xff] %v6940_v2  ;;  %v417_v58 = vsub.f32 %v6922_v41, %v6940_v2  ;;  %v6983_v40 = vand.u32 4294901760, %v6965_v46 }
  0x66   : > { %596 = vmatmul.f32.gmra.mxu1 %v6779_v20  ;;  %1457 = vmatpush.msra.mxu0 %v6671_v61  ;;  %10765 = vst [vmem:[#allocation41_spill] sm:$0xff] %v6965_v46 }
  0x67   : > { %1580 = vmatpush.msra.mxu1 %v6628_v39  ;;  %840 = vmatmul.f32.gmra.mxu3 %v6868_v48  ;;  %v6976_v48 = vand.u32 4294901760, %v417_v58  ;;  %10767 = vst [vmem:[#allocation43_spill] sm:$0xff] %v6983_v40  ;;  %v6993_v58 = vsub.f32 %v262_v56, %v6987_v4 }
  0x68   : > { %720 = vmatmul.f32.gmra.mxu2 %v6848_v34  ;;  %1460 = vmatpush.msra.mxu0 %v6719_v27  ;;  %v6985_v34 = vand.u32 4294901760, %v204_v32 }
  0x69   : > { %1582 = vmatpush.msra.mxu1 %v6659_v35  ;;  %1344 = vmatpush.msrb.mxu3 %v1343_v29  ;;  %v10361_v29 = vand.u32 4294901760, %v6956_v1  ;;  %10766 = vst [vmem:[#allocation42_spill] sm:$0xff] %v6976_v48 }
  0x6a   : > { %1463 = vmatpush.msra.mxu0 %v6758_v24  ;;  %10768 = vst [vmem:[#allocation44_spill] sm:$0xff] %v6985_v34  ;;  %1147 = vmatpush.msrb.mxu2 %v6987_v4 }
  0x6b   : > { %1584 = vmatpush.msra.mxu1 %v6710_v13  ;;  %v1348_v9 = vsub.f32 %v6956_v1, %v10361_v29  ;;  %v7002_v29 = vsub.f32 %v204_v32, %v6985_v34  ;;  %v260_v32 = vld [vmem:[%s10328_s1 + $0x130] sm:$0xff] }
  0x6c   : > { %1466 = vmatpush.msra.mxu0 %v6798_v21  ;;  %v7024_v55 = vand.u32 4294901760, %v260_v32 }
  0x6d   : > { %1586 = vmatpush.msra.mxu1 %v6751_v42  ;;  %411 = vmatmul.f32.gmra.mxu0 %v6946_v3  ;;  %10769 = vst [vmem:[#allocation45_spill] sm:$0xff] %v7002_v29  ;;  %v7022_v19 = vand.u32 4294901760, %v7002_v29 }
  0x6e   : > { %600 = vmatmul.f32.gmra.mxu1 %v6829_v43  ;;  %1469 = vmatpush.msra.mxu0 %v6838_v38 }
  0x6f   : > { %1588 = vmatpush.msra.mxu1 %v6792_v53  ;;  %846 = vmatmul.f32.gmra.mxu3 %v6911_v63  ;;  %v1349_v63 = vand.u32 4294901760, %v1348_v9  ;;  %v425_v9 = vsub.f32 %v6965_v46, %v6983_v40  ;;  %10772 = vst [vmem:[#allocation48_spill] sm:$0xff] %v7022_v19 }
  0x70   : > { %725 = vmatmul.f32.gmra.mxu2 %v6889_v44  ;;  %1472 = vmatpush.msra.mxu0 %v6879_v26  ;;  %v10368_v44 = vand.u32 4294901760, %v6993_v58 }
  0x71   : > { %1590 = vmatpush.msra.mxu1 %v6831_v23  ;;  %1350 = vmatpush.msrb.mxu3 %v1349_v63  ;;  %v207_v63 = vld [vmem:[%s6495_s8 + $0x108] sm:$0xff]  ;;  %v7019_v14 = vand.u32 4294901760, %v425_v9  ;;  %v433_v9 = vsub.f32 %v7002_v29, %v7022_v19 }
  0x72   : > { %1475 = vmatpush.msra.mxu0 %v6919_v33  ;;  %v1354_v56 = vsub.f32 %v6993_v58, %v10368_v44  ;;  %v7013_v5 = vand.u32 4294901760, %v207_v63  ;;  %1149 = vmatpush.msrb.mxu2 %v7024_v55  ;;  %v7030_v44 = vsub.f32 %v260_v32, %v7024_v55 }
  0x73   : > { %1592 = vmatpush.msra.mxu1 %v6872_v11  ;;  %10771 = vst [vmem:[#allocation47_spill] sm:$0xff] %v7019_v14  ;;  %v7054_v60 = vand.u32 4294901760, %v433_v9 }
  0x74   : > { %1478 = vmatpush.msra.mxu0 %v6956_v1  ;;  %10770 = vst [vmem:[#allocation46_spill] sm:$0xff] %v7013_v5 }
  0x75   : > { %419 = vmatmul.f32.gmra.mxu0 %v6976_v48  ;;  %1594 = vmatpush.msra.mxu1 %v6913_v28  ;;  %10775 = vst [vmem:[#allocation51_spill] sm:$0xff] %v7054_v60 }
  0x76   : > { %604 = vmatmul.f32.gmra.mxu1 %v6870_v62  ;;  %1481 = vmatpush.msra.mxu0 %v6993_v58 }
  0x77   : > { %852 = vmatmul.f32.gmra.mxu3 %v6940_v2  ;;  %1596 = vmatpush.msra.mxu1 %v6950_v36  ;;  %v1355_v2 = vand.u32 4294901760, %v1354_v56  ;;  %v10375_v56 = vand.u32 4294901760, %v7030_v44 }
  0x78   : > { %730 = vmatmul.f32.gmra.mxu2 %v6922_v41  ;;  %v7033_v41 = vsub.f32 %v207_v63, %v7013_v5  ;;  %1484 = vmatpush.msra.mxu0 %v7030_v44 }
  0x79   : > { %1598 = vmatpush.msra.mxu1 %v6987_v4  ;;  %1356 = vmatpush.msrb.mxu3 %v1355_v2  ;;  %v210_v2 = vld [vmem:[%s6495_s8 + $0x120] sm:$0xff]  ;;  %v1360_v63 = vsub.f32 %v7030_v44, %v10375_v56 }
  0x7a   : > { %10773 = vst [vmem:[#allocation49_spill] sm:$0xff] %v7033_v41  ;;  %v7049_v32 = vand.u32 4294901760, %v7033_v41  ;;  %v7056_v54 = vand.u32 4294901760, %v210_v2 }
  0x7b   : > { %1600 = vmatpush.msra.mxu1 %v7024_v55  ;;  %v1361_v47 = vand.u32 4294901760, %v1360_v63 }
  0x7c   : > { %10774 = vst [vmem:[#allocation50_spill] sm:$0xff] %v7049_v32  ;;  %v7070_v9 = vsub.f32 %v210_v2, %v7056_v54  ;;  %v256_v2 = vld [vmem:[%s10328_s1 + $0x110] sm:$0xff] }
  0x7d   : > { %427 = vmatmul.f32.gmra.mxu0 %v7019_v14  ;;  %10776 = vst [vmem:[#allocation52_spill] sm:$0xff] %v7056_v54  ;;  %1362 = vmatpush.msrb.mxu3 %v1361_v47  ;;  %v213_v47 = vld [vmem:[%s6495_s8 + $0x138] sm:$0xff] }
  0x7e   : > { %608 = vmatmul.f32.gmra.mxu1 %v6902_v17  ;;  %10777 = vst [vmem:[#allocation53_spill] sm:$0xff] %v7070_v9  ;;  %v7086_v30 = vand.u32 4294901760, %v7070_v9 }
  0x7f   : > { %858 = vmatmul.f32.gmra.mxu3 %v6983_v40  ;;  %v7058_v40 = vand.u32 4294901760, %v258_v15 }
  0x80   : > { %735 = vmatmul.f32.gmra.mxu2 %v6965_v46  ;;  %v441_v46 = vsub.f32 %v7033_v41, %v7049_v32  ;;  %10779 = vst [vmem:[#allocation55_spill] sm:$0xff] %v7086_v30 }
  0x81   : > { %1151 = vmatpush.msrb.mxu2 %v7058_v40  ;;  %v7062_v56 = vsub.f32 %v258_v15, %v7058_v40  ;;  %1602 = vmatpush.msra.mxu1 %v7058_v40 }
  0x82   : > { %v7080_v37 = vand.u32 4294901760, %v441_v46  ;;  %v449_v46 = vsub.f32 %v7070_v9, %v7086_v30 }
  0x83   : > { %v10382_v63 = vand.u32 4294901760, %v7062_v56  ;;  %1487 = vmatpush.msra.mxu0 %v7062_v56 }
  0x84   : > { %10778 = vst [vmem:[#allocation54_spill] sm:$0xff] %v7080_v37  ;;  %v7121_v3 = vand.u32 4294901760, %v449_v46 }
  0x85   : > { %435 = vmatmul.f32.gmra.mxu0 %v7054_v60  ;;  %v1366_v15 = vsub.f32 %v7062_v56, %v10382_v63  ;;  %v7088_v60 = vand.u32 4294901760, %v213_v47 }
  0x86   : > { %612 = vmatmul.f32.gmra.mxu1 %v6948_v52  ;;  %10782 = vst [vmem:[#allocation58_spill] sm:$0xff] %v7121_v3 }
  0x87   : > { %864 = vmatmul.f32.gmra.mxu3 %v7022_v19  ;;  %10780 = vst [vmem:[#allocation56_spill] sm:$0xff] %v7088_v60  ;;  %v1367_v14 = vand.u32 4294901760, %v1366_v15  ;;  %v7090_v19 = vand.u32 4294901760, %v256_v2 }
  0x88   : > { %740 = vmatmul.f32.gmra.mxu2 %v7002_v29  ;;  %v7102_v29 = vsub.f32 %v213_v47, %v7088_v60 }
  0x89   : > { %1368 = vmatpush.msrb.mxu3 %v1367_v14  ;;  %1153 = vmatpush.msrb.mxu2 %v7090_v19  ;;  %v7094_v63 = vsub.f32 %v256_v2, %v7090_v19  ;;  %v254_v14 = vld [vmem:[%s10328_s1 + $0x100] sm:$0xff]  ;;  %v216_v2 = vld [vmem:[%s6495_s8 + $0x150] sm:$0xff] }
  0x8a   : > { %1604 = vmatpush.msra.mxu1 %v7090_v19  ;;  %10781 = vst [vmem:[#allocation57_spill] sm:$0xff] %v7102_v29  ;;  %v7109_v48 = vand.u32 4294901760, %v254_v14  ;;  %v7124_v12 = vand.u32 4294901760, %v7102_v29  ;;  %v7126_v59 = vand.u32 4294901760, %v216_v2 }
  0x8b   : > { %v10390_v15 = vand.u32 4294901760, %v7094_v63  ;;  %1490 = vmatpush.msra.mxu0 %v7094_v63 }
  0x8c   : > { %v7118_v47 = vsub.f32 %v254_v14, %v7109_v48  ;;  %1606 = vmatpush.msra.mxu1 %v7109_v48  ;;  %10783 = vst [vmem:[#allocation59_spill] sm:$0xff] %v7124_v12  ;;  %1155 = vmatpush.msrb.mxu2 %v7109_v48  ;;  %v10786_v14 = vand.u32 4294901760, %v6618_v8 }
  0x8d   : > { %443 = vmatmul.f32.gmra.mxu0 %v7080_v37  ;;  %v1372_v37 = vsub.f32 %v7094_v63, %v10390_v15  ;;  %10784 = vst [vmem:[#allocation60_spill] sm:$0xff] %v7126_v59 }
  0x8e   : > { %616 = vmatmul.f32.gmra.mxu1 %v6985_v34  ;;  %v10393_v15 = vand.u32 4294901760, %v7118_v47  ;;  %1493 = vmatpush.msra.mxu0 %v7118_v47 }
  0x8f   : > { %870 = vmatmul.f32.gmra.mxu3 %v7049_v32  ;;  %v1373_v32 = vand.u32 4294901760, %v1372_v37  ;;  %v457_v37 = vsub.f32 %v7102_v29, %v7124_v12 }
  0x90   : > { %745 = vmatmul.f32.gmra.mxu2 %v7033_v41  ;;  %v10785_v41 = vand.u32 4294901760, %v6602_v57  ;;  %v1378_v46 = vsub.f32 %v7118_v47, %v10393_v15  ;;  %v7143_v57 = vsub.f32 %v216_v2, %v7126_v59  ;;  %v10792_v2 = vand.u32 4294901760, %v6671_v61 }
  0x91   : > { %1374 = vmatpush.msrb.mxu3 %v1373_v32  ;;  %v10788_v32 = vand.u32 4294901760, %v6657_v7  ;;  %v7150_v8 = vand.u32 4294901760, %v457_v37  ;;  %v10793_v7 = vand.u32 4294901760, %v6719_v27  ;;  %v175_v27 = vld [vmem:[%s6495_s8 + $0x8] sm:$0xff]  ;;  %v10798_v37 = vand.u32 4294901760, %v6798_v21 }
  0x92   : > { %1707 = vmatpush.msra.mxu2 %v10785_v41  ;;  %10787 = vst [vmem:[#allocation61_spill] sm:$0xff] %v7143_v57  ;;  %v219_v41 = vld [vmem:[%s6495_s8 + $0x168] sm:$0xff]  ;;  %v1379_v25 = vand.u32 4294901760, %v1378_v46  ;;  %v10801_v21 = vand.u32 4294901760, %v6879_v26 }
  0x93   : > { %10789 = vst [vmem:[#allocation62_spill] sm:$0xff] %v7150_v8  ;;  %v7155_v15 = vand.u32 4294901760, %v219_v41 }
  0x94   : > { %1711 = vmatpush.msra.mxu2 %v10786_v14  ;;  %1380 = vmatpush.msrb.mxu3 %v1379_v25  ;;  %v7153_v14 = vand.u32 4294901760, %v7143_v57 }
  0x95   : > { %451 = vmatmul.f32.gmra.mxu0 %v7121_v3  ;;  %10791 = vst [vmem:[#allocation64_spill] sm:$0xff] %v7155_v15  ;;  %v7168_v46 = vsub.f32 %v219_v41, %v7155_v15  ;;  %v10804_v41 = vand.u32 4294901760, %v6919_v33 }
  0x96   : > { %620 = vmatmul.f32.gmra.mxu1 %v7013_v5  ;;  %1715 = vmatpush.msra.mxu2 %v10788_v32  ;;  %10790 = vst [vmem:[#allocation63_spill] sm:$0xff] %v7153_v14  ;;  %v465_v25 = vsub.f32 %v7143_v57, %v7153_v14 }
  0x97   : > { %876 = vmatmul.f32.gmra.mxu3 %v7086_v30  ;;  %10794 = vst [vmem:[#allocation65_spill] sm:$0xff] %v7168_v46  ;;  %v7179_v61 = vand.u32 4294901760, %v7168_v46 }
  0x98   : > { %750 = vmatmul.f32.gmra.mxu2 %v7070_v9  ;;  %1834 = vmatpush.msra.mxu3 %v6566_v31  ;;  %v10795_v31 = vand.u32 4294901760, %v6758_v24  ;;  %v7187_v24 = vand.u32 4294901760, %v175_v27 }
  0x99   : > { %1719 = vmatpush.msra.mxu2 %v10792_v2  ;;  %10797 = vst [vmem:[#allocation67_spill] sm:$0xff] %v7179_v61 }
  0x9a   : > { %1836 = vmatpush.msra.mxu3 %v6591_v50  ;;  %v7176_v50 = vand.u32 4294901760, %v465_v25  ;;  %10800 = vst [vmem:[#allocation68_spill] sm:$0xff] %v7187_v24 }
  0x9b   : > { %1723 = vmatpush.msra.mxu2 %v10793_v7 }
  0x9c   : > { %1838 = vmatpush.msra.mxu3 %v6628_v39  ;;  %10796 = vst [vmem:[#allocation66_spill] sm:$0xff] %v7176_v50  ;;  %v10799_v39 = vand.u32 4294901760, %v6838_v38  ;;  %v178_v38 = vld [vmem:[%s6495_s8 + $0x20] sm:$0xff] }
  0x9d   : > { %459 = vmatmul.f32.gmra.mxu0 %v7150_v8  ;;  %1727 = vmatpush.msra.mxu2 %v10795_v31  ;;  %v7214_v32 = vand.u32 4294901760, %v178_v38 }
  0x9e   : > { %624 = vmatmul.f32.gmra.mxu1 %v7056_v54  ;;  %1840 = vmatpush.msra.mxu3 %v6659_v35  ;;  %v473_v35 = vsub.f32 %v7168_v46, %v7179_v61 }
  0x9f   : > { %882 = vmatmul.f32.gmra.mxu3 %v7124_v12  ;;  %1731 = vmatpush.msra.mxu2 %v10798_v37  ;;  %10807 = vst [vmem:[#allocation72_spill] sm:$0xff] %v7214_v32  ;;  %v7227_v33 = vsub.f32 %v178_v38, %v7214_v32 }
  0xa0   : > { %755 = vmatmul.f32.gmra.mxu2 %v7102_v29  ;;  %1842 = vmatpush.msra.mxu3 %v6710_v13  ;;  %v7200_v13 = vsub.f32 %v175_v27, %v7187_v24 }
  0xa1   : > { %1735 = vmatpush.msra.mxu2 %v10799_v39  ;;  %10809 = vst [vmem:[#allocation73_spill] sm:$0xff] %v7227_v33  ;;  %v7239_v7 = vand.u32 4294901760, %v7227_v33 }
  0xa2   : > { %1844 = vmatpush.msra.mxu3 %v6751_v42  ;;  %10802 = vst [vmem:[#allocation69_spill] sm:$0xff] %v7200_v13  ;;  %v7203_v42 = vand.u32 4294901760, %v473_v35  ;;  %v7212_v26 = vand.u32 4294901760, %v7200_v13 }
  0xa3   : > { %1739 = vmatpush.msra.mxu2 %v10801_v21  ;;  %10813 = vst [vmem:[#allocation75_spill] sm:$0xff] %v7239_v7 }
  0xa4   : > { %1846 = vmatpush.msra.mxu3 %v6792_v53  ;;  %10803 = vst [vmem:[#allocation70_spill] sm:$0xff] %v7203_v42  ;;  %v10805_v53 = vand.u32 4294901760, %v6956_v1  ;;  %v10810_v1 = vand.u32 4294901760, %v7030_v44 }
  0xa5   : > { %467 = vmatmul.f32.gmra.mxu0 %v7176_v50  ;;  %1743 = vmatpush.msra.mxu2 %v10804_v41  ;;  %10806 = vst [vmem:[#allocation71_spill] sm:$0xff] %v7212_v26 }
  0xa6   : > { %628 = vmatmul.f32.gmra.mxu1 %v7088_v60  ;;  %1848 = vmatpush.msra.mxu3 %v6831_v23  ;;  %v10808_v23 = vand.u32 4294901760, %v6993_v58  ;;  %v10811_v58 = vand.u32 4294901760, %v7062_v56  ;;  %v10817_v56 = vand.u32 4294901760, %v7118_v47 }
  0xa7   : > { %888 = vmatmul.f32.gmra.mxu3 %v7153_v14  ;;  %1747 = vmatpush.msra.mxu2 %v10805_v53  ;;  %v187_v53 = vld [vmem:[%s6495_s8 + $0x68] sm:$0xff] }
  0xa8   : > { %760 = vmatmul.f32.gmra.mxu2 %v7143_v57  ;;  %1850 = vmatpush.msra.mxu3 %v6872_v11  ;;  %v1159_v11 = vsub.f32 %v7200_v13, %v7212_v26 }
  0xa9   : > { %1751 = vmatpush.msra.mxu2 %v10808_v23 }
  0xaa   : > { %1852 = vmatpush.msra.mxu3 %v6913_v28  ;;  %v181_v28 = vld [vmem:[%s6495_s8 + $0x38] sm:$0xff]  ;;  %v7236_v2 = vand.u32 4294901760, %v1159_v11 }
  0xab   : > { %1755 = vmatpush.msra.mxu2 %v10810_v1  ;;  %v7241_v25 = vand.u32 4294901760, %v181_v28 }
  0xac   : > { %1854 = vmatpush.msra.mxu3 %v6950_v36  ;;  %10812 = vst [vmem:[#allocation74_spill] sm:$0xff] %v7236_v2 }
  0xad   : > { %475 = vmatmul.f32.gmra.mxu0 %v7203_v42  ;;  %1759 = vmatpush.msra.mxu2 %v10811_v58  ;;  %10814 = vst [vmem:[#allocation76_spill] sm:$0xff] %v7241_v25  ;;  %v7254_v44 = vsub.f32 %v181_v28, %v7241_v25 }
  0xae   : > { %632 = vmatmul.f32.gmra.mxu1 %v7126_v59  ;;  %1856 = vmatpush.msra.mxu3 %v6987_v4  ;;  %v10815_v4 = vand.u32 4294901760, %v7094_v63 }
  0xaf   : > { %894 = vmatmul.f32.gmra.mxu3 %v7179_v61  ;;  %10816 = vst [vmem:[#allocation77_spill] sm:$0xff] %v7254_v44  ;;  %v7263_v35 = vand.u32 4294901760, %v7254_v44 }
  0xb0   : > { %765 = vmatmul.f32.gmra.mxu2 %v7168_v46  ;;  %1858 = vmatpush.msra.mxu3 %v7024_v55  ;;  %v1167_v55 = vsub.f32 %v7227_v33, %v7239_v7 }
  0xb1   : > { %1763 = vmatpush.msra.mxu2 %v10815_v4  ;;  %10819 = vst [vmem:[#allocation79_spill] sm:$0xff] %v7263_v35  ;;  %v1175_v47 = vsub.f32 %v7254_v44, %v7263_v35 }
  0xb2   : > { %v356_v36 = vpop.f32.mrf.mxu0  ;;  %1860 = vmatpush.msra.mxu3 %v7058_v40  ;;  %v184_v40 = vld [vmem:[%s6495_s8 + $0x50] sm:$0xff]  ;;  %v7260_v39 = vand.u32 4294901760, %v1167_v55  ;;  %v7284_v55 = vand.u32 4294901760, %v187_v53 }
  0xb3   : > { %1767 = vmatpush.msra.mxu2 %v10817_v56  ;;  %v7265_v21 = vand.u32 4294901760, %v184_v40  ;;  %v7279_v58 = vand.u32 4294901760, %v1175_v47 }
  0xb4   : > { %1862 = vmatpush.msra.mxu3 %v7090_v19  ;;  %10818 = vst [vmem:[#allocation78_spill] sm:$0xff] %v7260_v39 }
  0xb5   : > { %963 = vmatmul.f32.vlgmr.msrb.gmra.mxu0 %v6546_v6  ;;  %10820 = vst [vmem:[#allocation80_spill] sm:$0xff] %v7265_v21  ;;  %v7276_v41 = vsub.f32 %v184_v40, %v7265_v21 }
  0xb6   : > { %636 = vmatmul.f32.gmra.mxu1 %v7155_v15  ;;  %1864 = vmatpush.msra.mxu3 %v7109_v48  ;;  %10822 = vst [vmem:[#allocation82_spill] sm:$0xff] %v7279_v58 }
  0xb7   : > { %1382 = vmatmul.f32.vlgmr.msrb.gmra.mxu3 %v7187_v24  ;;  %10821 = vst [vmem:[#allocation81_spill] sm:$0xff] %v7276_v41  ;;  %v7282_v4 = vand.u32 4294901760, %v7276_v41 }
  0xb8   : > { %1161 = vmatmul.f32.vlgmr.msrb.gmra.mxu2 %v7236_v2  ;;  %10824 = vst [vmem:[#allocation84_spill] sm:$0xff] %v7284_v55 }
  0xb9   : > { %10823 = vst [vmem:[#allocation83_spill] sm:$0xff] %v7282_v4 }
  0xba   : > { %v364_v63 = vpop.f32.mrf.mxu0  ;;  %v577_v31 = vpop.f32.mrf.mxu1 }
  0xbb   : > { %v578_v19 = vadd.f32 %v577_v31, %v356_v36  ;;  %v691_v27 = vpop.f32.mrf.mxu2  ;;  %v805_v37 = vpop.f32.mrf.mxu3  ;;  %v7295_v31 = vsub.f32 %v187_v53, %v7284_v55 }
  0xbd   : > { %v692_v38 = vadd.f32 %v691_v27, %v578_v19  ;;  %967 = vmatmul.f32.gmra.mxu0 %v6589_v49  ;;  %10825 = vst [vmem:[#allocation85_spill] sm:$0xff] %v7295_v31  ;;  %v190_v19 = vld [vmem:[%s6495_s8 + $0x80] sm:$0xff] }
  0xbe   : > { %1060 = vmatmul.f32.vlgmr.msrb.gmra.mxu1 %v6546_v6 }
  0xbf   : > { %v7269_v48 = vadd.f32 %v805_v37, %v692_v38  ;;  %1386 = vmatmul.f32.gmra.mxu3 %v7214_v32 }
  0xc0   : > { %1169 = vmatmul.f32.gmra.mxu2 %v7260_v39 }
  0xc2   : > { %v372_v23 = vpop.f32.mrf.mxu0  ;;  %v581_v11 = vpop.f32.mrf.mxu1 }
  0xc3   : > { %v582_v28 = vadd.f32 %v581_v11, %v364_v63  ;;  %v696_v1 = vpop.f32.mrf.mxu2  ;;  %v811_v36 = vpop.f32.mrf.mxu3  ;;  %v1183_v63 = vsub.f32 %v7276_v41, %v7282_v4 }
  0xc5   : > { %v697_v56 = vadd.f32 %v696_v1, %v582_v28  ;;  %971 = vmatmul.f32.gmra.mxu0 %v6644_v51  ;;  %v7298_v28 = vand.u32 4294901760, %v1183_v63  ;;  %v7301_v1 = vand.u32 4294901760, %v7295_v31 }
  0xc6   : > { %1064 = vmatmul.f32.gmra.mxu1 %v6589_v49 }
  0xc7   : > { %v7288_v40 = vadd.f32 %v811_v36, %v697_v56  ;;  %1390 = vmatmul.f32.gmra.mxu3 %v7241_v25  ;;  %10826 = vst [vmem:[#allocation86_spill] sm:$0xff] %v7298_v28  ;;  %v7303_v36 = vand.u32 4294901760, %v190_v19 }
  0xc8   : > { %1177 = vmatmul.f32.gmra.mxu2 %v7279_v58  ;;  %10827 = vst [vmem:[#allocation87_spill] sm:$0xff] %v7301_v1 }
  0xc9   : > { %10828 = vst [vmem:[#allocation88_spill] sm:$0xff] %v7303_v36  ;;  %v7314_v63 = vsub.f32 %v190_v19, %v7303_v36 }
  0xca   : > { %v380_v27 = vpop.f32.mrf.mxu0  ;;  %v585_v37 = vpop.f32.mrf.mxu1 }
  0xcb   : > { %v586_v38 = vadd.f32 %v585_v37, %v372_v23  ;;  %v701_v47 = vpop.f32.mrf.mxu2  ;;  %v817_v11 = vpop.f32.mrf.mxu3  ;;  %v1191_v23 = vsub.f32 %v7295_v31, %v7301_v1  ;;  %10829 = vst [vmem:[#allocation89_spill] sm:$0xff] %v7314_v63  ;;  %v193_v37 = vld [vmem:[%s6495_s8 + $0x98] sm:$0xff] }
  0xcd   : > { %v702_v56 = vadd.f32 %v701_v47, %v586_v38  ;;  %975 = vmatmul.f32.gmra.mxu0 %v6694_v22  ;;  %v7317_v61 = vand.u32 4294901760, %v1191_v23 }
  0xce   : > { %1068 = vmatmul.f32.gmra.mxu1 %v6644_v51 }
  0xcf   : > { %v7307_v53 = vadd.f32 %v817_v11, %v702_v56  ;;  %1394 = vmatmul.f32.gmra.mxu3 %v7265_v21  ;;  %10830 = vst [vmem:[#allocation90_spill] sm:$0xff] %v7317_v61  ;;  %v7320_v11 = vand.u32 4294901760, %v7314_v63  ;;  %v7322_v56 = vand.u32 4294901760, %v193_v37 }
  0xd0   : > { %1185 = vmatmul.f32.gmra.mxu2 %v7298_v28 }
  0xd1   : > { %10831 = vst [vmem:[#allocation91_spill] sm:$0xff] %v7320_v11  ;;  %v7333_v23 = vsub.f32 %v193_v37, %v7322_v56 }
  0xd2   : > { %v388_v58 = vpop.f32.mrf.mxu0  ;;  %v589_v38 = vpop.f32.mrf.mxu1  ;;  %10832 = vst [vmem:[#allocation92_spill] sm:$0xff] %v7322_v56 }
  0xd3   : > { %v590_v47 = vadd.f32 %v589_v38, %v380_v27  ;;  %v706_v39 = vpop.f32.mrf.mxu2  ;;  %v823_v2 = vpop.f32.mrf.mxu3  ;;  %v1199_v27 = vsub.f32 %v7314_v63, %v7320_v11  ;;  %10833 = vst [vmem:[#allocation93_spill] sm:$0xff] %v7333_v23  ;;  %v196_v38 = vld [vmem:[%s6495_s8 + $0xb0] sm:$0xff] }
  0xd5   : > { %v707_v28 = vadd.f32 %v706_v39, %v590_v47  ;;  %979 = vmatmul.f32.gmra.mxu0 %v6749_v16  ;;  %v7336_v57 = vand.u32 4294901760, %v1199_v27 }
  0xd6   : > { %1072 = vmatmul.f32.gmra.mxu1 %v6694_v22 }
  0xd7   : > { %v7326_v19 = vadd.f32 %v823_v2, %v707_v28  ;;  %1398 = vmatmul.f32.gmra.mxu3 %v7284_v55  ;;  %10834 = vst [vmem:[#allocation94_spill] sm:$0xff] %v7336_v57  ;;  %v7339_v2 = vand.u32 4294901760, %v7333_v23  ;;  %v7341_v28 = vand.u32 4294901760, %v196_v38 }
  0xd8   : > { %1193 = vmatmul.f32.gmra.mxu2 %v7317_v61 }
  0xd9   : > { %10835 = vst [vmem:[#allocation95_spill] sm:$0xff] %v7339_v2  ;;  %v7352_v27 = vsub.f32 %v196_v38, %v7341_v28 }
  0xda   : > { %v396_v14 = vpop.f32.mrf.mxu0  ;;  %v593_v39 = vpop.f32.mrf.mxu1  ;;  %10836 = vst [vmem:[#allocation96_spill] sm:$0xff] %v7341_v28 }
  0xdb   : > { %v594_v47 = vadd.f32 %v593_v39, %v388_v58  ;;  %v711_v46 = vpop.f32.mrf.mxu2  ;;  %v829_v12 = vpop.f32.mrf.mxu3  ;;  %v1207_v58 = vsub.f32 %v7333_v23, %v7339_v2  ;;  %10837 = vst [vmem:[#allocation97_spill] sm:$0xff] %v7352_v27  ;;  %v199_v39 = vld [vmem:[%s6495_s8 + $0xc8] sm:$0xff] }
  0xdd   : > { %v712_v61 = vadd.f32 %v711_v46, %v594_v47  ;;  %983 = vmatmul.f32.gmra.mxu0 %v6779_v20  ;;  %v7355_v42 = vand.u32 4294901760, %v1207_v58 }
  0xde   : > { %1076 = vmatmul.f32.gmra.mxu1 %v6749_v16 }
  0xdf   : > { %v7345_v37 = vadd.f32 %v829_v12, %v712_v61  ;;  %1402 = vmatmul.f32.gmra.mxu3 %v7303_v36  ;;  %10838 = vst [vmem:[#allocation98_spill] sm:$0xff] %v7355_v42  ;;  %v7358_v12 = vand.u32 4294901760, %v7352_v27  ;;  %v7360_v61 = vand.u32 4294901760, %v199_v39 }
  0xe0   : > { %1201 = vmatmul.f32.gmra.mxu2 %v7336_v57 }
  0xe1   : > { %10839 = vst [vmem:[#allocation99_spill] sm:$0xff] %v7358_v12  ;;  %v7371_v58 = vsub.f32 %v199_v39, %v7360_v61 }
  0xe2   : > { %v404_v30 = vpop.f32.mrf.mxu0  ;;  %10840 = vst [vmem:[#allocation100_spill] sm:$0xff] %v7360_v61 }
  0xe3   : > { %v597_v46 = vpop.f32.mrf.mxu1  ;;  %v716_v29 = vpop.f32.mrf.mxu2  ;;  %10841 = vst [vmem:[#allocation101_spill] sm:$0xff] %v7371_v58 }
  0xe4   : > { %v598_v47 = vadd.f32 %v597_v46, %v396_v14  ;;  %v835_v9 = vpop.f32.mrf.mxu3  ;;  %v1215_v14 = vsub.f32 %v7352_v27, %v7358_v12  ;;  %v202_v46 = vld [vmem:[%s6495_s8 + $0xe0] sm:$0xff] }
  0xe5   : > { %987 = vmatmul.f32.gmra.mxu0 %v6829_v43 }
  0xe6   : > { %v717_v57 = vadd.f32 %v716_v29, %v598_v47  ;;  %1080 = vmatmul.f32.gmra.mxu1 %v6779_v20  ;;  %v7374_v20 = vand.u32 4294901760, %v1215_v14 }
  0xe7   : > { %1406 = vmatmul.f32.gmra.mxu3 %v7322_v56 }
  0xe8   : > { %v7364_v38 = vadd.f32 %v835_v9, %v717_v57  ;;  %1209 = vmatmul.f32.gmra.mxu2 %v7355_v42  ;;  %10842 = vst [vmem:[#allocation102_spill] sm:$0xff] %v7374_v20  ;;  %v7377_v9 = vand.u32 4294901760, %v7371_v58  ;;  %v7379_v57 = vand.u32 4294901760, %v202_v46 }
  0xea   : > { %v412_v50 = vpop.f32.mrf.mxu0  ;;  %10843 = vst [vmem:[#allocation103_spill] sm:$0xff] %v7377_v9  ;;  %v7390_v14 = vsub.f32 %v202_v46, %v7379_v57 }
  0xeb   : > { %v601_v29 = vpop.f32.mrf.mxu1  ;;  %v721_v8 = vpop.f32.mrf.mxu2  ;;  %10844 = vst [vmem:[#allocation104_spill] sm:$0xff] %v7379_v57 }
  0xec   : > { %v602_v47 = vadd.f32 %v601_v29, %v404_v30  ;;  %v841_v3 = vpop.f32.mrf.mxu3  ;;  %v1223_v30 = vsub.f32 %v7371_v58, %v7377_v9  ;;  %10845 = vst [vmem:[#allocation105_spill] sm:$0xff] %v7390_v14  ;;  %v205_v29 = vld [vmem:[%s6495_s8 + $0xf8] sm:$0xff] }
  0xed   : > { %991 = vmatmul.f32.gmra.mxu0 %v6870_v62 }
  0xee   : > { %v722_v42 = vadd.f32 %v721_v8, %v602_v47  ;;  %1084 = vmatmul.f32.gmra.mxu1 %v6829_v43  ;;  %v7393_v43 = vand.u32 4294901760, %v1223_v30 }
  0xef   : > { %1410 = vmatmul.f32.gmra.mxu3 %v7341_v28 }
  0xf0   : > { %v7383_v39 = vadd.f32 %v841_v3, %v722_v42  ;;  %1217 = vmatmul.f32.gmra.mxu2 %v7374_v20  ;;  %10846 = vst [vmem:[#allocation106_spill] sm:$0xff] %v7393_v43  ;;  %v7396_v3 = vand.u32 4294901760, %v7390_v14  ;;  %v7398_v42 = vand.u32 4294901760, %v205_v29 }
  0xf2   : > { %v420_v16 = vpop.f32.mrf.mxu0  ;;  %10847 = vst [vmem:[#allocation107_spill] sm:$0xff] %v7396_v3  ;;  %v7409_v30 = vsub.f32 %v205_v29, %v7398_v42 }
  0xf3   : > { %v605_v8 = vpop.f32.mrf.mxu1  ;;  %v726_v10 = vpop.f32.mrf.mxu2  ;;  %10848 = vst [vmem:[#allocation108_spill] sm:$0xff] %v7398_v42 }
  0xf4   : > { %v606_v47 = vadd.f32 %v605_v8, %v412_v50  ;;  %v847_v22 = vpop.f32.mrf.mxu3  ;;  %v1231_v50 = vsub.f32 %v7390_v14, %v7396_v3  ;;  %10849 = vst [vmem:[#allocation109_spill] sm:$0xff] %v7409_v30  ;;  %v208_v8 = vld [vmem:[%s6495_s8 + $0x110] sm:$0xff] }
  0xf5   : > { %995 = vmatmul.f32.gmra.mxu0 %v6902_v17 }
  0xf6   : > { %v727_v20 = vadd.f32 %v726_v10, %v606_v47  ;;  %1088 = vmatmul.f32.gmra.mxu1 %v6870_v62  ;;  %v7412_v62 = vand.u32 4294901760, %v1231_v50 }
  0xf7   : > { %1414 = vmatmul.f32.gmra.mxu3 %v7360_v61 }
  0xf8   : > { %v7402_v46 = vadd.f32 %v847_v22, %v727_v20  ;;  %1225 = vmatmul.f32.gmra.mxu2 %v7393_v43  ;;  %10850 = vst [vmem:[#allocation110_spill] sm:$0xff] %v7412_v62  ;;  %v7415_v22 = vand.u32 4294901760, %v7409_v30  ;;  %v7417_v20 = vand.u32 4294901760, %v208_v8 }
  0xfa   : > { %v428_v45 = vpop.f32.mrf.mxu0  ;;  %10851 = vst [vmem:[#allocation111_spill] sm:$0xff] %v7415_v22  ;;  %v7428_v50 = vsub.f32 %v208_v8, %v7417_v20 }
  0xfb   : > { %v609_v10 = vpop.f32.mrf.mxu1  ;;  %v731_v51 = vpop.f32.mrf.mxu2  ;;  %10852 = vst [vmem:[#allocation112_spill] sm:$0xff] %v7417_v20 }
  0xfc   : > { %v610_v47 = vadd.f32 %v609_v10, %v420_v16  ;;  %v853_v18 = vpop.f32.mrf.mxu3  ;;  %v1239_v16 = vsub.f32 %v7409_v30, %v7415_v22  ;;  %10853 = vst [vmem:[#allocation113_spill] sm:$0xff] %v7428_v50  ;;  %v211_v10 = vld [vmem:[%s6495_s8 + $0x128] sm:$0xff] }
  0xfd   : > { %999 = vmatmul.f32.gmra.mxu0 %v6948_v52 }
  0xfe   : > { %v732_v43 = vadd.f32 %v731_v51, %v610_v47  ;;  %1092 = vmatmul.f32.gmra.mxu1 %v6902_v17  ;;  %v7431_v17 = vand.u32 4294901760, %v1239_v16 }
  0xff   : > { %1418 = vmatmul.f32.gmra.mxu3 %v7379_v57 }
 0x100   : > { %v7421_v29 = vadd.f32 %v853_v18, %v732_v43  ;;  %1233 = vmatmul.f32.gmra.mxu2 %v7412_v62  ;;  %10854 = vst [vmem:[#allocation114_spill] sm:$0xff] %v7431_v17  ;;  %v7434_v18 = vand.u32 4294901760, %v7428_v50  ;;  %v7436_v43 = vand.u32 4294901760, %v211_v10 }
 0x102   : > { %v436_v49 = vpop.f32.mrf.mxu0  ;;  %10855 = vst [vmem:[#allocation115_spill] sm:$0xff] %v7434_v18  ;;  %v7447_v16 = vsub.f32 %v211_v10, %v7436_v43 }
 0x103   : > { %v613_v51 = vpop.f32.mrf.mxu1  ;;  %v736_v0 = vpop.f32.mrf.mxu2  ;;  %10856 = vst [vmem:[#allocation116_spill] sm:$0xff] %v7436_v43 }
 0x104   : > { %v614_v47 = vadd.f32 %v613_v51, %v428_v45  ;;  %v859_v6 = vpop.f32.mrf.mxu3  ;;  %v1247_v45 = vsub.f32 %v7428_v50, %v7434_v18  ;;  %10857 = vst [vmem:[#allocation117_spill] sm:$0xff] %v7447_v16  ;;  %v214_v51 = vld [vmem:[%s6495_s8 + $0x140] sm:$0xff] }
 0x105   : > { %1003 = vmatmul.f32.gmra.mxu0 %v6985_v34 }
 0x106   : > { %v737_v62 = vadd.f32 %v736_v0, %v614_v47  ;;  %1096 = vmatmul.f32.gmra.mxu1 %v6948_v52  ;;  %v7450_v52 = vand.u32 4294901760, %v1247_v45 }
 0x107   : > { %1422 = vmatmul.f32.gmra.mxu3 %v7398_v42 }
 0x108   : > { %v7440_v8 = vadd.f32 %v859_v6, %v737_v62  ;;  %1241 = vmatmul.f32.gmra.mxu2 %v7431_v17  ;;  %10858 = vst [vmem:[#allocation118_spill] sm:$0xff] %v7450_v52  ;;  %v7453_v6 = vand.u32 4294901760, %v7447_v16  ;;  %v7455_v62 = vand.u32 4294901760, %v214_v51 }
 0x10a   : > { %v444_v22 = vpop.f32.mrf.mxu0  ;;  %10859 = vst [vmem:[#allocation119_spill] sm:$0xff] %v7453_v6  ;;  %v7466_v45 = vsub.f32 %v214_v51, %v7455_v62 }
 0x10b   : > { %v617_v0 = vpop.f32.mrf.mxu1  ;;  %v741_v3 = vpop.f32.mrf.mxu2  ;;  %10860 = vst [vmem:[#allocation120_spill] sm:$0xff] %v7455_v62 }
 0x10c   : > { %v618_v47 = vadd.f32 %v617_v0, %v436_v49  ;;  %v865_v30 = vpop.f32.mrf.mxu3  ;;  %v1255_v49 = vsub.f32 %v7447_v16, %v7453_v6  ;;  %10861 = vst [vmem:[#allocation121_spill] sm:$0xff] %v7466_v45  ;;  %v217_v0 = vld [vmem:[%s6495_s8 + $0x158] sm:$0xff] }
 0x10d   : > { %1007 = vmatmul.f32.gmra.mxu0 %v7013_v5 }
 0x10e   : > { %v742_v17 = vadd.f32 %v741_v3, %v618_v47  ;;  %1100 = vmatmul.f32.gmra.mxu1 %v6985_v34  ;;  %v7469_v34 = vand.u32 4294901760, %v1255_v49  ;;  %v316_v49 = vld [vmem:[%s10328_s1 + $0x2f0] sm:$0xff] }
 0x10f   : > { %1426 = vmatmul.f32.gmra.mxu3 %v7417_v20 }
 0x110   : > { %v7459_v10 = vadd.f32 %v865_v30, %v742_v17  ;;  %1249 = vmatmul.f32.gmra.mxu2 %v7450_v52  ;;  %10862 = vst [vmem:[#allocation122_spill] sm:$0xff] %v7469_v34  ;;  %v7472_v17 = vand.u32 4294901760, %v7466_v45  ;;  %v7474_v30 = vand.u32 4294901760, %v217_v0 }
 0x112   : > { %v452_v18 = vpop.f32.mrf.mxu0  ;;  %10863 = vst [vmem:[#allocation123_spill] sm:$0xff] %v7472_v17 }
 0x113   : > { %v621_v50 = vpop.f32.mrf.mxu1  ;;  %v746_v47 = vpop.f32.mrf.mxu2  ;;  %10864 = vst [vmem:[#allocation124_spill] sm:$0xff] %v7474_v30 }
 0x114   : > { %v622_v3 = vadd.f32 %v621_v50, %v444_v22  ;;  %v871_v42 = vpop.f32.mrf.mxu3  ;;  %v1263_v22 = vsub.f32 %v7466_v45, %v7472_v17  ;;  %v7485_v50 = vsub.f32 %v217_v0, %v7474_v30 }
 0x115   : > { %1011 = vmatmul.f32.gmra.mxu0 %v7056_v54 }
 0x116   : > { %v747_v52 = vadd.f32 %v746_v47, %v622_v3  ;;  %1104 = vmatmul.f32.gmra.mxu1 %v7013_v5  ;;  %10865 = vst [vmem:[#allocation125_spill] sm:$0xff] %v7485_v50  ;;  %v220_v3 = vld [vmem:[%s6495_s8 + $0x170] sm:$0xff]  ;;  %v7491_v47 = vand.u32 4294901760, %v316_v49  ;;  %v7498_v0 = vand.u32 4294901760, %v1263_v22  ;;  %v7501_v17 = vand.u32 4294901760, %v7485_v50 }
 0x117   : > { %1430 = vmatmul.f32.gmra.mxu3 %v7436_v43  ;;  %v7503_v45 = vand.u32 4294901760, %v220_v3 }
 0x118   : > { %v7478_v51 = vadd.f32 %v871_v42, %v747_v52  ;;  %1257 = vmatmul.f32.gmra.mxu2 %v7469_v34  ;;  %10866 = vst [vmem:[#allocation126_spill] sm:$0xff] %v7491_v47  ;;  %v7494_v34 = vsub.f32 %v316_v49, %v7491_v47  ;;  %1931 = vmatpush.msrb.mxu0 %v7491_v47 }
 0x119   : > { %2382 = vmatpush.msrb.mxu3 %v7491_v47  ;;  %10867 = vst [vmem:[#allocation127_spill] sm:$0xff] %v7498_v0  ;;  %v1271_v22 = vsub.f32 %v7485_v50, %v7501_v17 }
 0x11a   : > { %v460_v5 = vpop.f32.mrf.mxu0  ;;  %10868 = vst [vmem:[#allocation128_spill] sm:$0xff] %v7501_v17  ;;  %2254 = vmatpush.msrb.mxu2 %v7494_v34  ;;  %v10479_v49 = vand.u32 4294901760, %v7494_v34 }
 0x11b   : > { %v625_v52 = vpop.f32.mrf.mxu1  ;;  %v751_v6 = vpop.f32.mrf.mxu2  ;;  %10869 = vst [vmem:[#allocation129_spill] sm:$0xff] %v7503_v45 }
 0x11c   : > { %v626_v42 = vadd.f32 %v625_v52, %v452_v18  ;;  %v877_v43 = vpop.f32.mrf.mxu3  ;;  %v7516_v52 = vsub.f32 %v220_v3, %v7503_v45  ;;  %v7531_v3 = vand.u32 4294901760, %v1271_v22 }
 0x11d   : > { %1015 = vmatmul.f32.gmra.mxu0 %v7088_v60 }
 0x11e   : > { %v752_v16 = vadd.f32 %v751_v6, %v626_v42  ;;  %1108 = vmatmul.f32.gmra.mxu1 %v7056_v54  ;;  %10871 = vst [vmem:[#allocation131_spill] sm:$0xff] %v7516_v52  ;;  %v314_v6 = vld [vmem:[%s10328_s1 + $0x2e0] sm:$0xff]  ;;  %v7534_v50 = vand.u32 4294901760, %v7516_v52 }
 0x11f   : > { %1434 = vmatmul.f32.gmra.mxu3 %v7455_v62  ;;  %10872 = vst [vmem:[#allocation132_spill] sm:$0xff] %v7531_v3 }
 0x120   : > { %v7508_v18 = vadd.f32 %v877_v43, %v752_v16  ;;  %1265 = vmatmul.f32.gmra.mxu2 %v7498_v0  ;;  %v2094_v43 = vsub.f32 %v7494_v34, %v10479_v49  ;;  %v7524_v16 = vand.u32 4294901760, %v314_v6  ;;  %10873 = vst [vmem:[#allocation133_spill] sm:$0xff] %v7534_v50  ;;  %v1279_v22 = vsub.f32 %v7516_v52, %v7534_v50 }
 0x122   : > { %10870 = vst [vmem:[#allocation130_spill] sm:$0xff] %v7508_v18  ;;  %v468_v42 = vpop.f32.mrf.mxu0  ;;  %v2095_v18 = vand.u32 4294901760, %v2094_v43  ;;  %v7527_v17 = vsub.f32 %v314_v6, %v7524_v16  ;;  %1933 = vmatpush.msrb.mxu0 %v7524_v16  ;;  %2384 = vmatpush.msrb.mxu3 %v7524_v16  ;;  %v7559_v50 = vand.u32 4294901760, %v1279_v22  ;;  %v310_v22 = vld [vmem:[%s10328_s1 + $0x2c0] sm:$0xff] }
 0x123   : > { %v629_v54 = vpop.f32.mrf.mxu1  ;;  %v756_v0 = vpop.f32.mrf.mxu2 }
 0x124   : > { %v630_v62 = vadd.f32 %v629_v54, %v460_v5  ;;  %v883_v47 = vpop.f32.mrf.mxu3  ;;  %2096 = vmatpush.msrb.mxu1 %v2095_v18  ;;  %2257 = vmatpush.msrb.mxu2 %v7527_v17  ;;  %v10489_v5 = vand.u32 4294901760, %v7527_v17  ;;  %10874 = vst [vmem:[#allocation134_spill] sm:$0xff] %v7559_v50 }
 0x125   : > { %1019 = vmatmul.f32.gmra.mxu0 %v7126_v59 }
 0x126   : > { %v757_v49 = vadd.f32 %v756_v0, %v630_v62  ;;  %1112 = vmatmul.f32.gmra.mxu1 %v7088_v60  ;;  %v312_v62 = vld [vmem:[%s10328_s1 + $0x2d0] sm:$0xff]  ;;  %v2100_v0 = vsub.f32 %v7527_v17, %v10489_v5 }
 0x127   : > { %1438 = vmatmul.f32.gmra.mxu3 %v7474_v30  ;;  %v7552_v18 = vand.u32 4294901760, %v312_v62 }
 0x128   : > { %v7539_v54 = vadd.f32 %v883_v47, %v757_v49  ;;  %1273 = vmatmul.f32.gmra.mxu2 %v7531_v3  ;;  %v2101_v30 = vand.u32 4294901760, %v2100_v0 }
 0x129   : > { %v7555_v3 = vsub.f32 %v312_v62, %v7552_v18  ;;  %1935 = vmatpush.msrb.mxu0 %v7552_v18  ;;  %2386 = vmatpush.msrb.mxu3 %v7552_v18 }
 0x12a   : > { %v476_v47 = vpop.f32.mrf.mxu0  ;;  %2102 = vmatpush.msrb.mxu1 %v2101_v30 }
 0x12b   : > { %v633_v49 = vpop.f32.mrf.mxu1  ;;  %v761_v43 = vpop.f32.mrf.mxu2  ;;  %2260 = vmatpush.msrb.mxu2 %v7555_v3  ;;  %v10493_v62 = vand.u32 4294901760, %v7555_v3 }
 0x12c   : > { %v634_v6 = vadd.f32 %v633_v49, %v468_v42  ;;  %v889_v60 = vpop.f32.mrf.mxu3  ;;  %v7575_v49 = vand.u32 4294901760, %v310_v22 }
 0x12d   : > { %1023 = vmatmul.f32.gmra.mxu0 %v7155_v15  ;;  %v2106_v0 = vsub.f32 %v7555_v3, %v10493_v62 }
 0x12e   : > { %v762_v52 = vadd.f32 %v761_v43, %v634_v6  ;;  %1116 = vmatmul.f32.gmra.mxu1 %v7126_v59  ;;  %v7578_v59 = vsub.f32 %v310_v22, %v7575_v49  ;;  %1937 = vmatpush.msrb.mxu0 %v7575_v49  ;;  %v308_v22 = vld [vmem:[%s10328_s1 + $0x2b0] sm:$0xff] }
 0x12f   : > { %1442 = vmatmul.f32.gmra.mxu3 %v7503_v45  ;;  %v2107_v5 = vand.u32 4294901760, %v2106_v0 }
 0x130   : > { %v7564_v42 = vadd.f32 %v889_v60, %v762_v52  ;;  %1281 = vmatmul.f32.gmra.mxu2 %v7559_v50  ;;  %2388 = vmatpush.msrb.mxu3 %v7575_v49 }
 0x131   : > { %2108 = vmatpush.msrb.mxu1 %v2107_v5  ;;  %2263 = vmatpush.msrb.mxu2 %v7578_v59 }
 0x132   : > { %v964_v6 = vpop.f32.mrf.mxu0 }
 0x133   : > { %v637_v30 = vpop.f32.mrf.mxu1  ;;  %v766_v52 = vpop.f32.mrf.mxu2  ;;  %v965_v0 = vadd.f32 %v964_v6, %v7269_v48 }
 0x134   : > { %v638_v60 = vadd.f32 %v637_v30, %v476_v47  ;;  %v895_v43 = vpop.f32.mrf.mxu3  ;;  %v10499_v47 = vand.u32 4294901760, %v7578_v59  ;;  %v7597_v30 = vand.u32 4294901760, %v308_v22 }
 0x135   : > { %1496 = vmatmul.f32.vlgmr.msra.gmra.mxu0 %v7200_v13 }
 0x136   : > { %v767_v50 = vadd.f32 %v766_v52, %v638_v60  ;;  %1120 = vmatmul.f32.gmra.mxu1 %v7155_v15  ;;  %v2112_v5 = vsub.f32 %v7578_v59, %v10499_v47  ;;  %1939 = vmatpush.msrb.mxu0 %v7597_v30 }
 0x137   : > { %1866 = vmatmul.f32.vlgmr.msra.gmra.mxu3 %v7187_v24 }
 0x138   : > { %v7585_v62 = vadd.f32 %v895_v43, %v767_v50  ;;  %1769 = vmatmul.f32.vlgmr.msra.gmra.mxu2 %v7187_v24  ;;  %v2113_v15 = vand.u32 4294901760, %v2112_v5  ;;  %v7600_v24 = vsub.f32 %v308_v22, %v7597_v30  ;;  %2390 = vmatpush.msrb.mxu3 %v7597_v30  ;;  %v306_v22 = vld [vmem:[%s10328_s1 + $0x2a0] sm:$0xff] }
 0x13a   : > { %v968_v50 = vpop.f32.mrf.mxu0  ;;  %2114 = vmatpush.msrb.mxu1 %v2113_v15  ;;  %2266 = vmatpush.msrb.mxu2 %v7600_v24 }
 0x13b   : > { %v1061_v60 = vpop.f32.mrf.mxu1  ;;  %v1162_v43 = vpop.f32.mrf.mxu2  ;;  %v969_v5 = vadd.f32 %v968_v50, %v7288_v40 }
 0x13c   : > { %v1062_v52 = vadd.f32 %v1061_v60, %v965_v0  ;;  %v1383_v13 = vpop.f32.mrf.mxu3  ;;  %v10503_v0 = vand.u32 4294901760, %v7600_v24  ;;  %v7619_v60 = vand.u32 4294901760, %v306_v22 }
 0x13d   : > { %1501 = vmatmul.f32.gmra.mxu0 %v7227_v33 }
 0x13e   : > { %v1163_v48 = vadd.f32 %v1162_v43, %v1062_v52  ;;  %1610 = vmatmul.f32.vlgmr.msra.gmra.mxu1 %v7212_v26  ;;  %v2118_v15 = vsub.f32 %v7600_v24, %v10503_v0  ;;  %1941 = vmatpush.msrb.mxu0 %v7619_v60 }
 0x13f   : > { %1870 = vmatmul.f32.gmra.mxu3 %v7214_v32 }
 0x140   : > { %v7607_v6 = vadd.f32 %v1383_v13, %v1163_v48  ;;  %1773 = vmatmul.f32.gmra.mxu2 %v7214_v32  ;;  %v2119_v33 = vand.u32 4294901760, %v2118_v15  ;;  %v7622_v32 = vsub.f32 %v306_v22, %v7619_v60  ;;  %2392 = vmatpush.msrb.mxu3 %v7619_v60  ;;  %v304_v22 = vld [vmem:[%s10328_s1 + $0x290] sm:$0xff] }
 0x142   : > { %v972_v13 = vpop.f32.mrf.mxu0  ;;  %2120 = vmatpush.msrb.mxu1 %v2119_v33  ;;  %2269 = vmatpush.msrb.mxu2 %v7622_v32 }
 0x143   : > { %v1065_v52 = vpop.f32.mrf.mxu1  ;;  %v1170_v48 = vpop.f32.mrf.mxu2  ;;  %v973_v15 = vadd.f32 %v972_v13, %v7307_v53 }
 0x144   : > { %v1066_v43 = vadd.f32 %v1065_v52, %v969_v5  ;;  %v1387_v47 = vpop.f32.mrf.mxu3  ;;  %v10507_v5 = vand.u32 4294901760, %v7622_v32  ;;  %v7641_v52 = vand.u32 4294901760, %v304_v22 }
 0x145   : > { %1506 = vmatmul.f32.gmra.mxu0 %v7254_v44 }
 0x146   : > { %v1171_v40 = vadd.f32 %v1170_v48, %v1066_v43  ;;  %1616 = vmatmul.f32.gmra.mxu1 %v7239_v7  ;;  %v2124_v33 = vsub.f32 %v7622_v32, %v10507_v5  ;;  %1943 = vmatpush.msrb.mxu0 %v7641_v52 }
 0x147   : > { %1874 = vmatmul.f32.gmra.mxu3 %v7241_v25 }
 0x148   : > { %v7629_v50 = vadd.f32 %v1387_v47, %v1171_v40  ;;  %1777 = vmatmul.f32.gmra.mxu2 %v7241_v25  ;;  %v2125_v44 = vand.u32 4294901760, %v2124_v33  ;;  %v7644_v25 = vsub.f32 %v304_v22, %v7641_v52  ;;  %2394 = vmatpush.msrb.mxu3 %v7641_v52  ;;  %v302_v22 = vld [vmem:[%s10328_s1 + $0x280] sm:$0xff] }
 0x14a   : > { %v976_v47 = vpop.f32.mrf.mxu0  ;;  %2126 = vmatpush.msrb.mxu1 %v2125_v44  ;;  %2272 = vmatpush.msrb.mxu2 %v7644_v25 }
 0x14b   : > { %v1069_v43 = vpop.f32.mrf.mxu1  ;;  %v1178_v40 = vpop.f32.mrf.mxu2  ;;  %v977_v33 = vadd.f32 %v976_v47, %v7326_v19 }
 0x14c   : > { %v1070_v48 = vadd.f32 %v1069_v43, %v973_v15  ;;  %v1391_v0 = vpop.f32.mrf.mxu3  ;;  %v10511_v15 = vand.u32 4294901760, %v7644_v25  ;;  %v7663_v43 = vand.u32 4294901760, %v302_v22 }
 0x14d   : > { %1511 = vmatmul.f32.gmra.mxu0 %v7276_v41 }
 0x14e   : > { %v1179_v53 = vadd.f32 %v1178_v40, %v1070_v48  ;;  %1622 = vmatmul.f32.gmra.mxu1 %v7263_v35  ;;  %v2130_v44 = vsub.f32 %v7644_v25, %v10511_v15  ;;  %1945 = vmatpush.msrb.mxu0 %v7663_v43 }
 0x14f   : > { %1878 = vmatmul.f32.gmra.mxu3 %v7265_v21 }
 0x150   : > { %v7651_v13 = vadd.f32 %v1391_v0, %v1179_v53  ;;  %1781 = vmatmul.f32.gmra.mxu2 %v7265_v21  ;;  %v2131_v41 = vand.u32 4294901760, %v2130_v44  ;;  %v7666_v21 = vsub.f32 %v302_v22, %v7663_v43  ;;  %2396 = vmatpush.msrb.mxu3 %v7663_v43  ;;  %v300_v22 = vld [vmem:[%s10328_s1 + $0x270] sm:$0xff] }
 0x152   : > { %v980_v0 = vpop.f32.mrf.mxu0  ;;  %2132 = vmatpush.msrb.mxu1 %v2131_v41  ;;  %2275 = vmatpush.msrb.mxu2 %v7666_v21 }
 0x153   : > { %v1073_v48 = vpop.f32.mrf.mxu1  ;;  %v1186_v53 = vpop.f32.mrf.mxu2  ;;  %v981_v44 = vadd.f32 %v980_v0, %v7345_v37 }
 0x154   : > { %v1074_v40 = vadd.f32 %v1073_v48, %v977_v33  ;;  %v1395_v5 = vpop.f32.mrf.mxu3  ;;  %v10515_v33 = vand.u32 4294901760, %v7666_v21  ;;  %v7685_v48 = vand.u32 4294901760, %v300_v22 }
 0x155   : > { %1516 = vmatmul.f32.gmra.mxu0 %v7295_v31 }
 0x156   : > { %v1187_v19 = vadd.f32 %v1186_v53, %v1074_v40  ;;  %1628 = vmatmul.f32.gmra.mxu1 %v7282_v4  ;;  %v2136_v41 = vsub.f32 %v7666_v21, %v10515_v33  ;;  %1947 = vmatpush.msrb.mxu0 %v7685_v48 }
 0x157   : > { %1882 = vmatmul.f32.gmra.mxu3 %v7284_v55 }
 0x158   : > { %v7673_v47 = vadd.f32 %v1395_v5, %v1187_v19  ;;  %1785 = vmatmul.f32.gmra.mxu2 %v7284_v55  ;;  %v2137_v31 = vand.u32 4294901760, %v2136_v41  ;;  %v7688_v55 = vsub.f32 %v300_v22, %v7685_v48  ;;  %2398 = vmatpush.msrb.mxu3 %v7685_v48  ;;  %v298_v22 = vld [vmem:[%s10328_s1 + $0x260] sm:$0xff] }
 0x15a   : > { %v984_v5 = vpop.f32.mrf.mxu0  ;;  %2138 = vmatpush.msrb.mxu1 %v2137_v31  ;;  %2278 = vmatpush.msrb.mxu2 %v7688_v55 }
 0x15b   : > { %v1077_v40 = vpop.f32.mrf.mxu1  ;;  %v1194_v19 = vpop.f32.mrf.mxu2  ;;  %v985_v41 = vadd.f32 %v984_v5, %v7364_v38 }
 0x15c   : > { %v1078_v53 = vadd.f32 %v1077_v40, %v981_v44  ;;  %v1399_v15 = vpop.f32.mrf.mxu3  ;;  %v10519_v44 = vand.u32 4294901760, %v7688_v55  ;;  %v7707_v40 = vand.u32 4294901760, %v298_v22 }
 0x15d   : > { %1521 = vmatmul.f32.gmra.mxu0 %v7314_v63 }
 0x15e   : > { %v1195_v37 = vadd.f32 %v1194_v19, %v1078_v53  ;;  %1634 = vmatmul.f32.gmra.mxu1 %v7301_v1  ;;  %v2142_v31 = vsub.f32 %v7688_v55, %v10519_v44  ;;  %1949 = vmatpush.msrb.mxu0 %v7707_v40  ;;  %v10887_v1 = vand.u32 4294901760, %v7578_v59 }
 0x15f   : > { %1886 = vmatmul.f32.gmra.mxu3 %v7303_v36 }
 0x160   : > { %v7695_v0 = vadd.f32 %v1399_v15, %v1195_v37  ;;  %1789 = vmatmul.f32.gmra.mxu2 %v7303_v36  ;;  %v2143_v63 = vand.u32 4294901760, %v2142_v31  ;;  %v7710_v36 = vsub.f32 %v298_v22, %v7707_v40  ;;  %2400 = vmatpush.msrb.mxu3 %v7707_v40  ;;  %v296_v22 = vld [vmem:[%s10328_s1 + $0x250] sm:$0xff] }
 0x162   : > { %v988_v15 = vpop.f32.mrf.mxu0  ;;  %2144 = vmatpush.msrb.mxu1 %v2143_v63  ;;  %2281 = vmatpush.msrb.mxu2 %v7710_v36 }
 0x163   : > { %v1081_v53 = vpop.f32.mrf.mxu1  ;;  %v1202_v37 = vpop.f32.mrf.mxu2  ;;  %v989_v31 = vadd.f32 %v988_v15, %v7383_v39 }
 0x164   : > { %v1082_v19 = vadd.f32 %v1081_v53, %v985_v41  ;;  %v1403_v33 = vpop.f32.mrf.mxu3  ;;  %v10523_v41 = vand.u32 4294901760, %v7710_v36  ;;  %v7729_v53 = vand.u32 4294901760, %v296_v22 }
 0x165   : > { %1526 = vmatmul.f32.gmra.mxu0 %v7333_v23 }
 0x166   : > { %v1203_v38 = vadd.f32 %v1202_v37, %v1082_v19  ;;  %1640 = vmatmul.f32.gmra.mxu1 %v7320_v11  ;;  %v2148_v63 = vsub.f32 %v7710_v36, %v10523_v41  ;;  %1951 = vmatpush.msrb.mxu0 %v7729_v53  ;;  %v10882_v11 = vld [vmem:[#allocation115_spill] sm:$0xff] }
 0x167   : > { %1890 = vmatmul.f32.gmra.mxu3 %v7322_v56 }
 0x168   : > { %v7717_v5 = vadd.f32 %v1403_v33, %v1203_v38  ;;  %1793 = vmatmul.f32.gmra.mxu2 %v7322_v56  ;;  %v2149_v23 = vand.u32 4294901760, %v2148_v63  ;;  %v7732_v56 = vsub.f32 %v296_v22, %v7729_v53  ;;  %2402 = vmatpush.msrb.mxu3 %v7729_v53  ;;  %v294_v22 = vld [vmem:[%s10328_s1 + $0x240] sm:$0xff] }
 0x16a   : > { %v992_v33 = vpop.f32.mrf.mxu0  ;;  %2150 = vmatpush.msrb.mxu1 %v2149_v23  ;;  %2284 = vmatpush.msrb.mxu2 %v7732_v56 }
 0x16b   : > { %v1085_v19 = vpop.f32.mrf.mxu1  ;;  %v1210_v38 = vpop.f32.mrf.mxu2  ;;  %v993_v63 = vadd.f32 %v992_v33, %v7402_v46 }
 0x16c   : > { %v1086_v37 = vadd.f32 %v1085_v19, %v989_v31  ;;  %v1407_v44 = vpop.f32.mrf.mxu3  ;;  %v10527_v31 = vand.u32 4294901760, %v7732_v56  ;;  %v7751_v19 = vand.u32 4294901760, %v294_v22 }
 0x16d   : > { %1531 = vmatmul.f32.gmra.mxu0 %v7352_v27 }
 0x16e   : > { %v1211_v39 = vadd.f32 %v1210_v38, %v1086_v37  ;;  %1646 = vmatmul.f32.gmra.mxu1 %v7339_v2  ;;  %v2154_v23 = vsub.f32 %v7732_v56, %v10527_v31  ;;  %1953 = vmatpush.msrb.mxu0 %v7751_v19  ;;  %v10879_v2 = vld [vmem:[#allocation111_spill] sm:$0xff] }
 0x16f   : > { %1894 = vmatmul.f32.gmra.mxu3 %v7341_v28 }
 0x170   : > { %v7739_v15 = vadd.f32 %v1407_v44, %v1211_v39  ;;  %1797 = vmatmul.f32.gmra.mxu2 %v7341_v28  ;;  %v2155_v27 = vand.u32 4294901760, %v2154_v23  ;;  %v7754_v28 = vsub.f32 %v294_v22, %v7751_v19  ;;  %2404 = vmatpush.msrb.mxu3 %v7751_v19  ;;  %v292_v22 = vld [vmem:[%s10328_s1 + $0x230] sm:$0xff] }
 0x172   : > { %v996_v44 = vpop.f32.mrf.mxu0  ;;  %2156 = vmatpush.msrb.mxu1 %v2155_v27  ;;  %2287 = vmatpush.msrb.mxu2 %v7754_v28 }
 0x173   : > { %v1089_v37 = vpop.f32.mrf.mxu1  ;;  %v1218_v39 = vpop.f32.mrf.mxu2  ;;  %v997_v23 = vadd.f32 %v996_v44, %v7421_v29 }
 0x174   : > { %v1090_v38 = vadd.f32 %v1089_v37, %v993_v63  ;;  %v1411_v41 = vpop.f32.mrf.mxu3  ;;  %v10531_v63 = vand.u32 4294901760, %v7754_v28  ;;  %v7773_v37 = vand.u32 4294901760, %v292_v22 }
 0x175   : > { %1536 = vmatmul.f32.gmra.mxu0 %v7371_v58 }
 0x176   : > { %v1219_v46 = vadd.f32 %v1218_v39, %v1090_v38  ;;  %1652 = vmatmul.f32.gmra.mxu1 %v7358_v12  ;;  %v2160_v27 = vsub.f32 %v7754_v28, %v10531_v63  ;;  %1955 = vmatpush.msrb.mxu0 %v7773_v37 }
 0x177   : > { %1898 = vmatmul.f32.gmra.mxu3 %v7360_v61 }
 0x178   : > { %v7761_v33 = vadd.f32 %v1411_v41, %v1219_v46  ;;  %1801 = vmatmul.f32.gmra.mxu2 %v7360_v61  ;;  %v2161_v58 = vand.u32 4294901760, %v2160_v27  ;;  %v7776_v61 = vsub.f32 %v292_v22, %v7773_v37  ;;  %2406 = vmatpush.msrb.mxu3 %v7773_v37  ;;  %v290_v22 = vld [vmem:[%s10328_s1 + $0x220] sm:$0xff] }
 0x17a   : > { %v1000_v41 = vpop.f32.mrf.mxu0  ;;  %2162 = vmatpush.msrb.mxu1 %v2161_v58  ;;  %2290 = vmatpush.msrb.mxu2 %v7776_v61 }
 0x17b   : > { %v1093_v38 = vpop.f32.mrf.mxu1  ;;  %v1226_v46 = vpop.f32.mrf.mxu2  ;;  %v1001_v27 = vadd.f32 %v1000_v41, %v7440_v8  ;;  %v10875_v41 = vld [vmem:[#allocation109_spill] sm:$0xff] }
 0x17c   : > { %v1094_v39 = vadd.f32 %v1093_v38, %v997_v23  ;;  %v1415_v31 = vpop.f32.mrf.mxu3  ;;  %v10536_v23 = vand.u32 4294901760, %v7776_v61  ;;  %v7795_v38 = vand.u32 4294901760, %v290_v22 }
 0x17d   : > { %1541 = vmatmul.f32.gmra.mxu0 %v7390_v14 }
 0x17e   : > { %v1227_v29 = vadd.f32 %v1226_v46, %v1094_v39  ;;  %1658 = vmatmul.f32.gmra.mxu1 %v7377_v9  ;;  %v2166_v58 = vsub.f32 %v7776_v61, %v10536_v23  ;;  %1957 = vmatpush.msrb.mxu0 %v7795_v38  ;;  %v10876_v9 = vld [vmem:[#allocation107_spill] sm:$0xff] }
 0x17f   : > { %1902 = vmatmul.f32.gmra.mxu3 %v7379_v57 }
 0x180   : > { %v7783_v44 = vadd.f32 %v1415_v31, %v1227_v29  ;;  %1805 = vmatmul.f32.gmra.mxu2 %v7379_v57  ;;  %v2167_v14 = vand.u32 4294901760, %v2166_v58  ;;  %v7798_v57 = vsub.f32 %v290_v22, %v7795_v38  ;;  %2408 = vmatpush.msrb.mxu3 %v7795_v38  ;;  %v288_v22 = vld [vmem:[%s10328_s1 + $0x210] sm:$0xff] }
 0x182   : > { %v1004_v31 = vpop.f32.mrf.mxu0  ;;  %2168 = vmatpush.msrb.mxu1 %v2167_v14  ;;  %2293 = vmatpush.msrb.mxu2 %v7798_v57  ;;  %v10540_v58 = vand.u32 4294901760, %v7798_v57 }
 0x183   : > { %v1097_v39 = vpop.f32.mrf.mxu1  ;;  %v1234_v29 = vpop.f32.mrf.mxu2 }
 0x184   : > { %v1098_v46 = vadd.f32 %v1097_v39, %v1001_v27  ;;  %v1419_v63 = vpop.f32.mrf.mxu3  ;;  %v10877_v27 = vld [vmem:[#allocation108_spill] sm:$0xff]  ;;  %v1005_v39 = vadd.f32 %v1004_v31, %v7459_v10  ;;  %v2172_v14 = vsub.f32 %v7798_v57, %v10540_v58  ;;  %v10878_v31 = vld [vmem:[#allocation113_spill] sm:$0xff] }
 0x185   : > { %1546 = vmatmul.f32.gmra.mxu0 %v10875_v41 }
 0x186   : > { %v1235_v8 = vadd.f32 %v1234_v29, %v1098_v46  ;;  %1664 = vmatmul.f32.gmra.mxu1 %v10876_v9  ;;  %v7817_v46 = vand.u32 4294901760, %v288_v22  ;;  %v2173_v12 = vand.u32 4294901760, %v2172_v14 }
 0x187   : > { %1906 = vmatmul.f32.gmra.mxu3 %v10877_v27 }
 0x188   : > { %v7805_v23 = vadd.f32 %v1419_v63, %v1235_v8  ;;  %1809 = vmatmul.f32.gmra.mxu2 %v10877_v27  ;;  %v7820_v27 = vsub.f32 %v288_v22, %v7817_v46  ;;  %1959 = vmatpush.msrb.mxu0 %v7817_v46  ;;  %v286_v22 = vld [vmem:[%s10328_s1 + $0x200] sm:$0xff] }
 0x189   : > { %2410 = vmatpush.msrb.mxu3 %v7817_v46  ;;  %2174 = vmatpush.msrb.mxu1 %v2173_v12  ;;  %v7839_v14 = vand.u32 4294901760, %v286_v22 }
 0x18a   : > { %v1008_v63 = vpop.f32.mrf.mxu0  ;;  %2296 = vmatpush.msrb.mxu2 %v7820_v27 }
 0x18b   : > { %v1101_v29 = vpop.f32.mrf.mxu1  ;;  %v1242_v41 = vpop.f32.mrf.mxu2  ;;  %1961 = vmatpush.msrb.mxu0 %v7839_v14  ;;  %2412 = vmatpush.msrb.mxu3 %v7839_v14 }
 0x18c   : > { %v1102_v8 = vadd.f32 %v1101_v29, %v1005_v39  ;;  %v1423_v9 = vpop.f32.mrf.mxu3  ;;  %v10543_v39 = vand.u32 4294901760, %v7820_v27 }
 0x18d   : > { %1551 = vmatmul.f32.gmra.mxu0 %v10878_v31 }
 0x18e   : > { %v1243_v10 = vadd.f32 %v1242_v41, %v1102_v8  ;;  %1670 = vmatmul.f32.gmra.mxu1 %v10879_v2  ;;  %v1009_v41 = vadd.f32 %v1008_v63, %v7478_v51  ;;  %v2178_v12 = vsub.f32 %v7820_v27, %v10543_v39  ;;  %v10880_v51 = vand.u32 4294901760, %v7494_v34  ;;  %v10881_v39 = vld [vmem:[#allocation117_spill] sm:$0xff] }
 0x18f   : > { %1910 = vmatmul.f32.gmra.mxu3 %v7417_v20 }
 0x190   : > { %v7827_v58 = vadd.f32 %v1423_v9, %v1243_v10  ;;  %1813 = vmatmul.f32.gmra.mxu2 %v7417_v20  ;;  %v2179_v2 = vand.u32 4294901760, %v2178_v12  ;;  %v7842_v20 = vsub.f32 %v286_v22, %v7839_v14  ;;  %2513 = vmatpush.msra.mxu0 %v10880_v51  ;;  %v10883_v22 = vld [vmem:[#allocation116_spill] sm:$0xff]  ;;  %v10886_v51 = vand.u32 4294901760, %v7555_v3  ;;  %v10889_v3 = vld [vmem:[#allocation119_spill] sm:$0xff] }
 0x192   : > { %v1012_v9 = vpop.f32.mrf.mxu0  ;;  %2180 = vmatpush.msrb.mxu1 %v2179_v2  ;;  %2299 = vmatpush.msrb.mxu2 %v7842_v20  ;;  %v253_v2 = vld [vmem:[%s10328_s1 + $0xf8] sm:$0xff] }
 0x193   : > { %v1105_v29 = vpop.f32.mrf.mxu1  ;;  %v1250_v10 = vpop.f32.mrf.mxu2 }
 0x194   : > { %v1106_v8 = vadd.f32 %v1105_v29, %v1009_v41  ;;  %v1427_v31 = vpop.f32.mrf.mxu3  ;;  %v10546_v41 = vand.u32 4294901760, %v7842_v20  ;;  %v10884_v29 = vand.u32 4294901760, %v7527_v17 }
 0x195   : > { %1556 = vmatmul.f32.gmra.mxu0 %v10881_v39 }
 0x196   : > { %v1251_v63 = vadd.f32 %v1250_v10, %v1106_v8  ;;  %1676 = vmatmul.f32.gmra.mxu1 %v10882_v11  ;;  %2517 = vmatpush.msra.mxu0 %v10884_v29  ;;  %v2184_v34 = vsub.f32 %v7842_v20, %v10546_v41  ;;  %v10885_v8 = vld [vmem:[#allocation130_spill] sm:$0xff] }
 0x197   : > { %1914 = vmatmul.f32.gmra.mxu3 %v10883_v22  ;;  %v1013_v10 = vadd.f32 %v1012_v9, %v10885_v8  ;;  %v10888_v8 = vld [vmem:[#allocation121_spill] sm:$0xff] }
 0x198   : > { %v7852_v12 = vadd.f32 %v1427_v31, %v1251_v63  ;;  %1817 = vmatmul.f32.gmra.mxu2 %v10883_v22  ;;  %v7865_v31 = vand.u32 4294901760, %v253_v2  ;;  %2521 = vmatpush.msra.mxu0 %v10886_v51  ;;  %v2185_v29 = vand.u32 4294901760, %v2184_v34  ;;  %v176_v51 = vld [vmem:[%s6495_s8 + $0x10] sm:$0xff] }
 0x19a   : > { %v1016_v17 = vpop.f32.mrf.mxu0  ;;  %2737 = vmatpush.msra.mxu2 %v7865_v31  ;;  %v7871_v41 = vsub.f32 %v253_v2, %v7865_v31  ;;  %2525 = vmatpush.msra.mxu0 %v10887_v1  ;;  %v10892_v2 = vld [vmem:[#allocation120_spill] sm:$0xff]  ;;  %v7889_v1 = vand.u32 4294901760, %v176_v51 }
 0x19b   : > { %v1109_v63 = vpop.f32.mrf.mxu1  ;;  %v1258_v39 = vpop.f32.mrf.mxu2  ;;  %2186 = vmatpush.msrb.mxu1 %v2185_v29  ;;  %v10894_v29 = vand.u32 4294901760, %v7622_v32  ;;  %v10896_v32 = vand.u32 4294901760, %v7644_v25 }
 0x19c   : > { %v1110_v22 = vadd.f32 %v1109_v63, %v1013_v10  ;;  %v1431_v11 = vpop.f32.mrf.mxu3  ;;  %v10549_v34 = vand.u32 4294901760, %v7871_v41  ;;  %v10890_v10 = vld [vmem:[#allocation126_spill] sm:$0xff]  ;;  %v10891_v63 = vand.u32 4294901760, %v7600_v24  ;;  %10893 = vst [vmem:[#allocation130_spill] sm:$0xff] %v7889_v1  ;;  %v1017_v24 = vadd.f32 %v1016_v17, %v7539_v54 }
 0x19d   : > { %1561 = vmatmul.f32.gmra.mxu0 %v10888_v8  ;;  %2640 = vmatpush.msra.mxu1 %v10890_v10  ;;  %v7906_v54 = vsub.f32 %v176_v51, %v7889_v1 }
 0x19e   : > { %v1259_v9 = vadd.f32 %v1258_v39, %v1110_v22  ;;  %1682 = vmatmul.f32.gmra.mxu1 %v10889_v3  ;;  %2529 = vmatpush.msra.mxu0 %v10891_v63  ;;  %v2900_v59 = vsub.f32 %v7871_v41, %v10549_v34  ;;  %v251_v39 = vld [vmem:[%s10328_s1 + $0xe8] sm:$0xff] }
 0x19f   : > { %1918 = vmatmul.f32.gmra.mxu3 %v10892_v2  ;;  %2642 = vmatpush.msra.mxu1 %v7524_v16  ;;  %v7896_v22 = vand.u32 4294901760, %v251_v39  ;;  %10895 = vst [vmem:[#allocation126_spill] sm:$0xff] %v7906_v54 }
 0x1a0   : > { %v7882_v4 = vadd.f32 %v1431_v11, %v1259_v9  ;;  %1821 = vmatmul.f32.gmra.mxu2 %v10892_v2  ;;  %v2901_v11 = vand.u32 4294901760, %v2900_v59  ;;  %2533 = vmatpush.msra.mxu0 %v10894_v29  ;;  %v10897_v59 = vld [vmem:[#allocation125_spill] sm:$0xff]  ;;  %v10900_v29 = vld [vmem:[#allocation124_spill] sm:$0xff] }
 0x1a1   : > { %2644 = vmatpush.msra.mxu1 %v7552_v18  ;;  %2739 = vmatpush.msra.mxu2 %v7896_v22  ;;  %v7903_v16 = vsub.f32 %v251_v39, %v7896_v22  ;;  %v10898_v18 = vld [vmem:[#allocation123_spill] sm:$0xff]  ;;  %v10899_v39 = vand.u32 4294901760, %v7666_v21 }
 0x1a2   : > { %v1020_v9 = vpop.f32.mrf.mxu0  ;;  %2902 = vmatpush.msra.mxu3 %v2901_v11  ;;  %2537 = vmatpush.msra.mxu0 %v10896_v32  ;;  %v179_v11 = vld [vmem:[%s6495_s8 + $0x28] sm:$0xff] }
 0x1a3   : > { %v1113_v10 = vpop.f32.mrf.mxu1  ;;  %v1266_v34 = vpop.f32.mrf.mxu2  ;;  %2646 = vmatpush.msra.mxu1 %v7575_v49  ;;  %v7926_v49 = vand.u32 4294901760, %v7906_v54  ;;  %v1021_v21 = vadd.f32 %v1020_v9, %v7564_v42 }
 0x1a4   : > { %v1114_v63 = vadd.f32 %v1113_v10, %v1017_v24  ;;  %v1435_v2 = vpop.f32.mrf.mxu3  ;;  %v10551_v24 = vand.u32 4294901760, %v7903_v16  ;;  %2541 = vmatpush.msra.mxu0 %v10899_v39 }
 0x1a5   : > { %1566 = vmatmul.f32.gmra.mxu0 %v10897_v59  ;;  %2648 = vmatpush.msra.mxu1 %v7597_v30  ;;  %10901 = vst [vmem:[#allocation135_spill] sm:$0xff] %v7926_v49  ;;  %v249_v30 = vld [vmem:[%s10328_s1 + $0xd8] sm:$0xff] }
 0x1a6   : > { %v1267_v17 = vadd.f32 %v1266_v34, %v1114_v63  ;;  %1688 = vmatmul.f32.gmra.mxu1 %v10898_v18  ;;  %v2906_v25 = vsub.f32 %v7903_v16, %v10551_v24  ;;  %v7933_v34 = vand.u32 4294901760, %v179_v11  ;;  %v7935_v10 = vand.u32 4294901760, %v249_v30 }
 0x1a7   : > { %1922 = vmatmul.f32.gmra.mxu3 %v10900_v29  ;;  %2650 = vmatpush.msra.mxu1 %v7619_v60  ;;  %v10903_v63 = vand.u32 4294901760, %v7688_v55  ;;  %v1965_v60 = vsub.f32 %v7906_v54, %v7926_v49  ;;  %v10904_v55 = vand.u32 4294901760, %v7710_v36 }
 0x1a8   : > { %v7918_v51 = vadd.f32 %v1435_v2, %v1267_v17  ;;  %1825 = vmatmul.f32.gmra.mxu2 %v10900_v29  ;;  %10902 = vst [vmem:[#allocation136_spill] sm:$0xff] %v7933_v34  ;;  %v2907_v2 = vand.u32 4294901760, %v2906_v25  ;;  %v7942_v42 = vsub.f32 %v249_v30, %v7935_v10  ;;  %v10905_v25 = vld [vmem:[#allocation131_spill] sm:$0xff] }
 0x1a9   : > { %2545 = vmatpush.msra.mxu0 %v10903_v63  ;;  %2652 = vmatpush.msra.mxu1 %v7641_v52  ;;  %v10906_v52 = vld [vmem:[#allocation128_spill] sm:$0xff]  ;;  %v10908_v63 = vand.u32 4294901760, %v7732_v56 }
 0x1aa   : > { %v1024_v32 = vpop.f32.mrf.mxu0  ;;  %2908 = vmatpush.msra.mxu3 %v2907_v2  ;;  %2741 = vmatpush.msra.mxu2 %v7935_v10  ;;  %v182_v2 = vld [vmem:[%s6495_s8 + $0x40] sm:$0xff]  ;;  %v10553_v30 = vand.u32 4294901760, %v7942_v42 }
 0x1ab   : > { %v1117_v17 = vpop.f32.mrf.mxu1  ;;  %v1274_v24 = vpop.f32.mrf.mxu2  ;;  %2654 = vmatpush.msra.mxu1 %v7663_v43  ;;  %2549 = vmatpush.msra.mxu0 %v10904_v55  ;;  %v1025_v56 = vadd.f32 %v1024_v32, %v7585_v62  ;;  %v10912_v55 = vand.u32 4294901760, %v7754_v28  ;;  %v10914_v28 = vand.u32 4294901760, %v7776_v61 }
 0x1ac   : > { %v1118_v39 = vadd.f32 %v1117_v17, %v1021_v21  ;;  %v1439_v29 = vpop.f32.mrf.mxu3  ;;  %v7952_v21 = vsub.f32 %v179_v11, %v7933_v34  ;;  %v2912_v36 = vsub.f32 %v7942_v42, %v10553_v30  ;;  %v7968_v11 = vand.u32 4294901760, %v182_v2 }
 0x1ad   : > { %1571 = vmatmul.f32.gmra.mxu0 %v10905_v25  ;;  %2656 = vmatpush.msra.mxu1 %v7685_v48  ;;  %v247_v48 = vld [vmem:[%s10328_s1 + $0xc8] sm:$0xff] }
 0x1ae   : > { %v1275_v9 = vadd.f32 %v1274_v24, %v1118_v39  ;;  %1694 = vmatmul.f32.gmra.mxu1 %v10906_v52  ;;  %10907 = vst [vmem:[#allocation137_spill] sm:$0xff] %v7952_v21  ;;  %2553 = vmatpush.msra.mxu0 %v10908_v63  ;;  %v7966_v24 = vand.u32 4294901760, %v1965_v60  ;;  %v2913_v17 = vand.u32 4294901760, %v2912_v36  ;;  %v7978_v39 = vand.u32 4294901760, %v247_v48  ;;  %v10915_v36 = vld [vmem:[#allocation133_spill] sm:$0xff] }
 0x1af   : > { %1926 = vmatmul.f32.gmra.mxu3 %v7503_v45  ;;  %10910 = vst [vmem:[#allocation139_spill] sm:$0xff] %v7968_v11  ;;  %2658 = vmatpush.msra.mxu1 %v7707_v40  ;;  %v7988_v40 = vsub.f32 %v182_v2, %v7968_v11  ;;  %v10916_v2 = vand.u32 4294901760, %v7798_v57  ;;  %v245_v57 = vld [vmem:[%s10328_s1 + $0xb8] sm:$0xff] }
 0x1b0   : > { %v7959_v43 = vadd.f32 %v1439_v29, %v1275_v9  ;;  %1829 = vmatmul.f32.gmra.mxu2 %v7503_v45  ;;  %10909 = vst [vmem:[#allocation138_spill] sm:$0xff] %v7966_v24  ;;  %v7976_v29 = vand.u32 4294901760, %v7952_v21  ;;  %2557 = vmatpush.msra.mxu0 %v10912_v55  ;;  %v7985_v62 = vsub.f32 %v247_v48, %v7978_v39 }
 0x1b1   : > { %2660 = vmatpush.msra.mxu1 %v7729_v53  ;;  %2914 = vmatpush.msra.mxu3 %v2913_v17  ;;  %10913 = vst [vmem:[#allocation141_spill] sm:$0xff] %v7988_v40 }
 0x1b2   : > { %10911 = vst [vmem:[#allocation140_spill] sm:$0xff] %v7976_v29  ;;  %v1497_v9 = vpop.f32.mrf.mxu0  ;;  %2743 = vmatpush.msra.mxu2 %v7978_v39  ;;  %2561 = vmatpush.msra.mxu0 %v10914_v28  ;;  %v1973_v53 = vsub.f32 %v7952_v21, %v7976_v29  ;;  %v10556_v48 = vand.u32 4294901760, %v7985_v62 }
 0x1b3   : > { %v1121_v60 = vpop.f32.mrf.mxu1  ;;  %v1282_v30 = vpop.f32.mrf.mxu2  ;;  %2662 = vmatpush.msra.mxu1 %v7751_v19 }
 0x1b4   : > { %v1122_v63 = vadd.f32 %v1121_v60, %v1025_v56  ;;  %v1443_v45 = vpop.f32.mrf.mxu3  ;;  %v185_v56 = vld [vmem:[%s6495_s8 + $0x58] sm:$0xff]  ;;  %2565 = vmatpush.msra.mxu0 %v10916_v2  ;;  %v2918_v61 = vsub.f32 %v7985_v62, %v10556_v48  ;;  %v8021_v60 = vand.u32 4294901760, %v245_v57 }
 0x1b5   : > { %1967 = vmatmul.f32.vlgmr.msrb.gmra.mxu0 %v7966_v24  ;;  %2664 = vmatpush.msra.mxu1 %v7773_v37  ;;  %v8012_v17 = vand.u32 4294901760, %v185_v56  ;;  %v8019_v37 = vand.u32 4294901760, %v1973_v53 }
 0x1b6   : > { %v1283_v32 = vadd.f32 %v1282_v30, %v1122_v63  ;;  %1700 = vmatmul.f32.gmra.mxu1 %v10915_v36  ;;  %v8010_v30 = vand.u32 4294901760, %v7988_v40  ;;  %v2919_v55 = vand.u32 4294901760, %v2918_v61  ;;  %v10920_v63 = vand.u32 4294901760, %v7820_v27  ;;  %2745 = vmatpush.msra.mxu2 %v8021_v60  ;;  %v188_v61 = vld [vmem:[%s6495_s8 + $0x70] sm:$0xff] }
 0x1b7   : > { %2416 = vmatmul.f32.vlgmr.msrb.gmra.mxu3 %v7926_v49  ;;  %10918 = vst [vmem:[#allocation143_spill] sm:$0xff] %v8012_v17  ;;  %2666 = vmatpush.msra.mxu1 %v7795_v38  ;;  %v8033_v27 = vsub.f32 %v185_v56, %v8012_v17 }
 0x1b8   : > { %v8002_v19 = vadd.f32 %v1443_v45, %v1283_v32  ;;  %2302 = vmatmul.f32.vlgmr.msrb.gmra.mxu2 %v7906_v54  ;;  %10917 = vst [vmem:[#allocation142_spill] sm:$0xff] %v8010_v30  ;;  %v1498_v45 = vadd.f32 %v1497_v9, %v7607_v6  ;;  %2569 = vmatpush.msra.mxu0 %v10920_v63  ;;  %v10922_v9 = vand.u32 4294901760, %v7842_v20 }
 0x1b9   : > { %10919 = vst [vmem:[#allocation144_spill] sm:$0xff] %v8019_v37  ;;  %2668 = vmatpush.msra.mxu1 %v7817_v46  ;;  %2920 = vmatpush.msra.mxu3 %v2919_v55  ;;  %v8028_v6 = vsub.f32 %v245_v57, %v8021_v60  ;;  %v1981_v38 = vsub.f32 %v7988_v40, %v8010_v30  ;;  %v8054_v56 = vand.u32 4294901760, %v8033_v27 }
 0x1ba   : > { %v1502_v28 = vpop.f32.mrf.mxu0  ;;  %10921 = vst [vmem:[#allocation145_spill] sm:$0xff] %v8033_v27  ;;  %2573 = vmatpush.msra.mxu0 %v10922_v9 }
 0x1bb   : > { %v1611_v32 = vpop.f32.mrf.mxu1  ;;  %v1770_v48 = vpop.f32.mrf.mxu2  ;;  %2670 = vmatpush.msra.mxu1 %v7839_v14  ;;  %v10558_v53 = vand.u32 4294901760, %v8028_v6  ;;  %v8051_v14 = vand.u32 4294901760, %v1981_v38  ;;  %10924 = vst [vmem:[#allocation147_spill] sm:$0xff] %v8054_v56 }
 0x1bc   : > { %v1612_v2 = vadd.f32 %v1611_v32, %v1498_v45  ;;  %v1867_v49 = vpop.f32.mrf.mxu3  ;;  %3060 = vmatpush.msrb.mxu0 %v7871_v41  ;;  %v8061_v45 = vand.u32 4294901760, %v188_v61 }
 0x1bd   : > { %1975 = vmatmul.f32.gmra.mxu0 %v8019_v37  ;;  %v2924_v20 = vsub.f32 %v8028_v6, %v10558_v53  ;;  %10923 = vst [vmem:[#allocation146_spill] sm:$0xff] %v8051_v14  ;;  %v241_v53 = vld [vmem:[%s10328_s1 + $0x98] sm:$0xff] }
 0x1be   : > { %v1771_v46 = vadd.f32 %v1770_v48, %v1612_v2  ;;  %2188 = vmatmul.f32.vlgmr.msrb.gmra.mxu1 %v7889_v1  ;;  %v243_v48 = vld [vmem:[%s10328_s1 + $0xa8] sm:$0xff]  ;;  %3063 = vmatpush.msrb.mxu0 %v7903_v16  ;;  %10925 = vst [vmem:[#allocation148_spill] sm:$0xff] %v8061_v45 }
 0x1bf   : > { %3188 = vmatpush.msrb.mxu1 %v7865_v31  ;;  %2422 = vmatmul.f32.gmra.mxu3 %v7976_v29  ;;  %v2925_v55 = vand.u32 4294901760, %v2924_v20  ;;  %v8063_v63 = vand.u32 4294901760, %v243_v48  ;;  %v8103_v29 = vand.u32 4294901760, %v241_v53 }
 0x1c0   : > { %v8044_v57 = vadd.f32 %v1867_v49, %v1771_v46  ;;  %2307 = vmatmul.f32.gmra.mxu2 %v7952_v21  ;;  %v1503_v49 = vadd.f32 %v1502_v28, %v7629_v50  ;;  %3066 = vmatpush.msrb.mxu0 %v7942_v42  ;;  %v1989_v28 = vsub.f32 %v8033_v27, %v8054_v56 }
 0x1c1   : > { %3190 = vmatpush.msrb.mxu1 %v7896_v22  ;;  %2926 = vmatpush.msra.mxu3 %v2925_v55  ;;  %v8069_v50 = vsub.f32 %v243_v48, %v8063_v63  ;;  %v191_v55 = vld [vmem:[%s6495_s8 + $0x88] sm:$0xff] }
 0x1c2   : > { %v1507_v32 = vpop.f32.mrf.mxu0  ;;  %2747 = vmatpush.msra.mxu2 %v8063_v63  ;;  %3069 = vmatpush.msrb.mxu0 %v7985_v62 }
 0x1c3   : > { %v1617_v2 = vpop.f32.mrf.mxu1  ;;  %v1774_v9 = vpop.f32.mrf.mxu2  ;;  %3192 = vmatpush.msrb.mxu1 %v7935_v10 }
 0x1c4   : > { %v1618_v38 = vadd.f32 %v1617_v2, %v1503_v49  ;;  %v1871_v46 = vpop.f32.mrf.mxu3  ;;  %v8078_v49 = vsub.f32 %v188_v61, %v8061_v45  ;;  %v10561_v2 = vand.u32 4294901760, %v8069_v50  ;;  %3072 = vmatpush.msrb.mxu0 %v8028_v6  ;;  %v8093_v61 = vand.u32 4294901760, %v191_v55  ;;  %2749 = vmatpush.msra.mxu2 %v8103_v29 }
 0x1c5   : > { %1983 = vmatmul.f32.gmra.mxu0 %v8051_v14  ;;  %3194 = vmatpush.msrb.mxu1 %v7978_v39 }
 0x1c6   : > { %v1775_v20 = vadd.f32 %v1774_v9, %v1618_v38  ;;  %2192 = vmatmul.f32.gmra.mxu1 %v7933_v34  ;;  %10926 = vst [vmem:[#allocation149_spill] sm:$0xff] %v8078_v49  ;;  %v2930_v38 = vsub.f32 %v8069_v50, %v10561_v2  ;;  %v8091_v9 = vand.u32 4294901760, %v1989_v28  ;;  %3075 = vmatpush.msrb.mxu0 %v8069_v50 }
 0x1c7   : > { %2428 = vmatmul.f32.gmra.mxu3 %v8010_v30  ;;  %10928 = vst [vmem:[#allocation151_spill] sm:$0xff] %v8093_v61  ;;  %3196 = vmatpush.msrb.mxu1 %v8021_v60 }
 0x1c8   : > { %v8084_v48 = vadd.f32 %v1871_v46, %v1775_v20  ;;  %2312 = vmatmul.f32.gmra.mxu2 %v7988_v40  ;;  %10927 = vst [vmem:[#allocation150_spill] sm:$0xff] %v8091_v9  ;;  %v1508_v46 = vadd.f32 %v1507_v32, %v7651_v13  ;;  %v8101_v20 = vand.u32 4294901760, %v8078_v49  ;;  %v2931_v30 = vand.u32 4294901760, %v2930_v38 }
 0x1c9   : > { %3198 = vmatpush.msrb.mxu1 %v8063_v63  ;;  %v8109_v13 = vsub.f32 %v241_v53, %v8103_v29  ;;  %v8112_v32 = vsub.f32 %v191_v55, %v8093_v61 }
 0x1ca   : > { %10929 = vst [vmem:[#allocation152_spill] sm:$0xff] %v8101_v20  ;;  %v1512_v28 = vpop.f32.mrf.mxu0  ;;  %2932 = vmatpush.msra.mxu3 %v2931_v30 }
 0x1cb   : > { %v1623_v2 = vpop.f32.mrf.mxu1  ;;  %v1778_v21 = vpop.f32.mrf.mxu2  ;;  %10930 = vst [vmem:[#allocation153_spill] sm:$0xff] %v8112_v32  ;;  %3200 = vmatpush.msrb.mxu1 %v8103_v29  ;;  %v10568_v30 = vand.u32 4294901760, %v8109_v13  ;;  %3078 = vmatpush.msrb.mxu0 %v8109_v13 }
 0x1cc   : > { %v1624_v40 = vadd.f32 %v1623_v2, %v1508_v46  ;;  %v1875_v54 = vpop.f32.mrf.mxu3  ;;  %v1997_v2 = vsub.f32 %v8078_v49, %v8101_v20  ;;  %v194_v46 = vld [vmem:[%s6495_s8 + $0xa0] sm:$0xff] }
 0x1cd   : > { %1991 = vmatmul.f32.gmra.mxu0 %v8091_v9  ;;  %v8132_v55 = vand.u32 4294901760, %v194_v46  ;;  %v239_v9 = vld [vmem:[%s10328_s1 + $0x88] sm:$0xff] }
 0x1ce   : > { %v1779_v38 = vadd.f32 %v1778_v21, %v1624_v40  ;;  %2196 = vmatmul.f32.gmra.mxu1 %v7968_v11  ;;  %v2936_v21 = vsub.f32 %v8109_v13, %v10568_v30  ;;  %v8130_v40 = vand.u32 4294901760, %v8112_v32  ;;  %v8140_v14 = vand.u32 4294901760, %v239_v9 }
 0x1cf   : > { %2434 = vmatmul.f32.gmra.mxu3 %v8054_v56  ;;  %10932 = vst [vmem:[#allocation155_spill] sm:$0xff] %v8132_v55 }
 0x1d0   : > { %v8122_v53 = vadd.f32 %v1875_v54, %v1779_v38  ;;  %2317 = vmatmul.f32.gmra.mxu2 %v8033_v27  ;;  %10931 = vst [vmem:[#allocation154_spill] sm:$0xff] %v8130_v40  ;;  %v1513_v54 = vadd.f32 %v1512_v28, %v7673_v47  ;;  %v8138_v38 = vand.u32 4294901760, %v1997_v2  ;;  %v2937_v56 = vand.u32 4294901760, %v2936_v21  ;;  %3202 = vmatpush.msrb.mxu1 %v8140_v14  ;;  %v237_v21 = vld [vmem:[%s10328_s1 + $0x78] sm:$0xff] }
 0x1d1   : > { %2751 = vmatpush.msra.mxu2 %v8140_v14  ;;  %v8144_v25 = vsub.f32 %v239_v9, %v8140_v14  ;;  %v2005_v47 = vsub.f32 %v8112_v32, %v8130_v40  ;;  %v8149_v28 = vsub.f32 %v194_v46, %v8132_v55 }
 0x1d2   : > { %10933 = vst [vmem:[#allocation156_spill] sm:$0xff] %v8138_v38  ;;  %v1517_v30 = vpop.f32.mrf.mxu0  ;;  %2938 = vmatpush.msra.mxu3 %v2937_v56  ;;  %v197_v56 = vld [vmem:[%s6495_s8 + $0xb8] sm:$0xff] }
 0x1d3   : > { %v1629_v37 = vpop.f32.mrf.mxu1  ;;  %v1782_v24 = vpop.f32.mrf.mxu2  ;;  %10934 = vst [vmem:[#allocation157_spill] sm:$0xff] %v8149_v28  ;;  %3081 = vmatpush.msrb.mxu0 %v8144_v25 }
 0x1d4   : > { %v1630_v27 = vadd.f32 %v1629_v37, %v1513_v54  ;;  %v1879_v36 = vpop.f32.mrf.mxu3  ;;  %v10573_v37 = vand.u32 4294901760, %v8144_v25  ;;  %v8173_v54 = vand.u32 4294901760, %v197_v56 }
 0x1d5   : > { %1999 = vmatmul.f32.gmra.mxu0 %v8138_v38 }
 0x1d6   : > { %v1783_v2 = vadd.f32 %v1782_v24, %v1630_v27  ;;  %2200 = vmatmul.f32.gmra.mxu1 %v8012_v17  ;;  %v2942_v46 = vsub.f32 %v8144_v25, %v10573_v37  ;;  %v8164_v24 = vand.u32 4294901760, %v2005_v47  ;;  %v8167_v27 = vand.u32 4294901760, %v8149_v28  ;;  %10938 = vst [vmem:[#allocation161_spill] sm:$0xff] %v8173_v54 }
 0x1d7   : > { %2440 = vmatmul.f32.gmra.mxu3 %v8101_v20  ;;  %v8175_v20 = vand.u32 4294901760, %v237_v21 }
 0x1d8   : > { %v8157_v9 = vadd.f32 %v1879_v36, %v1783_v2  ;;  %2322 = vmatmul.f32.gmra.mxu2 %v8078_v49  ;;  %10936 = vst [vmem:[#allocation159_spill] sm:$0xff] %v8164_v24  ;;  %v1518_v36 = vadd.f32 %v1517_v30, %v7695_v0  ;;  %v2943_v2 = vand.u32 4294901760, %v2942_v46  ;;  %v2013_v0 = vsub.f32 %v8149_v28, %v8167_v27  ;;  %v200_v46 = vld [vmem:[%s6495_s8 + $0xd0] sm:$0xff] }
 0x1d9   : > { %10937 = vst [vmem:[#allocation160_spill] sm:$0xff] %v8167_v27  ;;  %2753 = vmatpush.msra.mxu2 %v8175_v20  ;;  %v8179_v59 = vsub.f32 %v237_v21, %v8175_v20  ;;  %3204 = vmatpush.msrb.mxu1 %v8175_v20 }
 0x1da   : > { %10935 = vst [vmem:[#allocation158_spill] sm:$0xff] %v8157_v9  ;;  %v1522_v37 = vpop.f32.mrf.mxu0  ;;  %2944 = vmatpush.msra.mxu3 %v2943_v2  ;;  %v8199_v2 = vand.u32 4294901760, %v2013_v0 }
 0x1db   : > { %v1635_v38 = vpop.f32.mrf.mxu1  ;;  %v1786_v47 = vpop.f32.mrf.mxu2  ;;  %3084 = vmatpush.msrb.mxu0 %v8179_v59 }
 0x1dc   : > { %v1636_v49 = vadd.f32 %v1635_v38, %v1518_v36  ;;  %v1883_v52 = vpop.f32.mrf.mxu3  ;;  %v8187_v38 = vsub.f32 %v197_v56, %v8173_v54  ;;  %v10578_v36 = vand.u32 4294901760, %v8179_v59  ;;  %10941 = vst [vmem:[#allocation164_spill] sm:$0xff] %v8199_v2  ;;  %v235_v56 = vld [vmem:[%s10328_s1 + $0x68] sm:$0xff] }
 0x1dd   : > { %2007 = vmatmul.f32.gmra.mxu0 %v8164_v24  ;;  %v1523_v24 = vadd.f32 %v1522_v37, %v7717_v5 }
 0x1de   : > { %v1787_v30 = vadd.f32 %v1786_v47, %v1636_v49  ;;  %2204 = vmatmul.f32.gmra.mxu1 %v8061_v45  ;;  %10939 = vst [vmem:[#allocation162_spill] sm:$0xff] %v8187_v38  ;;  %v2948_v49 = vsub.f32 %v8179_v59, %v10578_v36  ;;  %v8201_v47 = vand.u32 4294901760, %v200_v46 }
 0x1df   : > { %2446 = vmatmul.f32.gmra.mxu3 %v8130_v40  ;;  %v8210_v40 = vand.u32 4294901760, %v235_v56 }
 0x1e0   : > { %v8192_v21 = vadd.f32 %v1883_v52, %v1787_v30  ;;  %2327 = vmatmul.f32.gmra.mxu2 %v8112_v32  ;;  %10942 = vst [vmem:[#allocation165_spill] sm:$0xff] %v8201_v47  ;;  %v8208_v52 = vand.u32 4294901760, %v8187_v38  ;;  %v2949_v30 = vand.u32 4294901760, %v2948_v49  ;;  %v8217_v5 = vsub.f32 %v200_v46, %v8201_v47 }
 0x1e1   : > { %2755 = vmatpush.msra.mxu2 %v8210_v40  ;;  %v8214_v3 = vsub.f32 %v235_v56, %v8210_v40  ;;  %3206 = vmatpush.msrb.mxu1 %v8210_v40 }
 0x1e2   : > { %10940 = vst [vmem:[#allocation163_spill] sm:$0xff] %v8192_v21  ;;  %v1527_v36 = vpop.f32.mrf.mxu0  ;;  %2950 = vmatpush.msra.mxu3 %v2949_v30  ;;  %v8235_v46 = vand.u32 4294901760, %v8217_v5 }
 0x1e3   : > { %10943 = vst [vmem:[#allocation166_spill] sm:$0xff] %v8208_v52  ;;  %v1641_v18 = vpop.f32.mrf.mxu1  ;;  %v1790_v0 = vpop.f32.mrf.mxu2  ;;  %v10582_v49 = vand.u32 4294901760, %v8214_v3  ;;  %3087 = vmatpush.msrb.mxu0 %v8214_v3 }
 0x1e4   : > { %v1642_v32 = vadd.f32 %v1641_v18, %v1523_v24  ;;  %v1887_v8 = vpop.f32.mrf.mxu3  ;;  %10944 = vst [vmem:[#allocation167_spill] sm:$0xff] %v8217_v5  ;;  %v2021_v18 = vsub.f32 %v8187_v38, %v8208_v52  ;;  %v203_v24 = vld [vmem:[%s6495_s8 + $0xe8] sm:$0xff] }
 0x1e5   : > { %2015 = vmatmul.f32.gmra.mxu0 %v8199_v2  ;;  %10946 = vst [vmem:[#allocation169_spill] sm:$0xff] %v8235_v46  ;;  %v8237_v30 = vand.u32 4294901760, %v203_v24 }
 0x1e6   : > { %v1791_v37 = vadd.f32 %v1790_v0, %v1642_v32  ;;  %2208 = vmatmul.f32.gmra.mxu1 %v8093_v61  ;;  %v2954_v32 = vsub.f32 %v8214_v3, %v10582_v49  ;;  %v233_v0 = vld [vmem:[%s10328_s1 + $0x58] sm:$0xff] }
 0x1e7   : > { %2452 = vmatmul.f32.gmra.mxu3 %v8167_v27  ;;  %10947 = vst [vmem:[#allocation170_spill] sm:$0xff] %v8237_v30  ;;  %v8245_v2 = vand.u32 4294901760, %v233_v0 }
 0x1e8   : > { %v8227_v56 = vadd.f32 %v1887_v8, %v1791_v37  ;;  %2332 = vmatmul.f32.gmra.mxu2 %v8149_v28  ;;  %v1528_v8 = vadd.f32 %v1527_v36, %v7739_v15  ;;  %v8243_v37 = vand.u32 4294901760, %v2021_v18  ;;  %v2955_v27 = vand.u32 4294901760, %v2954_v32 }
 0x1e9   : > { %2757 = vmatpush.msra.mxu2 %v8245_v2  ;;  %v2029_v15 = vsub.f32 %v8217_v5, %v8235_v46  ;;  %v8254_v36 = vsub.f32 %v203_v24, %v8237_v30  ;;  %3208 = vmatpush.msrb.mxu1 %v8245_v2 }
 0x1ea   : > { %10945 = vst [vmem:[#allocation168_spill] sm:$0xff] %v8227_v56  ;;  %v1532_v49 = vpop.f32.mrf.mxu0  ;;  %2956 = vmatpush.msra.mxu3 %v2955_v27  ;;  %v8249_v56 = vsub.f32 %v233_v0, %v8245_v2  ;;  %v206_v27 = vld [vmem:[%s6495_s8 + $0x100] sm:$0xff]  ;;  %v231_v0 = vld [vmem:[%s10328_s1 + $0x48] sm:$0xff] }
 0x1eb   : > { %10948 = vst [vmem:[#allocation171_spill] sm:$0xff] %v8243_v37  ;;  %v1647_v35 = vpop.f32.mrf.mxu1  ;;  %v1794_v7 = vpop.f32.mrf.mxu2 }
 0x1ec   : > { %v1648_v28 = vadd.f32 %v1647_v35, %v1528_v8  ;;  %v1891_v26 = vpop.f32.mrf.mxu3  ;;  %10949 = vst [vmem:[#allocation172_spill] sm:$0xff] %v8254_v36  ;;  %v10588_v35 = vand.u32 4294901760, %v8249_v56  ;;  %3090 = vmatpush.msrb.mxu0 %v8249_v56  ;;  %v8278_v8 = vand.u32 4294901760, %v206_v27 }
 0x1ed   : > { %2023 = vmatmul.f32.gmra.mxu0 %v8243_v37 }
 0x1ee   : > { %v1795_v18 = vadd.f32 %v1794_v7, %v1648_v28  ;;  %2212 = vmatmul.f32.gmra.mxu1 %v8132_v55  ;;  %v2960_v24 = vsub.f32 %v8249_v56, %v10588_v35  ;;  %v8269_v7 = vand.u32 4294901760, %v2029_v15  ;;  %v8272_v28 = vand.u32 4294901760, %v8254_v36  ;;  %10953 = vst [vmem:[#allocation176_spill] sm:$0xff] %v8278_v8 }
 0x1ef   : > { %2458 = vmatmul.f32.gmra.mxu3 %v8208_v52  ;;  %v8280_v52 = vand.u32 4294901760, %v231_v0 }
 0x1f0   : > { %v8262_v32 = vadd.f32 %v1891_v26, %v1795_v18  ;;  %2337 = vmatmul.f32.gmra.mxu2 %v8187_v38  ;;  %10951 = vst [vmem:[#allocation174_spill] sm:$0xff] %v8269_v7  ;;  %v1533_v26 = vadd.f32 %v1532_v49, %v7761_v33  ;;  %v2961_v18 = vand.u32 4294901760, %v2960_v24  ;;  %v2037_v33 = vsub.f32 %v8254_v36, %v8272_v28  ;;  %v209_v24 = vld [vmem:[%s6495_s8 + $0x118] sm:$0xff] }
 0x1f1   : > { %10952 = vst [vmem:[#allocation175_spill] sm:$0xff] %v8272_v28  ;;  %2759 = vmatpush.msra.mxu2 %v8280_v52  ;;  %v8284_v55 = vsub.f32 %v231_v0, %v8280_v52  ;;  %3210 = vmatpush.msrb.mxu1 %v8280_v52 }
 0x1f2   : > { %10950 = vst [vmem:[#allocation173_spill] sm:$0xff] %v8262_v32  ;;  %v1537_v35 = vpop.f32.mrf.mxu0  ;;  %2962 = vmatpush.msra.mxu3 %v2961_v18  ;;  %v8304_v18 = vand.u32 4294901760, %v2037_v33 }
 0x1f3   : > { %v1653_v37 = vpop.f32.mrf.mxu1  ;;  %v1798_v15 = vpop.f32.mrf.mxu2  ;;  %3093 = vmatpush.msrb.mxu0 %v8284_v55 }
 0x1f4   : > { %v1654_v38 = vadd.f32 %v1653_v37, %v1533_v26  ;;  %v1895_v32 = vpop.f32.mrf.mxu3  ;;  %v8292_v37 = vsub.f32 %v206_v27, %v8278_v8  ;;  %v10595_v26 = vand.u32 4294901760, %v8284_v55  ;;  %10956 = vst [vmem:[#allocation179_spill] sm:$0xff] %v8304_v18  ;;  %v229_v27 = vld [vmem:[%s10328_s1 + $0x38] sm:$0xff] }
 0x1f5   : > { %2031 = vmatmul.f32.gmra.mxu0 %v8269_v7  ;;  %v1538_v7 = vadd.f32 %v1537_v35, %v7783_v44 }
 0x1f6   : > { %v1799_v49 = vadd.f32 %v1798_v15, %v1654_v38  ;;  %2216 = vmatmul.f32.gmra.mxu1 %v8173_v54  ;;  %10954 = vst [vmem:[#allocation177_spill] sm:$0xff] %v8292_v37  ;;  %v2966_v38 = vsub.f32 %v8284_v55, %v10595_v26  ;;  %v8306_v15 = vand.u32 4294901760, %v209_v24 }
 0x1f7   : > { %2464 = vmatmul.f32.gmra.mxu3 %v8235_v46  ;;  %v8315_v46 = vand.u32 4294901760, %v229_v27 }
 0x1f8   : > { %v8297_v0 = vadd.f32 %v1895_v32, %v1799_v49  ;;  %2342 = vmatmul.f32.gmra.mxu2 %v8217_v5  ;;  %10957 = vst [vmem:[#allocation180_spill] sm:$0xff] %v8306_v15  ;;  %v8313_v32 = vand.u32 4294901760, %v8292_v37  ;;  %v2967_v49 = vand.u32 4294901760, %v2966_v38  ;;  %v8322_v44 = vsub.f32 %v209_v24, %v8306_v15 }
 0x1f9   : > { %2761 = vmatpush.msra.mxu2 %v8315_v46  ;;  %v8319_v61 = vsub.f32 %v229_v27, %v8315_v46  ;;  %3212 = vmatpush.msrb.mxu1 %v8315_v46 }
 0x1fa   : > { %10955 = vst [vmem:[#allocation178_spill] sm:$0xff] %v8297_v0  ;;  %v1542_v26 = vpop.f32.mrf.mxu0  ;;  %2968 = vmatpush.msra.mxu3 %v2967_v49  ;;  %v8340_v24 = vand.u32 4294901760, %v8322_v44 }
 0x1fb   : > { %10958 = vst [vmem:[#allocation181_spill] sm:$0xff] %v8313_v32  ;;  %v1659_v0 = vpop.f32.mrf.mxu1  ;;  %v1802_v33 = vpop.f32.mrf.mxu2  ;;  %v10603_v38 = vand.u32 4294901760, %v8319_v61  ;;  %3096 = vmatpush.msrb.mxu0 %v8319_v61 }
 0x1fc   : > { %v1660_v5 = vadd.f32 %v1659_v0, %v1538_v7  ;;  %v1899_v54 = vpop.f32.mrf.mxu3  ;;  %10959 = vst [vmem:[#allocation182_spill] sm:$0xff] %v8322_v44  ;;  %v2045_v7 = vsub.f32 %v8292_v37, %v8313_v32  ;;  %v212_v0 = vld [vmem:[%s6495_s8 + $0x130] sm:$0xff] }
 0x1fd   : > { %2039 = vmatmul.f32.gmra.mxu0 %v8304_v18  ;;  %10961 = vst [vmem:[#allocation184_spill] sm:$0xff] %v8340_v24  ;;  %v8342_v49 = vand.u32 4294901760, %v212_v0 }
 0x1fe   : > { %v1803_v35 = vadd.f32 %v1802_v33, %v1660_v5  ;;  %2220 = vmatmul.f32.gmra.mxu1 %v8201_v47  ;;  %v2972_v5 = vsub.f32 %v8319_v61, %v10603_v38  ;;  %v227_v33 = vld [vmem:[%s10328_s1 + $0x28] sm:$0xff] }
 0x1ff   : > { %2470 = vmatmul.f32.gmra.mxu3 %v8272_v28  ;;  %10962 = vst [vmem:[#allocation185_spill] sm:$0xff] %v8342_v49  ;;  %v8350_v18 = vand.u32 4294901760, %v227_v33 }
 0x200   : > { %v8332_v27 = vadd.f32 %v1899_v54, %v1803_v35  ;;  %2347 = vmatmul.f32.gmra.mxu2 %v8254_v36  ;;  %v1543_v54 = vadd.f32 %v1542_v26, %v7805_v23  ;;  %v8348_v35 = vand.u32 4294901760, %v2045_v7  ;;  %v2973_v28 = vand.u32 4294901760, %v2972_v5 }
 0x201   : > { %2763 = vmatpush.msra.mxu2 %v8350_v18  ;;  %v8354_v45 = vsub.f32 %v227_v33, %v8350_v18  ;;  %v2053_v23 = vsub.f32 %v8322_v44, %v8340_v24  ;;  %v8359_v26 = vsub.f32 %v212_v0, %v8342_v49  ;;  %3214 = vmatpush.msrb.mxu1 %v8350_v18  ;;  %v225_v33 = vld [vmem:[%s10328_s1 + $0x18] sm:$0xff] }
 0x202   : > { %10960 = vst [vmem:[#allocation183_spill] sm:$0xff] %v8332_v27  ;;  %v1547_v38 = vpop.f32.mrf.mxu0  ;;  %2974 = vmatpush.msra.mxu3 %v2973_v28 }
 0x203   : > { %10963 = vst [vmem:[#allocation186_spill] sm:$0xff] %v8348_v35  ;;  %v1665_v27 = vpop.f32.mrf.mxu1  ;;  %v1806_v47 = vpop.f32.mrf.mxu2  ;;  %v10611_v28 = vand.u32 4294901760, %v8354_v45  ;;  %3099 = vmatpush.msrb.mxu0 %v8354_v45 }
 0x204   : > { %v1666_v36 = vadd.f32 %v1665_v27, %v1543_v54  ;;  %v1903_v21 = vpop.f32.mrf.mxu3  ;;  %10964 = vst [vmem:[#allocation187_spill] sm:$0xff] %v8359_v26  ;;  %v215_v27 = vld [vmem:[%s6495_s8 + $0x148] sm:$0xff] }
 0x205   : > { %2047 = vmatmul.f32.gmra.mxu0 %v8348_v35  ;;  %v2978_v0 = vsub.f32 %v8354_v45, %v10611_v28  ;;  %v8383_v54 = vand.u32 4294901760, %v215_v27 }
 0x206   : > { %v1807_v7 = vadd.f32 %v1806_v47, %v1666_v36  ;;  %2224 = vmatmul.f32.gmra.mxu1 %v8237_v30  ;;  %v8374_v47 = vand.u32 4294901760, %v2053_v23  ;;  %v8377_v36 = vand.u32 4294901760, %v8359_v26 }
 0x207   : > { %2476 = vmatmul.f32.gmra.mxu3 %v8313_v32  ;;  %10968 = vst [vmem:[#allocation191_spill] sm:$0xff] %v8383_v54  ;;  %v8385_v32 = vand.u32 4294901760, %v225_v33 }
 0x208   : > { %v8367_v5 = vadd.f32 %v1903_v21, %v1807_v7  ;;  %2352 = vmatmul.f32.gmra.mxu2 %v8292_v37  ;;  %10966 = vst [vmem:[#allocation189_spill] sm:$0xff] %v8374_v47  ;;  %v1548_v21 = vadd.f32 %v1547_v38, %v7827_v58  ;;  %v2979_v7 = vand.u32 4294901760, %v2978_v0  ;;  %v2061_v58 = vsub.f32 %v8359_v26, %v8377_v36 }
 0x209   : > { %10967 = vst [vmem:[#allocation190_spill] sm:$0xff] %v8377_v36  ;;  %2765 = vmatpush.msra.mxu2 %v8385_v32  ;;  %v8389_v30 = vsub.f32 %v225_v33, %v8385_v32  ;;  %3216 = vmatpush.msrb.mxu1 %v8385_v32  ;;  %v223_v33 = vld [vmem:[%s10328_s1 + $0x8] sm:$0xff] }
 0x20a   : > { %10965 = vst [vmem:[#allocation188_spill] sm:$0xff] %v8367_v5  ;;  %v1552_v35 = vpop.f32.mrf.mxu0  ;;  %2980 = vmatpush.msra.mxu3 %v2979_v7  ;;  %v8404_v7 = vand.u32 4294901760, %v223_v33 }
 0x20b   : > { %v1671_v28 = vpop.f32.mrf.mxu1  ;;  %v1810_v23 = vpop.f32.mrf.mxu2  ;;  %v10617_v0 = vand.u32 4294901760, %v8389_v30  ;;  %3102 = vmatpush.msrb.mxu0 %v8389_v30 }
 0x20c   : > { %v1672_v37 = vadd.f32 %v1671_v28, %v1548_v21  ;;  %v1907_v5 = vpop.f32.mrf.mxu3  ;;  %v8397_v28 = vsub.f32 %v215_v27, %v8383_v54  ;;  %v218_v21 = vld [vmem:[%s6495_s8 + $0x160] sm:$0xff]  ;;  %v8414_v27 = vand.u32 4294901760, %v2061_v58  ;;  %3218 = vmatpush.msrb.mxu1 %v8404_v7  ;;  %2767 = vmatpush.msra.mxu2 %v8404_v7 }
 0x20d   : > { %2055 = vmatmul.f32.gmra.mxu0 %v8374_v47  ;;  %v1553_v47 = vadd.f32 %v1552_v35, %v7852_v12 }
 0x20e   : > { %v1811_v38 = vadd.f32 %v1810_v23, %v1672_v37  ;;  %2228 = vmatmul.f32.gmra.mxu1 %v8278_v8  ;;  %10969 = vst [vmem:[#allocation192_spill] sm:$0xff] %v8397_v28  ;;  %v2984_v37 = vsub.f32 %v8389_v30, %v10617_v0  ;;  %v8417_v23 = vsub.f32 %v223_v33, %v8404_v7  ;;  %v10974_v33 = vand.u32 4294901760, %v7871_v41 }
 0x20f   : > { %2482 = vmatmul.f32.gmra.mxu3 %v8340_v24  ;;  %10971 = vst [vmem:[#allocation194_spill] sm:$0xff] %v8414_v27  ;;  %v10975_v8 = vand.u32 4294901760, %v7903_v16 }
 0x210   : > { %v8407_v9 = vadd.f32 %v1907_v5, %v1811_v38  ;;  %2357 = vmatmul.f32.gmra.mxu2 %v8322_v44  ;;  %v8422_v5 = vand.u32 4294901760, %v8397_v28  ;;  %v8424_v38 = vand.u32 4294901760, %v218_v21  ;;  %v2985_v24 = vand.u32 4294901760, %v2984_v37  ;;  %3105 = vmatpush.msrb.mxu0 %v8417_v23 }
 0x211   : > { %v10623_v58 = vand.u32 4294901760, %v8417_v23  ;;  %3319 = vmatpush.msrb.mxu2 %v10974_v33  ;;  %v10977_v33 = vand.u32 4294901760, %v7942_v42  ;;  %v10981_v42 = vand.u32 4294901760, %v7985_v62 }
 0x212   : > { %10970 = vst [vmem:[#allocation193_spill] sm:$0xff] %v8407_v9  ;;  %v1557_v0 = vpop.f32.mrf.mxu0  ;;  %2986 = vmatpush.msra.mxu3 %v2985_v24  ;;  %v2069_v41 = vsub.f32 %v8397_v28, %v8422_v5 }
 0x213   : > { %10972 = vst [vmem:[#allocation195_spill] sm:$0xff] %v8422_v5  ;;  %v1677_v44 = vpop.f32.mrf.mxu1  ;;  %v1814_v12 = vpop.f32.mrf.mxu2  ;;  %v2990_v37 = vsub.f32 %v8417_v23, %v10623_v58  ;;  %3323 = vmatpush.msrb.mxu2 %v10975_v8  ;;  %v1558_v16 = vadd.f32 %v1557_v0, %v7882_v4  ;;  %v10982_v4 = vand.u32 4294901760, %v8028_v6 }
 0x214   : > { %10973 = vst [vmem:[#allocation196_spill] sm:$0xff] %v8424_v38  ;;  %v1678_v9 = vadd.f32 %v1677_v44, %v1553_v47  ;;  %v1911_v35 = vpop.f32.mrf.mxu3  ;;  %v8441_v44 = vsub.f32 %v218_v21, %v8424_v38  ;;  %v221_v47 = vld [vmem:[%s6495_s8 + $0x178] sm:$0xff]  ;;  %s6248_s8 = scalar_lea.hbm %s6247_s10, 8 }
 0x215   : > { %2063 = vmatmul.f32.gmra.mxu0 %v8414_v27  ;;  %v2991_v24 = vand.u32 4294901760, %v2990_v37  ;;  %3327 = vmatpush.msrb.mxu2 %v10977_v33  ;;  %v8456_v21 = vand.u32 4294901760, %v221_v47  ;;  %p6249_p11 = scmp.ne.s32.totalorder %s6247_s10, %s6248_s8  ;;  %p6254_p1 = scmp.lt.s32.totalorder %s6252_s16, %s6248_s8 }
 0x216   : > { %v1815_v17 = vadd.f32 %v1814_v12, %v1678_v9  ;;  %2232 = vmatmul.f32.gmra.mxu1 %v8306_v15  ;;  %10976 = vst [vmem:[#allocation197_spill] sm:$0xff] %v8441_v44  ;;  %v8451_v9 = vand.u32 4294901760, %v2069_v41  ;;  %v8454_v8 = vand.u32 4294901760, %v8441_v44  ;;  %v10984_v41 = vand.u32 4294901760, %v8069_v50 }
 0x217   : > { %2488 = vmatmul.f32.gmra.mxu3 %v8377_v36  ;;  %10980 = vst [vmem:[#allocation200_spill] sm:$0xff] %v8456_v21  ;;  %3331 = vmatpush.msrb.mxu2 %v10981_v42  ;;  %v8469_v62 = vsub.f32 %v221_v47, %v8456_v21  ;;  %p6250_p12 = pnand %p6249_p11, %p6356_p5  ;;  %p6255_p2 = por %p6254_p1, %p6253_p0 }
 0x218   : > { %v8446_v58 = vadd.f32 %v1911_v35, %v1815_v17  ;;  %2362 = vmatmul.f32.gmra.mxu2 %v8359_v26  ;;  %2992 = vmatpush.msra.mxu3 %v2991_v24  ;;  %10978 = vst [vmem:[#allocation198_spill] sm:$0xff] %v8451_v9 }
 0x219   : > { %10979 = vst [vmem:[#allocation199_spill] sm:$0xff] %v8454_v8  ;;  %3335 = vmatpush.msrb.mxu2 %v10982_v4  ;;  %v8483_v47 = vand.u32 4294901760, %v8469_v62  ;;  %p6251_p13 = pneg %p6250_p12 }
 0x21a   : > { %3446 = vmatpush.msrb.mxu3 %v7865_v31  ;;  %v1562_v17 = vpop.f32.mrf.mxu0  ;;  %v2077_v31 = vsub.f32 %v8441_v44, %v8454_v8  ;;  %10983 = vst [vmem:[#allocation201_spill] sm:$0xff] %v8469_v62 }
 0x21b   : > { %v1683_v12 = vpop.f32.mrf.mxu1  ;;  %v1818_v37 = vpop.f32.mrf.mxu2  ;;  %3339 = vmatpush.msrb.mxu2 %v10984_v41  ;;  %v1563_v6 = vadd.f32 %v1562_v17, %v7918_v51  ;;  %10986 = vst [vmem:[#allocation203_spill] sm:$0xff] %v8483_v47  ;;  %v10991_v17 = vand.u32 4294901760, %v8214_v3  ;;  %v10993_v3 = vand.u32 4294901760, %v8284_v55  ;;  %p6256_p3 = pnand %p6255_p2, %p6251_p13 }
 0x21c   : > { %v1684_v35 = vadd.f32 %v1683_v12, %v1558_v16  ;;  %v1915_v33 = vpop.f32.mrf.mxu3  ;;  %3448 = vmatpush.msrb.mxu3 %v7896_v22  ;;  %v8480_v24 = vand.u32 4294901760, %v2077_v31  ;;  %v10992_v31 = vand.u32 4294901760, %v8249_v56 }
 0x21d   : > { %2071 = vmatmul.f32.gmra.mxu0 %v8451_v9 }
 0x21e   : > { %v1819_v0 = vadd.f32 %v1818_v37, %v1684_v35  ;;  %2236 = vmatmul.f32.gmra.mxu1 %v8342_v49  ;;  %3450 = vmatpush.msrb.mxu3 %v7935_v10  ;;  %10985 = vst [vmem:[#allocation202_spill] sm:$0xff] %v8480_v24  ;;  %v10987_v10 = vand.u32 4294901760, %v8109_v13  ;;  %v10988_v37 = vand.u32 4294901760, %v8144_v25 }
 0x21f   : > { %2494 = vmatmul.f32.gmra.mxu3 %v8422_v5 }
 0x220   : > { %v8474_v22 = vadd.f32 %v1915_v33, %v1819_v0  ;;  %2367 = vmatmul.f32.gmra.mxu2 %v8397_v28  ;;  %3452 = vmatpush.msrb.mxu3 %v7978_v39  ;;  %v2085_v39 = vsub.f32 %v8469_v62, %v8483_v47 }
 0x221   : > { %3343 = vmatpush.msrb.mxu2 %v10987_v10  ;;  %v10995_v10 = vand.u32 4294901760, %v8354_v45 }
 0x222   : > { %v1567_v50 = vpop.f32.mrf.mxu0  ;;  %3454 = vmatpush.msrb.mxu3 %v8021_v60  ;;  %v10989_v60 = vand.u32 4294901760, %v8179_v59 }
 0x223   : > { %v1689_v16 = vpop.f32.mrf.mxu1  ;;  %v1822_v12 = vpop.f32.mrf.mxu2  ;;  %3347 = vmatpush.msrb.mxu2 %v10988_v37  ;;  %v1568_v25 = vadd.f32 %v1567_v50, %v7959_v43 }
 0x224   : > { %v1690_v42 = vadd.f32 %v1689_v16, %v1563_v6  ;;  %v1919_v35 = vpop.f32.mrf.mxu3  ;;  %3456 = vmatpush.msrb.mxu3 %v8063_v63  ;;  %v8504_v63 = vand.u32 4294901760, %v2085_v39 }
 0x225   : > { %2079 = vmatmul.f32.gmra.mxu0 %v8480_v24  ;;  %3351 = vmatpush.msrb.mxu2 %v10989_v60 }
 0x226   : > { %v1823_v51 = vadd.f32 %v1822_v12, %v1690_v42  ;;  %2240 = vmatmul.f32.gmra.mxu1 %v8383_v54  ;;  %3458 = vmatpush.msrb.mxu3 %v8103_v29  ;;  %10990 = vst [vmem:[#allocation204_spill] sm:$0xff] %v8504_v63 }
 0x227   : > { %2500 = vmatmul.f32.gmra.mxu3 %v8454_v8  ;;  %3355 = vmatpush.msrb.mxu2 %v10991_v17  ;;  %v11032_v8 = vld [vmem:[#allocation176_spill] sm:$0xff] }
 0x228   : > { %v8498_v13 = vadd.f32 %v1919_v35, %v1823_v51  ;;  %2372 = vmatmul.f32.gmra.mxu2 %v8441_v44  ;;  %3460 = vmatpush.msrb.mxu3 %v8140_v14  ;;  %v11000_v51 = vld [vmem:[#allocation8_spill] sm:$0xff] }
 0x229   : > { %3359 = vmatpush.msrb.mxu2 %v10992_v31 }
 0x22a   : > { %v1572_v33 = vpop.f32.mrf.mxu0  ;;  %3462 = vmatpush.msrb.mxu3 %v8175_v20 }
 0x22b   : > { %v1695_v29 = vpop.f32.mrf.mxu1  ;;  %v1826_v4 = vpop.f32.mrf.mxu2  ;;  %3363 = vmatpush.msrb.mxu2 %v10993_v3  ;;  %v1573_v20 = vadd.f32 %v1572_v33, %v8002_v19  ;;  %v10996_v19 = vand.u32 4294901760, %v8389_v30 }
 0x22c   : > { %v1696_v59 = vadd.f32 %v1695_v29, %v1568_v25  ;;  %v1923_v0 = vpop.f32.mrf.mxu3  ;;  %3464 = vmatpush.msrb.mxu3 %v8210_v40  ;;  %v10994_v40 = vand.u32 4294901760, %v8319_v61 }
 0x22d   : > { %2087 = vmatmul.f32.gmra.mxu0 %v8504_v63 }
 0x22e   : > { %v1827_v14 = vadd.f32 %v1826_v4, %v1696_v59  ;;  %2244 = vmatmul.f32.gmra.mxu1 %v8424_v38  ;;  %3466 = vmatpush.msrb.mxu3 %v8245_v2  ;;  %v11002_v59 = vld [vmem:[#allocation10_spill] sm:$0xff] }
 0x22f   : > { %2506 = vmatmul.f32.gmra.mxu3 %v8483_v47  ;;  %3367 = vmatpush.msrb.mxu2 %v10994_v40  ;;  %v11003_v4 = vld [vmem:[#allocation18_spill] sm:$0xff] }
 0x230   : > { %v8517_v43 = vadd.f32 %v1923_v0, %v1827_v14  ;;  %2377 = vmatmul.f32.gmra.mxu2 %v8469_v62  ;;  %3468 = vmatpush.msrb.mxu3 %v8280_v52  ;;  %v10997_v52 = vld [vmem:[#allocation5_spill] sm:$0xff] }
 0x231   : > { %3371 = vmatpush.msrb.mxu2 %v10995_v10 }
 0x232   : > { %v1968_v41 = vpop.f32.mrf.mxu0  ;;  %3470 = vmatpush.msrb.mxu3 %v8315_v46  ;;  %v10998_v46 = vld [vmem:[#allocation11_spill] sm:$0xff] }
 0x233   : > { %v1701_v56 = vpop.f32.mrf.mxu1  ;;  %v1830_v55 = vpop.f32.mrf.mxu2  ;;  %3375 = vmatpush.msrb.mxu2 %v10996_v19  ;;  %v1969_v45 = vadd.f32 %v1968_v41, %v8044_v57 }
 0x234   : > { %v1702_v2 = vadd.f32 %v1701_v56, %v1573_v20  ;;  %v1927_v6 = vpop.f32.mrf.mxu3  ;;  %3472 = vmatpush.msrb.mxu3 %v8350_v18  ;;  %v10999_v18 = vand.u32 4294901760, %v8417_v23  ;;  %v11004_v56 = vld [vmem:[#allocation143_spill] sm:$0xff] }
 0x235   : > { %2575 = vmatmul.f32.vlgmr.msra.gmra.mxu0 %v7889_v1 }
 0x236   : > { %v1831_v50 = vadd.f32 %v1830_v55, %v1702_v2  ;;  %2248 = vmatmul.f32.gmra.mxu1 %v8456_v21  ;;  %3474 = vmatpush.msrb.mxu3 %v8385_v32  ;;  %v11005_v2 = vld [vmem:[#allocation14_spill] sm:$0xff]  ;;  %v11006_v55 = vld [vmem:[#allocation23_spill] sm:$0xff] }
 0x237   : > { %2994 = vmatmul.f32.vlgmr.msra.gmra.mxu3 %v10997_v52  ;;  %3379 = vmatpush.msrb.mxu2 %v10999_v18 }
 0x238   : > { %v8534_v61 = vadd.f32 %v1927_v6, %v1831_v50  ;;  %2773 = vmatmul.f32.vlgmr.msra.gmra.mxu2 %v10998_v46  ;;  %3476 = vmatpush.msrb.mxu3 %v8404_v7  ;;  %v11001_v7 = vld [vmem:[#allocation15_spill] sm:$0xff]  ;;  %v11007_v6 = vld [vmem:[#allocation158_spill] sm:$0xff] }
 0x23a   : > { %v1976_v16 = vpop.f32.mrf.mxu0 }
 0x23b   : > { %v2189_v42 = vpop.f32.mrf.mxu1  ;;  %v2303_v30 = vpop.f32.mrf.mxu2  ;;  %v1977_v57 = vadd.f32 %v1976_v16, %v8084_v48  ;;  %v11008_v16 = vld [vmem:[#allocation148_spill] sm:$0xff] }
 0x23c   : > { %v2190_v12 = vadd.f32 %v2189_v42, %v1969_v45  ;;  %v2417_v35 = vpop.f32.mrf.mxu3 }
 0x23d   : > { %2579 = vmatmul.f32.gmra.mxu0 %v7933_v34 }
 0x23e   : > { %v2304_v37 = vadd.f32 %v2303_v30, %v2190_v12  ;;  %2672 = vmatmul.f32.vlgmr.msra.gmra.mxu1 %v7889_v1  ;;  %v11009_v12 = vld [vmem:[#allocation20_spill] sm:$0xff]  ;;  %v11010_v30 = vld [vmem:[#allocation27_spill] sm:$0xff] }
 0x23f   : > { %2998 = vmatmul.f32.gmra.mxu3 %v11000_v51 }
 0x240   : > { %v8544_v32 = vadd.f32 %v2417_v35, %v2304_v37  ;;  %2781 = vmatmul.f32.gmra.mxu2 %v11001_v7  ;;  %v11011_v35 = vld [vmem:[#allocation163_spill] sm:$0xff] }
 0x242   : > { %v1984_v23 = vpop.f32.mrf.mxu0 }
 0x243   : > { %v2193_v39 = vpop.f32.mrf.mxu1  ;;  %v2308_v25 = vpop.f32.mrf.mxu2  ;;  %v1985_v0 = vadd.f32 %v1984_v23, %v8122_v53 }
 0x244   : > { %v2194_v60 = vadd.f32 %v2193_v39, %v1977_v57  ;;  %v2423_v17 = vpop.f32.mrf.mxu3 }
 0x245   : > { %2583 = vmatmul.f32.gmra.mxu0 %v7968_v11 }
 0x246   : > { %v2309_v33 = vadd.f32 %v2308_v25, %v2194_v60  ;;  %2676 = vmatmul.f32.gmra.mxu1 %v7933_v34 }
 0x247   : > { %3002 = vmatmul.f32.gmra.mxu3 %v11002_v59 }
 0x248   : > { %v8551_v29 = vadd.f32 %v2423_v17, %v2309_v33  ;;  %2789 = vmatmul.f32.gmra.mxu2 %v11003_v4  ;;  %v11012_v17 = vld [vmem:[#allocation151_spill] sm:$0xff]  ;;  %v11013_v4 = vld [vmem:[#allocation22_spill] sm:$0xff] }
 0x24a   : > { %v1992_v31 = vpop.f32.mrf.mxu0 }
 0x24b   : > { %v2197_v48 = vpop.f32.mrf.mxu1  ;;  %v2313_v3 = vpop.f32.mrf.mxu2  ;;  %v1993_v10 = vadd.f32 %v1992_v31, %v11007_v6  ;;  %v11015_v31 = vld [vmem:[#allocation168_spill] sm:$0xff] }
 0x24c   : > { %v2198_v14 = vadd.f32 %v2197_v48, %v1985_v0  ;;  %v2429_v20 = vpop.f32.mrf.mxu3  ;;  %v11014_v0 = vld [vmem:[#allocation30_spill] sm:$0xff] }
 0x24d   : > { %2587 = vmatmul.f32.gmra.mxu0 %v11004_v56 }
 0x24e   : > { %v2314_v40 = vadd.f32 %v2313_v3, %v2198_v14  ;;  %2680 = vmatmul.f32.gmra.mxu1 %v7968_v11 }
 0x24f   : > { %3006 = vmatmul.f32.gmra.mxu3 %v11005_v2 }
 0x250   : > { %v8558_v41 = vadd.f32 %v2429_v20, %v2314_v40  ;;  %2797 = vmatmul.f32.gmra.mxu2 %v11006_v55 }
 0x252   : > { %v2000_v50 = vpop.f32.mrf.mxu0 }
 0x253   : > { %v2201_v53 = vpop.f32.mrf.mxu1  ;;  %v2318_v46 = vpop.f32.mrf.mxu2  ;;  %v2001_v37 = vadd.f32 %v2000_v50, %v11011_v35 }
 0x254   : > { %v2202_v19 = vadd.f32 %v2201_v53, %v1993_v10  ;;  %v2435_v45 = vpop.f32.mrf.mxu3  ;;  %v11016_v10 = vld [vmem:[#allocation155_spill] sm:$0xff]  ;;  %v11017_v53 = vld [vmem:[#allocation28_spill] sm:$0xff] }
 0x255   : > { %2591 = vmatmul.f32.gmra.mxu0 %v11008_v16 }
 0x256   : > { %v2319_v18 = vadd.f32 %v2318_v46, %v2202_v19  ;;  %2684 = vmatmul.f32.gmra.mxu1 %v11004_v56  ;;  %v11018_v19 = vld [vmem:[#allocation35_spill] sm:$0xff]  ;;  %v11019_v46 = vld [vmem:[#allocation173_spill] sm:$0xff] }
 0x257   : > { %3010 = vmatmul.f32.gmra.mxu3 %v11009_v12 }
 0x258   : > { %v8565_v42 = vadd.f32 %v2435_v45, %v2319_v18  ;;  %2805 = vmatmul.f32.gmra.mxu2 %v11010_v30 }
 0x25a   : > { %v2008_v7 = vpop.f32.mrf.mxu0 }
 0x25b   : > { %v2205_v57 = vpop.f32.mrf.mxu1  ;;  %v2323_v39 = vpop.f32.mrf.mxu2  ;;  %v2009_v48 = vadd.f32 %v2008_v7, %v11015_v31 }
 0x25c   : > { %v2206_v23 = vadd.f32 %v2205_v57, %v2001_v37  ;;  %v2441_v60 = vpop.f32.mrf.mxu3 }
 0x25d   : > { %2595 = vmatmul.f32.gmra.mxu0 %v11012_v17 }
 0x25e   : > { %v2324_v25 = vadd.f32 %v2323_v39, %v2206_v23  ;;  %2688 = vmatmul.f32.gmra.mxu1 %v11008_v16  ;;  %v11020_v23 = vld [vmem:[#allocation161_spill] sm:$0xff] }
 0x25f   : > { %3014 = vmatmul.f32.gmra.mxu3 %v11013_v4 }
 0x260   : > { %v8572_v33 = vadd.f32 %v2441_v60, %v2324_v25  ;;  %2813 = vmatmul.f32.gmra.mxu2 %v11014_v0  ;;  %v11021_v60 = vld [vmem:[#allocation32_spill] sm:$0xff]  ;;  %v11022_v25 = vld [vmem:[#allocation39_spill] sm:$0xff]  ;;  %v11023_v0 = vld [vmem:[#allocation178_spill] sm:$0xff] }
 0x262   : > { %v2016_v14 = vpop.f32.mrf.mxu0 }
 0x263   : > { %v2209_v3 = vpop.f32.mrf.mxu1  ;;  %v2328_v40 = vpop.f32.mrf.mxu2  ;;  %v2017_v45 = vadd.f32 %v2016_v14, %v11019_v46  ;;  %v11025_v46 = vld [vmem:[#allocation34_spill] sm:$0xff] }
 0x264   : > { %v2210_v20 = vadd.f32 %v2209_v3, %v2009_v48  ;;  %v2447_v55 = vpop.f32.mrf.mxu3 }
 0x265   : > { %2599 = vmatmul.f32.gmra.mxu0 %v11016_v10 }
 0x266   : > { %v2329_v6 = vadd.f32 %v2328_v40, %v2210_v20  ;;  %2692 = vmatmul.f32.gmra.mxu1 %v11012_v17 }
 0x267   : > { %3018 = vmatmul.f32.gmra.mxu3 %v11017_v53 }
 0x268   : > { %v8579_v50 = vadd.f32 %v2447_v55, %v2329_v6  ;;  %2821 = vmatmul.f32.gmra.mxu2 %v11018_v19  ;;  %v11024_v6 = vld [vmem:[#allocation165_spill] sm:$0xff] }
 0x26a   : > { %v2024_v18 = vpop.f32.mrf.mxu0 }
 0x26b   : > { %v2213_v30 = vpop.f32.mrf.mxu1  ;;  %v2333_v37 = vpop.f32.mrf.mxu2  ;;  %v2025_v31 = vadd.f32 %v2024_v18, %v11023_v0 }
 0x26c   : > { %v2214_v35 = vadd.f32 %v2213_v30, %v2017_v45  ;;  %v2453_v7 = vpop.f32.mrf.mxu3  ;;  %v11026_v45 = vld [vmem:[#allocation42_spill] sm:$0xff]  ;;  %v11027_v30 = vld [vmem:[#allocation183_spill] sm:$0xff] }
 0x26d   : > { %2603 = vmatmul.f32.gmra.mxu0 %v11020_v23 }
 0x26e   : > { %v2334_v57 = vadd.f32 %v2333_v37, %v2214_v35  ;;  %2696 = vmatmul.f32.gmra.mxu1 %v11016_v10  ;;  %v11056_v10 = vld [vmem:[#allocation16_spill] sm:$0xff] }
 0x26f   : > { %3022 = vmatmul.f32.gmra.mxu3 %v11021_v60 }
 0x270   : > { %v8586_v39 = vadd.f32 %v2453_v7, %v2334_v57  ;;  %2829 = vmatmul.f32.gmra.mxu2 %v11022_v25 }
 0x272   : > { %v2032_v48 = vpop.f32.mrf.mxu0 }
 0x273   : > { %v2217_v14 = vpop.f32.mrf.mxu1  ;;  %v2338_v20 = vpop.f32.mrf.mxu2  ;;  %v2033_v35 = vadd.f32 %v2032_v48, %v11027_v30 }
 0x274   : > { %v2218_v3 = vadd.f32 %v2217_v14, %v2025_v31  ;;  %v2459_v40 = vpop.f32.mrf.mxu3  ;;  %v11028_v31 = vld [vmem:[#allocation170_spill] sm:$0xff] }
 0x275   : > { %2607 = vmatmul.f32.gmra.mxu0 %v11024_v6 }
 0x276   : > { %v2339_v55 = vadd.f32 %v2338_v20, %v2218_v3  ;;  %2700 = vmatmul.f32.gmra.mxu1 %v11020_v23  ;;  %v11029_v3 = vld [vmem:[#allocation40_spill] sm:$0xff]  ;;  %v11030_v20 = vld [vmem:[#allocation47_spill] sm:$0xff]  ;;  %v11055_v23 = vld [vmem:[#allocation17_spill] sm:$0xff] }
 0x277   : > { %3026 = vmatmul.f32.gmra.mxu3 %v11025_v46 }
 0x278   : > { %v8593_v19 = vadd.f32 %v2459_v40, %v2339_v55  ;;  %2837 = vmatmul.f32.gmra.mxu2 %v11026_v45  ;;  %v11031_v40 = vld [vmem:[#allocation188_spill] sm:$0xff] }
 0x27a   : > { %v2040_v37 = vpop.f32.mrf.mxu0 }
 0x27b   : > { %v2221_v18 = vpop.f32.mrf.mxu1  ;;  %v2343_v57 = vpop.f32.mrf.mxu2  ;;  %v2041_v55 = vadd.f32 %v2040_v37, %v11031_v40 }
 0x27c   : > { %v2222_v7 = vadd.f32 %v2221_v18, %v2033_v35  ;;  %v2465_v25 = vpop.f32.mrf.mxu3 }
 0x27d   : > { %2611 = vmatmul.f32.gmra.mxu0 %v11028_v31 }
 0x27e   : > { %v2344_v0 = vadd.f32 %v2343_v57, %v2222_v7  ;;  %2704 = vmatmul.f32.gmra.mxu1 %v11024_v6  ;;  %v11033_v57 = vld [vmem:[#allocation44_spill] sm:$0xff] }
 0x27f   : > { %3030 = vmatmul.f32.gmra.mxu3 %v11029_v3 }
 0x280   : > { %v8600_v14 = vadd.f32 %v2465_v25, %v2344_v0  ;;  %2845 = vmatmul.f32.gmra.mxu2 %v11030_v20  ;;  %v11034_v25 = vld [vmem:[#allocation51_spill] sm:$0xff]  ;;  %v11035_v0 = vld [vmem:[#allocation193_spill] sm:$0xff] }
 0x282   : > { %v2048_v45 = vpop.f32.mrf.mxu0 }
 0x283   : > { %v2225_v48 = vpop.f32.mrf.mxu1  ;;  %v2348_v47 = vpop.f32.mrf.mxu2  ;;  %v2049_v20 = vadd.f32 %v2048_v45, %v11035_v0 }
 0x284   : > { %v2226_v30 = vadd.f32 %v2225_v48, %v2041_v55  ;;  %v2471_v35 = vpop.f32.mrf.mxu3 }
 0x285   : > { %2615 = vmatmul.f32.gmra.mxu0 %v11032_v8 }
 0x286   : > { %v2349_v18 = vadd.f32 %v2348_v47, %v2226_v30  ;;  %2708 = vmatmul.f32.gmra.mxu1 %v11028_v31  ;;  %v11036_v30 = vld [vmem:[#allocation46_spill] sm:$0xff] }
 0x287   : > { %3034 = vmatmul.f32.gmra.mxu3 %v11033_v57 }
 0x288   : > { %v8607_v7 = vadd.f32 %v2471_v35, %v2349_v18  ;;  %2853 = vmatmul.f32.gmra.mxu2 %v11034_v25  ;;  %v11037_v35 = vld [vmem:[#allocation54_spill] sm:$0xff] }
 0x28a   : > { %v2056_v62 = vpop.f32.mrf.mxu0 }
 0x28b   : > { %v2229_v37 = vpop.f32.mrf.mxu1  ;;  %v2353_v5 = vpop.f32.mrf.mxu2  ;;  %v2057_v18 = vadd.f32 %v2056_v62, %v8446_v58  ;;  %v285_v58 = vld [vmem:[%s10328_s1 + $0x1f8] sm:$0xff] }
 0x28c   : > { %v2230_v40 = vadd.f32 %v2229_v37, %v2049_v20  ;;  %v2477_v55 = vpop.f32.mrf.mxu3 }
 0x28d   : > { %2619 = vmatmul.f32.gmra.mxu0 %v8306_v15 }
 0x28e   : > { %v2354_v48 = vadd.f32 %v2353_v5, %v2230_v40  ;;  %2712 = vmatmul.f32.gmra.mxu1 %v11032_v8  ;;  %v11038_v40 = vld [vmem:[#allocation52_spill] sm:$0xff] }
 0x28f   : > { %3038 = vmatmul.f32.gmra.mxu3 %v11036_v30 }
 0x290   : > { %v8614_v47 = vadd.f32 %v2477_v55, %v2354_v48  ;;  %2861 = vmatmul.f32.gmra.mxu2 %v11037_v35  ;;  %v11039_v55 = vld [vmem:[#allocation58_spill] sm:$0xff]  ;;  %v8629_v48 = vand.u32 4294901760, %v285_v58 }
 0x292   : > { %v2064_v25 = vpop.f32.mrf.mxu0  ;;  %3543 = vmatpush.msra.mxu0 %v8629_v48  ;;  %3994 = vmatpush.msra.mxu3 %v8629_v48 }
 0x293   : > { %v2233_v45 = vpop.f32.mrf.mxu1  ;;  %v2358_v44 = vpop.f32.mrf.mxu2  ;;  %v2065_v62 = vadd.f32 %v2064_v25, %v8474_v22 }
 0x294   : > { %v2234_v0 = vadd.f32 %v2233_v45, %v2057_v18  ;;  %v2483_v20 = vpop.f32.mrf.mxu3 }
 0x295   : > { %2623 = vmatmul.f32.gmra.mxu0 %v8342_v49 }
 0x296   : > { %v2359_v37 = vadd.f32 %v2358_v44, %v2234_v0  ;;  %2716 = vmatmul.f32.gmra.mxu1 %v8306_v15 }
 0x297   : > { %3042 = vmatmul.f32.gmra.mxu3 %v11038_v40 }
 0x298   : > { %v8621_v5 = vadd.f32 %v2483_v20, %v2359_v37  ;;  %2869 = vmatmul.f32.gmra.mxu2 %v11039_v55  ;;  %v8632_v20 = vsub.f32 %v285_v58, %v8629_v48  ;;  %v11040_v55 = vld [vmem:[#allocation56_spill] sm:$0xff] }
 0x29a   : > { %v2072_v35 = vpop.f32.mrf.mxu0  ;;  %v10634_v22 = vand.u32 4294901760, %v8632_v20  ;;  %3866 = vmatpush.msra.mxu2 %v8632_v20 }
 0x29b   : > { %v2237_v44 = vpop.f32.mrf.mxu1  ;;  %v2363_v45 = vpop.f32.mrf.mxu2 }
 0x29c   : > { %v2238_v18 = vadd.f32 %v2237_v44, %v2065_v62  ;;  %v2489_v0 = vpop.f32.mrf.mxu3  ;;  %v3706_v58 = vsub.f32 %v8632_v20, %v10634_v22  ;;  %v11041_v62 = vld [vmem:[#allocation62_spill] sm:$0xff]  ;;  %v283_v44 = vld [vmem:[%s10328_s1 + $0x1e8] sm:$0xff] }
 0x29d   : > { %2627 = vmatmul.f32.gmra.mxu0 %v8383_v54  ;;  %v8651_v36 = vand.u32 4294901760, %v283_v44 }
 0x29e   : > { %v2364_v37 = vadd.f32 %v2363_v45, %v2238_v18  ;;  %2720 = vmatmul.f32.gmra.mxu1 %v8342_v49  ;;  %v2073_v18 = vadd.f32 %v2072_v35, %v8498_v13  ;;  %v3707_v45 = vand.u32 4294901760, %v3706_v58  ;;  %v11042_v58 = vld [vmem:[#allocation60_spill] sm:$0xff] }
 0x29f   : > { %3046 = vmatmul.f32.gmra.mxu3 %v11040_v55  ;;  %v8654_v24 = vsub.f32 %v283_v44, %v8651_v36  ;;  %3545 = vmatpush.msra.mxu0 %v8651_v36 }
 0x2a0   : > { %v8640_v25 = vadd.f32 %v2489_v0, %v2364_v37  ;;  %2877 = vmatmul.f32.gmra.mxu2 %v11041_v62  ;;  %3708 = vmatpush.msra.mxu1 %v3707_v45 }
 0x2a1   : > { %3996 = vmatpush.msra.mxu3 %v8651_v36  ;;  %v10640_v13 = vand.u32 4294901760, %v8654_v24  ;;  %3869 = vmatpush.msra.mxu2 %v8654_v24 }
 0x2a2   : > { %v2080_v28 = vpop.f32.mrf.mxu0 }
 0x2a3   : > { %v2241_v0 = vpop.f32.mrf.mxu1  ;;  %v2368_v26 = vpop.f32.mrf.mxu2  ;;  %v3712_v44 = vsub.f32 %v8654_v24, %v10640_v13  ;;  %v2081_v45 = vadd.f32 %v2080_v28, %v8517_v43 }
 0x2a4   : > { %v2242_v37 = vadd.f32 %v2241_v0, %v2073_v18  ;;  %v2495_v63 = vpop.f32.mrf.mxu3  ;;  %v11043_v18 = vld [vmem:[#allocation66_spill] sm:$0xff] }
 0x2a5   : > { %2631 = vmatmul.f32.gmra.mxu0 %v8424_v38  ;;  %v3713_v0 = vand.u32 4294901760, %v3712_v44  ;;  %v11044_v44 = vld [vmem:[#allocation64_spill] sm:$0xff] }
 0x2a6   : > { %v2369_v62 = vadd.f32 %v2368_v26, %v2242_v37  ;;  %2724 = vmatmul.f32.gmra.mxu1 %v8383_v54  ;;  %v281_v26 = vld [vmem:[%s10328_s1 + $0x1d8] sm:$0xff] }
 0x2a7   : > { %3050 = vmatmul.f32.gmra.mxu3 %v11042_v58  ;;  %v8673_v37 = vand.u32 4294901760, %v281_v26  ;;  %3714 = vmatpush.msra.mxu1 %v3713_v0 }
 0x2a8   : > { %v8662_v35 = vadd.f32 %v2495_v63, %v2369_v62  ;;  %2885 = vmatmul.f32.gmra.mxu2 %v11043_v18 }
 0x2a9   : > { %v8676_v49 = vsub.f32 %v281_v26, %v8673_v37  ;;  %3547 = vmatpush.msra.mxu0 %v8673_v37  ;;  %3998 = vmatpush.msra.mxu3 %v8673_v37 }
 0x2aa   : > { %v2088_v22 = vpop.f32.mrf.mxu0 }
 0x2ab   : > { %v2245_v63 = vpop.f32.mrf.mxu1  ;;  %v2373_v54 = vpop.f32.mrf.mxu2  ;;  %v10647_v28 = vand.u32 4294901760, %v8676_v49  ;;  %3872 = vmatpush.msra.mxu2 %v8676_v49  ;;  %v2089_v0 = vadd.f32 %v2088_v22, %v8534_v61  ;;  %v11046_v61 = vld [vmem:[#allocation6_spill] sm:$0xff] }
 0x2ac   : > { %v2246_v62 = vadd.f32 %v2245_v63, %v2081_v45  ;;  %v2501_v9 = vpop.f32.mrf.mxu3  ;;  %v11045_v45 = vld [vmem:[#allocation70_spill] sm:$0xff] }
 0x2ad   : > { %2635 = vmatmul.f32.gmra.mxu0 %v8456_v21  ;;  %v3718_v26 = vsub.f32 %v8676_v49, %v10647_v28  ;;  %v11048_v28 = vld [vmem:[#allocation7_spill] sm:$0xff] }
 0x2ae   : > { %v2374_v18 = vadd.f32 %v2373_v54, %v2246_v62  ;;  %2728 = vmatmul.f32.gmra.mxu1 %v8424_v38  ;;  %v279_v54 = vld [vmem:[%s10328_s1 + $0x1c8] sm:$0xff] }
 0x2af   : > { %3054 = vmatmul.f32.gmra.mxu3 %v11044_v44  ;;  %v3719_v63 = vand.u32 4294901760, %v3718_v26  ;;  %v8695_v62 = vand.u32 4294901760, %v279_v54 }
 0x2b0   : > { %v8684_v43 = vadd.f32 %v2501_v9, %v2374_v18  ;;  %2893 = vmatmul.f32.gmra.mxu2 %v11045_v45 }
 0x2b1   : > { %3720 = vmatpush.msra.mxu1 %v3719_v63  ;;  %v8698_v15 = vsub.f32 %v279_v54, %v8695_v62  ;;  %3549 = vmatpush.msra.mxu0 %v8695_v62 }
 0x2b2   : > { %v2576_v9 = vpop.f32.mrf.mxu0  ;;  %4000 = vmatpush.msra.mxu3 %v8695_v62 }
 0x2b3   : > { %v2249_v13 = vpop.f32.mrf.mxu1  ;;  %v2378_v38 = vpop.f32.mrf.mxu2  ;;  %v10646_v22 = vand.u32 4294901760, %v8698_v15  ;;  %3875 = vmatpush.msra.mxu2 %v8698_v15 }
 0x2b4   : > { %v2250_v18 = vadd.f32 %v2249_v13, %v2089_v0  ;;  %v2507_v27 = vpop.f32.mrf.mxu3 }
 0x2b5   : > { %3108 = vmatmul.f32.vlgmr.msrb.gmra.mxu0 %v11046_v61  ;;  %v3724_v26 = vsub.f32 %v8698_v15, %v10646_v22 }
 0x2b6   : > { %v2379_v45 = vadd.f32 %v2378_v38, %v2250_v18  ;;  %2732 = vmatmul.f32.gmra.mxu1 %v8456_v21  ;;  %v277_v38 = vld [vmem:[%s10328_s1 + $0x1b8] sm:$0xff]  ;;  %v2577_v21 = vadd.f32 %v2576_v9, %v8544_v32 }
 0x2b7   : > { %3478 = vmatmul.f32.vlgmr.msrb.gmra.mxu3 %v10997_v52  ;;  %v3725_v54 = vand.u32 4294901760, %v3724_v26  ;;  %v8716_v0 = vand.u32 4294901760, %v277_v38 }
 0x2b8   : > { %v8706_v13 = vadd.f32 %v2507_v27, %v2379_v45  ;;  %3381 = vmatmul.f32.vlgmr.msrb.gmra.mxu2 %v10997_v52  ;;  %v11047_v52 = vld [vmem:[#allocation9_spill] sm:$0xff] }
 0x2b9   : > { %3726 = vmatpush.msra.mxu1 %v3725_v54  ;;  %v8719_v45 = vsub.f32 %v277_v38, %v8716_v0  ;;  %3551 = vmatpush.msra.mxu0 %v8716_v0  ;;  %v275_v54 = vld [vmem:[%s10328_s1 + $0x1a8] sm:$0xff] }
 0x2ba   : > { %v2580_v63 = vpop.f32.mrf.mxu0  ;;  %4002 = vmatpush.msra.mxu3 %v8716_v0 }
 0x2bb   : > { %v2673_v18 = vpop.f32.mrf.mxu1  ;;  %v2774_v61 = vpop.f32.mrf.mxu2  ;;  %v10652_v26 = vand.u32 4294901760, %v8719_v45  ;;  %3878 = vmatpush.msra.mxu2 %v8719_v45 }
 0x2bc   : > { %v2995_v27 = vpop.f32.mrf.mxu3 }
 0x2bd   : > { %v8722_v22 = vadd.f32 %v2995_v27, %v2774_v61  ;;  %3113 = vmatmul.f32.gmra.mxu0 %v11047_v52  ;;  %v3730_v38 = vsub.f32 %v8719_v45, %v10652_v26  ;;  %v8739_v61 = vadd.f32 %v2673_v18, %v2577_v21  ;;  %v8741_v52 = vand.u32 4294901760, %v275_v54  ;;  %v11052_v21 = vld [vmem:[#allocation13_spill] sm:$0xff] }
 0x2be   : > { %3222 = vmatmul.f32.vlgmr.msrb.gmra.mxu1 %v11048_v28  ;;  %v2581_v28 = vadd.f32 %v2580_v63, %v8551_v29  ;;  %v11053_v29 = vld [vmem:[#allocation12_spill] sm:$0xff] }
 0x2bf   : > { %3482 = vmatmul.f32.gmra.mxu3 %v11000_v51  ;;  %11049 = vst [vmem:[#allocation5_spill] sm:$0xff] %v8739_v61  ;;  %v3731_v27 = vand.u32 4294901760, %v3730_v38  ;;  %3553 = vmatpush.msra.mxu0 %v8741_v52  ;;  %v5260_v38 = vrot.slane %v8739_v61, 2 }
 0x2c0   : > { %3385 = vmatmul.f32.gmra.mxu2 %v11000_v51  ;;  %v8748_v51 = vsub.f32 %v275_v54, %v8741_v52  ;;  %4004 = vmatpush.msra.mxu3 %v8741_v52 }
 0x2c1   : > { %3732 = vmatpush.msra.mxu1 %v3731_v27 }
 0x2c2   : > { %v8743_v32 = vpop.f32.mrf.mxu0  ;;  %v10655_v54 = vand.u32 4294901760, %v8748_v51  ;;  %3881 = vmatpush.msra.mxu2 %v8748_v51 }
 0x2c3   : > { %v2677_v9 = vpop.f32.mrf.mxu1  ;;  %v2782_v31 = vpop.f32.mrf.mxu2 }
 0x2c4   : > { %v8745_v8 = vadd.f32 %v2677_v9, %v2581_v28  ;;  %v2999_v26 = vpop.f32.mrf.mxu3  ;;  %v273_v28 = vld [vmem:[%s10328_s1 + $0x198] sm:$0xff] }
 0x2c5   : > { %v8751_v6 = vadd.f32 %v2999_v26, %v2782_v31  ;;  %3118 = vmatmul.f32.gmra.mxu0 %v11052_v21  ;;  %v3736_v26 = vsub.f32 %v8748_v51, %v10655_v54  ;;  %v8775_v27 = vand.u32 4294901760, %v273_v28 }
 0x2c6   : > { %11050 = vst [vmem:[#allocation11_spill] sm:$0xff] %v8745_v8  ;;  %3228 = vmatmul.f32.gmra.mxu1 %v11053_v29  ;;  %v5261_v63 = vrot.slane %v8745_v8, 2  ;;  %v10654_v18 = vrot.slane %v8745_v8, 1  ;;  %v5424_v29 = vrot.slane %v8745_v8, 3 }
 0x2c7   : > { %11051 = vst [vmem:[#allocation8_spill] sm:$0xff] %v8751_v6  ;;  %3486 = vmatmul.f32.gmra.mxu3 %v11002_v59  ;;  %3555 = vmatpush.msra.mxu0 %v8775_v27 }
 0x2c8   : > { %5286 = vrot.lane.b32.xlu2 %v5261_v63, %s6296_s4  ;;  %5197 = vrot.lane.b32.xlu0 %v10654_v18, %s6297_s5  ;;  %v5262_v31 = vsel %vm5259_vm0, %v5260_v38, %v5261_v63  ;;  %v3737_v63 = vand.u32 4294901760, %v3736_v26  ;;  %v8779_v18 = vsub.f32 %v273_v28, %v8775_v27 }
 0x2c9   : > { %5284 = vrot.lane.b32.xlu1 %v5262_v31, %s6296_s4  ;;  %3389 = vmatmul.f32.gmra.mxu2 %v11002_v59  ;;  %v5423_v59 = vrot.slane %v8739_v61, 3 }
 0x2ca   : > { %v2588_v9 = vpop.f32.mrf.mxu0  ;;  %4006 = vmatpush.msra.mxu3 %v8775_v27  ;;  %3738 = vmatpush.msra.mxu1 %v3737_v63  ;;  %v10659_v26 = vand.u32 4294901760, %v8779_v18 }
 0x2cb   : > { %v2681_v21 = vpop.f32.mrf.mxu1  ;;  %v2790_v38 = vpop.f32.mrf.mxu2  ;;  %v5425_v17 = vsel %vm5422_vm1, %v5423_v59, %v5424_v29  ;;  %3884 = vmatpush.msra.mxu2 %v8779_v18 }
 0x2cc   : > { %v3003_v31 = vpop.f32.mrf.mxu3  ;;  %v3742_v28 = vsub.f32 %v8779_v18, %v10659_v26 }
 0x2cd   : > { %v8783_v54 = vadd.f32 %v3003_v31, %v2790_v38  ;;  %3123 = vmatmul.f32.gmra.mxu0 %v11055_v23  ;;  %v2589_v23 = vadd.f32 %v2588_v9, %v8565_v42  ;;  %v11060_v42 = vld [vmem:[#allocation19_spill] sm:$0xff] }
 0x2ce   : > { %3234 = vmatmul.f32.gmra.mxu1 %v11056_v10  ;;  %v271_v10 = vld [vmem:[%s10328_s1 + $0x188] sm:$0xff]  ;;  %v3743_v63 = vand.u32 4294901760, %v3742_v28 }
 0x2cf   : > { %11054 = vst [vmem:[#allocation15_spill] sm:$0xff] %v8783_v54  ;;  %3490 = vmatmul.f32.gmra.mxu3 %v11005_v2  ;;  %v8802_v38 = vand.u32 4294901760, %v271_v10 }
 0x2d0   : > { %5449 = vrot.lane.b32.xlu0 %v5424_v29, %s6298_s9  ;;  %5447 = vrot.lane.b32.xlu2 %v5425_v17, %s6298_s9 }
 0x2d1   : > { %3393 = vmatmul.f32.gmra.mxu2 %v11005_v2  ;;  %3744 = vmatpush.msra.mxu1 %v3743_v63  ;;  %v8809_v16 = vsub.f32 %v271_v10, %v8802_v38  ;;  %v11059_v2 = vld [vmem:[#allocation21_spill] sm:$0xff]  ;;  %v11061_v63 = vrot.slane %v8745_v8, 1 }
 0x2d2   : > { %v8804_v29 = vpop.f32.mrf.mxu0  ;;  %3557 = vmatpush.msra.mxu0 %v8802_v38  ;;  %4008 = vmatpush.msra.mxu3 %v8802_v38 }
 0x2d3   : > { %v2685_v17 = vpop.f32.mrf.mxu1  ;;  %v2798_v59 = vpop.f32.mrf.mxu2  ;;  %v10667_v10 = vand.u32 4294901760, %v8809_v16  ;;  %3887 = vmatpush.msra.mxu2 %v8809_v16 }
 0x2d4   : > { %v8806_v31 = vadd.f32 %v2685_v17, %v2589_v23  ;;  %v3007_v26 = vpop.f32.mrf.mxu3  ;;  %v5171_v23 = vrot.slane %v8739_v61, 1  ;;  %v11072_v61 = vld [vmem:[#allocation33_spill] sm:$0xff] }
 0x2d5   : > { %v8812_v56 = vadd.f32 %v3007_v26, %v2798_v59  ;;  %3128 = vmatmul.f32.gmra.mxu0 %v11059_v2  ;;  %v2585_v26 = vadd.f32 %v8743_v32, %v8558_v41  ;;  %v3748_v59 = vsub.f32 %v8809_v16, %v10667_v10  ;;  %v269_v41 = vld [vmem:[%s10328_s1 + $0x178] sm:$0xff] }
 0x2d6   : > { %11057 = vst [vmem:[#allocation10_spill] sm:$0xff] %v8806_v31  ;;  %3240 = vmatmul.f32.gmra.mxu1 %v11060_v42  ;;  %v10662_v9 = vrot.slane %v8806_v31, 3  ;;  %v5175_v28 = vrot.slane %v8806_v31, 1  ;;  %v5173_v17 = vsel %vm5170_vm2, %v5171_v23, %v11061_v63  ;;  %v8842_v2 = vand.u32 4294901760, %v269_v41 }
 0x2d7   : > { %11058 = vst [vmem:[#allocation18_spill] sm:$0xff] %v8812_v56  ;;  %v8839_v32 = vadd.f32 %v2681_v21, %v2585_v26  ;;  %3494 = vmatmul.f32.gmra.mxu3 %v11009_v12  ;;  %v3749_v63 = vand.u32 4294901760, %v3748_v59  ;;  %v5264_v11 = vrot.slane %v8806_v31, 2  ;;  %v11065_v26 = vld [vmem:[#allocation24_spill] sm:$0xff]  ;;  %v11074_v6 = vrot.slane %v8806_v31, 3 }
 0x2d8   : > { %5453 = vrot.lane.b32.xlu2 %v10662_v9, %s6298_s9  ;;  %5201 = vrot.lane.b32.xlu1 %v5175_v28, %s6297_s5  ;;  %v8846_v34 = vsub.f32 %v269_v41, %v8842_v2 }
 0x2d9   : > { %5195 = vrot.lane.b32.xlu0 %v5173_v17, %s6297_s5  ;;  %3397 = vmatmul.f32.gmra.mxu2 %v11009_v12  ;;  %11062 = vst [vmem:[#allocation14_spill] sm:$0xff] %v8839_v32  ;;  %v11064_v12 = vld [vmem:[#allocation25_spill] sm:$0xff]  ;;  %v5263_v59 = vrot.slane %v8839_v32, 2 }
 0x2da   : > { %v2596_v42 = vpop.f32.mrf.mxu0  ;;  %3559 = vmatpush.msra.mxu0 %v8842_v2  ;;  %4010 = vmatpush.msra.mxu3 %v8842_v2  ;;  %v10670_v10 = vand.u32 4294901760, %v8846_v34 }
 0x2db   : > { %v2689_v23 = vpop.f32.mrf.mxu1  ;;  %v2806_v17 = vpop.f32.mrf.mxu2  ;;  %3750 = vmatpush.msra.mxu1 %v3749_v63  ;;  %3890 = vmatpush.msra.mxu2 %v8846_v34  ;;  %v5265_v41 = vsel %vm5259_vm0, %v5263_v59, %v5264_v11  ;;  %v267_v63 = vld [vmem:[%s10328_s1 + $0x168] sm:$0xff] }
 0x2dc   : > { %v3011_v9 = vpop.f32.mrf.mxu3 }
 0x2dd   : > { %v8850_v21 = vadd.f32 %v3011_v9, %v2806_v17  ;;  %3133 = vmatmul.f32.gmra.mxu0 %v11064_v12  ;;  %v3754_v9 = vsub.f32 %v8846_v34, %v10670_v10  ;;  %v2597_v17 = vadd.f32 %v2596_v42, %v8579_v50  ;;  %v11068_v50 = vld [vmem:[#allocation29_spill] sm:$0xff]  ;;  %v11069_v42 = vld [vmem:[#allocation26_spill] sm:$0xff] }
 0x2de   : > { %3246 = vmatmul.f32.gmra.mxu1 %v11065_v26  ;;  %v8869_v26 = vand.u32 4294901760, %v267_v63 }
 0x2df   : > { %11063 = vst [vmem:[#allocation23_spill] sm:$0xff] %v8850_v21  ;;  %3498 = vmatmul.f32.gmra.mxu3 %v11013_v4  ;;  %v3755_v12 = vand.u32 4294901760, %v3754_v9 }
 0x2e0   : > { %5290 = vrot.lane.b32.xlu1 %v5264_v11, %s6296_s4  ;;  %v8876_v21 = vsub.f32 %v267_v63, %v8869_v26  ;;  %3561 = vmatpush.msra.mxu0 %v8869_v26  ;;  %v2593_v63 = vadd.f32 %v8804_v29, %v8572_v33  ;;  %v265_v33 = vld [vmem:[%s10328_s1 + $0x158] sm:$0xff] }
 0x2e1   : > { %5288 = vrot.lane.b32.xlu0 %v5265_v41, %s6296_s4  ;;  %3401 = vmatmul.f32.gmra.mxu2 %v11013_v4  ;;  %v5174_v4 = vrot.slane %v8839_v32, 1  ;;  %v8905_v29 = vand.u32 4294901760, %v265_v33 }
 0x2e2   : > { %v8871_v11 = vpop.f32.mrf.mxu0  ;;  %3756 = vmatpush.msra.mxu1 %v3755_v12  ;;  %4012 = vmatpush.msra.mxu3 %v8869_v26  ;;  %v10671_v12 = vand.u32 4294901760, %v8876_v21 }
 0x2e3   : > { %v2693_v59 = vpop.f32.mrf.mxu1  ;;  %v2814_v10 = vpop.f32.mrf.mxu2  ;;  %3893 = vmatpush.msra.mxu2 %v8876_v21  ;;  %3563 = vmatpush.msra.mxu0 %v8905_v29 }
 0x2e4   : > { %v8873_v1 = vadd.f32 %v2693_v59, %v2597_v17  ;;  %v3015_v41 = vpop.f32.mrf.mxu3  ;;  %v8894_v59 = vadd.f32 %v2689_v23, %v2593_v63  ;;  %4014 = vmatpush.msra.mxu3 %v8905_v29 }
 0x2e5   : > { %v8879_v56 = vadd.f32 %v3015_v41, %v2814_v10  ;;  %3138 = vmatmul.f32.gmra.mxu0 %v11068_v50  ;;  %v5176_v10 = vsel %vm5170_vm2, %v5174_v4, %v5175_v28  ;;  %v3760_v41 = vsub.f32 %v8876_v21, %v10671_v12 }
 0x2e6   : > { %11066 = vst [vmem:[#allocation158_spill] sm:$0xff] %v8873_v1  ;;  %3252 = vmatmul.f32.gmra.mxu1 %v11069_v42  ;;  %v5178_v9 = vrot.slane %v8873_v1, 1  ;;  %v5267_v17 = vrot.slane %v8873_v1, 2  ;;  %v5430_v63 = vrot.slane %v8873_v1, 3  ;;  %v5429_v1 = vrot.slane %v8894_v59, 3 }
 0x2e7   : > { %11067 = vst [vmem:[#allocation20_spill] sm:$0xff] %v8879_v56  ;;  %3502 = vmatmul.f32.gmra.mxu3 %v11017_v53  ;;  %v3761_v23 = vand.u32 4294901760, %v3760_v41  ;;  %v5426_v56 = vrot.slane %v8839_v32, 3  ;;  %v11073_v41 = vld [vmem:[#allocation31_spill] sm:$0xff] }
 0x2e8   : > { %5205 = vrot.lane.b32.xlu2 %v5178_v9, %s6297_s5  ;;  %5199 = vrot.lane.b32.xlu1 %v5176_v10, %s6297_s5  ;;  %11070 = vst [vmem:[#allocation27_spill] sm:$0xff] %v8894_v59  ;;  %v8909_v10 = vsub.f32 %v265_v33, %v8905_v29 }
 0x2e9   : > { %5294 = vrot.lane.b32.xlu0 %v5267_v17, %s6296_s4  ;;  %3405 = vmatmul.f32.gmra.mxu2 %v11017_v53  ;;  %v5177_v53 = vrot.slane %v8894_v59, 1 }
 0x2ea   : > { %v2604_v28 = vpop.f32.mrf.mxu0  ;;  %3762 = vmatpush.msra.mxu1 %v3761_v23  ;;  %v10676_v33 = vand.u32 4294901760, %v8909_v10  ;;  %3896 = vmatpush.msra.mxu2 %v8909_v10 }
 0x2eb   : > { %v2697_v4 = vpop.f32.mrf.mxu1  ;;  %v2822_v50 = vpop.f32.mrf.mxu2  ;;  %v5179_v54 = vsel %vm5170_vm2, %v5177_v53, %v5178_v9 }
 0x2ec   : > { %v3019_v42 = vpop.f32.mrf.mxu3  ;;  %v3766_v23 = vsub.f32 %v8909_v10, %v10676_v33 }
 0x2ed   : > { %v8913_v12 = vadd.f32 %v3019_v42, %v2822_v50  ;;  %3143 = vmatmul.f32.gmra.mxu0 %v11072_v61  ;;  %v5428_v50 = vsel %vm5422_vm1, %v5426_v56, %v11074_v6  ;;  %v5431_v61 = vsel %vm5422_vm1, %v5429_v1, %v5430_v63  ;;  %v263_v56 = vld [vmem:[%s10328_s1 + $0x148] sm:$0xff]  ;;  %v2605_v6 = vadd.f32 %v2604_v28, %v8593_v19  ;;  %v11077_v19 = vld [vmem:[#allocation37_spill] sm:$0xff] }
 0x2ee   : > { %3258 = vmatmul.f32.gmra.mxu1 %v11073_v41  ;;  %v8939_v9 = vand.u32 4294901760, %v263_v56  ;;  %v11078_v28 = vld [vmem:[#allocation36_spill] sm:$0xff] }
 0x2ef   : > { %11071 = vst [vmem:[#allocation163_spill] sm:$0xff] %v8913_v12  ;;  %3506 = vmatmul.f32.gmra.mxu3 %v11021_v60 }
 0x2f0   : > { %5203 = vrot.lane.b32.xlu2 %v5179_v54, %s6297_s5  ;;  %5451 = vrot.lane.b32.xlu1 %v5428_v50, %s6298_s9  ;;  %v3767_v54 = vand.u32 4294901760, %v3766_v23 }
 0x2f1   : > { %5455 = vrot.lane.b32.xlu0 %v5431_v61, %s6298_s9  ;;  %3409 = vmatmul.f32.gmra.mxu2 %v11021_v60  ;;  %v8946_v61 = vsub.f32 %v263_v56, %v8939_v9  ;;  %v5266_v60 = vrot.slane %v8894_v59, 2  ;;  %v2601_v56 = vadd.f32 %v8871_v11, %v8586_v39 }
 0x2f2   : > { %v8941_v1 = vpop.f32.mrf.mxu0  ;;  %3768 = vmatpush.msra.mxu1 %v3767_v54  ;;  %3565 = vmatpush.msra.mxu0 %v8939_v9 }
 0x2f3   : > { %v2701_v42 = vpop.f32.mrf.mxu1  ;;  %v2830_v41 = vpop.f32.mrf.mxu2  ;;  %4016 = vmatpush.msra.mxu3 %v8939_v9  ;;  %v5268_v54 = vsel %vm5259_vm0, %v5266_v60, %v5267_v17  ;;  %3899 = vmatpush.msra.mxu2 %v8946_v61  ;;  %v261_v17 = vld [vmem:[%s10328_s1 + $0x138] sm:$0xff] }
 0x2f4   : > { %v8943_v53 = vadd.f32 %v2701_v42, %v2605_v6  ;;  %v3023_v50 = vpop.f32.mrf.mxu3  ;;  %v10677_v6 = vand.u32 4294901760, %v8946_v61  ;;  %v8974_v39 = vand.u32 4294901760, %v261_v17 }
 0x2f5   : > { %v8949_v33 = vadd.f32 %v3023_v50, %v2830_v41  ;;  %3148 = vmatmul.f32.gmra.mxu0 %v11077_v19  ;;  %v8971_v41 = vadd.f32 %v2697_v4, %v2601_v56  ;;  %v11082_v56 = vld [vmem:[#allocation38_spill] sm:$0xff] }
 0x2f6   : > { %11075 = vst [vmem:[#allocation22_spill] sm:$0xff] %v8943_v53  ;;  %3264 = vmatmul.f32.gmra.mxu1 %v11078_v28  ;;  %v5433_v23 = vrot.slane %v8943_v53, 3  ;;  %v3772_v42 = vsub.f32 %v8946_v61, %v10677_v6  ;;  %v5181_v28 = vrot.slane %v8943_v53, 1  ;;  %3567 = vmatpush.msra.mxu0 %v8974_v39 }
 0x2f7   : > { %11076 = vst [vmem:[#allocation30_spill] sm:$0xff] %v8949_v33  ;;  %3510 = vmatmul.f32.gmra.mxu3 %v11025_v46  ;;  %v5180_v6 = vrot.slane %v8971_v41, 1 }
 0x2f8   : > { %5292 = vrot.lane.b32.xlu2 %v5268_v54, %s6296_s4  ;;  %5457 = vrot.lane.b32.xlu1 %v5430_v63, %s6298_s9  ;;  %11079 = vst [vmem:[#allocation168_spill] sm:$0xff] %v8971_v41  ;;  %v3773_v50 = vand.u32 4294901760, %v3772_v42  ;;  %v8978_v54 = vsub.f32 %v261_v17, %v8974_v39  ;;  %v5270_v42 = vrot.slane %v8943_v53, 2 }
 0x2f9   : > { %5461 = vrot.lane.b32.xlu0 %v5433_v23, %s6298_s9  ;;  %3413 = vmatmul.f32.gmra.mxu2 %v11025_v46  ;;  %v11081_v46 = vld [vmem:[#allocation41_spill] sm:$0xff]  ;;  %v5182_v17 = vsel %vm5170_vm2, %v5180_v6, %v5181_v28 }
 0x2fa   : > { %v2612_v11 = vpop.f32.mrf.mxu0  ;;  %4018 = vmatpush.msra.mxu3 %v8974_v39  ;;  %3774 = vmatpush.msra.mxu1 %v3773_v50  ;;  %v10678_v33 = vand.u32 4294901760, %v8978_v54 }
 0x2fb   : > { %v2705_v63 = vpop.f32.mrf.mxu1  ;;  %v2838_v60 = vpop.f32.mrf.mxu2  ;;  %3902 = vmatpush.msra.mxu2 %v8978_v54 }
 0x2fc   : > { %v3027_v19 = vpop.f32.mrf.mxu3  ;;  %v3778_v50 = vsub.f32 %v8978_v54, %v10678_v33 }
 0x2fd   : > { %v8982_v4 = vadd.f32 %v3027_v19, %v2838_v60  ;;  %3153 = vmatmul.f32.gmra.mxu0 %v11081_v46  ;;  %v259_v60 = vld [vmem:[%s10328_s1 + $0x128] sm:$0xff]  ;;  %v2613_v19 = vadd.f32 %v2612_v11, %v8607_v7  ;;  %v5269_v7 = vrot.slane %v8971_v41, 2  ;;  %v11085_v11 = vld [vmem:[#allocation45_spill] sm:$0xff] }
 0x2fe   : > { %3270 = vmatmul.f32.gmra.mxu1 %v11082_v56  ;;  %v3779_v46 = vand.u32 4294901760, %v3778_v50  ;;  %v9003_v56 = vand.u32 4294901760, %v259_v60  ;;  %v11086_v50 = vld [vmem:[#allocation43_spill] sm:$0xff] }
 0x2ff   : > { %11080 = vst [vmem:[#allocation28_spill] sm:$0xff] %v8982_v4  ;;  %3514 = vmatmul.f32.gmra.mxu3 %v11029_v3 }
 0x300   : > { %5298 = vrot.lane.b32.xlu2 %v5270_v42, %s6296_s4  ;;  %5209 = vrot.lane.b32.xlu1 %v5181_v28, %s6297_s5  ;;  %v9010_v53 = vsub.f32 %v259_v60, %v9003_v56 }
 0x301   : > { %5207 = vrot.lane.b32.xlu0 %v5182_v17, %s6297_s5  ;;  %3417 = vmatmul.f32.gmra.mxu2 %v11029_v3  ;;  %v5432_v3 = vrot.slane %v8971_v41, 3 }
 0x302   : > { %v9005_v6 = vpop.f32.mrf.mxu0  ;;  %3780 = vmatpush.msra.mxu1 %v3779_v46  ;;  %3569 = vmatpush.msra.mxu0 %v9003_v56  ;;  %v10681_v46 = vand.u32 4294901760, %v9010_v53 }
 0x303   : > { %v2709_v28 = vpop.f32.mrf.mxu1  ;;  %v2846_v33 = vpop.f32.mrf.mxu2  ;;  %4020 = vmatpush.msra.mxu3 %v9003_v56  ;;  %v5434_v60 = vsel %vm5422_vm1, %v5432_v3, %v5433_v23  ;;  %3905 = vmatpush.msra.mxu2 %v9010_v53  ;;  %v257_v23 = vld [vmem:[%s10328_s1 + $0x118] sm:$0xff] }
 0x304   : > { %v9007_v4 = vadd.f32 %v2709_v28, %v2613_v19  ;;  %v3031_v17 = vpop.f32.mrf.mxu3  ;;  %v5271_v28 = vsel %vm5259_vm0, %v5269_v7, %v5270_v42 }
 0x305   : > { %v9013_v12 = vadd.f32 %v3031_v17, %v2846_v33  ;;  %3158 = vmatmul.f32.gmra.mxu0 %v11085_v11  ;;  %v2609_v33 = vadd.f32 %v8941_v1, %v8600_v14  ;;  %v3784_v17 = vsub.f32 %v9010_v53, %v10681_v46  ;;  %v9040_v14 = vand.u32 4294901760, %v257_v23 }
 0x306   : > { %11083 = vst [vmem:[#allocation35_spill] sm:$0xff] %v9007_v4  ;;  %3276 = vmatmul.f32.gmra.mxu1 %v11086_v50  ;;  %v5184_v19 = vrot.slane %v9007_v4, 1 }
 0x307   : > { %11084 = vst [vmem:[#allocation173_spill] sm:$0xff] %v9013_v12  ;;  %v9037_v42 = vadd.f32 %v2705_v63, %v2609_v33  ;;  %3518 = vmatmul.f32.gmra.mxu3 %v11033_v57  ;;  %v3785_v7 = vand.u32 4294901760, %v3784_v17  ;;  %3571 = vmatpush.msra.mxu0 %v9040_v14  ;;  %v11090_v33 = vld [vmem:[#allocation48_spill] sm:$0xff]  ;;  %v5436_v17 = vrot.slane %v9007_v4, 3 }
 0x308   : > { %5459 = vrot.lane.b32.xlu2 %v5434_v60, %s6298_s9  ;;  %5296 = vrot.lane.b32.xlu1 %v5271_v28, %s6296_s4  ;;  %v5273_v60 = vrot.slane %v9007_v4, 2  ;;  %v9044_v28 = vsub.f32 %v257_v23, %v9040_v14 }
 0x309   : > { %5213 = vrot.lane.b32.xlu0 %v5184_v19, %s6297_s5  ;;  %3421 = vmatmul.f32.gmra.mxu2 %v11033_v57  ;;  %11087 = vst [vmem:[#allocation32_spill] sm:$0xff] %v9037_v42  ;;  %v11089_v57 = vld [vmem:[#allocation49_spill] sm:$0xff]  ;;  %v5272_v46 = vrot.slane %v9037_v42, 2 }
 0x30a   : > { %v2620_v1 = vpop.f32.mrf.mxu0  ;;  %4022 = vmatpush.msra.mxu3 %v9040_v14  ;;  %3786 = vmatpush.msra.mxu1 %v3785_v7  ;;  %v10682_v12 = vand.u32 4294901760, %v9044_v28 }
 0x30b   : > { %v2713_v3 = vpop.f32.mrf.mxu1  ;;  %v2854_v11 = vpop.f32.mrf.mxu2  ;;  %3908 = vmatpush.msra.mxu2 %v9044_v28  ;;  %v5274_v23 = vsel %vm5259_vm0, %v5272_v46, %v5273_v60 }
 0x30c   : > { %v3035_v50 = vpop.f32.mrf.mxu3  ;;  %v3790_v7 = vsub.f32 %v9044_v28, %v10682_v12 }
 0x30d   : > { %v9048_v63 = vadd.f32 %v3035_v50, %v2854_v11  ;;  %3163 = vmatmul.f32.gmra.mxu0 %v11089_v57  ;;  %v255_v11 = vld [vmem:[%s10328_s1 + $0x108] sm:$0xff]  ;;  %v2621_v50 = vadd.f32 %v2620_v1, %v8621_v5  ;;  %v5435_v5 = vrot.slane %v9037_v42, 3  ;;  %v11092_v1 = vand.u32 4294901760, %v8632_v20 }
 0x30e   : > { %3282 = vmatmul.f32.gmra.mxu1 %v11090_v33  ;;  %v3791_v57 = vand.u32 4294901760, %v3790_v7  ;;  %v9069_v33 = vand.u32 4294901760, %v255_v11  ;;  %v11093_v7 = vld [vmem:[#allocation53_spill] sm:$0xff]  ;;  %v2617_v20 = vadd.f32 %v9005_v6, %v8614_v47  ;;  %v11096_v6 = vand.u32 4294901760, %v8676_v49 }
 0x30f   : > { %11088 = vst [vmem:[#allocation39_spill] sm:$0xff] %v9048_v63  ;;  %3522 = vmatmul.f32.gmra.mxu3 %v11036_v30  ;;  %v11098_v49 = vld [vmem:[#allocation57_spill] sm:$0xff] }
 0x310   : > { %5465 = vrot.lane.b32.xlu2 %v5436_v17, %s6298_s9  ;;  %5302 = vrot.lane.b32.xlu1 %v5273_v60, %s6296_s4  ;;  %v9076_v4 = vsub.f32 %v255_v11, %v9069_v33 }
 0x311   : > { %5300 = vrot.lane.b32.xlu0 %v5274_v23, %s6296_s4  ;;  %3425 = vmatmul.f32.gmra.mxu2 %v11036_v30  ;;  %v5183_v30 = vrot.slane %v9037_v42, 1 }
 0x312   : > { %v9071_v46 = vpop.f32.mrf.mxu0  ;;  %3792 = vmatpush.msra.mxu1 %v3791_v57  ;;  %3573 = vmatpush.msra.mxu0 %v9069_v33  ;;  %v3795_v57 = vand.u32 4294901760, %v9076_v4 }
 0x313   : > { %v2717_v60 = vpop.f32.mrf.mxu1  ;;  %v2862_v12 = vpop.f32.mrf.mxu2  ;;  %4024 = vmatpush.msra.mxu3 %v9069_v33  ;;  %3911 = vmatpush.msra.mxu2 %v9076_v4 }
 0x314   : > { %v9073_v63 = vadd.f32 %v2717_v60, %v2621_v50  ;;  %v3039_v23 = vpop.f32.mrf.mxu3  ;;  %4125 = vmatpush.msrb.mxu0 %v11092_v1  ;;  %v11094_v50 = vld [vmem:[#allocation50_spill] sm:$0xff]  ;;  %v5437_v60 = vsel %vm5422_vm1, %v5435_v5, %v5436_v17  ;;  %v9109_v17 = vadd.f32 %v2713_v3, %v2617_v20  ;;  %v11097_v3 = vand.u32 4294901760, %v8698_v15 }
 0x315   : > { %v9079_v41 = vadd.f32 %v3039_v23, %v2862_v12  ;;  %3168 = vmatmul.f32.gmra.mxu0 %v11093_v7  ;;  %v5185_v12 = vsel %vm5170_vm2, %v5183_v30, %v5184_v19  ;;  %v11095_v23 = vand.u32 4294901760, %v8654_v24  ;;  %v3796_v19 = vsub.f32 %v9076_v4, %v3795_v57  ;;  %v317_v24 = vld [vmem:[%s10328_s1 + $0x2f8] sm:$0xff] }
 0x316   : > { %11091 = vst [vmem:[#allocation178_spill] sm:$0xff] %v9073_v63  ;;  %3288 = vmatmul.f32.gmra.mxu1 %v11094_v50  ;;  %v5276_v11 = vrot.slane %v9073_v63, 2  ;;  %v9112_v47 = vand.u32 4294901760, %v317_v24  ;;  %v5187_v20 = vrot.slane %v9073_v63, 1  ;;  %v309_v4 = vld [vmem:[%s10328_s1 + $0x2b8] sm:$0xff] }
 0x317   : > { %4129 = vmatpush.msrb.mxu0 %v11095_v23  ;;  %3526 = vmatmul.f32.gmra.mxu3 %v11038_v40  ;;  %v3797_v1 = vand.u32 4294901760, %v3796_v19  ;;  %v11099_v23 = vld [vmem:[#allocation55_spill] sm:$0xff]  ;;  %v5438_v19 = vrot.slane %v9109_v17, 3 }
 0x318   : > { %5211 = vrot.lane.b32.xlu2 %v5185_v12, %s6297_s5  ;;  %5463 = vrot.lane.b32.xlu1 %v5437_v60, %s6298_s9  ;;  %v5439_v12 = vrot.slane %v9073_v63, 3  ;;  %v9119_v60 = vsub.f32 %v317_v24, %v9112_v47  ;;  %v11100_v24 = vand.u32 4294901760, %v8719_v45 }
 0x319   : > { %5306 = vrot.lane.b32.xlu0 %v5276_v11, %s6296_s4  ;;  %3429 = vmatmul.f32.gmra.mxu2 %v11038_v40 }
 0x31a   : > { %4133 = vmatpush.msrb.mxu0 %v11096_v6  ;;  %v2628_v30 = vpop.f32.mrf.mxu0  ;;  %4349 = vmatpush.msrb.mxu2 %v9112_v47  ;;  %v10692_v6 = vand.u32 4294901760, %v9119_v60  ;;  %v5440_v15 = vsel %vm5422_vm1, %v5438_v19, %v5439_v12 }
 0x31b   : > { %v2721_v5 = vpop.f32.mrf.mxu1  ;;  %v2870_v7 = vpop.f32.mrf.mxu2  ;;  %3798 = vmatpush.msra.mxu1 %v3797_v1  ;;  %v2629_v45 = vadd.f32 %v2628_v30, %v8662_v35  ;;  %v5186_v30 = vrot.slane %v9109_v17, 1 }
 0x31c   : > { %v3043_v50 = vpop.f32.mrf.mxu3  ;;  %4137 = vmatpush.msrb.mxu0 %v11097_v3  ;;  %v4512_v1 = vsub.f32 %v9119_v60, %v10692_v6 }
 0x31d   : > { %v9123_v40 = vadd.f32 %v3043_v50, %v2870_v7  ;;  %3173 = vmatmul.f32.gmra.mxu0 %v11098_v49  ;;  %4252 = vmatpush.msrb.mxu1 %v8629_v48  ;;  %v315_v48 = vld [vmem:[%s10328_s1 + $0x2e8] sm:$0xff]  ;;  %v11101_v49 = vand.u32 4294901760, %v8748_v51  ;;  %v11102_v51 = vand.u32 4294901760, %v8779_v18  ;;  %v2625_v18 = vadd.f32 %v9071_v46, %v8640_v25 }
 0x31e   : > { %3294 = vmatmul.f32.gmra.mxu1 %v11099_v23  ;;  %4141 = vmatpush.msrb.mxu0 %v11100_v24  ;;  %v4513_v7 = vand.u32 4294901760, %v4512_v1  ;;  %v9146_v50 = vand.u32 4294901760, %v315_v48  ;;  %v11103_v1 = vld [vmem:[#allocation61_spill] sm:$0xff] }
 0x31f   : > { %3530 = vmatmul.f32.gmra.mxu3 %v11040_v55  ;;  %4254 = vmatpush.msrb.mxu1 %v8651_v36 }
 0x320   : > { %5217 = vrot.lane.b32.xlu2 %v5187_v20, %s6297_s5  ;;  %5469 = vrot.lane.b32.xlu1 %v5439_v12, %s6298_s9  ;;  %v9161_v36 = vsub.f32 %v315_v48, %v9146_v50  ;;  %v5188_v48 = vsel %vm5170_vm2, %v5186_v30, %v5187_v20 }
 0x321   : > { %5467 = vrot.lane.b32.xlu0 %v5440_v15, %s6298_s9  ;;  %3433 = vmatmul.f32.gmra.mxu2 %v11040_v55  ;;  %v5275_v55 = vrot.slane %v9109_v17, 2 }
 0x322   : > { %v9149_v12 = vpop.f32.mrf.mxu0  ;;  %4145 = vmatpush.msrb.mxu0 %v11101_v49  ;;  %4514 = vmatpush.msrb.mxu3 %v4513_v7  ;;  %v9166_v15 = vpop.permute.xlu2 %5286  ;;  %v10691_v49 = vand.u32 4294901760, %v9161_v36 }
 0x323   : > { %v2725_v3 = vpop.f32.mrf.mxu1  ;;  %v2878_v19 = vpop.f32.mrf.mxu2  ;;  %4351 = vmatpush.msrb.mxu2 %v9146_v50  ;;  %4256 = vmatpush.msrb.mxu1 %v8673_v37  ;;  %v11105_v37 = vand.u32 4294901760, %v8809_v16  ;;  %v9191_v16 = vld [vmem:[%s10328_s1 + $0x2d8] sm:$0xff] }
 0x324   : > { %v9153_v23 = vadd.f32 %v2725_v3, %v2629_v45  ;;  %v3047_v24 = vpop.f32.mrf.mxu3  ;;  %4149 = vmatpush.msrb.mxu0 %v11102_v51  ;;  %v11104_v45 = vld [vmem:[#allocation59_spill] sm:$0xff]  ;;  %v5277_v3 = vsel %vm5259_vm0, %v5275_v55, %v5276_v11  ;;  %v4518_v11 = vsub.f32 %v9161_v36, %v10691_v49  ;;  %v9197_v25 = vand.u32 4294901760, %v9191_v16 }
 0x325   : > { %v9156_v35 = vadd.f32 %v3047_v24, %v2878_v19  ;;  %3178 = vmatmul.f32.gmra.mxu0 %v11103_v1  ;;  %4258 = vmatpush.msrb.mxu1 %v8695_v62  ;;  %v9193_v62 = vadd.f32 %v2721_v5, %v2625_v18  ;;  %v11106_v24 = vand.u32 4294901760, %v8846_v34  ;;  %v11107_v5 = vand.u32 4294901760, %v8876_v21  ;;  %v11109_v1 = vld [vmem:[#allocation63_spill] sm:$0xff] }
 0x326   : > { %3300 = vmatmul.f32.gmra.mxu1 %v11104_v45  ;;  %v5442_v7 = vrot.slane %v9153_v23, 3  ;;  %4153 = vmatpush.msrb.mxu0 %v11105_v37  ;;  %v4519_v19 = vand.u32 4294901760, %v4518_v11  ;;  %v5190_v51 = vrot.slane %v9153_v23, 1  ;;  %v5279_v34 = vrot.slane %v9153_v23, 2 }
 0x327   : > { %3534 = vmatmul.f32.gmra.mxu3 %v11042_v58  ;;  %4260 = vmatpush.msrb.mxu1 %v8716_v0  ;;  %v11108_v0 = vld [vmem:[#allocation65_spill] sm:$0xff]  ;;  %v5189_v45 = vrot.slane %v9193_v62, 1  ;;  %v11111_v37 = vand.u32 4294901760, %v8946_v61 }
 0x328   : > { %5304 = vrot.lane.b32.xlu2 %v5277_v3, %s6296_s4  ;;  %5215 = vrot.lane.b32.xlu1 %v5188_v48, %s6297_s5  ;;  %v11110_v3 = vand.u32 4294901760, %v8909_v10 }
 0x329   : > { %5473 = vrot.lane.b32.xlu0 %v5442_v7, %s6298_s9  ;;  %3437 = vmatmul.f32.gmra.mxu2 %v11042_v58  ;;  %v5191_v21 = vsel %vm5170_vm2, %v5189_v45, %v5190_v51  ;;  %v11118_v45 = vand.u32 4294901760, %v9044_v28 }
 0x32a   : > { %v2636_v46 = vpop.f32.mrf.mxu0  ;;  %4157 = vmatpush.msrb.mxu0 %v11106_v24  ;;  %4353 = vmatpush.msrb.mxu2 %v9197_v25 }
 0x32b   : > { %v2729_v20 = vpop.f32.mrf.mxu1  ;;  %v2886_v55 = vpop.f32.mrf.mxu2  ;;  %4262 = vmatpush.msrb.mxu1 %v8741_v52  ;;  %4520 = vmatpush.msrb.mxu3 %v4519_v19  ;;  %v2637_v48 = vadd.f32 %v2636_v46, %v8706_v13  ;;  %v5278_v13 = vrot.slane %v9193_v62, 2  ;;  %v11114_v46 = vld [vmem:[#allocation74_spill] sm:$0xff] }
 0x32c   : > { %v3051_v30 = vpop.f32.mrf.mxu3  ;;  %4161 = vmatpush.msrb.mxu0 %v11107_v5  ;;  %v9216_v52 = vpop.permute.xlu2 %5447  ;;  %v2633_v5 = vadd.f32 %v9149_v12, %v8684_v43 }
 0x32d   : > { %v9205_v58 = vadd.f32 %v3051_v30, %v2886_v55  ;;  %3183 = vmatmul.f32.gmra.mxu0 %v11108_v0  ;;  %4264 = vmatpush.msrb.mxu1 %v8775_v27  ;;  %v5441_v55 = vrot.slane %v9193_v62, 3 }
 0x32e   : > { %3306 = vmatmul.f32.gmra.mxu1 %v11109_v1  ;;  %4165 = vmatpush.msrb.mxu0 %v11110_v3  ;;  %v11117_v1 = vld [vmem:[#allocation71_spill] sm:$0xff] }
 0x32f   : > { %3538 = vmatmul.f32.gmra.mxu3 %v11044_v44  ;;  %4266 = vmatpush.msrb.mxu1 %v8802_v38  ;;  %v11113_v38 = vld [vmem:[#allocation67_spill] sm:$0xff]  ;;  %v5443_v30 = vsel %vm5422_vm1, %v5441_v55, %v5442_v7  ;;  %v9253_v7 = vadd.f32 %v2729_v20, %v2633_v5  ;;  %v11122_v55 = vld [vmem:[#allocation73_spill] sm:$0xff] }
 0x330   : > { %5310 = vrot.lane.b32.xlu2 %v5279_v34, %s6296_s4  ;;  %5221 = vrot.lane.b32.xlu1 %v5190_v51, %s6297_s5  ;;  %v5280_v51 = vsel %vm5259_vm0, %v5278_v13, %v5279_v34  ;;  %v11123_v13 = vld [vmem:[#allocation8_spill] sm:$0xff] }
 0x331   : > { %5219 = vrot.lane.b32.xlu0 %v5191_v21, %s6297_s5  ;;  %3441 = vmatmul.f32.gmra.mxu2 %v11044_v44  ;;  %v11112_v44 = vand.u32 4294901760, %v8978_v54  ;;  %v11116_v54 = vld [vmem:[#allocation69_spill] sm:$0xff] }
 0x332   : > { %v3109_v10 = vpop.f32.mrf.mxu0  ;;  %4169 = vmatpush.msrb.mxu0 %v11111_v37  ;;  %4268 = vmatpush.msrb.mxu1 %v8842_v2  ;;  %v11115_v2 = vand.u32 4294901760, %v9010_v53  ;;  %v5281_v37 = vrot.slane %v9253_v7, 2 }
 0x333   : > { %v2733_v27 = vpop.f32.mrf.mxu1  ;;  %v2894_v11 = vpop.f32.mrf.mxu2 }
 0x334   : > { %v9228_v18 = vadd.f32 %v2733_v27, %v2637_v48  ;;  %v3055_v19 = vpop.f32.mrf.mxu3  ;;  %4173 = vmatpush.msrb.mxu0 %v11112_v44  ;;  %4270 = vmatpush.msrb.mxu1 %v8869_v26  ;;  %v9255_v0 = vpop.permute.xlu2 %5453  ;;  %v3110_v26 = vadd.f32 %v3109_v10, %v8722_v22  ;;  %v11119_v27 = vld [vmem:[#allocation78_spill] sm:$0xff]  ;;  %v11120_v10 = vld [vmem:[#allocation68_spill] sm:$0xff] }
 0x335   : > { %v9231_v24 = vadd.f32 %v3055_v19, %v2894_v11  ;;  %3579 = vmatmul.f32.vlgmr.msra.gmra.mxu0 %v11114_v46  ;;  %v9276_v11 = vsub.f32 %v9191_v16, %v9197_v25 }
 0x336   : > { %3312 = vmatmul.f32.gmra.mxu1 %v11113_v38  ;;  %v5193_v61 = vrot.slane %v9228_v18, 1  ;;  %4177 = vmatpush.msrb.mxu0 %v11115_v2  ;;  %v5282_v20 = vrot.slane %v9228_v18, 2  ;;  %v5445_v28 = vrot.slane %v9228_v18, 3  ;;  %v9306_v2 = vand.u32 4294901760, %v309_v4 }
 0x337   : > { %4028 = vmatmul.f32.vlgmr.msra.gmra.mxu3 %v11117_v1  ;;  %4272 = vmatpush.msrb.mxu1 %v8905_v29 }
 0x338   : > { %5471 = vrot.lane.b32.xlu2 %v5443_v30, %s6298_s9  ;;  %5308 = vrot.lane.b32.xlu1 %v5280_v51, %s6296_s4  ;;  %v11124_v30 = vld [vmem:[#allocation75_spill] sm:$0xff] }
 0x339   : > { %5225 = vrot.lane.b32.xlu0 %v5193_v61, %s6297_s5  ;;  %3914 = vmatmul.f32.vlgmr.msra.gmra.mxu2 %v11116_v54 }
 0x33a   : > { %v5198_v53 = vpop.permute.xlu0 %5197  ;;  %v3114_v12 = vpop.f32.mrf.mxu0  ;;  %4181 = vmatpush.msrb.mxu0 %v11118_v45  ;;  %4274 = vmatpush.msrb.mxu1 %v8939_v9  ;;  %v311_v9 = vld [vmem:[%s10328_s1 + $0x2c8] sm:$0xff]  ;;  %v5444_v45 = vrot.slane %v9253_v7, 3 }
 0x33b   : > { %v5244_v43 = vadd.f32 %v5198_v53, %v8745_v8  ;;  %v3223_v34 = vpop.f32.mrf.mxu1  ;;  %v3382_v21 = vpop.f32.mrf.mxu2  ;;  %v9291_v16 = vand.u32 4294901760, %v311_v9  ;;  %v3115_v44 = vadd.f32 %v3114_v12, %v11123_v13  ;;  %v11129_v13 = vld [vmem:[#allocation79_spill] sm:$0xff] }
 0x33c   : > { %v3224_v3 = vadd.f32 %v3223_v34, %v3110_v26  ;;  %v3479_v48 = vpop.f32.mrf.mxu3  ;;  %4185 = vmatpush.msrb.mxu0 %v3795_v57  ;;  %4276 = vmatpush.msrb.mxu1 %v8974_v39  ;;  %v9293_v19 = vpop.permute.xlu1 %5284  ;;  %v10690_v39 = vand.u32 4294901760, %v9276_v11 }
 0x33d   : > { %v9266_v22 = vadd.f32 %v9166_v15, %v5244_v43  ;;  %3587 = vmatmul.f32.gmra.mxu0 %v11119_v27  ;;  %v5283_v15 = vsel %vm5259_vm0, %v5281_v37, %v5282_v20  ;;  %4355 = vmatpush.msrb.mxu2 %v9291_v16  ;;  %v9304_v51 = vsub.f32 %v311_v9, %v9291_v16 }
 0x33e   : > { %v3383_v29 = vadd.f32 %v3382_v21, %v3224_v3  ;;  %3800 = vmatmul.f32.vlgmr.msra.gmra.mxu1 %v11120_v10  ;;  %4672 = vmatpush.msra.mxu0 %v9119_v60  ;;  %v4524_v53 = vsub.f32 %v9276_v11, %v10690_v39  ;;  %v5192_v3 = vrot.slane %v9253_v7, 1  ;;  %v5446_v27 = vsel %vm5422_vm1, %v5444_v45, %v5445_v28 }
 0x33f   : > { %4034 = vmatmul.f32.gmra.mxu3 %v11124_v30  ;;  %4278 = vmatpush.msrb.mxu1 %v9003_v56  ;;  %v10689_v12 = vand.u32 4294901760, %v9304_v51  ;;  %v11125_v56 = vld [vmem:[#allocation82_spill] sm:$0xff]  ;;  %v9342_v30 = vsub.f32 %v309_v4, %v9306_v2 }
 0x340   : > { %v9286_v57 = vadd.f32 %v3479_v48, %v3383_v29  ;;  %5477 = vrot.lane.b32.xlu2 %v5445_v28, %s6298_s9  ;;  %5314 = vrot.lane.b32.xlu1 %v5282_v20, %s6296_s4  ;;  %v4525_v21 = vand.u32 4294901760, %v4524_v53  ;;  %v11126_v48 = vld [vmem:[#allocation72_spill] sm:$0xff]  ;;  %v5194_v37 = vsel %vm5170_vm2, %v5192_v3, %v5193_v61  ;;  %v11130_v61 = vld [vmem:[#allocation15_spill] sm:$0xff]  ;;  %v11131_v53 = vld [vmem:[#allocation5_spill] sm:$0xff] }
 0x341   : > { %5312 = vrot.lane.b32.xlu0 %v5283_v15, %s6296_s4  ;;  %3919 = vmatmul.f32.gmra.mxu2 %v11122_v55  ;;  %v4530_v29 = vsub.f32 %v9304_v51, %v10689_v12  ;;  %v11128_v15 = vld [vmem:[#allocation77_spill] sm:$0xff]  ;;  %v10687_v3 = vand.u32 4294901760, %v9342_v30  ;;  %v303_v12 = vld [vmem:[%s10328_s1 + $0x288] sm:$0xff] }
 0x342   : > { %11121 = vst [vmem:[#allocation34_spill] sm:$0xff] %v9286_v57  ;;  %v5450_v38 = vpop.permute.xlu0 %5449  ;;  %v9299_v46 = vpop.permute.xlu2 %5205  ;;  %4675 = vmatpush.msra.mxu0 %v9161_v36  ;;  %4357 = vmatpush.msrb.mxu2 %v9306_v2 }
 0x343   : > { %v9309_v5 = vadd.f32 %v5450_v38, %v9266_v22  ;;  %v3119_v54 = vpop.f32.mrf.mxu0  ;;  %v3229_v26 = vpop.f32.mrf.mxu1  ;;  %4280 = vmatpush.msrb.mxu1 %v9040_v14  ;;  %4526 = vmatpush.msrb.mxu3 %v4525_v21  ;;  %v4531_v9 = vand.u32 4294901760, %v4530_v29 }
 0x344   : > { %v3230_v1 = vadd.f32 %v3229_v26, %v3115_v44  ;;  %v3386_v43 = vpop.f32.mrf.mxu2  ;;  %v3483_v34 = vpop.f32.mrf.mxu3  ;;  %4678 = vmatpush.msra.mxu0 %v9276_v11  ;;  %v3120_v44 = vadd.f32 %v3119_v54, %v11130_v61  ;;  %v307_v26 = vld [vmem:[%s10328_s1 + $0x2a8] sm:$0xff] }
 0x345   : > { %3595 = vmatmul.f32.gmra.mxu0 %v11125_v56  ;;  %4282 = vmatpush.msrb.mxu1 %v9069_v33  ;;  %v9350_v21 = vand.u32 4294901760, %v307_v26  ;;  %v11133_v56 = vld [vmem:[#allocation76_spill] sm:$0xff] }
 0x346   : > { %v3387_v20 = vadd.f32 %v3386_v43, %v3230_v1  ;;  %3804 = vmatmul.f32.gmra.mxu1 %v11126_v48  ;;  %4681 = vmatpush.msra.mxu0 %v9304_v51 }
 0x347   : > { %4800 = vmatpush.msra.mxu1 %v9112_v47  ;;  %4040 = vmatmul.f32.gmra.mxu3 %v11129_v13 }
 0x348   : > { %v9332_v14 = vadd.f32 %v3483_v34, %v3387_v20  ;;  %5475 = vrot.lane.b32.xlu1 %v5446_v27, %s6298_s9  ;;  %5223 = vrot.lane.b32.xlu2 %v5194_v37, %s6297_s5  ;;  %v11132_v20 = vld [vmem:[#allocation86_spill] sm:$0xff]  ;;  %v4536_v27 = vsub.f32 %v9342_v30, %v10687_v3  ;;  %v5351_v37 = vsel %vm5350_vm3, %v9266_v22, -inf }
 0x349   : > { %3924 = vmatmul.f32.gmra.mxu2 %v11128_v15  ;;  %4532 = vmatpush.msrb.mxu3 %v4531_v9 }
 0x34a   : > { %11127 = vst [vmem:[#allocation42_spill] sm:$0xff] %v9332_v14  ;;  %v5204_v55 = vpop.permute.xlu2 %5203  ;;  %v5202_v28 = vpop.permute.xlu1 %5201  ;;  %4802 = vmatpush.msra.mxu1 %v9146_v50  ;;  %4684 = vmatpush.msra.mxu0 %v9342_v30 }
 0x34b   : > { %v5196_v33 = vpop.permute.xlu0 %5195  ;;  %v3124_v38 = vpop.f32.mrf.mxu0  ;;  %4359 = vmatpush.msrb.mxu2 %v9350_v21  ;;  %v5246_v13 = vadd.f32 %v5202_v28, %v8806_v31 }
 0x34c   : > { %v5243_v1 = vadd.f32 %v5196_v33, %v11131_v53  ;;  %v3235_v43 = vpop.f32.mrf.mxu1  ;;  %v3390_v34 = vpop.f32.mrf.mxu2  ;;  %4804 = vmatpush.msra.mxu1 %v9197_v25  ;;  %v11135_v33 = vld [vmem:[#allocation81_spill] sm:$0xff] }
 0x34d   : > { %v3236_v45 = vadd.f32 %v3235_v43, %v3120_v44  ;;  %v3487_v54 = vpop.f32.mrf.mxu3  ;;  %3603 = vmatmul.f32.gmra.mxu0 %v11132_v20  ;;  %v5514_v43 = vsel %vm5513_vm5, %v9309_v5, -inf  ;;  %v9381_v5 = vsub.f32 %v307_v26, %v9350_v21 }
 0x34e   : > { %v5332_v4 = vadd.f32 %v9293_v19, %v5243_v1  ;;  %3808 = vmatmul.f32.gmra.mxu1 %v11133_v56  ;;  %v5247_v19 = vadd.f32 %v5204_v55, %v8894_v59  ;;  %v4537_v1 = vand.u32 4294901760, %v4536_v27  ;;  %v11146_v59 = vld [vmem:[#allocation84_spill] sm:$0xff] }
 0x34f   : > { %v3391_v29 = vadd.f32 %v3390_v34, %v3236_v45  ;;  %4806 = vmatpush.msra.mxu1 %v9291_v16  ;;  %v11136_v45 = vld [vmem:[#allocation83_spill] sm:$0xff]  ;;  %4687 = vmatpush.msra.mxu0 %v9381_v5 }
 0x350   : > { %v5349_v9 = vsel %vm5348_vm4, %v5332_v4, -inf  ;;  %v5495_v15 = vadd.f32 %v9216_v52, %v5332_v4  ;;  %4046 = vmatmul.f32.gmra.mxu3 %v11136_v45 }
 0x351   : > { %v5352_v61 = vmax.f32 %v5349_v9, %v5351_v37  ;;  %v9368_v44 = vadd.f32 %v3487_v54, %v3391_v29  ;;  %3929 = vmatmul.f32.gmra.mxu2 %v11135_v33  ;;  %4808 = vmatpush.msra.mxu1 %v9306_v2  ;;  %v11137_v29 = vld [vmem:[#allocation18_spill] sm:$0xff] }
 0x352   : > { %v5512_v22 = vsel %vm5511_vm6, %v5495_v15, -inf  ;;  %v5293_v55 = vpop.permute.xlu2 %5292  ;;  %v5291_v34 = vpop.permute.xlu1 %5290  ;;  %4538 = vmatpush.msrb.mxu3 %v4537_v1  ;;  %v3125_v27 = vadd.f32 %v3124_v38, %v11137_v29  ;;  %v305_v15 = vld [vmem:[%s10328_s1 + $0x298] sm:$0xff]  ;;  %v10688_v38 = vand.u32 4294901760, %v9381_v5  ;;  %v11141_v29 = vld [vmem:[#allocation85_spill] sm:$0xff] }
 0x353   : > { %11134 = vst [vmem:[#allocation183_spill] sm:$0xff] %v9368_v44  ;;  %v5515_v52 = vmax.f32 %v5512_v22, %v5514_v43  ;;  %v9376_v4 = vadd.f32 %v5293_v55, %v5247_v19  ;;  %v5335_v28 = vadd.f32 %v5291_v34, %v5246_v13  ;;  %v5289_v54 = vpop.permute.xlu0 %5288  ;;  %v3129_v20 = vpop.f32.mrf.mxu0  ;;  %4810 = vmatpush.msra.mxu1 %v9350_v21  ;;  %v5353_v33 = vrot.slane %v5352_v61, 4  ;;  %v11138_v1 = vld [vmem:[#allocation90_spill] sm:$0xff]  ;;  %v11139_v22 = vld [vmem:[#allocation80_spill] sm:$0xff] }
 0x354   : > { %v3241_v37 = vpop.f32.mrf.mxu1  ;;  %v3394_v9 = vpop.f32.mrf.mxu2  ;;  %v9392_v55 = vand.u32 4294901760, %v305_v15  ;;  %v4542_v34 = vsub.f32 %v9381_v5, %v10688_v38 }
 0x355   : > { %v3491_v19 = vpop.f32.mrf.mxu3  ;;  %v9387_v13 = vadd.f32 %v9255_v0, %v5335_v28  ;;  %v3242_v43 = vadd.f32 %v3241_v37, %v3125_v27  ;;  %3611 = vmatmul.f32.gmra.mxu0 %v11138_v1  ;;  %v11140_v0 = vld [vmem:[#allocation158_spill] sm:$0xff]  ;;  %v5354_v27 = vmax.f32 %v5352_v61, %v5353_v33  ;;  %v5516_v61 = vrot.slane %v5515_v52, 4  ;;  %v11144_v33 = vld [vmem:[#allocation23_spill] sm:$0xff] }
 0x356   : > { %3812 = vmatmul.f32.gmra.mxu1 %v11139_v22  ;;  %4361 = vmatpush.msrb.mxu2 %v9392_v55  ;;  %v5248_v45 = vadd.f32 %v9299_v46, %v11140_v0  ;;  %v9409_v38 = vsub.f32 %v305_v15, %v9392_v55  ;;  %v9417_v46 = vld [vmem:[%s10328_s1 + $0x278] sm:$0xff]  ;;  %v5368_v15 = vsel %vm5348_vm4, %v9376_v4, -inf }
 0x357   : > { %v3395_v26 = vadd.f32 %v3394_v9, %v3242_v43  ;;  %4812 = vmatpush.msra.mxu1 %v9392_v55  ;;  %v11143_v9 = vld [vmem:[#allocation87_spill] sm:$0xff]  ;;  %v4543_v43 = vand.u32 4294901760, %v4542_v34  ;;  %v9421_v34 = vand.u32 4294901760, %v303_v12  ;;  %v9432_v31 = vand.u32 4294901760, %v9417_v46 }
 0x358   : > { %4052 = vmatmul.f32.gmra.mxu3 %v11143_v9  ;;  %4690 = vmatpush.msra.mxu0 %v9409_v38 }
 0x359   : > { %3934 = vmatmul.f32.gmra.mxu2 %v11141_v29  ;;  %v9403_v37 = vadd.f32 %v3491_v19, %v3395_v26  ;;  %v3130_v19 = vadd.f32 %v3129_v20, %v11144_v33  ;;  %4544 = vmatpush.msrb.mxu3 %v4543_v43  ;;  %v5360_v20 = vsel %vm5350_vm3, %v5335_v28, -inf  ;;  %v11147_v28 = vand.u32 4294901760, %v9409_v38 }
 0x35a   : > { %v9405_v1 = vpop.permute.xlu2 %5298  ;;  %v5200_v3 = vpop.permute.xlu1 %5199  ;;  %4363 = vmatpush.msrb.mxu2 %v9421_v34  ;;  %4814 = vmatpush.msra.mxu1 %v9421_v34 }
 0x35b   : > { %11142 = vst [vmem:[#allocation40_spill] sm:$0xff] %v9403_v37  ;;  %v5245_v26 = vadd.f32 %v5200_v3, %v8839_v32  ;;  %v5295_v29 = vpop.permute.xlu0 %5294  ;;  %v3134_v9 = vpop.f32.mrf.mxu0 }
 0x35c   : > { %v9425_v39 = vadd.f32 %v5295_v29, %v5248_v45  ;;  %v3247_v49 = vpop.f32.mrf.mxu1  ;;  %v3398_v6 = vpop.f32.mrf.mxu2  ;;  %v5355_v45 = vrot.slane %v5354_v27, 2  ;;  %v11145_v29 = vld [vmem:[#allocation94_spill] sm:$0xff]  ;;  %4365 = vmatpush.msrb.mxu2 %v9432_v31  ;;  %4816 = vmatpush.msra.mxu1 %v9432_v31 }
 0x35d   : > { %v3248_v33 = vadd.f32 %v3247_v49, %v3130_v19  ;;  %v3495_v3 = vpop.f32.mrf.mxu3  ;;  %v5334_v0 = vadd.f32 %v5289_v54, %v5245_v26  ;;  %3619 = vmatmul.f32.gmra.mxu0 %v11145_v29  ;;  %v4548_v49 = vsub.f32 %v9409_v38, %v11147_v28  ;;  %v9443_v54 = vsub.f32 %v303_v12, %v9421_v34  ;;  %v11149_v12 = vld [vmem:[#allocation89_spill] sm:$0xff] }
 0x35e   : > { %v5369_v43 = vsel %vm5350_vm3, %v9425_v39, -inf  ;;  %3816 = vmatmul.f32.gmra.mxu1 %v11146_v59  ;;  %v5517_v19 = vmax.f32 %v5515_v52, %v5516_v61  ;;  %v5356_v52 = vmax.f32 %v5354_v27, %v5355_v45 }
 0x35f   : > { %v5370_v26 = vmax.f32 %v5368_v15, %v5369_v43  ;;  %v3399_v32 = vadd.f32 %v3398_v6, %v3248_v33  ;;  %v5359_v53 = vsel %vm5348_vm4, %v5334_v0, -inf  ;;  %v4549_v29 = vand.u32 4294901760, %v4548_v49  ;;  %4693 = vmatpush.msra.mxu0 %v9443_v54  ;;  %v11150_v33 = vld [vmem:[#allocation91_spill] sm:$0xff]  ;;  %v11151_v49 = vld [vmem:[#allocation20_spill] sm:$0xff] }
 0x360   : > { %v5361_v8 = vmax.f32 %v5359_v53, %v5360_v20  ;;  %v10697_v59 = vand.u32 4294901760, %v9443_v54  ;;  %4058 = vmatmul.f32.gmra.mxu3 %v11150_v33  ;;  %v5518_v20 = vrot.slane %v5517_v19, 2  ;;  %v3135_v22 = vadd.f32 %v3134_v9, %v11151_v49 }
 0x361   : > { %v5371_v37 = vrot.slane %v5370_v26, 4  ;;  %v9450_v28 = vadd.f32 %v3495_v3, %v3399_v32  ;;  %3939 = vmatmul.f32.gmra.mxu2 %v11149_v12  ;;  %4550 = vmatpush.msrb.mxu3 %v4549_v29  ;;  %v5523_v33 = vsel %vm5513_vm5, %v9387_v13, -inf  ;;  %v11155_v13 = vld [vmem:[#allocation93_spill] sm:$0xff] }
 0x362   : > { %v9453_v61 = vpop.permute.xlu2 %5459  ;;  %v5452_v6 = vpop.permute.xlu1 %5451  ;;  %v5362_v15 = vrot.slane %v5361_v8, 4  ;;  %v4554_v53 = vsub.f32 %v9443_v54, %v10697_v59  ;;  %v5519_v29 = vmax.f32 %v5517_v19, %v5518_v20 }
 0x363   : > { %11148 = vst [vmem:[#allocation47_spill] sm:$0xff] %v9450_v28  ;;  %v5372_v43 = vmax.f32 %v5370_v26, %v5371_v37  ;;  %v5497_v44 = vadd.f32 %v5452_v6, %v5334_v0  ;;  %v5456_v32 = vpop.permute.xlu0 %5455  ;;  %v3139_v3 = vpop.f32.mrf.mxu0  ;;  %v11152_v0 = vld [vmem:[#allocation98_spill] sm:$0xff]  ;;  %v11153_v6 = vld [vmem:[#allocation88_spill] sm:$0xff] }
 0x364   : > { %v5363_v12 = vmax.f32 %v5361_v8, %v5362_v15  ;;  %v5499_v27 = vadd.f32 %v5456_v32, %v9376_v4  ;;  %v3253_v45 = vpop.f32.mrf.mxu1  ;;  %v3402_v28 = vpop.f32.mrf.mxu2  ;;  %v4555_v56 = vand.u32 4294901760, %v4554_v53  ;;  %v5357_v8 = vrot.slane %v5356_v52, 1 }
 0x365   : > { %v5373_v14 = vrot.slane %v5372_v43, 2  ;;  %v5522_v59 = vsel %vm5511_vm6, %v5497_v44, -inf  ;;  %v3254_v48 = vadd.f32 %v3253_v45, %v3135_v22  ;;  %v3499_v37 = vpop.f32.mrf.mxu3  ;;  %3627 = vmatmul.f32.gmra.mxu0 %v11152_v0 }
 0x366   : > { %v5364_v26 = vrot.slane %v5363_v12, 2  ;;  %v5524_v9 = vmax.f32 %v5522_v59, %v5523_v33  ;;  %3820 = vmatmul.f32.gmra.mxu1 %v11153_v6  ;;  %4556 = vmatpush.msrb.mxu3 %v4555_v56  ;;  %v11156_v33 = vld [vmem:[#allocation95_spill] sm:$0xff]  ;;  %v5358_v19 = vmax.f32 %v5356_v52, %v5357_v8  ;;  %v299_v52 = vld [vmem:[%s10328_s1 + $0x268] sm:$0xff] }
 0x367   : > { %v5374_v4 = vmax.f32 %v5372_v43, %v5373_v14  ;;  %v3403_v15 = vadd.f32 %v3402_v28, %v3254_v48  ;;  %v5520_v14 = vrot.slane %v5519_v29, 1  ;;  %v11157_v48 = vld [vmem:[#allocation163_spill] sm:$0xff] }
 0x368   : > { %v5365_v53 = vmax.f32 %v5363_v12, %v5364_v26  ;;  %v5525_v49 = vrot.slane %v5524_v9, 4  ;;  %4064 = vmatmul.f32.gmra.mxu3 %v11156_v33  ;;  %v3140_v56 = vadd.f32 %v3139_v3, %v11157_v48  ;;  %v5531_v26 = vsel %vm5511_vm6, %v5499_v27, -inf  ;;  %v11159_v33 = vld [vmem:[#allocation92_spill] sm:$0xff] }
 0x369   : > { %v5375_v32 = vrot.slane %v5374_v4, 1  ;;  %v9466_v57 = vadd.f32 %v3499_v37, %v3403_v15  ;;  %3944 = vmatmul.f32.gmra.mxu2 %v11155_v13  ;;  %v9477_v15 = vsub.f32 %v9417_v46, %v9432_v31  ;;  %v9483_v13 = vand.u32 4294901760, %v299_v52 }
 0x36a   : > { %v5366_v44 = vrot.slane %v5365_v53, 1  ;;  %v5526_v22 = vmax.f32 %v5524_v9, %v5525_v49  ;;  %v9469_v59 = vpop.permute.xlu2 %5465  ;;  %v5458_v45 = vpop.permute.xlu1 %5457 }
 0x36b   : > { %11154 = vst [vmem:[#allocation188_spill] sm:$0xff] %v9466_v57  ;;  %v5500_v28 = vadd.f32 %v5458_v45, %v9425_v39  ;;  %v5462_v20 = vpop.permute.xlu0 %5461  ;;  %v3144_v43 = vpop.f32.mrf.mxu0  ;;  %v5376_v8 = vmax.f32 %v5374_v4, %v5375_v32  ;;  %v11158_v45 = vld [vmem:[#allocation102_spill] sm:$0xff]  ;;  %v10698_v46 = vand.u32 4294901760, %v9477_v15  ;;  %4367 = vmatpush.msrb.mxu2 %v9483_v13  ;;  %4696 = vmatpush.msra.mxu0 %v9477_v15 }
 0x36c   : > { %v5367_v12 = vmax.f32 %v5365_v53, %v5366_v44  ;;  %v5527_v37 = vrot.slane %v5526_v22, 2  ;;  %v3259_v0 = vpop.f32.mrf.mxu1  ;;  %v3406_v9 = vpop.f32.mrf.mxu2  ;;  %4818 = vmatpush.msra.mxu1 %v9483_v13 }
 0x36d   : > { %v5532_v3 = vsel %vm5513_vm5, %v5500_v28, -inf  ;;  %v3260_v39 = vadd.f32 %v3259_v0, %v3140_v56  ;;  %v3503_v49 = vpop.f32.mrf.mxu3  ;;  %3635 = vmatmul.f32.gmra.mxu0 %v11158_v45  ;;  %v11161_v28 = vld [vmem:[#allocation97_spill] sm:$0xff]  ;;  %v11164_v45 = vld [vmem:[#allocation22_spill] sm:$0xff] }
 0x36e   : > { %v5528_v53 = vmax.f32 %v5526_v22, %v5527_v37  ;;  %v6037_v27 = vsel %vm6036_vm7, %v5367_v12, %v5358_v19  ;;  %v5533_v44 = vmax.f32 %v5531_v26, %v5532_v3  ;;  %3824 = vmatmul.f32.gmra.mxu1 %v11159_v33  ;;  %v4560_v22 = vsub.f32 %v9477_v15, %v10698_v46 }
 0x36f   : > { %v3407_v48 = vadd.f32 %v3406_v9, %v3260_v39  ;;  %v9492_v4 = vsel %vm6038_vm8, %v5376_v8, %v6037_v27  ;;  %v5521_v12 = vmax.f32 %v5519_v29, %v5520_v14  ;;  %v11162_v8 = vld [vmem:[#allocation99_spill] sm:$0xff]  ;;  %v11163_v39 = vld [vmem:[#allocation30_spill] sm:$0xff] }
 0x370   : > { %v5529_v32 = vrot.slane %v5528_v53, 1  ;;  %v5534_v56 = vrot.slane %v5533_v44, 4  ;;  %4070 = vmatmul.f32.gmra.mxu3 %v11162_v8  ;;  %v4561_v3 = vand.u32 4294901760, %v4560_v22  ;;  %v3145_v27 = vadd.f32 %v3144_v43, %v11163_v39  ;;  %v297_v29 = vld [vmem:[%s10328_s1 + $0x258] sm:$0xff]  ;;  %v11167_v8 = vld [vmem:[#allocation96_spill] sm:$0xff] }
 0x371   : > { %v9498_v19 = vadd.f32 %v3503_v49, %v3407_v48  ;;  %3949 = vmatmul.f32.gmra.mxu2 %v11161_v28  ;;  %v9507_v49 = vsub.f32 %v299_v52, %v9483_v13  ;;  %v9515_v28 = vand.u32 4294901760, %v297_v29 }
 0x372   : > { %v5530_v37 = vmax.f32 %v5528_v53, %v5529_v32  ;;  %v5535_v26 = vmax.f32 %v5533_v44, %v5534_v56  ;;  %v9501_v0 = vpop.permute.xlu2 %5211  ;;  %v5210_v9 = vpop.permute.xlu1 %5209  ;;  %4562 = vmatpush.msrb.mxu3 %v4561_v3 }
 0x373   : > { %11160 = vst [vmem:[#allocation44_spill] sm:$0xff] %v9498_v19  ;;  %v5250_v33 = vadd.f32 %v5210_v9, %v11164_v45  ;;  %v5208_v46 = vpop.permute.xlu0 %5207  ;;  %v3149_v57 = vpop.f32.mrf.mxu0  ;;  %v10699_v22 = vand.u32 4294901760, %v9507_v49  ;;  %4699 = vmatpush.msra.mxu0 %v9507_v49  ;;  %v11166_v9 = vld [vmem:[#allocation106_spill] sm:$0xff]  ;;  %4369 = vmatpush.msrb.mxu2 %v9515_v28  ;;  %v11176_v19 = vld [vmem:[#allocation100_spill] sm:$0xff] }
 0x374   : > { %v6059_v14 = vsel %vm6036_vm7, %v5530_v37, %v5521_v12  ;;  %v5536_v53 = vrot.slane %v5535_v26, 2  ;;  %v3265_v44 = vpop.f32.mrf.mxu1  ;;  %v3410_v48 = vpop.f32.mrf.mxu2  ;;  %11165 = vst [vmem:[#allocation51_spill] sm:$0xff] %v9515_v28  ;;  %4820 = vmatpush.msra.mxu1 %v9515_v28  ;;  %v11175_v45 = vld [vmem:[#allocation110_spill] sm:$0xff] }
 0x375   : > { %v5339_v32 = vadd.f32 %v9405_v1, %v5250_v33  ;;  %v3266_v43 = vadd.f32 %v3265_v44, %v3145_v27  ;;  %v3507_v56 = vpop.f32.mrf.mxu3  ;;  %3643 = vmatmul.f32.gmra.mxu0 %v11166_v9  ;;  %v4566_v3 = vsub.f32 %v9507_v49, %v10699_v22  ;;  %v11168_v33 = vld [vmem:[#allocation168_spill] sm:$0xff] }
 0x376   : > { %v5537_v52 = vmax.f32 %v5535_v26, %v5536_v53  ;;  %3828 = vmatmul.f32.gmra.mxu1 %v11167_v8  ;;  %v5249_v39 = vadd.f32 %v5208_v46, %v11168_v33  ;;  %v11170_v26 = vld [vmem:[#allocation101_spill] sm:$0xff]  ;;  %v295_v22 = vld [vmem:[%s10328_s1 + $0x248] sm:$0xff]  ;;  %v9541_v46 = vld [vmem:[%s10328_s1 + $0x238] sm:$0xff] }
 0x377   : > { %v5502_v12 = vadd.f32 %v5462_v20, %v5339_v32  ;;  %v3411_v37 = vadd.f32 %v3410_v48, %v3266_v43  ;;  %v4567_v53 = vand.u32 4294901760, %v4566_v3  ;;  %v11171_v48 = vld [vmem:[#allocation103_spill] sm:$0xff]  ;;  %v9533_v43 = vsub.f32 %v297_v29, %v9515_v28 }
 0x378   : > { %v5538_v1 = vrot.slane %v5537_v52, 1  ;;  %4076 = vmatmul.f32.gmra.mxu3 %v11171_v48  ;;  %v5378_v29 = vsel %vm5350_vm3, %v5339_v32, -inf }
 0x379   : > { %v9526_v27 = vadd.f32 %v3507_v56, %v3411_v37  ;;  %3954 = vmatmul.f32.gmra.mxu2 %v11170_v26  ;;  %v11172_v56 = vld [vmem:[#allocation28_spill] sm:$0xff]  ;;  %4568 = vmatpush.msrb.mxu3 %v4567_v53  ;;  %v9544_v26 = vand.u32 4294901760, %v295_v22 }
 0x37a   : > { %v5539_v44 = vmax.f32 %v5537_v52, %v5538_v1  ;;  %v9529_v9 = vpop.permute.xlu2 %5217  ;;  %v5297_v20 = vpop.permute.xlu1 %5296  ;;  %v3150_v37 = vadd.f32 %v3149_v57, %v11172_v56  ;;  %4702 = vmatpush.msra.mxu0 %v9533_v43 }
 0x37b   : > { %11169 = vst [vmem:[#allocation193_spill] sm:$0xff] %v9526_v27  ;;  %v5338_v52 = vadd.f32 %v5297_v20, %v5249_v39  ;;  %v5214_v3 = vpop.permute.xlu0 %5213  ;;  %v3154_v1 = vpop.f32.mrf.mxu0  ;;  %v9549_v27 = vand.u32 4294901760, %v9541_v46  ;;  %4371 = vmatpush.msrb.mxu2 %v9544_v26  ;;  %v9559_v32 = vsub.f32 %v295_v22, %v9544_v26  ;;  %4822 = vmatpush.msra.mxu1 %v9544_v26 }
 0x37c   : > { %11173 = vst [vmem:[#allocation46_spill] sm:$0xff] %v9544_v26  ;;  %v3271_v48 = vpop.f32.mrf.mxu1  ;;  %v3414_v33 = vpop.f32.mrf.mxu2  ;;  %v9553_v8 = vsel %vm6038_vm8, %v5539_v44, %v6059_v14  ;;  %v11177_v14 = vand.u32 4294901760, %v9533_v43 }
 0x37d   : > { %v5377_v57 = vsel %vm5348_vm4, %v5338_v52, -inf  ;;  %v5501_v39 = vadd.f32 %v9453_v61, %v5338_v52  ;;  %v3272_v53 = vadd.f32 %v3271_v48, %v3150_v37  ;;  %v3511_v20 = vpop.f32.mrf.mxu3  ;;  %11174 = vst [vmem:[#allocation54_spill] sm:$0xff] %v9559_v32  ;;  %3651 = vmatmul.f32.gmra.mxu0 %v11175_v45  ;;  %v5541_v37 = vsel %vm5513_vm5, %v5502_v12, -inf  ;;  %4373 = vmatpush.msrb.mxu2 %v9549_v27 }
 0x37e   : > { %v5379_v56 = vmax.f32 %v5377_v57, %v5378_v29  ;;  %3832 = vmatmul.f32.gmra.mxu1 %v11176_v19  ;;  %v4572_v44 = vsub.f32 %v9533_v43, %v11177_v14  ;;  %v10702_v48 = vand.u32 4294901760, %v9559_v32  ;;  %4705 = vmatpush.msra.mxu0 %v9559_v32  ;;  %v11178_v57 = vld [vmem:[#allocation35_spill] sm:$0xff]  ;;  %v11180_v14 = vld [vmem:[#allocation105_spill] sm:$0xff] }
 0x37f   : > { %v5540_v61 = vsel %vm5511_vm6, %v5501_v39, -inf  ;;  %v3415_v52 = vadd.f32 %v3414_v33, %v3272_v53  ;;  %4824 = vmatpush.msra.mxu1 %v9549_v27  ;;  %v5252_v19 = vadd.f32 %v5214_v3, %v11178_v57  ;;  %v5251_v33 = vadd.f32 %v9501_v0, %v9037_v42 }
 0x380   : > { %v5380_v22 = vrot.slane %v5379_v56, 4  ;;  %v5542_v29 = vmax.f32 %v5540_v61, %v5541_v37  ;;  %v4573_v45 = vand.u32 4294901760, %v4572_v44  ;;  %v4578_v12 = vsub.f32 %v9559_v32, %v10702_v48  ;;  %v11181_v61 = vld [vmem:[#allocation107_spill] sm:$0xff]  ;;  %v11182_v44 = vld [vmem:[#allocation173_spill] sm:$0xff] }
 0x381   : > { %v9574_v6 = vadd.f32 %v3511_v20, %v3415_v52  ;;  %3959 = vmatmul.f32.gmra.mxu2 %v11180_v14  ;;  %4082 = vmatmul.f32.gmra.mxu3 %v11181_v61  ;;  %v3155_v37 = vadd.f32 %v3154_v1, %v11182_v44 }
 0x382   : > { %v5381_v39 = vmax.f32 %v5379_v56, %v5380_v22  ;;  %v5543_v53 = vrot.slane %v5542_v29, 4  ;;  %v5303_v26 = vpop.permute.xlu1 %5302  ;;  %4574 = vmatpush.msrb.mxu3 %v4573_v45  ;;  %v4579_v52 = vand.u32 4294901760, %v4578_v12  ;;  %v9586_v1 = vpop.permute.xlu2 %5304  ;;  %v11184_v45 = vld [vmem:[#allocation104_spill] sm:$0xff] }
 0x383   : > { %11179 = vst [vmem:[#allocation52_spill] sm:$0xff] %v9574_v6  ;;  %v5341_v10 = vadd.f32 %v5303_v26, %v5252_v19  ;;  %v5301_v3 = vpop.permute.xlu0 %5300  ;;  %v3159_v20 = vpop.f32.mrf.mxu0  ;;  %v11183_v26 = vld [vmem:[#allocation114_spill] sm:$0xff] }
 0x384   : > { %v5382_v14 = vrot.slane %v5381_v39, 2  ;;  %v5544_v57 = vmax.f32 %v5542_v29, %v5543_v53  ;;  %v5340_v6 = vadd.f32 %v5301_v3, %v5251_v33  ;;  %v3277_v28 = vpop.f32.mrf.mxu1  ;;  %v3418_v48 = vpop.f32.mrf.mxu2  ;;  %4580 = vmatpush.msrb.mxu3 %v4579_v52 }
 0x385   : > { %v5387_v32 = vsel %vm5350_vm3, %v5341_v10, -inf  ;;  %v5504_v0 = vadd.f32 %v9469_v59, %v5341_v10  ;;  %v3278_v56 = vadd.f32 %v3277_v28, %v3155_v37  ;;  %v3515_v22 = vpop.f32.mrf.mxu3  ;;  %3659 = vmatmul.f32.gmra.mxu0 %v11183_v26  ;;  %v11186_v10 = vld [vmem:[#allocation109_spill] sm:$0xff]  ;;  %v5254_v59 = vadd.f32 %v9529_v9, %v9073_v63  ;;  %v11187_v37 = vld [vmem:[#allocation111_spill] sm:$0xff] }
 0x386   : > { %v5383_v61 = vmax.f32 %v5381_v39, %v5382_v14  ;;  %v5545_v42 = vrot.slane %v5544_v57, 2  ;;  %v5386_v19 = vsel %vm5348_vm4, %v5340_v6, -inf  ;;  %3836 = vmatmul.f32.gmra.mxu1 %v11184_v45  ;;  %v11188_v14 = vld [vmem:[#allocation39_spill] sm:$0xff]  ;;  %v9603_v9 = vsub.f32 %v9541_v46, %v9549_v27  ;;  %v11190_v46 = vld [vmem:[#allocation108_spill] sm:$0xff] }
 0x387   : > { %v5388_v29 = vmax.f32 %v5386_v19, %v5387_v32  ;;  %v3419_v12 = vadd.f32 %v3418_v48, %v3278_v56  ;;  %v3160_v26 = vadd.f32 %v3159_v20, %v11188_v14  ;;  %v5550_v48 = vsel %vm5513_vm5, %v5504_v0, -inf  ;;  %v11193_v63 = vld [vmem:[#allocation115_spill] sm:$0xff] }
 0x388   : > { %v5384_v33 = vrot.slane %v5383_v61, 1  ;;  %v5546_v53 = vmax.f32 %v5544_v57, %v5545_v42  ;;  %4708 = vmatpush.msra.mxu0 %v9603_v9 }
 0x389   : > { %v5389_v44 = vrot.slane %v5388_v29, 4  ;;  %v9591_v3 = vadd.f32 %v3515_v22, %v3419_v12  ;;  %3964 = vmatmul.f32.gmra.mxu2 %v11186_v10  ;;  %4088 = vmatmul.f32.gmra.mxu3 %v11187_v37 }
 0x38a   : > { %v5547_v28 = vrot.slane %v5546_v53, 1  ;;  %v5464_v39 = vpop.permute.xlu1 %5463  ;;  %v5385_v56 = vmax.f32 %v5383_v61, %v5384_v33 }
 0x38b   : > { %11185 = vst [vmem:[#allocation58_spill] sm:$0xff] %v9591_v3  ;;  %v5390_v52 = vmax.f32 %v5388_v29, %v5389_v44  ;;  %v5503_v32 = vadd.f32 %v5464_v39, %v5340_v6  ;;  %v5307_v42 = vpop.permute.xlu0 %5306  ;;  %v3164_v57 = vpop.f32.mrf.mxu0  ;;  %v291_v29 = vld [vmem:[%s10328_s1 + $0x228] sm:$0xff]  ;;  %v289_v6 = vld [vmem:[%s10328_s1 + $0x218] sm:$0xff] }
 0x38c   : > { %v5548_v22 = vmax.f32 %v5546_v53, %v5547_v28  ;;  %v9599_v19 = vadd.f32 %v5307_v42, %v5254_v59  ;;  %v3283_v12 = vpop.f32.mrf.mxu1  ;;  %v3422_v10 = vpop.f32.mrf.mxu2  ;;  %v9612_v53 = vand.u32 4294901760, %v291_v29  ;;  %v11189_v59 = vld [vmem:[#allocation118_spill] sm:$0xff]  ;;  %v10705_v28 = vand.u32 4294901760, %v9603_v9 }
 0x38d   : > { %v5391_v20 = vrot.slane %v5390_v52, 2  ;;  %v5549_v0 = vsel %vm5511_vm6, %v5503_v32, -inf  ;;  %v3284_v61 = vadd.f32 %v3283_v12, %v3160_v26  ;;  %v3519_v33 = vpop.f32.mrf.mxu3  ;;  %3667 = vmatmul.f32.gmra.mxu0 %v11189_v59  ;;  %v9621_v42 = vand.u32 4294901760, %v289_v6  ;;  %v9624_v26 = vpop.permute.xlu2 %5310 }
 0x38e   : > { %v5551_v44 = vmax.f32 %v5549_v0, %v5550_v48  ;;  %3840 = vmatmul.f32.gmra.mxu1 %v11190_v46  ;;  %4375 = vmatpush.msrb.mxu2 %v9612_v53  ;;  %v9619_v14 = vsub.f32 %v291_v29, %v9612_v53  ;;  %v4584_v48 = vsub.f32 %v9603_v9, %v10705_v28 }
 0x38f   : > { %v5392_v39 = vmax.f32 %v5390_v52, %v5391_v20  ;;  %v3423_v37 = vadd.f32 %v3422_v10, %v3284_v61  ;;  %4826 = vmatpush.msra.mxu1 %v9612_v53  ;;  %v9632_v52 = vsel %vm6040_vm9, %v5548_v22, %v9553_v8  ;;  %v6041_v12 = vsel %vm6040_vm9, %v5385_v56, %v9492_v4  ;;  %v11192_v20 = vld [vmem:[#allocation113_spill] sm:$0xff]  ;;  %v287_v4 = vld [vmem:[%s10328_s1 + $0x208] sm:$0xff] }
 0x390   : > { %v5552_v32 = vrot.slane %v5551_v44, 4  ;;  %v10707_v0 = vand.u32 4294901760, %v9619_v14  ;;  %4711 = vmatpush.msra.mxu0 %v9619_v14  ;;  %v3165_v59 = vadd.f32 %v3164_v57, %v9079_v41  ;;  %v4585_v8 = vand.u32 4294901760, %v4584_v48  ;;  %4377 = vmatpush.msrb.mxu2 %v9621_v42 }
 0x391   : > { %v5393_v10 = vrot.slane %v5392_v39, 1  ;;  %v9636_v29 = vadd.f32 %v3519_v33, %v3423_v37  ;;  %3969 = vmatmul.f32.gmra.mxu2 %v11192_v20  ;;  %4094 = vmatmul.f32.gmra.mxu3 %v11193_v63  ;;  %v9652_v57 = vsub.f32 %v289_v6, %v9621_v42  ;;  %v9655_v48 = vand.u32 4294901760, %v287_v4  ;;  %v11195_v6 = vld [vmem:[#allocation112_spill] sm:$0xff] }
 0x392   : > { %v5553_v61 = vmax.f32 %v5551_v44, %v5552_v32  ;;  %v5470_v28 = vpop.permute.xlu1 %5469  ;;  %v4590_v41 = vsub.f32 %v9619_v14, %v10707_v0  ;;  %4828 = vmatpush.msra.mxu1 %v9621_v42  ;;  %4586 = vmatpush.msrb.mxu3 %v4585_v8  ;;  %v11194_v0 = vld [vmem:[#allocation122_spill] sm:$0xff] }
 0x393   : > { %11191 = vst [vmem:[#allocation56_spill] sm:$0xff] %v9636_v29  ;;  %v5394_v56 = vmax.f32 %v5392_v39, %v5393_v10  ;;  %v5506_v22 = vadd.f32 %v5470_v28, %v9599_v19  ;;  %v5468_v33 = vpop.permute.xlu0 %5467  ;;  %v3169_v37 = vpop.f32.mrf.mxu0  ;;  %v10709_v20 = vand.u32 4294901760, %v9652_v57  ;;  %4714 = vmatpush.msra.mxu0 %v9652_v57  ;;  %v9662_v46 = vsub.f32 %v287_v4, %v9655_v48 }
 0x394   : > { %v5554_v63 = vrot.slane %v5553_v61, 2  ;;  %v3289_v44 = vpop.f32.mrf.mxu1  ;;  %v3426_v32 = vpop.f32.mrf.mxu2  ;;  %v4591_v28 = vand.u32 4294901760, %v4590_v41  ;;  %4379 = vmatpush.msrb.mxu2 %v9655_v48  ;;  %4830 = vmatpush.msra.mxu1 %v9655_v48 }
 0x395   : > { %v3290_v39 = vadd.f32 %v3289_v44, %v3165_v59  ;;  %v3523_v10 = vpop.f32.mrf.mxu3  ;;  %3675 = vmatmul.f32.gmra.mxu0 %v11194_v0  ;;  %v9665_v3 = vsel %vm6042_vm10, %v5394_v56, %v6041_v12  ;;  %v4596_v59 = vsub.f32 %v9652_v57, %v10709_v20  ;;  %v11196_v0 = vand.u32 4294901760, %v9119_v60  ;;  %v11197_v12 = vld [vmem:[#allocation117_spill] sm:$0xff]  ;;  %v9679_v44 = vpop.permute.xlu2 %5471 }
 0x396   : > { %v5555_v29 = vmax.f32 %v5553_v61, %v5554_v63  ;;  %3844 = vmatmul.f32.gmra.mxu1 %v11195_v6  ;;  %4592 = vmatpush.msrb.mxu3 %v4591_v28  ;;  %v10708_v61 = vand.u32 4294901760, %v9662_v46  ;;  %v11199_v28 = vand.u32 4294901760, %v9161_v36 }
 0x397   : > { %v3427_v8 = vadd.f32 %v3426_v32, %v3290_v39  ;;  %4931 = vmatpush.msra.mxu2 %v11196_v0  ;;  %4717 = vmatpush.msra.mxu0 %v9662_v46  ;;  %v4597_v56 = vand.u32 4294901760, %v4596_v59  ;;  %v11198_v39 = vld [vmem:[#allocation119_spill] sm:$0xff] }
 0x398   : > { %v5556_v41 = vrot.slane %v5555_v29, 1  ;;  %v4602_v60 = vsub.f32 %v9662_v46, %v10708_v61 }
 0x399   : > { %v9675_v4 = vadd.f32 %v3523_v10, %v3427_v8  ;;  %3974 = vmatmul.f32.gmra.mxu2 %v11197_v12  ;;  %4100 = vmatmul.f32.gmra.mxu3 %v11198_v39  ;;  %v3170_v10 = vadd.f32 %v3169_v37, %v9123_v40  ;;  %v11200_v39 = vand.u32 4294901760, %v9276_v11  ;;  %v11201_v37 = vld [vmem:[#allocation127_spill] sm:$0xff] }
 0x39a   : > { %v5557_v63 = vmax.f32 %v5555_v29, %v5556_v41  ;;  %v5216_v32 = vpop.permute.xlu1 %5215  ;;  %4935 = vmatpush.msra.mxu2 %v11199_v28  ;;  %4598 = vmatpush.msrb.mxu3 %v4597_v56  ;;  %v4603_v12 = vand.u32 4294901760, %v4602_v60  ;;  %v5396_v56 = vsel %vm5350_vm3, %v9599_v19, -inf }
 0x39b   : > { %v5253_v8 = vadd.f32 %v5216_v32, %v9109_v17  ;;  %v9689_v59 = vpop.permute.xlu0 %5473  ;;  %v3174_v0 = vpop.f32.mrf.mxu0  ;;  %v11202_v32 = vld [vmem:[#allocation116_spill] sm:$0xff] }
 0x39c   : > { %v3295_v29 = vpop.f32.mrf.mxu1  ;;  %v3430_v41 = vpop.f32.mrf.mxu2  ;;  %4939 = vmatpush.msra.mxu2 %v11200_v39  ;;  %v9695_v61 = vsel %vm6042_vm10, %v5557_v63, %v9632_v52  ;;  %4604 = vmatpush.msrb.mxu3 %v4603_v12  ;;  %v11203_v39 = vand.u32 4294901760, %v9304_v51  ;;  %v3175_v51 = vadd.f32 %v3174_v0, %v9156_v35 }
 0x39d   : > { %v5342_v36 = vadd.f32 %v9586_v1, %v5253_v8  ;;  %v3296_v28 = vadd.f32 %v3295_v29, %v3170_v10  ;;  %v3527_v40 = vpop.f32.mrf.mxu3  ;;  %3683 = vmatmul.f32.gmra.mxu0 %v11201_v37  ;;  %v5559_v1 = vsel %vm5513_vm5, %v5506_v22, -inf  ;;  %v11204_v8 = vld [vmem:[#allocation121_spill] sm:$0xff] }
 0x39e   : > { %3848 = vmatmul.f32.gmra.mxu1 %v11202_v32  ;;  %4943 = vmatpush.msra.mxu2 %v11203_v39  ;;  %v11208_v39 = vld [vmem:[#allocation132_spill] sm:$0xff] }
 0x39f   : > { %v5395_v60 = vsel %vm5348_vm4, %v5342_v36, -inf  ;;  %v5505_v20 = vadd.f32 %v5468_v33, %v5342_v36  ;;  %v3431_v11 = vadd.f32 %v3430_v41, %v3296_v28  ;;  %5058 = vmatpush.msra.mxu3 %v9112_v47  ;;  %v11205_v33 = vld [vmem:[#allocation123_spill] sm:$0xff]  ;;  %v11206_v41 = vand.u32 4294901760, %v9342_v30 }
 0x3a0   : > { %v5397_v52 = vmax.f32 %v5395_v60, %v5396_v56  ;;  %v11207_v56 = vand.u32 4294901760, %v9381_v5  ;;  %v9719_v60 = vpop.permute.xlu2 %5477  ;;  %v11210_v5 = vand.u32 4294901760, %v9409_v38 }
 0x3a1   : > { %v5558_v63 = vsel %vm5511_vm6, %v5505_v20, -inf  ;;  %v9708_v10 = vadd.f32 %v3527_v40, %v3431_v11  ;;  %3979 = vmatmul.f32.gmra.mxu2 %v11204_v8  ;;  %4106 = vmatmul.f32.gmra.mxu3 %v11205_v33 }
 0x3a2   : > { %v5398_v19 = vrot.slane %v5397_v52, 4  ;;  %v5560_v29 = vmax.f32 %v5558_v63, %v5559_v1  ;;  %v5222_v37 = vpop.permute.xlu1 %5221  ;;  %4947 = vmatpush.msra.mxu2 %v11206_v41  ;;  %5060 = vmatpush.msra.mxu3 %v9146_v50  ;;  %v11209_v1 = vld [vmem:[#allocation120_spill] sm:$0xff] }
 0x3a3   : > { %v5256_v47 = vadd.f32 %v5222_v37, %v9153_v23  ;;  %v5220_v12 = vpop.permute.xlu0 %5219  ;;  %v3179_v22 = vpop.f32.mrf.mxu0 }
 0x3a4   : > { %v5399_v20 = vmax.f32 %v5397_v52, %v5398_v19  ;;  %v5561_v36 = vrot.slane %v5560_v29, 4  ;;  %v3301_v28 = vpop.f32.mrf.mxu1  ;;  %v3434_v40 = vpop.f32.mrf.mxu2  ;;  %4951 = vmatpush.msra.mxu2 %v11207_v56  ;;  %5062 = vmatpush.msra.mxu3 %v9197_v25  ;;  %v5255_v19 = vadd.f32 %v5220_v12, %v9193_v62  ;;  %v11211_v25 = vld [vmem:[#allocation125_spill] sm:$0xff] }
 0x3a5   : > { %v3302_v11 = vadd.f32 %v3301_v28, %v3175_v51  ;;  %v3531_v30 = vpop.f32.mrf.mxu3  ;;  %3691 = vmatmul.f32.gmra.mxu0 %v11208_v39  ;;  %v5345_v50 = vadd.f32 %v9624_v26, %v5256_v47  ;;  %v11212_v26 = vld [vmem:[#allocation128_spill] sm:$0xff]  ;;  %v3180_v51 = vadd.f32 %v3179_v22, %v9205_v58 }
 0x3a6   : > { %v5400_v35 = vrot.slane %v5399_v20, 2  ;;  %v5562_v0 = vmax.f32 %v5560_v29, %v5561_v36  ;;  %3852 = vmatmul.f32.gmra.mxu1 %v11209_v1  ;;  %5064 = vmatpush.msra.mxu3 %v9291_v16  ;;  %v11213_v16 = vand.u32 4294901760, %v9443_v54 }
 0x3a7   : > { %v3435_v52 = vadd.f32 %v3434_v40, %v3302_v11  ;;  %4955 = vmatpush.msra.mxu2 %v11210_v5  ;;  %v5508_v38 = vadd.f32 %v9689_v59, %v5345_v50  ;;  %v11214_v40 = vand.u32 4294901760, %v9477_v15  ;;  %v5405_v54 = vsel %vm5350_vm3, %v5345_v50, -inf }
 0x3a8   : > { %v5401_v63 = vmax.f32 %v5399_v20, %v5400_v35  ;;  %v5563_v8 = vrot.slane %v5562_v0, 2  ;;  %5066 = vmatpush.msra.mxu3 %v9306_v2  ;;  %v11216_v35 = vld [vmem:[#allocation124_spill] sm:$0xff]  ;;  %v5224_v39 = vpop.permute.xlu2 %5223 }
 0x3a9   : > { %v9729_v37 = vadd.f32 %v3531_v30, %v3435_v52  ;;  %3984 = vmatmul.f32.gmra.mxu2 %v11211_v25  ;;  %4112 = vmatmul.f32.gmra.mxu3 %v11212_v26  ;;  %v5568_v52 = vsel %vm5513_vm5, %v5508_v38, -inf  ;;  %v11218_v25 = vld [vmem:[#allocation131_spill] sm:$0xff]  ;;  %v11220_v26 = vand.u32 4294901760, %v9533_v43 }
 0x3aa   : > { %v5402_v29 = vrot.slane %v5401_v63, 1  ;;  %v5564_v33 = vmax.f32 %v5562_v0, %v5563_v8  ;;  %v5309_v41 = vpop.permute.xlu1 %5308  ;;  %4959 = vmatpush.msra.mxu2 %v11213_v16  ;;  %5068 = vmatpush.msra.mxu3 %v9350_v21  ;;  %v11215_v21 = vld [vmem:[#allocation134_spill] sm:$0xff] }
 0x3ab   : > { %v5344_v47 = vadd.f32 %v5309_v41, %v5255_v19  ;;  %v5226_v12 = vpop.permute.xlu0 %5225  ;;  %v3184_v20 = vpop.f32.mrf.mxu0 }
 0x3ac   : > { %v5403_v36 = vmax.f32 %v5401_v63, %v5402_v29  ;;  %v3307_v2 = vpop.f32.mrf.mxu1  ;;  %v3438_v28 = vpop.f32.mrf.mxu2  ;;  %4963 = vmatpush.msra.mxu2 %v11214_v40  ;;  %v5565_v56 = vrot.slane %v5564_v33, 1  ;;  %5070 = vmatpush.msra.mxu3 %v9392_v55  ;;  %v11217_v55 = vand.u32 4294901760, %v9507_v49  ;;  %v5258_v19 = vadd.f32 %v5226_v12, %v9228_v18  ;;  %v11219_v49 = vld [vmem:[#allocation133_spill] sm:$0xff] }
 0x3ad   : > { %v5404_v11 = vsel %vm5348_vm4, %v5344_v47, -inf  ;;  %v5507_v59 = vadd.f32 %v9679_v44, %v5344_v47  ;;  %v3308_v58 = vadd.f32 %v3307_v2, %v3180_v51  ;;  %v3535_v22 = vpop.f32.mrf.mxu3  ;;  %3699 = vmatmul.f32.gmra.mxu0 %v11215_v21  ;;  %v5257_v29 = vadd.f32 %v5224_v39, %v9253_v7  ;;  %v11226_v21 = vld [vmem:[#allocation46_spill] sm:$0xff] }
 0x3ae   : > { %v5406_v30 = vmax.f32 %v5404_v11, %v5405_v54  ;;  %3856 = vmatmul.f32.gmra.mxu1 %v11216_v35  ;;  %v5566_v0 = vmax.f32 %v5564_v33, %v5565_v56  ;;  %v9749_v15 = vsel %vm6044_vm11, %v5403_v36, %v9665_v3  ;;  %5072 = vmatpush.msra.mxu3 %v9421_v34 }
 0x3af   : > { %v5567_v50 = vsel %vm5511_vm6, %v5507_v59, -inf  ;;  %v3439_v44 = vadd.f32 %v3438_v28, %v3308_v58  ;;  %4967 = vmatpush.msra.mxu2 %v11217_v55  ;;  %v11221_v28 = vld [vmem:[#allocation54_spill] sm:$0xff]  ;;  %v11224_v59 = vld [vmem:[#allocation129_spill] sm:$0xff]  ;;  %v11225_v58 = vld [vmem:[#allocation68_spill] sm:$0xff] }
 0x3b0   : > { %v5407_v5 = vrot.slane %v5406_v30, 4  ;;  %v5569_v63 = vmax.f32 %v5567_v50, %v5568_v52  ;;  %v6063_v8 = vsel %vm6044_vm11, %v5566_v0, %v9695_v61  ;;  %5074 = vmatpush.msra.mxu3 %v9432_v31  ;;  %v3185_v61 = vadd.f32 %v3184_v20, %v9231_v24  ;;  %v11223_v20 = vld [vmem:[#allocation51_spill] sm:$0xff]  ;;  %v11228_v55 = vld [vmem:[#allocation138_spill] sm:$0xff] }
 0x3b1   : > { %v9759_v3 = vadd.f32 %v3535_v22, %v3439_v44  ;;  %3989 = vmatmul.f32.gmra.mxu2 %v11218_v25  ;;  %4118 = vmatmul.f32.gmra.mxu3 %v11219_v49  ;;  %v11222_v40 = vand.u32 4294901760, %v11221_v28  ;;  %v11227_v0 = vand.u32 4294901760, %v9603_v9  ;;  %v11231_v9 = vld [vmem:[#allocation34_spill] sm:$0xff]  ;;  %v11235_v28 = vld [vmem:[#allocation144_spill] sm:$0xff] }
 0x3b2   : > { %v5408_v33 = vmax.f32 %v5406_v30, %v5407_v5  ;;  %v5570_v34 = vrot.slane %v5569_v63, 4  ;;  %v5315_v41 = vpop.permute.xlu1 %5314  ;;  %4971 = vmatpush.msra.mxu2 %v11220_v26  ;;  %5076 = vmatpush.msra.mxu3 %v9483_v13  ;;  %v11232_v26 = vand.u32 4294901760, %v9652_v57  ;;  %v11234_v57 = vand.u32 4294901760, %v9662_v46 }
 0x3b3   : > { %v9768_v16 = vadd.f32 %v5315_v41, %v5258_v19  ;;  %v5313_v38 = vpop.permute.xlu0 %5312  ;;  %v3580_v51 = vpop.f32.mrf.mxu0  ;;  %v11230_v19 = vand.u32 4294901760, %v9619_v14 }
 0x3b4   : > { %v5409_v47 = vrot.slane %v5408_v33, 2  ;;  %v5571_v31 = vmax.f32 %v5569_v63, %v5570_v34  ;;  %v9771_v12 = vadd.f32 %v5313_v38, %v5257_v29  ;;  %v3313_v36 = vpop.f32.mrf.mxu1  ;;  %v3442_v2 = vpop.f32.mrf.mxu2  ;;  %4975 = vmatpush.msra.mxu2 %v11222_v40  ;;  %5078 = vmatpush.msra.mxu3 %v11223_v20  ;;  %v11229_v63 = vld [vmem:[#allocation130_spill] sm:$0xff] }
 0x3b5   : > { %v5414_v43 = vsel %vm5350_vm3, %v9768_v16, -inf  ;;  %v3314_v56 = vadd.f32 %v3313_v36, %v3185_v61  ;;  %v3539_v24 = vpop.f32.mrf.mxu3  ;;  %4187 = vmatmul.f32.vlgmr.msrb.gmra.mxu0 %v11225_v58  ;;  %v11237_v40 = vld [vmem:[#allocation42_spill] sm:$0xff]  ;;  %vm6091_vm3 = vcmask 392192  }
 0x3b6   : > { %v5410_v54 = vmax.f32 %v5408_v33, %v5409_v47  ;;  %v5572_v11 = vrot.slane %v5571_v31, 2  ;;  %v5413_v13 = vsel %vm5348_vm4, %v9771_v12, -inf  ;;  %3860 = vmatmul.f32.gmra.mxu1 %v11224_v59  ;;  %5080 = vmatpush.msra.mxu3 %v11226_v21  ;;  %v3581_v33 = vadd.f32 %v3580_v51, %v11231_v9  ;;  %v11241_v21 = vld [vmem:[#allocation183_spill] sm:$0xff]  ;;  %v11243_v9 = vld [vmem:[#allocation150_spill] sm:$0xff] }
 0x3b7   : > { %v5415_v22 = vmax.f32 %v5413_v13, %v5414_v43  ;;  %v3443_v30 = vadd.f32 %v3442_v2, %v3314_v56  ;;  %4979 = vmatpush.msra.mxu2 %v11227_v0 }
 0x3b8   : > { %v5411_v39 = vrot.slane %v5410_v54, 1  ;;  %v5573_v50 = vmax.f32 %v5571_v31, %v5572_v11  ;;  %5082 = vmatpush.msra.mxu3 %v9549_v27  ;;  %v11233_v31 = vld [vmem:[#allocation72_spill] sm:$0xff] }
 0x3b9   : > { %v5416_v52 = vrot.slane %v5415_v22, 4  ;;  %v9785_v44 = vadd.f32 %v3539_v24, %v3443_v30  ;;  %4385 = vmatmul.f32.vlgmr.msrb.gmra.mxu2 %v11228_v55  ;;  %4606 = vmatmul.f32.vlgmr.msrb.gmra.mxu3 %v11229_v63  ;;  %v11240_v30 = vld [vmem:[#allocation139_spill] sm:$0xff] }
 0x3ba   : > { %v5412_v5 = vmax.f32 %v5410_v54, %v5411_v39  ;;  %4983 = vmatpush.msra.mxu2 %v11230_v19  ;;  %v5574_v25 = vrot.slane %v5573_v50, 1  ;;  %5084 = vmatpush.msra.mxu3 %v9612_v53  ;;  %v11242_v19 = vld [vmem:[#allocation80_spill] sm:$0xff] }
 0x3bb   : > { %v5417_v29 = vmax.f32 %v5415_v22, %v5416_v52  ;;  %v3588_v34 = vpop.f32.mrf.mxu0  ;;  %v11239_v22 = vld [vmem:[#allocation146_spill] sm:$0xff] }
 0x3bc   : > { %v3801_v41 = vpop.f32.mrf.mxu1  ;;  %v3915_v49 = vpop.f32.mrf.mxu2  ;;  %4987 = vmatpush.msra.mxu2 %v11232_v26  ;;  %v5575_v27 = vmax.f32 %v5573_v50, %v5574_v25  ;;  %v6047_v61 = vsel %vm6046_vm12, %v5412_v5, %v9749_v15  ;;  %5086 = vmatpush.msra.mxu3 %v9621_v42  ;;  %v11236_v42 = vld [vmem:[#allocation136_spill] sm:$0xff]  ;;  %v3589_v43 = vadd.f32 %v3588_v34, %v11237_v40 }
 0x3bd   : > { %v5418_v38 = vrot.slane %v5417_v29, 2  ;;  %v3802_v47 = vadd.f32 %v3801_v41, %v3581_v33  ;;  %v4029_v14 = vpop.f32.mrf.mxu3  ;;  %4191 = vmatmul.f32.gmra.mxu0 %v11233_v31  ;;  %v11244_v33 = vld [vmem:[#allocation143_spill] sm:$0xff]  ;;  %v11245_v34 = vld [vmem:[#allocation40_spill] sm:$0xff] }
 0x3be   : > { %4284 = vmatmul.f32.vlgmr.msrb.gmra.mxu1 %v11225_v58  ;;  %v9802_v53 = vsel %vm6046_vm12, %v5575_v27, %v6063_v8  ;;  %4991 = vmatpush.msra.mxu2 %v11234_v57  ;;  %v11249_v57 = vld [vmem:[#allocation47_spill] sm:$0xff] }
 0x3bf   : > { %v5419_v51 = vmax.f32 %v5417_v29, %v5418_v38  ;;  %v3916_v36 = vadd.f32 %v3915_v49, %v3802_v47  ;;  %5088 = vmatpush.msra.mxu3 %v9655_v48  ;;  %v11238_v48 = vld [vmem:[#allocation76_spill] sm:$0xff] }
 0x3c0   : > { %v11246_v47 = vld [vmem:[#allocation84_spill] sm:$0xff] }
 0x3c1   : > { %v5420_v15 = vrot.slane %v5419_v51, 1  ;;  %v9807_v2 = vadd.f32 %v4029_v14, %v3916_v36  ;;  %4393 = vmatmul.f32.gmra.mxu2 %v11235_v28  ;;  %4610 = vmatmul.f32.gmra.mxu3 %v11236_v42  ;;  %v11248_v36 = vld [vmem:[#allocation148_spill] sm:$0xff] }
 0x3c3   : > { %v3596_v56 = vpop.f32.mrf.mxu0  ;;  %v5421_v8 = vmax.f32 %v5419_v51, %v5420_v15  ;;  %v11247_v51 = vld [vmem:[#allocation156_spill] sm:$0xff] }
 0x3c4   : > { %v3805_v24 = vpop.f32.mrf.mxu1  ;;  %v3920_v20 = vpop.f32.mrf.mxu2  ;;  %v3597_v0 = vadd.f32 %v3596_v56, %v11241_v21 }
 0x3c5   : > { %v3806_v54 = vadd.f32 %v3805_v24, %v3589_v43  ;;  %v4035_v11 = vpop.f32.mrf.mxu3  ;;  %v9813_v46 = vsel %vm6048_vm13, %v5421_v8, %v6047_v61  ;;  %4195 = vmatmul.f32.gmra.mxu0 %v11238_v48  ;;  %v11250_v24 = vld [vmem:[#allocation88_spill] sm:$0xff] }
 0x3c6   : > { %4288 = vmatmul.f32.gmra.mxu1 %v11233_v31 }
 0x3c7   : > { %v3921_v13 = vadd.f32 %v3920_v20, %v3806_v54 }
 0x3c9   : > { %v9817_v58 = vadd.f32 %v4035_v11, %v3921_v13  ;;  %4401 = vmatmul.f32.gmra.mxu2 %v11239_v22  ;;  %4614 = vmatmul.f32.gmra.mxu3 %v11240_v30  ;;  %v11251_v11 = vld [vmem:[#allocation159_spill] sm:$0xff]  ;;  %v11253_v13 = vld [vmem:[#allocation188_spill] sm:$0xff] }
 0x3cb   : > { %v3604_v39 = vpop.f32.mrf.mxu0 }
 0x3cc   : > { %v3809_v50 = vpop.f32.mrf.mxu1  ;;  %v3925_v52 = vpop.f32.mrf.mxu2  ;;  %v3605_v41 = vadd.f32 %v3604_v39, %v11245_v34  ;;  %v11257_v34 = vld [vmem:[#allocation44_spill] sm:$0xff] }
 0x3cd   : > { %v3810_v55 = vadd.f32 %v3809_v50, %v3597_v0  ;;  %v4041_v5 = vpop.f32.mrf.mxu3  ;;  %4199 = vmatmul.f32.gmra.mxu0 %v11242_v19 }
 0x3ce   : > { %4292 = vmatmul.f32.gmra.mxu1 %v11238_v48  ;;  %v11252_v48 = vld [vmem:[#allocation151_spill] sm:$0xff] }
 0x3cf   : > { %v3926_v25 = vadd.f32 %v3925_v52, %v3810_v55  ;;  %v11254_v55 = vld [vmem:[#allocation92_spill] sm:$0xff] }
 0x3d1   : > { %v9824_v29 = vadd.f32 %v4041_v5, %v3926_v25  ;;  %4409 = vmatmul.f32.gmra.mxu2 %v11243_v9  ;;  %4618 = vmatmul.f32.gmra.mxu3 %v11244_v33  ;;  %v11255_v25 = vld [vmem:[#allocation164_spill] sm:$0xff]  ;;  %v11256_v9 = vld [vmem:[#allocation155_spill] sm:$0xff] }
 0x3d3   : > { %v3612_v49 = vpop.f32.mrf.mxu0 }
 0x3d4   : > { %v3813_v26 = vpop.f32.mrf.mxu1  ;;  %v3930_v27 = vpop.f32.mrf.mxu2  ;;  %v3613_v15 = vadd.f32 %v3612_v49, %v11249_v57  ;;  %v11259_v57 = vld [vmem:[#allocation171_spill] sm:$0xff] }
 0x3d5   : > { %v3814_v61 = vadd.f32 %v3813_v26, %v3605_v41  ;;  %v4047_v38 = vpop.f32.mrf.mxu3  ;;  %4203 = vmatmul.f32.gmra.mxu0 %v11246_v47 }
 0x3d6   : > { %4296 = vmatmul.f32.gmra.mxu1 %v11242_v19 }
 0x3d7   : > { %v3931_v14 = vadd.f32 %v3930_v27, %v3814_v61 }
 0x3d9   : > { %v9831_v31 = vadd.f32 %v4047_v38, %v3931_v14  ;;  %4417 = vmatmul.f32.gmra.mxu2 %v11247_v51  ;;  %4622 = vmatmul.f32.gmra.mxu3 %v11248_v36 }
 0x3db   : > { %v3620_v28 = vpop.f32.mrf.mxu0 }
 0x3dc   : > { %v3817_v40 = vpop.f32.mrf.mxu1  ;;  %v3935_v43 = vpop.f32.mrf.mxu2  ;;  %v3621_v22 = vadd.f32 %v3620_v28, %v11253_v13  ;;  %v11261_v28 = vld [vmem:[#allocation193_spill] sm:$0xff] }
 0x3dd   : > { %v3818_v56 = vadd.f32 %v3817_v40, %v3613_v15  ;;  %v4053_v8 = vpop.f32.mrf.mxu3  ;;  %4207 = vmatmul.f32.gmra.mxu0 %v11250_v24  ;;  %v11260_v15 = vld [vmem:[#allocation161_spill] sm:$0xff] }
 0x3de   : > { %4300 = vmatmul.f32.gmra.mxu1 %v11246_v47  ;;  %v11258_v47 = vld [vmem:[#allocation96_spill] sm:$0xff] }
 0x3df   : > { %v3936_v20 = vadd.f32 %v3935_v43, %v3818_v56 }
 0x3e1   : > { %v9838_v54 = vadd.f32 %v4053_v8, %v3936_v20  ;;  %4425 = vmatmul.f32.gmra.mxu2 %v11251_v11  ;;  %4626 = vmatmul.f32.gmra.mxu3 %v11252_v48  ;;  %v11262_v11 = vld [vmem:[#allocation100_spill] sm:$0xff] }
 0x3e3   : > { %v3628_v21 = vpop.f32.mrf.mxu0 }
 0x3e4   : > { %v3821_v0 = vpop.f32.mrf.mxu1  ;;  %v3940_v39 = vpop.f32.mrf.mxu2  ;;  %v3629_v41 = vadd.f32 %v3628_v21, %v11257_v34  ;;  %v11263_v21 = vld [vmem:[#allocation174_spill] sm:$0xff] }
 0x3e5   : > { %v3822_v50 = vadd.f32 %v3821_v0, %v3621_v22  ;;  %v4059_v52 = vpop.f32.mrf.mxu3  ;;  %4211 = vmatmul.f32.gmra.mxu0 %v11254_v55  ;;  %v11264_v0 = vld [vmem:[#allocation165_spill] sm:$0xff] }
 0x3e6   : > { %4304 = vmatmul.f32.gmra.mxu1 %v11250_v24 }
 0x3e7   : > { %v3941_v5 = vadd.f32 %v3940_v39, %v3822_v50  ;;  %v11265_v39 = vld [vmem:[#allocation52_spill] sm:$0xff] }
 0x3e9   : > { %v9845_v19 = vadd.f32 %v4059_v52, %v3941_v5  ;;  %4433 = vmatmul.f32.gmra.mxu2 %v11255_v25  ;;  %4630 = vmatmul.f32.gmra.mxu3 %v11256_v9 }
 0x3eb   : > { %v3636_v49 = vpop.f32.mrf.mxu0 }
 0x3ec   : > { %v3825_v26 = vpop.f32.mrf.mxu1  ;;  %v3945_v27 = vpop.f32.mrf.mxu2  ;;  %v3637_v40 = vadd.f32 %v3636_v49, %v11261_v28 }
 0x3ed   : > { %v3826_v61 = vadd.f32 %v3825_v26, %v3629_v41  ;;  %v4065_v38 = vpop.f32.mrf.mxu3  ;;  %4215 = vmatmul.f32.gmra.mxu0 %v11258_v47  ;;  %v11266_v26 = vld [vmem:[#allocation179_spill] sm:$0xff] }
 0x3ee   : > { %4308 = vmatmul.f32.gmra.mxu1 %v11254_v55 }
 0x3ef   : > { %v3946_v14 = vadd.f32 %v3945_v27, %v3826_v61  ;;  %v11267_v27 = vld [vmem:[#allocation170_spill] sm:$0xff] }
 0x3f0   : > { %v11268_v61 = vld [vmem:[#allocation58_spill] sm:$0xff] }
 0x3f1   : > { %v9852_v51 = vadd.f32 %v4065_v38, %v3946_v14  ;;  %4441 = vmatmul.f32.gmra.mxu2 %v11259_v57  ;;  %4634 = vmatmul.f32.gmra.mxu3 %v11260_v15 }
 0x3f3   : > { %v3644_v43 = vpop.f32.mrf.mxu0 }
 0x3f4   : > { %v3829_v56 = vpop.f32.mrf.mxu1  ;;  %v3950_v8 = vpop.f32.mrf.mxu2  ;;  %v3645_v50 = vadd.f32 %v3644_v43, %v11265_v39  ;;  %v11269_v43 = vld [vmem:[#allocation108_spill] sm:$0xff] }
 0x3f5   : > { %v3830_v24 = vadd.f32 %v3829_v56, %v3637_v40  ;;  %v4071_v20 = vpop.f32.mrf.mxu3  ;;  %4219 = vmatmul.f32.gmra.mxu0 %v11262_v11 }
 0x3f6   : > { %4312 = vmatmul.f32.gmra.mxu1 %v11258_v47 }
 0x3f7   : > { %v3951_v13 = vadd.f32 %v3950_v8, %v3830_v24  ;;  %v11270_v24 = vld [vmem:[#allocation186_spill] sm:$0xff] }
 0x3f9   : > { %v9859_v22 = vadd.f32 %v4071_v20, %v3951_v13  ;;  %4449 = vmatmul.f32.gmra.mxu2 %v11263_v21  ;;  %4638 = vmatmul.f32.gmra.mxu3 %v11264_v0  ;;  %v11271_v20 = vld [vmem:[#allocation176_spill] sm:$0xff] }
 0x3fb   : > { %v3652_v52 = vpop.f32.mrf.mxu0 }
 0x3fc   : > { %v3833_v55 = vpop.f32.mrf.mxu1  ;;  %v3955_v5 = vpop.f32.mrf.mxu2  ;;  %v3653_v38 = vadd.f32 %v3652_v52, %v11268_v61 }
 0x3fd   : > { %v3834_v25 = vadd.f32 %v3833_v55, %v3645_v50  ;;  %v4077_v34 = vpop.f32.mrf.mxu3  ;;  %4223 = vmatmul.f32.gmra.mxu0 %v11184_v45 }
 0x3fe   : > { %4316 = vmatmul.f32.gmra.mxu1 %v11262_v11  ;;  %v11272_v11 = vld [vmem:[#allocation56_spill] sm:$0xff] }
 0x3ff   : > { %v3956_v41 = vadd.f32 %v3955_v5, %v3834_v25  ;;  %v11273_v25 = vld [vmem:[#allocation189_spill] sm:$0xff] }
 0x401   : > { %v9866_v49 = vadd.f32 %v4077_v34, %v3956_v41  ;;  %4457 = vmatmul.f32.gmra.mxu2 %v11266_v26  ;;  %4642 = vmatmul.f32.gmra.mxu3 %v11267_v27  ;;  %v11274_v34 = vld [vmem:[#allocation180_spill] sm:$0xff] }
 0x403   : > { %v3660_v47 = vpop.f32.mrf.mxu0 }
 0x404   : > { %v3837_v14 = vpop.f32.mrf.mxu1  ;;  %v3960_v57 = vpop.f32.mrf.mxu2  ;;  %v3661_v13 = vadd.f32 %v3660_v47, %v11272_v11 }
 0x405   : > { %v3838_v28 = vadd.f32 %v3837_v14, %v3653_v38  ;;  %v4083_v40 = vpop.f32.mrf.mxu3  ;;  %4227 = vmatmul.f32.gmra.mxu0 %v11269_v43 }
 0x406   : > { %4320 = vmatmul.f32.gmra.mxu1 %v11184_v45 }
 0x407   : > { %v3961_v56 = vadd.f32 %v3960_v57, %v3838_v28 }
 0x409   : > { %v9873_v8 = vadd.f32 %v4083_v40, %v3961_v56  ;;  %4465 = vmatmul.f32.gmra.mxu2 %v11270_v24  ;;  %4646 = vmatmul.f32.gmra.mxu3 %v11271_v20  ;;  %v11275_v40 = vld [vmem:[#allocation194_spill] sm:$0xff] }
 0x40b   : > { %v3668_v21 = vpop.f32.mrf.mxu0 }
 0x40c   : > { %v3841_v39 = vpop.f32.mrf.mxu1  ;;  %v3965_v50 = vpop.f32.mrf.mxu2  ;;  %v3669_v41 = vadd.f32 %v3668_v21, %v9675_v4 }
 0x40d   : > { %v3842_v52 = vadd.f32 %v3841_v39, %v3661_v13  ;;  %v4089_v55 = vpop.f32.mrf.mxu3  ;;  %4231 = vmatmul.f32.gmra.mxu0 %v11195_v6 }
 0x40e   : > { %4324 = vmatmul.f32.gmra.mxu1 %v11269_v43  ;;  %v11276_v43 = vld [vmem:[#allocation185_spill] sm:$0xff] }
 0x40f   : > { %v3966_v5 = vadd.f32 %v3965_v50, %v3842_v52  ;;  %v11277_v50 = vld [vmem:[#allocation198_spill] sm:$0xff]  ;;  %v11278_v52 = vld [vmem:[#allocation191_spill] sm:$0xff] }
 0x411   : > { %v9880_v45 = vadd.f32 %v4089_v55, %v3966_v5  ;;  %4473 = vmatmul.f32.gmra.mxu2 %v11273_v25  ;;  %4650 = vmatmul.f32.gmra.mxu3 %v11274_v34 }
 0x413   : > { %v3676_v26 = vpop.f32.mrf.mxu0 }
 0x414   : > { %v3845_v61 = vpop.f32.mrf.mxu1  ;;  %v3970_v38 = vpop.f32.mrf.mxu2  ;;  %v3677_v56 = vadd.f32 %v3676_v26, %v9708_v10 }
 0x415   : > { %v3846_v47 = vadd.f32 %v3845_v61, %v3669_v41  ;;  %v4095_v14 = vpop.f32.mrf.mxu3  ;;  %4235 = vmatmul.f32.gmra.mxu0 %v11202_v32 }
 0x416   : > { %4328 = vmatmul.f32.gmra.mxu1 %v11195_v6 }
 0x417   : > { %v3971_v57 = vadd.f32 %v3970_v38, %v3846_v47  ;;  %v11279_v38 = vld [vmem:[#allocation202_spill] sm:$0xff]  ;;  %v11280_v47 = vld [vmem:[#allocation196_spill] sm:$0xff] }
 0x419   : > { %v9887_v28 = vadd.f32 %v4095_v14, %v3971_v57  ;;  %4481 = vmatmul.f32.gmra.mxu2 %v11275_v40  ;;  %4654 = vmatmul.f32.gmra.mxu3 %v11276_v43 }
 0x41b   : > { %v3684_v24 = vpop.f32.mrf.mxu0 }
 0x41c   : > { %v3849_v4 = vpop.f32.mrf.mxu1  ;;  %v3975_v11 = vpop.f32.mrf.mxu2  ;;  %v3685_v55 = vadd.f32 %v3684_v24, %v9729_v37 }
 0x41d   : > { %v3850_v13 = vadd.f32 %v3849_v4, %v3677_v56  ;;  %v4101_v21 = vpop.f32.mrf.mxu3  ;;  %4239 = vmatmul.f32.gmra.mxu0 %v11209_v1 }
 0x41e   : > { %4332 = vmatmul.f32.gmra.mxu1 %v11202_v32 }
 0x41f   : > { %v3976_v39 = vadd.f32 %v3975_v11, %v3850_v13  ;;  %v11281_v11 = vld [vmem:[#allocation204_spill] sm:$0xff] }
 0x420   : > { %v11282_v13 = vld [vmem:[#allocation200_spill] sm:$0xff] }
 0x421   : > { %v9894_v6 = vadd.f32 %v4101_v21, %v3976_v39  ;;  %4489 = vmatmul.f32.gmra.mxu2 %v11277_v50  ;;  %4658 = vmatmul.f32.gmra.mxu3 %v11278_v52 }
 0x423   : > { %v3692_v5 = vpop.f32.mrf.mxu0 }
 0x424   : > { %v3853_v10 = vpop.f32.mrf.mxu1  ;;  %v3980_v25 = vpop.f32.mrf.mxu2  ;;  %v3693_v14 = vadd.f32 %v3692_v5, %v9759_v3 }
 0x425   : > { %v3854_v41 = vadd.f32 %v3853_v10, %v3685_v55  ;;  %v4107_v26 = vpop.f32.mrf.mxu3  ;;  %4243 = vmatmul.f32.gmra.mxu0 %v11216_v35  ;;  %v11283_v10 = vld [vmem:[#allocation126_spill] sm:$0xff] }
 0x426   : > { %4336 = vmatmul.f32.gmra.mxu1 %v11209_v1 }
 0x427   : > { %v3981_v61 = vadd.f32 %v3980_v25, %v3854_v41 }
 0x429   : > { %v9901_v32 = vadd.f32 %v4107_v26, %v3981_v61  ;;  %4497 = vmatmul.f32.gmra.mxu2 %v11279_v38  ;;  %4662 = vmatmul.f32.gmra.mxu3 %v11280_v47 }
 0x42b   : > { %v3700_v57 = vpop.f32.mrf.mxu0 }
 0x42c   : > { %v3857_v37 = vpop.f32.mrf.mxu1  ;;  %v3985_v40 = vpop.f32.mrf.mxu2  ;;  %v3701_v21 = vadd.f32 %v3700_v57, %v9785_v44  ;;  %v11284_v57 = vld [vmem:[#allocation137_spill] sm:$0xff] }
 0x42d   : > { %v3858_v56 = vadd.f32 %v3857_v37, %v3693_v14  ;;  %v4113_v24 = vpop.f32.mrf.mxu3  ;;  %4247 = vmatmul.f32.gmra.mxu0 %v11224_v59  ;;  %v11285_v37 = vld [vmem:[#allocation135_spill] sm:$0xff] }
 0x42e   : > { %4340 = vmatmul.f32.gmra.mxu1 %v11216_v35 }
 0x42f   : > { %v3986_v4 = vadd.f32 %v3985_v40, %v3858_v56 }
 0x431   : > { %v9908_v1 = vadd.f32 %v4113_v24, %v3986_v4  ;;  %4505 = vmatmul.f32.gmra.mxu2 %v11281_v11  ;;  %4666 = vmatmul.f32.gmra.mxu3 %v11282_v13 }
 0x433   : > { %v4188_v39 = vpop.f32.mrf.mxu0 }
 0x434   : > { %v3861_v3 = vpop.f32.mrf.mxu1  ;;  %v3990_v50 = vpop.f32.mrf.mxu2  ;;  %v4189_v41 = vadd.f32 %v4188_v39, %v9807_v2  ;;  %v11287_v39 = vld [vmem:[#allocation140_spill] sm:$0xff] }
 0x435   : > { %v3862_v55 = vadd.f32 %v3861_v3, %v3701_v21  ;;  %v4119_v5 = vpop.f32.mrf.mxu3  ;;  %4720 = vmatmul.f32.vlgmr.msra.gmra.mxu0 %v11283_v10  ;;  %v11286_v21 = vld [vmem:[#allocation141_spill] sm:$0xff] }
 0x436   : > { %4344 = vmatmul.f32.gmra.mxu1 %v11224_v59 }
 0x437   : > { %v3991_v25 = vadd.f32 %v3990_v50, %v3862_v55 }
 0x439   : > { %v9915_v35 = vadd.f32 %v4119_v5, %v3991_v25  ;;  %4993 = vmatmul.f32.vlgmr.msra.gmra.mxu2 %v11229_v63  ;;  %5090 = vmatmul.f32.vlgmr.msra.gmra.mxu3 %v11229_v63 }
 0x43b   : > { %v4192_v26 = vpop.f32.mrf.mxu0 }
 0x43c   : > { %v4285_v44 = vpop.f32.mrf.mxu1  ;;  %v4386_v61 = vpop.f32.mrf.mxu2  ;;  %v4193_v63 = vadd.f32 %v4192_v26, %v9817_v58  ;;  %v11289_v26 = vld [vmem:[#allocation142_spill] sm:$0xff] }
 0x43d   : > { %v4286_v38 = vadd.f32 %v4285_v44, %v4189_v41  ;;  %v4607_v14 = vpop.f32.mrf.mxu3  ;;  %4725 = vmatmul.f32.gmra.mxu0 %v11284_v57  ;;  %v11288_v41 = vld [vmem:[#allocation145_spill] sm:$0xff] }
 0x43e   : > { %4834 = vmatmul.f32.vlgmr.msra.gmra.mxu1 %v11285_v37 }
 0x43f   : > { %v4387_v59 = vadd.f32 %v4386_v61, %v4286_v38 }
 0x441   : > { %v9922_v40 = vadd.f32 %v4607_v14, %v4387_v59  ;;  %4997 = vmatmul.f32.gmra.mxu2 %v11236_v42  ;;  %5094 = vmatmul.f32.gmra.mxu3 %v11236_v42  ;;  %v11290_v59 = vld [vmem:[#allocation149_spill] sm:$0xff] }
 0x443   : > { %v4196_v56 = vpop.f32.mrf.mxu0 }
 0x444   : > { %v4289_v2 = vpop.f32.mrf.mxu1  ;;  %v4394_v24 = vpop.f32.mrf.mxu2  ;;  %v4197_v42 = vadd.f32 %v4196_v56, %v9824_v29 }
 0x445   : > { %v4290_v4 = vadd.f32 %v4289_v2, %v4193_v63  ;;  %v4611_v11 = vpop.f32.mrf.mxu3  ;;  %4730 = vmatmul.f32.gmra.mxu0 %v11286_v21  ;;  %v11291_v63 = vld [vmem:[#allocation147_spill] sm:$0xff] }
 0x446   : > { %4840 = vmatmul.f32.gmra.mxu1 %v11287_v39  ;;  %v11292_v39 = vld [vmem:[#allocation153_spill] sm:$0xff] }
 0x447   : > { %v4395_v3 = vadd.f32 %v4394_v24, %v4290_v4 }
 0x449   : > { %v9929_v50 = vadd.f32 %v4611_v11, %v4395_v3  ;;  %5001 = vmatmul.f32.gmra.mxu2 %v11240_v30  ;;  %5098 = vmatmul.f32.gmra.mxu3 %v11240_v30  ;;  %v11293_v3 = vld [vmem:[#allocation152_spill] sm:$0xff] }
 0x44b   : > { %v4200_v55 = vpop.f32.mrf.mxu0 }
 0x44c   : > { %v4293_v58 = vpop.f32.mrf.mxu1  ;;  %v4402_v5 = vpop.f32.mrf.mxu2  ;;  %v4201_v30 = vadd.f32 %v4200_v55, %v9831_v31 }
 0x44d   : > { %v4294_v10 = vadd.f32 %v4293_v58, %v4197_v42  ;;  %v4615_v25 = vpop.f32.mrf.mxu3  ;;  %4735 = vmatmul.f32.gmra.mxu0 %v11288_v41  ;;  %v11294_v41 = vld [vmem:[#allocation157_spill] sm:$0xff] }
 0x44e   : > { %4846 = vmatmul.f32.gmra.mxu1 %v11289_v26  ;;  %v11295_v26 = vld [vmem:[#allocation154_spill] sm:$0xff] }
 0x44f   : > { %v4403_v44 = vadd.f32 %v4402_v5, %v4294_v10 }
 0x451   : > { %v9936_v61 = vadd.f32 %v4615_v25, %v4403_v44  ;;  %5005 = vmatmul.f32.gmra.mxu2 %v11244_v33  ;;  %5102 = vmatmul.f32.gmra.mxu3 %v11244_v33 }
 0x453   : > { %v4204_v38 = vpop.f32.mrf.mxu0 }
 0x454   : > { %v4297_v29 = vpop.f32.mrf.mxu1  ;;  %v4410_v14 = vpop.f32.mrf.mxu2  ;;  %v4205_v33 = vadd.f32 %v4204_v38, %v9838_v54 }
 0x455   : > { %v4298_v57 = vadd.f32 %v4297_v29, %v4201_v30  ;;  %v4619_v37 = vpop.f32.mrf.mxu3  ;;  %4740 = vmatmul.f32.gmra.mxu0 %v11290_v59  ;;  %v11297_v59 = vld [vmem:[#allocation160_spill] sm:$0xff] }
 0x456   : > { %4852 = vmatmul.f32.gmra.mxu1 %v11291_v63 }
 0x457   : > { %v4411_v56 = vadd.f32 %v4410_v14, %v4298_v57 }
 0x459   : > { %v9943_v2 = vadd.f32 %v4619_v37, %v4411_v56  ;;  %5009 = vmatmul.f32.gmra.mxu2 %v11248_v36  ;;  %5106 = vmatmul.f32.gmra.mxu3 %v11248_v36  ;;  %v11296_v37 = vld [vmem:[#allocation162_spill] sm:$0xff] }
 0x45b   : > { %v4208_v24 = vpop.f32.mrf.mxu0 }
 0x45c   : > { %v4301_v31 = vpop.f32.mrf.mxu1  ;;  %v4418_v4 = vpop.f32.mrf.mxu2  ;;  %v4209_v36 = vadd.f32 %v4208_v24, %v9845_v19 }
 0x45d   : > { %v4302_v11 = vadd.f32 %v4301_v31, %v4205_v33  ;;  %v4623_v21 = vpop.f32.mrf.mxu3  ;;  %4745 = vmatmul.f32.gmra.mxu0 %v11292_v39  ;;  %v11299_v39 = vld [vmem:[#allocation166_spill] sm:$0xff] }
 0x45e   : > { %4858 = vmatmul.f32.gmra.mxu1 %v11293_v3 }
 0x45f   : > { %v4419_v42 = vadd.f32 %v4418_v4, %v4302_v11 }
 0x461   : > { %v9950_v55 = vadd.f32 %v4623_v21, %v4419_v42  ;;  %5013 = vmatmul.f32.gmra.mxu2 %v11252_v48  ;;  %5110 = vmatmul.f32.gmra.mxu3 %v11252_v48  ;;  %v11298_v21 = vld [vmem:[#allocation167_spill] sm:$0xff] }
 0x463   : > { %v4212_v58 = vpop.f32.mrf.mxu0 }
 0x464   : > { %v4305_v54 = vpop.f32.mrf.mxu1  ;;  %v4426_v5 = vpop.f32.mrf.mxu2  ;;  %v4213_v48 = vadd.f32 %v4212_v58, %v9852_v51 }
 0x465   : > { %v4306_v10 = vadd.f32 %v4305_v54, %v4209_v36  ;;  %v4627_v25 = vpop.f32.mrf.mxu3  ;;  %4750 = vmatmul.f32.gmra.mxu0 %v11294_v41 }
 0x466   : > { %4864 = vmatmul.f32.gmra.mxu1 %v11295_v26 }
 0x467   : > { %v4427_v44 = vadd.f32 %v4426_v5, %v4306_v10  ;;  %v11300_v5 = vld [vmem:[#allocation172_spill] sm:$0xff]  ;;  %v11301_v10 = vld [vmem:[#allocation169_spill] sm:$0xff] }
 0x469   : > { %v9957_v30 = vadd.f32 %v4627_v25, %v4427_v44  ;;  %5017 = vmatmul.f32.gmra.mxu2 %v11256_v9  ;;  %5114 = vmatmul.f32.gmra.mxu3 %v11256_v9 }
 0x46b   : > { %v4216_v38 = vpop.f32.mrf.mxu0 }
 0x46c   : > { %v4309_v19 = vpop.f32.mrf.mxu1  ;;  %v4434_v29 = vpop.f32.mrf.mxu2  ;;  %v4217_v9 = vadd.f32 %v4216_v38, %v9859_v22 }
 0x46d   : > { %v4310_v14 = vadd.f32 %v4309_v19, %v4213_v48  ;;  %v4631_v57 = vpop.f32.mrf.mxu3  ;;  %4755 = vmatmul.f32.gmra.mxu0 %v11296_v37  ;;  %v11302_v19 = vld [vmem:[#allocation177_spill] sm:$0xff] }
 0x46e   : > { %4870 = vmatmul.f32.gmra.mxu1 %v11297_v59 }
 0x46f   : > { %v4435_v63 = vadd.f32 %v4434_v29, %v4310_v14  ;;  %v11303_v29 = vld [vmem:[#allocation175_spill] sm:$0xff] }
 0x471   : > { %v9964_v56 = vadd.f32 %v4631_v57, %v4435_v63  ;;  %5021 = vmatmul.f32.gmra.mxu2 %v11260_v15  ;;  %5118 = vmatmul.f32.gmra.mxu3 %v11260_v15 }
 0x473   : > { %v4220_v33 = vpop.f32.mrf.mxu0 }
 0x474   : > { %v4221_v51 = vadd.f32 %v4220_v33, %v9866_v49  ;;  %v4313_v24 = vpop.f32.mrf.mxu1  ;;  %v4442_v31 = vpop.f32.mrf.mxu2  ;;  %v11304_v33 = vld [vmem:[#allocation182_spill] sm:$0xff] }
 0x475   : > { %v4314_v4 = vadd.f32 %v4313_v24, %v4217_v9  ;;  %v4635_v11 = vpop.f32.mrf.mxu3  ;;  %4760 = vmatmul.f32.gmra.mxu0 %v11298_v21 }
 0x476   : > { %4876 = vmatmul.f32.gmra.mxu1 %v11299_v39 }
 0x477   : > { %v4443_v3 = vadd.f32 %v4442_v31, %v4314_v4 }
 0x479   : > { %v9972_v42 = vadd.f32 %v4635_v11, %v4443_v3  ;;  %5025 = vmatmul.f32.gmra.mxu2 %v11264_v0  ;;  %5122 = vmatmul.f32.gmra.mxu3 %v11264_v0  ;;  %v11306_v3 = vld [vmem:[#allocation187_spill] sm:$0xff] }
 0x47b   : > { %v4224_v15 = vpop.f32.mrf.mxu0 }
 0x47c   : > { %v4225_v22 = vadd.f32 %v4224_v15, %v9873_v8  ;;  %v4317_v36 = vpop.f32.mrf.mxu1  ;;  %v4450_v49 = vpop.f32.mrf.mxu2  ;;  %v11307_v15 = vld [vmem:[#allocation184_spill] sm:$0xff] }
 0x47d   : > { %v4318_v58 = vadd.f32 %v4317_v36, %v4221_v51  ;;  %v4639_v54 = vpop.f32.mrf.mxu3  ;;  %4765 = vmatmul.f32.gmra.mxu0 %v11300_v5  ;;  %v11305_v51 = vld [vmem:[#allocation181_spill] sm:$0xff] }
 0x47e   : > { %4882 = vmatmul.f32.gmra.mxu1 %v11301_v10  ;;  %v11308_v10 = vld [vmem:[#allocation192_spill] sm:$0xff] }
 0x47f   : > { %v4451_v25 = vadd.f32 %v4450_v49, %v4318_v58 }
 0x481   : > { %v9979_v41 = vadd.f32 %v4639_v54, %v4451_v25  ;;  %5029 = vmatmul.f32.gmra.mxu2 %v11267_v27  ;;  %5126 = vmatmul.f32.gmra.mxu3 %v11267_v27  ;;  %v11309_v25 = vld [vmem:[#allocation190_spill] sm:$0xff] }
 0x483   : > { %v4228_v26 = vpop.f32.mrf.mxu0 }
 0x484   : > { %v4229_v0 = vadd.f32 %v4228_v26, %v9880_v45  ;;  %v4321_v44 = vpop.f32.mrf.mxu1  ;;  %v4458_v8 = vpop.f32.mrf.mxu2 }
 0x485   : > { %v4322_v48 = vadd.f32 %v4321_v44, %v4225_v22  ;;  %v4643_v38 = vpop.f32.mrf.mxu3  ;;  %4770 = vmatmul.f32.gmra.mxu0 %v11302_v19  ;;  %v11310_v19 = vld [vmem:[#allocation197_spill] sm:$0xff] }
 0x486   : > { %4888 = vmatmul.f32.gmra.mxu1 %v11303_v29  ;;  %v11311_v29 = vld [vmem:[#allocation195_spill] sm:$0xff] }
 0x487   : > { %v4459_v14 = vadd.f32 %v4458_v8, %v4322_v48 }
 0x489   : > { %v9986_v57 = vadd.f32 %v4643_v38, %v4459_v14  ;;  %5033 = vmatmul.f32.gmra.mxu2 %v11271_v20  ;;  %5130 = vmatmul.f32.gmra.mxu3 %v11271_v20 }
 0x48b   : > { %v4232_v37 = vpop.f32.mrf.mxu0 }
 0x48c   : > { %v4233_v27 = vadd.f32 %v4232_v37, %v9887_v28  ;;  %v4325_v59 = vpop.f32.mrf.mxu1  ;;  %v4466_v45 = vpop.f32.mrf.mxu2 }
 0x48d   : > { %v4326_v63 = vadd.f32 %v4325_v59, %v4229_v0  ;;  %v4647_v9 = vpop.f32.mrf.mxu3  ;;  %4775 = vmatmul.f32.gmra.mxu0 %v11304_v33  ;;  %v11313_v33 = vld [vmem:[#allocation199_spill] sm:$0xff] }
 0x48e   : > { %4894 = vmatmul.f32.gmra.mxu1 %v11305_v51 }
 0x48f   : > { %v4467_v24 = vadd.f32 %v4466_v45, %v4326_v63 }
 0x491   : > { %v9993_v31 = vadd.f32 %v4647_v9, %v4467_v24  ;;  %5037 = vmatmul.f32.gmra.mxu2 %v11274_v34  ;;  %5134 = vmatmul.f32.gmra.mxu3 %v11274_v34  ;;  %v11312_v9 = vld [vmem:[#allocation201_spill] sm:$0xff] }
 0x493   : > { %v4236_v4 = vpop.f32.mrf.mxu0 }
 0x494   : > { %v4237_v20 = vadd.f32 %v4236_v4, %v9894_v6  ;;  %v4329_v11 = vpop.f32.mrf.mxu1  ;;  %v4474_v28 = vpop.f32.mrf.mxu2 }
 0x495   : > { %v4330_v21 = vadd.f32 %v4329_v11, %v4233_v27  ;;  %v4651_v39 = vpop.f32.mrf.mxu3  ;;  %4780 = vmatmul.f32.gmra.mxu0 %v11306_v3 }
 0x496   : > { %4900 = vmatmul.f32.gmra.mxu1 %v11307_v15 }
 0x497   : > { %v4475_v22 = vadd.f32 %v4474_v28, %v4330_v21  ;;  %v11314_v28 = vld [vmem:[#allocation203_spill] sm:$0xff] }
 0x499   : > { %v10000_v36 = vadd.f32 %v4651_v39, %v4475_v22  ;;  %5041 = vmatmul.f32.gmra.mxu2 %v11276_v43  ;;  %5138 = vmatmul.f32.gmra.mxu3 %v11276_v43 }
 0x49b   : > { %v4240_v49 = vpop.f32.mrf.mxu0 }
 0x49c   : > { %v4241_v34 = vadd.f32 %v4240_v49, %v9901_v32  ;;  %v4333_v58 = vpop.f32.mrf.mxu1  ;;  %v4482_v6 = vpop.f32.mrf.mxu2 }
 0x49d   : > { %v4334_v54 = vadd.f32 %v4333_v58, %v4237_v20  ;;  %v4655_v5 = vpop.f32.mrf.mxu3  ;;  %4785 = vmatmul.f32.gmra.mxu0 %v11308_v10 }
 0x49e   : > { %4906 = vmatmul.f32.gmra.mxu1 %v11309_v25 }
 0x49f   : > { %v4483_v26 = vadd.f32 %v4482_v6, %v4334_v54 }
 0x4a1   : > { %v10007_v0 = vadd.f32 %v4655_v5, %v4483_v26  ;;  %5045 = vmatmul.f32.gmra.mxu2 %v11278_v52  ;;  %5142 = vmatmul.f32.gmra.mxu3 %v11278_v52 }
 0x4a3   : > { %v4244_v44 = vpop.f32.mrf.mxu0 }
 0x4a4   : > { %v4245_v43 = vadd.f32 %v4244_v44, %v9908_v1  ;;  %v4337_v8 = vpop.f32.mrf.mxu1  ;;  %v4490_v32 = vpop.f32.mrf.mxu2 }
 0x4a5   : > { %v4338_v48 = vadd.f32 %v4337_v8, %v4241_v34  ;;  %v4659_v38 = vpop.f32.mrf.mxu3  ;;  %4790 = vmatmul.f32.gmra.mxu0 %v11310_v19 }
 0x4a6   : > { %4912 = vmatmul.f32.gmra.mxu1 %v11311_v29 }
 0x4a7   : > { %v4491_v14 = vadd.f32 %v4490_v32, %v4338_v48 }
 0x4a9   : > { %v10014_v37 = vadd.f32 %v4659_v38, %v4491_v14  ;;  %5049 = vmatmul.f32.gmra.mxu2 %v11280_v47  ;;  %5146 = vmatmul.f32.gmra.mxu3 %v11280_v47 }
 0x4ab   : > { %v4248_v27 = vpop.f32.mrf.mxu0 }
 0x4ac   : > { %v4249_v52 = vadd.f32 %v4248_v27, %v9915_v35  ;;  %v4341_v59 = vpop.f32.mrf.mxu1  ;;  %v4498_v1 = vpop.f32.mrf.mxu2 }
 0x4ad   : > { %v4342_v45 = vadd.f32 %v4341_v59, %v4245_v43  ;;  %v4663_v63 = vpop.f32.mrf.mxu3  ;;  %4795 = vmatmul.f32.gmra.mxu0 %v11312_v9 }
 0x4ae   : > { %4918 = vmatmul.f32.gmra.mxu1 %v11313_v33 }
 0x4af   : > { %v4499_v51 = vadd.f32 %v4498_v1, %v4342_v45 }
 0x4b1   : > { %v10021_v24 = vadd.f32 %v4663_v63, %v4499_v51  ;;  %5053 = vmatmul.f32.gmra.mxu2 %v11282_v13  ;;  %5150 = vmatmul.f32.gmra.mxu3 %v11282_v13 }
 0x4b3   : > { %v4721_v4 = vpop.f32.mrf.mxu0 }
 0x4b4   : > { %v4345_v47 = vpop.f32.mrf.mxu1  ;;  %v4506_v20 = vpop.f32.mrf.mxu2  ;;  %v4722_v15 = vadd.f32 %v4721_v4, %v9922_v40 }
 0x4b5   : > { %v4346_v11 = vadd.f32 %v4345_v47, %v4249_v52  ;;  %v4667_v35 = vpop.f32.mrf.mxu3 }
 0x4b6   : > { %4924 = vmatmul.f32.gmra.mxu1 %v11314_v28 }
 0x4b7   : > { %v4507_v21 = vadd.f32 %v4506_v20, %v4346_v11 }
 0x4b9   : > { %v10026_v39 = vadd.f32 %v4667_v35, %v4507_v21 }
 0x4bb   : > { %v4726_v3 = vpop.f32.mrf.mxu0 }
 0x4bc   : > { %v4835_v22 = vpop.f32.mrf.mxu1  ;;  %v4994_v49 = vpop.f32.mrf.mxu2  ;;  %v4727_v13 = vadd.f32 %v4726_v3, %v9929_v50 }
 0x4bd   : > { %v5091_v34 = vpop.f32.mrf.mxu3  ;;  %v4836_v58 = vadd.f32 %v4835_v22, %v4722_v15 }
 0x4bf   : > { %v4995_v6 = vadd.f32 %v4994_v49, %v4836_v58 }
 0x4c1   : > { %v5092_v44 = vadd.f32 %v5091_v34, %v4995_v6 }
 0x4c3   : > { %v4731_v54 = vpop.f32.mrf.mxu0  ;;  %v5689_v32 = vrot.slane %v5092_v44, 2  ;;  %v5601_v48 = vrot.slane %v5092_v44, 1  ;;  %v5866_v59 = vrot.slane %v5092_v44, 4  ;;  %v5777_v1 = vrot.slane %v5092_v44, 3 }
 0x4c4   : > { %v4841_v5 = vpop.f32.mrf.mxu1  ;;  %v4998_v10 = vpop.f32.mrf.mxu2  ;;  %v4732_v27 = vadd.f32 %v4731_v54, %v9936_v61 }
 0x4c5   : > { %v4842_v25 = vadd.f32 %v4841_v5, %v4727_v13  ;;  %v5095_v26 = vpop.f32.mrf.mxu3 }
 0x4c7   : > { %v4999_v43 = vadd.f32 %v4998_v10, %v4842_v25 }
 0x4c9   : > { %v5096_v8 = vadd.f32 %v5095_v26, %v4999_v43 }
 0x4cb   : > { %v4736_v38 = vpop.f32.mrf.mxu0  ;;  %v5602_v40 = vrot.slane %v5096_v8, 1  ;;  %v5778_v19 = vrot.slane %v5096_v8, 3  ;;  %v5690_v29 = vrot.slane %v5096_v8, 2  ;;  %v5867_v14 = vrot.slane %v5096_v8, 4 }
 0x4cc   : > { %v4847_v52 = vpop.f32.mrf.mxu1  ;;  %v5002_v50 = vpop.f32.mrf.mxu2  ;;  %v4737_v47 = vadd.f32 %v4736_v38, %v9943_v2 }
 0x4cd   : > { %5627 = vrot.lane.b32.xlu1 %v5602_v40, %s6297_s5  ;;  %5803 = vrot.lane.b32.xlu0 %v5778_v19, %s6298_s9  ;;  %v5099_v45 = vpop.f32.mrf.mxu3  ;;  %v5691_v63 = vsel %vm5259_vm0, %v5689_v32, %v5690_v29  ;;  %v5603_v9 = vsel %vm5170_vm2, %v5601_v48, %v5602_v40  ;;  %v4848_v33 = vadd.f32 %v4847_v52, %v4732_v27 }
 0x4ce   : > { %5715 = vrot.lane.b32.xlu2 %v5690_v29, %s6296_s4  ;;  %v5868_v51 = vsel %vm5865_vm14, %v5866_v59, %v5867_v14  ;;  %v5779_v61 = vsel %vm5422_vm1, %v5777_v1, %v5778_v19 }
 0x4cf   : > { %v5003_v4 = vadd.f32 %v5002_v50, %v4848_v33 }
 0x4d1   : > { %v5100_v3 = vadd.f32 %v5099_v45, %v5003_v4 }
 0x4d3   : > { %v4741_v20 = vpop.f32.mrf.mxu0  ;;  %v5692_v49 = vrot.slane %v5100_v3, 2  ;;  %v5869_v34 = vrot.slane %v5100_v3, 4  ;;  %v5604_v26 = vrot.slane %v5100_v3, 1  ;;  %v5780_v44 = vrot.slane %v5100_v3, 3 }
 0x4d4   : > { %v4853_v11 = vpop.f32.mrf.mxu1  ;;  %v5006_v35 = vpop.f32.mrf.mxu2  ;;  %v4742_v5 = vadd.f32 %v4741_v20, %v9950_v55 }
 0x4d5   : > { %v4854_v28 = vadd.f32 %v4853_v11, %v4737_v47  ;;  %5713 = vrot.lane.b32.xlu1 %v5691_v63, %s6296_s4  ;;  %5625 = vrot.lane.b32.xlu0 %v5603_v9, %s6297_s5  ;;  %v5103_v21 = vpop.f32.mrf.mxu3 }
 0x4d6   : > { %5892 = vrot.lane.b32.xlu2 %v5867_v14, %s6299_s19 }
 0x4d7   : > { %v5007_v15 = vadd.f32 %v5006_v35, %v4854_v28 }
 0x4d9   : > { %v5104_v22 = vadd.f32 %v5103_v21, %v5007_v15 }
 0x4db   : > { %v4746_v58 = vpop.f32.mrf.mxu0  ;;  %v5605_v6 = vrot.slane %v5104_v22, 1  ;;  %v5693_v2 = vrot.slane %v5104_v22, 2  ;;  %v5781_v13 = vrot.slane %v5104_v22, 3  ;;  %v5870_v54 = vrot.slane %v5104_v22, 4 }
 0x4dc   : > { %v4859_v10 = vpop.f32.mrf.mxu1  ;;  %v5010_v25 = vpop.f32.mrf.mxu2  ;;  %v4747_v19 = vadd.f32 %v4746_v58, %v9957_v30 }
 0x4dd   : > { %5890 = vrot.lane.b32.xlu1 %v5868_v51, %s6299_s19  ;;  %5631 = vrot.lane.b32.xlu0 %v5605_v6, %s6297_s5  ;;  %v5107_v43 = vpop.f32.mrf.mxu3  ;;  %v5694_v8 = vsel %vm5259_vm0, %v5692_v49, %v5693_v2  ;;  %v5871_v32 = vsel %vm5865_vm14, %v5869_v34, %v5870_v54  ;;  %v4860_v48 = vadd.f32 %v4859_v10, %v4742_v5 }
 0x4de   : > { %5801 = vrot.lane.b32.xlu2 %v5779_v61, %s6298_s9  ;;  %v5606_v38 = vsel %vm5170_vm2, %v5604_v26, %v5605_v6  ;;  %v5782_v55 = vsel %vm5422_vm1, %v5780_v44, %v5781_v13 }
 0x4df   : > { %v5011_v40 = vadd.f32 %v5010_v25, %v4860_v48 }
 0x4e1   : > { %v5108_v59 = vadd.f32 %v5107_v43, %v5011_v40 }
 0x4e3   : > { %v4751_v29 = vpop.f32.mrf.mxu0  ;;  %v5695_v63 = vrot.slane %v5108_v59, 2  ;;  %v5607_v9 = vrot.slane %v5108_v59, 1  ;;  %v5783_v35 = vrot.slane %v5108_v59, 3  ;;  %v5872_v28 = vrot.slane %v5108_v59, 4 }
 0x4e4   : > { %v4865_v14 = vpop.f32.mrf.mxu1  ;;  %v5014_v27 = vpop.f32.mrf.mxu2  ;;  %v4752_v47 = vadd.f32 %v4751_v29, %v9964_v56 }
 0x4e5   : > { %v4866_v52 = vadd.f32 %v4865_v14, %v4747_v19  ;;  %5719 = vrot.lane.b32.xlu1 %v5693_v2, %s6296_s4  ;;  %5717 = vrot.lane.b32.xlu0 %v5694_v8, %s6296_s4  ;;  %v5111_v50 = vpop.f32.mrf.mxu3 }
 0x4e6   : > { %5807 = vrot.lane.b32.xlu2 %v5781_v13, %s6298_s9 }
 0x4e7   : > { %v5015_v1 = vadd.f32 %v5014_v27, %v4866_v52 }
 0x4e9   : > { %v5112_v45 = vadd.f32 %v5111_v50, %v5015_v1 }
 0x4eb   : > { %v4756_v33 = vpop.f32.mrf.mxu0  ;;  %v5696_v51 = vrot.slane %v5112_v45, 2  ;;  %v5608_v61 = vrot.slane %v5112_v45, 1  ;;  %v5784_v30 = vrot.slane %v5112_v45, 3  ;;  %v5873_v4 = vrot.slane %v5112_v45, 4 }
 0x4ec   : > { %v4871_v20 = vpop.f32.mrf.mxu1  ;;  %v5018_v11 = vpop.f32.mrf.mxu2  ;;  %v4757_v58 = vadd.f32 %v4756_v33, %v9972_v42 }
 0x4ed   : > { %5896 = vrot.lane.b32.xlu1 %v5870_v54, %s6299_s19  ;;  %5894 = vrot.lane.b32.xlu0 %v5871_v32, %s6299_s19  ;;  %v5115_v21 = vpop.f32.mrf.mxu3  ;;  %v5697_v3 = vsel %vm5259_vm0, %v5695_v63, %v5696_v51  ;;  %v5609_v15 = vsel %vm5170_vm2, %v5607_v9, %v5608_v61  ;;  %v4872_v22 = vadd.f32 %v4871_v20, %v4752_v47 }
 0x4ee   : > { %5629 = vrot.lane.b32.xlu2 %v5606_v38, %s6297_s5  ;;  %v5785_v49 = vsel %vm5422_vm1, %v5783_v35, %v5784_v30  ;;  %v5874_v56 = vsel %vm5865_vm14, %v5872_v28, %v5873_v4 }
 0x4ef   : > { %v5019_v34 = vadd.f32 %v5018_v11, %v4872_v22 }
 0x4f1   : > { %v5116_v10 = vadd.f32 %v5115_v21, %v5019_v34 }
 0x4f3   : > { %v4761_v6 = vpop.f32.mrf.mxu0  ;;  %v5698_v44 = vrot.slane %v5116_v10, 2  ;;  %v5786_v43 = vrot.slane %v5116_v10, 3  ;;  %v5610_v29 = vrot.slane %v5116_v10, 1  ;;  %v5875_v14 = vrot.slane %v5116_v10, 4 }
 0x4f4   : > { %v4877_v2 = vpop.f32.mrf.mxu1  ;;  %v5022_v13 = vpop.f32.mrf.mxu2 }
 0x4f5   : > { %v4878_v54 = vadd.f32 %v4877_v2, %v4757_v58  ;;  %5805 = vrot.lane.b32.xlu1 %v5782_v55, %s6298_s9  ;;  %5723 = vrot.lane.b32.xlu0 %v5696_v51, %s6296_s4  ;;  %v5119_v5 = vpop.f32.mrf.mxu3  ;;  %v4762_v55 = vadd.f32 %v4761_v6, %v9979_v41 }
 0x4f6   : > { %5635 = vrot.lane.b32.xlu2 %v5608_v61, %s6297_s5 }
 0x4f7   : > { %v5023_v25 = vadd.f32 %v5022_v13, %v4878_v54 }
 0x4f9   : > { %v10066_v26 = vadd.f32 %v5119_v5, %v5023_v25 }
 0x4fb   : > { %v4766_v8 = vpop.f32.mrf.mxu0  ;;  %v5611_v42 = vrot.slane %v10066_v26, 1  ;;  %v5787_v32 = vrot.slane %v10066_v26, 3  ;;  %v5699_v48 = vrot.slane %v10066_v26, 2  ;;  %v5876_v38 = vrot.slane %v10066_v26, 4 }
 0x4fc   : > { %v4883_v40 = vpop.f32.mrf.mxu1  ;;  %v5026_v19 = vpop.f32.mrf.mxu2  ;;  %v4767_v63 = vadd.f32 %v4766_v8, %v9986_v57 }
 0x4fd   : > { %5811 = vrot.lane.b32.xlu1 %v5784_v30, %s6298_s9  ;;  %5900 = vrot.lane.b32.xlu0 %v5873_v4, %s6299_s19  ;;  %v5123_v27 = vpop.f32.mrf.mxu3  ;;  %v5700_v52 = vsel %vm5259_vm0, %v5698_v44, %v5699_v48  ;;  %v5788_v50 = vsel %vm5422_vm1, %v5786_v43, %v5787_v32  ;;  %v4884_v59 = vadd.f32 %v4883_v40, %v4762_v55 }
 0x4fe   : > { %5721 = vrot.lane.b32.xlu2 %v5697_v3, %s6296_s4  ;;  %v5612_v1 = vsel %vm5170_vm2, %v5610_v29, %v5611_v42  ;;  %v10080_v41 = vsel %vm5865_vm14, %v5875_v14, %v5876_v38 }
 0x4ff   : > { %v5027_v45 = vadd.f32 %v5026_v19, %v4884_v59 }
 0x501   : > { %v5124_v4 = vadd.f32 %v5123_v27, %v5027_v45 }
 0x503   : > { %v4771_v9 = vpop.f32.mrf.mxu0  ;;  %v5613_v11 = vrot.slane %v5124_v4, 1  ;;  %v5701_v35 = vrot.slane %v5124_v4, 2  ;;  %v5789_v58 = vrot.slane %v5124_v4, 3 }
 0x504   : > { %v4889_v33 = vpop.f32.mrf.mxu1  ;;  %v5030_v51 = vpop.f32.mrf.mxu2  ;;  %v4772_v22 = vadd.f32 %v4771_v9, %v9993_v31 }
 0x505   : > { %v4890_v61 = vadd.f32 %v4889_v33, %v4767_v63  ;;  %5633 = vrot.lane.b32.xlu1 %v5609_v15, %s6297_s5  ;;  %5809 = vrot.lane.b32.xlu0 %v5785_v49, %s6298_s9  ;;  %v5127_v30 = vpop.f32.mrf.mxu3 }
 0x506   : > { %5898 = vrot.lane.b32.xlu2 %v5874_v56, %s6299_s19  ;;  %v5878_v56 = vrot.slane %v5124_v4, 4 }
 0x507   : > { %v5031_v47 = vadd.f32 %v5030_v51, %v4890_v61 }
 0x509   : > { %v10086_v20 = vadd.f32 %v5127_v30, %v5031_v47 }
 0x50b   : > { %v4776_v28 = vpop.f32.mrf.mxu0  ;;  %v5702_v57 = vrot.slane %v10086_v20, 2  ;;  %v5790_v21 = vrot.slane %v10086_v20, 3  ;;  %v5614_v3 = vrot.slane %v10086_v20, 1  ;;  %v5879_v15 = vrot.slane %v10086_v20, 4 }
 0x50c   : > { %v4895_v49 = vpop.f32.mrf.mxu1  ;;  %v5034_v34 = vpop.f32.mrf.mxu2  ;;  %v4777_v25 = vadd.f32 %v4776_v28, %v10000_v36 }
 0x50d   : > { %5639 = vrot.lane.b32.xlu1 %v5611_v42, %s6297_s5  ;;  %5815 = vrot.lane.b32.xlu0 %v5787_v32, %s6298_s9  ;;  %v5131_v6 = vpop.f32.mrf.mxu3  ;;  %v5615_v2 = vsel %vm5170_vm2, %v5613_v11, %v5614_v3  ;;  %v10097_v13 = vsel %vm5259_vm0, %v5701_v35, %v5702_v57  ;;  %v4896_v54 = vadd.f32 %v4895_v49, %v4772_v22 }
 0x50e   : > { %5727 = vrot.lane.b32.xlu2 %v5699_v48, %s6296_s4  ;;  %v10101_v5 = vsel %vm5422_vm1, %v5789_v58, %v5790_v21  ;;  %v10106_v31 = vsel %vm5865_vm14, %v5878_v56, %v5879_v15 }
 0x50f   : > { %v5035_v10 = vadd.f32 %v5034_v34, %v4896_v54 }
 0x511   : > { %v5132_v32 = vadd.f32 %v5131_v6, %v5035_v10 }
 0x513   : > { %v4781_v26 = vpop.f32.mrf.mxu0  ;;  %v5616_v40 = vrot.slane %v5132_v32, 1  ;;  %v5704_v19 = vrot.slane %v5132_v32, 2  ;;  %v5881_v63 = vrot.slane %v5132_v32, 4 }
 0x514   : > { %v4901_v44 = vpop.f32.mrf.mxu1  ;;  %v5038_v43 = vpop.f32.mrf.mxu2 }
 0x515   : > { %v4902_v8 = vadd.f32 %v4901_v44, %v4777_v25  ;;  %5725 = vrot.lane.b32.xlu1 %v5700_v52, %s6296_s4  ;;  %5904 = vrot.lane.b32.xlu0 %v5876_v38, %s6299_s19  ;;  %v5135_v42 = vpop.f32.mrf.mxu3  ;;  %v4782_v38 = vadd.f32 %v4781_v26, %v10007_v0 }
 0x516   : > { %5813 = vrot.lane.b32.xlu2 %v5788_v50, %s6298_s9  ;;  %v5792_v50 = vrot.slane %v5132_v32, 3 }
 0x517   : > { %v5039_v48 = vadd.f32 %v5038_v43, %v4902_v8 }
 0x519   : > { %v10112_v55 = vadd.f32 %v5135_v42, %v5039_v48 }
 0x51b   : > { %v4786_v29 = vpop.f32.mrf.mxu0  ;;  %v5617_v36 = vrot.slane %v10112_v55, 1  ;;  %v5793_v14 = vrot.slane %v10112_v55, 3  ;;  %v5882_v27 = vrot.slane %v10112_v55, 4  ;;  %v5705_v52 = vrot.slane %v10112_v55, 2 }
 0x51c   : > { %v4907_v59 = vpop.f32.mrf.mxu1  ;;  %v5042_v45 = vpop.f32.mrf.mxu2  ;;  %v4787_v4 = vadd.f32 %v4786_v29, %v10014_v37 }
 0x51d   : > { %5731 = vrot.lane.b32.xlu1 %v5702_v57, %s6296_s4  ;;  %5637 = vrot.lane.b32.xlu0 %v5612_v1, %s6297_s5  ;;  %v5139_v9 = vpop.f32.mrf.mxu3  ;;  %v10122_v33 = vsel %vm5170_vm2, %v5616_v40, %v5617_v36  ;;  %v10127_v51 = vsel %vm5259_vm0, %v5704_v19, %v5705_v52  ;;  %v4908_v61 = vadd.f32 %v4907_v59, %v4782_v38  ;;  %v5476_v59 = vpop.permute.xlu1 %5475 }
 0x51e   : > { %5902 = vrot.lane.b32.xlu2 %v10080_v41, %s6299_s19  ;;  %v10132_v0 = vsel %vm5865_vm14, %v5881_v63, %v5882_v27  ;;  %v10135_v30 = vsel %vm5422_vm1, %v5792_v50, %v5793_v14 }
 0x51f   : > { %v5043_v1 = vadd.f32 %v5042_v45, %v4908_v61 }
 0x521   : > { %v5140_v57 = vadd.f32 %v5139_v9, %v5043_v1 }
 0x523   : > { %v4791_v22 = vpop.f32.mrf.mxu0  ;;  %v5707_v58 = vrot.slane %v5140_v57, 2  ;;  %v5619_v56 = vrot.slane %v5140_v57, 1  ;;  %v5795_v26 = vrot.slane %v5140_v57, 3 }
 0x524   : > { %v4913_v47 = vpop.f32.mrf.mxu1  ;;  %v5046_v11 = vpop.f32.mrf.mxu2 }
 0x525   : > { %v4914_v35 = vadd.f32 %v4913_v47, %v4787_v4  ;;  %5819 = vrot.lane.b32.xlu1 %v5790_v21, %s6298_s9  ;;  %5643 = vrot.lane.b32.xlu0 %v5614_v3, %s6297_s5  ;;  %v5143_v28 = vpop.f32.mrf.mxu3  ;;  %v4792_v3 = vadd.f32 %v4791_v22, %v10021_v24 }
 0x526   : > { %5641 = vrot.lane.b32.xlu2 %v5615_v2, %s6297_s5  ;;  %v5884_v2 = vrot.slane %v5140_v57, 4  ;;  %v11315_v57 = vld [vmem:[#allocation11_spill] sm:$0xff] }
 0x527   : > { %v5047_v41 = vadd.f32 %v5046_v11, %v4914_v35 }
 0x528   : > { %v5716_v49 = vpop.permute.xlu2 %5715 }
 0x529   : > { %v10141_v34 = vadd.f32 %v5143_v28, %v5047_v41 }
 0x52b   : > { %v5708_v37 = vrot.slane %v10141_v34, 2  ;;  %v5620_v6 = vrot.slane %v10141_v34, 1  ;;  %v5796_v54 = vrot.slane %v10141_v34, 3  ;;  %v5885_v21 = vrot.slane %v10141_v34, 4 }
 0x52c   : > { %v4919_v10 = vpop.f32.mrf.mxu1  ;;  %v5050_v25 = vpop.f32.mrf.mxu2 }
 0x52d   : > { %5908 = vrot.lane.b32.xlu1 %v5879_v15, %s6299_s19  ;;  %5729 = vrot.lane.b32.xlu0 %v10097_v13, %s6296_s4  ;;  %v5147_v44 = vpop.f32.mrf.mxu3  ;;  %v10154_v43 = vsel %vm5259_vm0, %v5707_v58, %v5708_v37  ;;  %v10159_v8 = vsel %vm5170_vm2, %v5619_v56, %v5620_v6  ;;  %v4920_v24 = vadd.f32 %v4919_v10, %v4792_v3  ;;  %v4796_v13 = vpop.f32.mrf.mxu0 }
 0x52e   : > { %5647 = vrot.lane.b32.xlu2 %v5617_v36, %s6297_s5  ;;  %v10165_v20 = vsel %vm5422_vm1, %v5795_v26, %v5796_v54  ;;  %v10170_v15 = vsel %vm5865_vm14, %v5884_v2, %v5885_v21  ;;  %v4797_v48 = vadd.f32 %v4796_v13, %v10026_v39 }
 0x52f   : > { %v5051_v32 = vadd.f32 %v5050_v25, %v4920_v24  ;;  %v11316_v25 = vld [vmem:[#allocation5_spill] sm:$0xff] }
 0x530   : > { %v5893_v42 = vpop.permute.xlu2 %5892 }
 0x531   : > { %v5148_v36 = vadd.f32 %v5147_v44, %v5051_v32 }
 0x533   : > { %v5622_v9 = vrot.slane %v5148_v36, 1  ;;  %v5710_v61 = vrot.slane %v5148_v36, 2  ;;  %v5798_v39 = vrot.slane %v5148_v36, 3  ;;  %v5887_v47 = vrot.slane %v5148_v36, 4 }
 0x534   : > { %v4925_v40 = vpop.f32.mrf.mxu1  ;;  %v5054_v19 = vpop.f32.mrf.mxu2 }
 0x535   : > { %v4926_v29 = vadd.f32 %v4925_v40, %v4797_v48  ;;  %5823 = vrot.lane.b32.xlu1 %v5793_v14, %s6298_s9  ;;  %5817 = vrot.lane.b32.xlu0 %v10101_v5, %s6298_s9  ;;  %v5151_v38 = vpop.f32.mrf.mxu3  ;;  %v11318_v40 = vld [vmem:[#allocation10_spill] sm:$0xff] }
 0x536   : > { %5912 = vrot.lane.b32.xlu2 %v5882_v27, %s6299_s19 }
 0x537   : > { %v5055_v45 = vadd.f32 %v5054_v19, %v4926_v29 }
 0x538   : > { %v5802_v63 = vpop.permute.xlu2 %5801 }
 0x539   : > { %v10177_v50 = vadd.f32 %v5151_v38, %v5055_v45 }
 0x53b   : > { %v5711_v1 = vrot.slane %v10177_v50, 2  ;;  %v5623_v4 = vrot.slane %v10177_v50, 1  ;;  %v5799_v14 = vrot.slane %v10177_v50, 3  ;;  %v5888_v5 = vrot.slane %v10177_v50, 4 }
 0x53d   : > { %5645 = vrot.lane.b32.xlu1 %v10122_v33, %s6297_s5  ;;  %5906 = vrot.lane.b32.xlu0 %v10106_v31, %s6299_s19  ;;  %v5624_v27 = vsel %vm5170_vm2, %v5622_v9, %v5623_v4  ;;  %v5712_v11 = vsel %vm5259_vm0, %v5710_v61, %v5711_v1  ;;  %v5800_v35 = vsel %vm5422_vm1, %v5798_v39, %v5799_v14  ;;  %vm5956_vm0 = vcmask 1044352  }
 0x53e   : > { %5733 = vrot.lane.b32.xlu2 %v10127_v51, %s6296_s4  ;;  %v10199_v33 = vsel %vm5865_vm14, %v5887_v47, %v5888_v5  ;;  %vm6087_vm1 = vcmask 130048   ;;  %vm6089_vm2 = vcmask 261120  }
 0x53f   : > { %v5628_v28 = vpop.permute.xlu1 %5627  ;;  %v5804_v31 = vpop.permute.xlu0 %5803 }
 0x540   : > { %v5674_v22 = vadd.f32 %v5628_v28, %v11315_v57  ;;  %v5808_v41 = vpop.permute.xlu2 %5807  ;;  %v11319_v28 = vld [vmem:[#allocation158_spill] sm:$0xff] }
 0x542   : > { %v5762_v58 = vadd.f32 %v5716_v49, %v5674_v22 }
 0x544   : > { %v5850_v56 = vadd.f32 %v5804_v31, %v5762_v58 }
 0x545   : > { %5910 = vrot.lane.b32.xlu1 %v10132_v0, %s6299_s19  ;;  %5735 = vrot.lane.b32.xlu0 %v5705_v52, %s6296_s4 }
 0x546   : > { %v5939_v51 = vadd.f32 %v5893_v42, %v5850_v56  ;;  %5739 = vrot.lane.b32.xlu2 %v5708_v37, %s6296_s4  ;;  %v5509_v37 = vadd.f32 %v5476_v59, %v9771_v12 }
 0x547   : > { %v5714_v3 = vpop.permute.xlu1 %5713  ;;  %v5626_v10 = vpop.permute.xlu0 %5625 }
 0x548   : > { %v5673_v26 = vadd.f32 %v5626_v10, %v11316_v25  ;;  %v5630_v2 = vpop.permute.xlu2 %5629  ;;  %v5957_v42 = vsel %vm5956_vm0, %v5939_v51, -inf  ;;  %v5576_v32 = vsel %vm5511_vm6, %v5509_v37, -inf }
 0x54a   : > { %v5761_v44 = vadd.f32 %v5714_v3, %v5673_v26 }
 0x54c   : > { %v5849_v24 = vadd.f32 %v5802_v63, %v5761_v44 }
 0x54d   : > { %5651 = vrot.lane.b32.xlu1 %v5620_v6, %s6297_s5  ;;  %5821 = vrot.lane.b32.xlu0 %v10135_v30, %s6298_s9  ;;  %v5510_v6 = vadd.f32 %v9719_v60, %v9768_v16 }
 0x54e   : > { %5827 = vrot.lane.b32.xlu2 %v5796_v54, %s6298_s9  ;;  %v11317_v54 = vld [vmem:[#allocation14_spill] sm:$0xff] }
 0x54f   : > { %v5891_v55 = vpop.permute.xlu1 %5890  ;;  %v5632_v52 = vpop.permute.xlu0 %5631  ;;  %v5675_v48 = vadd.f32 %v5630_v2, %v11317_v54  ;;  %v5577_v19 = vsel %vm5513_vm5, %v5510_v6, -inf }
 0x550   : > { %v5938_v0 = vadd.f32 %v5891_v55, %v5849_v24  ;;  %v5636_v49 = vpop.permute.xlu2 %5635  ;;  %v5676_v12 = vadd.f32 %v5632_v52, %v11318_v40  ;;  %v5578_v60 = vmax.f32 %v5576_v32, %v5577_v19 }
 0x552   : > { %v5955_v13 = vsel %vm5954_vm15, %v5938_v0, -inf  ;;  %v5579_v63 = vrot.slane %v5578_v60, 4 }
 0x553   : > { %v5958_v30 = vmax.f32 %v5955_v13, %v5957_v42  ;;  %v11320_v42 = vld [vmem:[#allocation27_spill] sm:$0xff] }
 0x554   : > { %v5580_v9 = vmax.f32 %v5578_v60, %v5579_v63 }
 0x555   : > { %5737 = vrot.lane.b32.xlu1 %v10154_v43, %s6296_s4  ;;  %5649 = vrot.lane.b32.xlu0 %v10159_v8, %s6297_s5  ;;  %v5959_v47 = vrot.slane %v5958_v30, 4 }
 0x556   : > { %5743 = vrot.lane.b32.xlu2 %v5711_v1, %s6296_s4  ;;  %v5581_v1 = vrot.slane %v5580_v9, 2 }
 0x557   : > { %v5720_v29 = vpop.permute.xlu1 %5719  ;;  %v5718_v36 = vpop.permute.xlu0 %5717 }
 0x558   : > { %v5764_v16 = vadd.f32 %v5720_v29, %v5676_v12  ;;  %v5763_v38 = vadd.f32 %v5718_v36, %v5675_v48  ;;  %v5722_v59 = vpop.permute.xlu2 %5721  ;;  %v11321_v36 = vld [vmem:[#allocation22_spill] sm:$0xff] }
 0x55a   : > { %v5852_v45 = vadd.f32 %v5808_v41, %v5764_v16  ;;  %v5960_v41 = vmax.f32 %v5958_v30, %v5959_v47 }
 0x55c   : > { %v5961_v10 = vrot.slane %v5960_v41, 2 }
 0x55d   : > { %5825 = vrot.lane.b32.xlu1 %v10165_v20, %s6298_s9  ;;  %5914 = vrot.lane.b32.xlu0 %v10170_v15, %s6299_s19  ;;  %v5678_v20 = vadd.f32 %v5636_v49, %v11319_v28 }
 0x55e   : > { %5653 = vrot.lane.b32.xlu2 %v5624_v27, %s6297_s5  ;;  %v5582_v27 = vmax.f32 %v5580_v9, %v5581_v1  ;;  %v5962_v24 = vmax.f32 %v5960_v41, %v5961_v10 }
 0x55f   : > { %v5897_v43 = vpop.permute.xlu1 %5896  ;;  %v5895_v8 = vpop.permute.xlu0 %5894 }
 0x560   : > { %v5941_v61 = vadd.f32 %v5897_v43, %v5852_v45  ;;  %v5899_v39 = vpop.permute.xlu2 %5898  ;;  %v5583_v3 = vrot.slane %v5582_v27, 1 }
 0x562   : > { %v5966_v56 = vsel %vm5956_vm0, %v5941_v61, -inf  ;;  %v5584_v44 = vmax.f32 %v5582_v27, %v5583_v3  ;;  %v11322_v27 = vld [vmem:[#allocation168_spill] sm:$0xff] }
 0x564   : > { %v6065_v34 = vsel %vm6048_vm13, %v5584_v44, %v9802_v53 }
 0x565   : > { %5741 = vrot.lane.b32.xlu1 %v5712_v11, %s6296_s4  ;;  %5655 = vrot.lane.b32.xlu0 %v5623_v4, %s6297_s5  ;;  %s164_s5 = sand.u32 1, %s6286_s13  }
 0x566   : > { %5829 = vrot.lane.b32.xlu2 %v5800_v35, %s6298_s9  ;;  %s6101_s7 = scalar_lea.sflag [#allocation3], %s164_s5 }
 0x567   : > { %v5806_v15 = vpop.permute.xlu1 %5805  ;;  %v5724_v31 = vpop.permute.xlu0 %5723 }
 0x568   : > { %v5851_v57 = vadd.f32 %v5806_v15, %v5763_v38  ;;  %v5766_v22 = vadd.f32 %v5724_v31, %v5678_v20  ;;  %v5728_v11 = vpop.permute.xlu2 %5727 }
 0x56a   : > { %v5940_v58 = vadd.f32 %v5895_v8, %v5851_v57 }
 0x56c   : > { %v5965_v51 = vsel %vm5954_vm15, %v5940_v58, -inf }
 0x56d   : > { %v5967_v25 = vmax.f32 %v5965_v51, %v5966_v56  ;;  %5916 = vrot.lane.b32.xlu1 %v5885_v21, %s6299_s19  ;;  %5831 = vrot.lane.b32.xlu0 %v5799_v14, %s6298_s9  ;;  %v5963_v21 = vrot.slane %v5962_v24, 1  ;;  %s6179_s9 = sshll.u32 %s164_s5, 3 }
 0x56e   : > { %5918 = vrot.lane.b32.xlu2 %v10199_v33, %s6299_s19  ;;  %s166_s28 = scalar_lea.vmem [#allocation2], %s6179_s9 }
 0x56f   : > { %v5968_v4 = vrot.slane %v5967_v25, 4  ;;  %v5812_v35 = vpop.permute.xlu1 %5811  ;;  %v5901_v26 = vpop.permute.xlu0 %5900  ;;  %v5964_v30 = vmax.f32 %v5962_v24, %v5963_v21  ;;  %s6113_s29 = sshll.u32 %s166_s28, 4  ;;  %s6114_s29 = int_to_ptr.vmem [resolvable:$true] %s6113_s29 }
 0x570   : > { %v5854_v2 = vadd.f32 %v5812_v35, %v5766_v22  ;;  %v5814_v14 = vpop.permute.xlu2 %5813 }
 0x571   : > { %v5969_v55 = vmax.f32 %v5967_v25, %v5968_v4  ;;  %v11323_v25 = vld [vmem:[#allocation35_spill] sm:$0xff] }
 0x572   : > { %v5943_v52 = vadd.f32 %v5901_v26, %v5854_v2 }
 0x573   : > { %v5970_v0 = vrot.slane %v5969_v55, 2 }
 0x574   : > { %v5975_v50 = vsel %vm5956_vm0, %v5943_v52, -inf }
 0x575   : > { %v5971_v49 = vmax.f32 %v5969_v55, %v5970_v0  ;;  %5920 = vrot.lane.b32.xlu0 %v5888_v5, %s6299_s19  ;;  %6066 = vrot.lane.b32.xlu1 %v6065_v34, %s6296_s4  ;;  %s6300_s4 = smov 48  }
 0x577   : > { %v5972_v33 = vrot.slane %v5971_v49, 1  ;;  %v5634_v37 = vpop.permute.xlu1 %5633  ;;  %v5810_v13 = vpop.permute.xlu0 %5809 }
 0x578   : > { %v5677_v6 = vadd.f32 %v5634_v37, %v11320_v42  ;;  %v5903_v29 = vpop.permute.xlu2 %5902 }
 0x579   : > { %v5973_v32 = vmax.f32 %v5971_v49, %v5972_v33 }
 0x57a   : > { %v5765_v54 = vadd.f32 %v5722_v59, %v5677_v6  ;;  %v11324_v6 = vld [vmem:[#allocation32_spill] sm:$0xff] }
 0x57b   : > { %v6077_v48 = vsel %vm6036_vm7, %v5973_v32, %v5964_v30 }
 0x57c   : > { %v5853_v53 = vadd.f32 %v5810_v13, %v5765_v54 }
 0x57e   : > { %v5942_v40 = vadd.f32 %v5899_v39, %v5853_v53 }
 0x57f   : > { %v5640_v12 = vpop.permute.xlu1 %5639  ;;  %v5816_v19 = vpop.permute.xlu0 %5815 }
 0x580   : > { %v5974_v5 = vsel %vm5954_vm15, %v5942_v40, -inf  ;;  %v5680_v60 = vadd.f32 %v5640_v12, %v11321_v36  ;;  %v5642_v39 = vpop.permute.xlu2 %5641 }
 0x581   : > { %v5976_v16 = vmax.f32 %v5974_v5, %v5975_v50  ;;  %v5681_v30 = vadd.f32 %v5642_v39, %v11324_v6 }
 0x582   : > { %v5768_v38 = vadd.f32 %v5728_v11, %v5680_v60 }
 0x583   : > { %v5977_v45 = vrot.slane %v5976_v16, 4 }
 0x584   : > { %v5856_v63 = vadd.f32 %v5816_v19, %v5768_v38 }
 0x585   : > { %v5978_v43 = vmax.f32 %v5976_v16, %v5977_v45 }
 0x587   : > { %v5979_v8 = vrot.slane %v5978_v43, 2  ;;  %v5726_v59 = vpop.permute.xlu1 %5725  ;;  %v5905_v9 = vpop.permute.xlu0 %5904 }
 0x588   : > { %v5945_v61 = vadd.f32 %v5905_v9, %v5856_v63  ;;  %v5648_v41 = vpop.permute.xlu2 %5647 }
 0x589   : > { %v5980_v1 = vmax.f32 %v5978_v43, %v5979_v8 }
 0x58a   : > { %v5984_v3 = vsel %vm5956_vm0, %v5945_v61, -inf }
 0x58b   : > { %v5981_v47 = vrot.slane %v5980_v1, 1 }
 0x58d   : > { %v5982_v28 = vmax.f32 %v5980_v1, %v5981_v47 }
 0x58f   : > { %v5732_v20 = vpop.permute.xlu1 %5731  ;;  %v5638_v15 = vpop.permute.xlu0 %5637  ;;  %v6078_v31 = vsel %vm6038_vm8, %v5982_v28, %v6077_v48 }
 0x590   : > { %v5679_v57 = vadd.f32 %v5638_v15, %v11322_v27  ;;  %v5913_v55 = vpop.permute.xlu2 %5912  ;;  %v11325_v15 = vld [vmem:[#allocation178_spill] sm:$0xff] }
 0x592   : > { %v5767_v22 = vadd.f32 %v5726_v59, %v5679_v57 }
 0x594   : > { %v5855_v58 = vadd.f32 %v5814_v14, %v5767_v22 }
 0x596   : > { %v5944_v56 = vadd.f32 %v5903_v29, %v5855_v58 }
 0x597   : > { %v5820_v51 = vpop.permute.xlu1 %5819  ;;  %v5644_v11 = vpop.permute.xlu0 %5643 }
 0x598   : > { %v5983_v10 = vsel %vm5954_vm15, %v5944_v56, -inf  ;;  %v5682_v4 = vadd.f32 %v5644_v11, %v11323_v25  ;;  %v5734_v42 = vpop.permute.xlu2 %5733 }
 0x599   : > { %v5985_v35 = vmax.f32 %v5983_v10, %v5984_v3 }
 0x59a   : > { %v5770_v26 = vadd.f32 %v5732_v20, %v5682_v4 }
 0x59b   : > { %v5986_v2 = vrot.slane %v5985_v35, 4 }
 0x59c   : > { %v5858_v44 = vadd.f32 %v5820_v51, %v5770_v26 }
 0x59d   : > { %v5987_v24 = vmax.f32 %v5985_v35, %v5986_v2 }
 0x59f   : > { %v5988_v52 = vrot.slane %v5987_v24, 2  ;;  %v5909_v0 = vpop.permute.xlu1 %5908  ;;  %v5730_v34 = vpop.permute.xlu0 %5729 }
 0x5a0   : > { %v5769_v32 = vadd.f32 %v5730_v34, %v5681_v30  ;;  %v5947_v54 = vadd.f32 %v5909_v0, %v5858_v44  ;;  %v5740_v50 = vpop.permute.xlu2 %5739 }
 0x5a1   : > { %v5989_v21 = vmax.f32 %v5987_v24, %v5988_v52 }
 0x5a2   : > { %v5993_v19 = vsel %vm5956_vm0, %v5947_v54, -inf }
 0x5a3   : > { %v5990_v49 = vrot.slane %v5989_v21, 1 }
 0x5a5   : > { %v5991_v14 = vmax.f32 %v5989_v21, %v5990_v49 }
 0x5a7   : > { %v5824_v33 = vpop.permute.xlu1 %5823  ;;  %v5818_v37 = vpop.permute.xlu0 %5817  ;;  %v6079_v13 = vsel %vm6040_vm9, %v5991_v14, %v6078_v31  ;;  %v5684_v31 = vadd.f32 %v5648_v41, %v11325_v15 }
 0x5a8   : > { %v5857_v48 = vadd.f32 %v5818_v37, %v5769_v32  ;;  %v5828_v43 = vpop.permute.xlu2 %5827 }
 0x5af   : > { %v5646_v53 = vpop.permute.xlu1 %5645  ;;  %v5907_v40 = vpop.permute.xlu0 %5906 }
 0x5b0   : > { %v5946_v12 = vadd.f32 %v5907_v40, %v5857_v48  ;;  %v5744_v39 = vpop.permute.xlu2 %5743  ;;  %v5683_v20 = vadd.f32 %v5646_v53, %v9109_v17 }
 0x5b2   : > { %v5992_v5 = vsel %vm5954_vm15, %v5946_v12, -inf  ;;  %v5771_v57 = vadd.f32 %v5734_v42, %v5683_v20 }
 0x5b3   : > { %v5994_v29 = vmax.f32 %v5992_v5, %v5993_v19 }
 0x5b5   : > { %v5995_v36 = vrot.slane %v5994_v29, 4 }
 0x5b7   : > { %v5996_v60 = vmax.f32 %v5994_v29, %v5995_v36  ;;  %v5911_v16 = vpop.permute.xlu1 %5910  ;;  %v5736_v38 = vpop.permute.xlu0 %5735 }
 0x5b8   : > { %v5772_v27 = vadd.f32 %v5736_v38, %v5684_v31  ;;  %v5654_v51 = vpop.permute.xlu2 %5653 }
 0x5b9   : > { %v5997_v45 = vrot.slane %v5996_v60, 2  ;;  %v5687_v34 = vadd.f32 %v5654_v51, %v9253_v7 }
 0x5ba   : > { %v5860_v11 = vadd.f32 %v5824_v33, %v5772_v27 }
 0x5bb   : > { %v5998_v63 = vmax.f32 %v5996_v60, %v5997_v45 }
 0x5bc   : > { %v5949_v25 = vadd.f32 %v5913_v55, %v5860_v11 }
 0x5bd   : > { %v5999_v8 = vrot.slane %v5998_v63, 1 }
 0x5be   : > { %v6002_v41 = vsel %vm5956_vm0, %v5949_v25, -inf }
 0x5bf   : > { %v6000_v59 = vmax.f32 %v5998_v63, %v5999_v8  ;;  %v5652_v9 = vpop.permute.xlu1 %5651  ;;  %v5822_v61 = vpop.permute.xlu0 %5821 }
 0x5c0   : > { %v5859_v56 = vadd.f32 %v5822_v61, %v5771_v57  ;;  %v5686_v4 = vadd.f32 %v5652_v9, %v9153_v23  ;;  %v5830_v0 = vpop.permute.xlu2 %5829  ;;  %v6231_v57 = vld [vmem:[%s10329_s2] ss:$0 sm:$0xff] }
 0x5c1   : > { %v10273_v1 = vsel %vm6042_vm10, %v6000_v59, %v6079_v13 }
 0x5c2   : > { %v5948_v3 = vadd.f32 %v5911_v16, %v5859_v56  ;;  %v5774_v44 = vadd.f32 %v5740_v50, %v5686_v4 }
 0x5c4   : > { %v6001_v2 = vsel %vm5954_vm15, %v5948_v3, -inf  ;;  %v5862_v14 = vadd.f32 %v5828_v43, %v5774_v44 }
 0x5c5   : > { %v6003_v52 = vmax.f32 %v6001_v2, %v6002_v41 }
 0x5c7   : > { %v5738_v47 = vpop.permute.xlu1 %5737  ;;  %v5650_v28 = vpop.permute.xlu0 %5649 }
 0x5c8   : > { %v5685_v10 = vadd.f32 %v5650_v28, %v9193_v62  ;;  %v6004_v62 = vrot.slane %v6003_v52, 4  ;;  %v5919_v48 = vpop.permute.xlu2 %5918 }
 0x5ca   : > { %v5773_v17 = vadd.f32 %v5738_v47, %v5685_v10  ;;  %v6005_v30 = vmax.f32 %v6003_v52, %v6004_v62 }
 0x5cc   : > { %v6006_v12 = vrot.slane %v6005_v30, 2 }
 0x5ce   : > { %v6007_v60 = vmax.f32 %v6005_v30, %v6006_v12 }
 0x5cf   : > { %v5826_v22 = vpop.permute.xlu1 %5825  ;;  %v5915_v58 = vpop.permute.xlu0 %5914 }
 0x5d0   : > { %v5861_v24 = vadd.f32 %v5826_v22, %v5773_v17  ;;  %v6008_v63 = vrot.slane %v6007_v60, 1 }
 0x5d2   : > { %v5950_v21 = vadd.f32 %v5915_v58, %v5861_v24  ;;  %v6009_v61 = vmax.f32 %v6007_v60, %v6008_v63 }
 0x5d4   : > { %v6010_v13 = vsel %vm5954_vm15, %v5950_v21, -inf  ;;  %v6081_v20 = vsel %vm6044_vm11, %v6009_v61, %v10273_v1 }
 0x5d7   : > { %v5742_v35 = vpop.permute.xlu1 %5741  ;;  %v5656_v26 = vpop.permute.xlu0 %5655 }
 0x5d8   : > { %v5775_v49 = vadd.f32 %v5742_v35, %v5687_v34  ;;  %v5688_v23 = vadd.f32 %v5656_v26, %v9228_v18 }
 0x5da   : > { %v5863_v42 = vadd.f32 %v5830_v0, %v5775_v49  ;;  %v5776_v54 = vadd.f32 %v5744_v39, %v5688_v23 }
 0x5dc   : > { %v5952_v7 = vadd.f32 %v5919_v48, %v5863_v42 }
 0x5de   : > { %v6019_v18 = vsel %vm5954_vm15, %v5952_v7, -inf }
 0x5df   : > { %v5917_v55 = vpop.permute.xlu1 %5916  ;;  %v5832_v33 = vpop.permute.xlu0 %5831 }
 0x5e0   : > { %v5951_v37 = vadd.f32 %v5917_v55, %v5862_v14  ;;  %v5864_v40 = vadd.f32 %v5832_v33, %v5776_v54 }
 0x5e2   : > { %v6011_v6 = vsel %vm5956_vm0, %v5951_v37, -inf }
 0x5e3   : > { %v6012_v32 = vmax.f32 %v6010_v13, %v6011_v6 }
 0x5e5   : > { %v6013_v53 = vrot.slane %v6012_v32, 4 }
 0x5e7   : > { %v6014_v19 = vmax.f32 %v6012_v32, %v6013_v53  ;;  %v5921_v50 = vpop.permute.xlu0 %5920  ;;  %v6067_v27 = vpop.permute.xlu1 %6066 }
 0x5e8   : > { %v5953_v5 = vadd.f32 %v5921_v50, %v5864_v40  ;;  %v6088_v1 = vsel %vm6087_vm1, %v9813_v46, %v6067_v27 }
 0x5e9   : > { %v6015_v29 = vrot.slane %v6014_v19, 2 }
 0x5ea   : > { %v6020_v36 = vsel %vm5956_vm0, %v5953_v5, -inf }
 0x5eb   : > { %v6021_v16 = vmax.f32 %v6019_v18, %v6020_v36  ;;  %v6016_v38 = vmax.f32 %v6014_v19, %v6015_v29 }
 0x5ed   : > { %v6022_v45 = vrot.slane %v6021_v16, 4  ;;  %v6017_v8 = vrot.slane %v6016_v38, 1 }
 0x5ef   : > { %v6023_v43 = vmax.f32 %v6021_v16, %v6022_v45  ;;  %v6018_v39 = vmax.f32 %v6016_v38, %v6017_v8 }
 0x5f1   : > { %v6024_v59 = vrot.slane %v6023_v43, 2  ;;  %v6082_v15 = vsel %vm6046_vm12, %v6018_v39, %v6081_v20 }
 0x5f3   : > { %v6025_v9 = vmax.f32 %v6023_v43, %v6024_v59 }
 0x5f5   : > { %v6026_v47 = vrot.slane %v6025_v9, 1 }
 0x5f7   : > { %v6027_v28 = vmax.f32 %v6025_v9, %v6026_v47 }
 0x5f9   : > { %v6083_v31 = vsel %vm6048_vm13, %v6027_v28, %v6082_v15 }
 0x5fa   : > { %6084 = vrot.lane.b32.xlu2 %v6083_v31, %s6300_s4 }
 0x654   : > { %v6085_v22 = vpop.permute.xlu2 %6084 }
 0x655   : > { %v6090_v58 = vsel %vm6089_vm2, %v6088_v1, %v6085_v22 }
 0x656   : > { %v6092_v56 = vsel %vm6091_vm3, %v6090_v58, 0.0 }
 0x657   : > { %v6097_v51 = vadd.f32 %v6231_v57, %v6092_v56 }
 0x659   : > { %v6098_v11 = vmax.f32 %v6097_v51, 0.0 }
 0x65b   : > { %6099 = vst [vmem:[%s166_s28] sm:$0xff] %v6098_v11 }
 0x65c   : > { %6259 = shalt.err (!%p6256_p3)
}
 0x65d   : > { %6187 = dma.vmem_to_hbm [thread:$0]  (%p6356_p5), %s6114_s29, 128, %s6116_s6, %s6101_s7  }
 0x65e PF: > { %p6193_p4 = scmp.ge.s32.totalorder %s6294_s15, 2  ;;  %s6127_s4 = sand.u32 1, %s6282_s12  }
 0x65f   : > { %s6128_s5 = scalar_lea.sflag [#allocation3], %s6127_s4 }
 0x660   : > { %p6190_p7 = pnand %p6193_p4, %p6360_p6 }
 0x662   : > { %p6191_p8 = pneg %p6190_p7 }
 0x664   : > { %6277 = dma.done.wait (%p6191_p8), %s6128_s5, 128  }
 0x665   : > { %6279 = vsyncadd (%p6191_p8), %s6128_s5, 4294967168  ;;  %p13_p9 = scmp.ge.s32.totalorder %s6344_s18, 5   ;;  %s11326_s12 = smov %s6286_s13 }
 0x666   : > { %s11327_s13 = smov %s6290_s14  ;;  %s11328_s14 = smov %s6354_s21 }
 0x667   : > { %s11329_s15 = smov %s6344_s18  ;;  %15 = sbr.rel (!%p13_p9) target bundleno = 3 (0x3), region = 67 }
 0x66c   :  { %6134 = vsyncpa [#allocation3], 1 }
 0x66d   :  { %6136 = vsyncpa [#allocation3 + $0x1], 1 }

</bundles_post_ra>
